<compile_context>
chip_gen: v5e
topology: v5e:2x2
jax: 0.10.0
libtpu: 0.0.40
codegen_flags: <defaults>
</compile_context>

<pallas_src>
import jax
import jax.numpy as jnp
from jax.experimental import pallas as pl
from jax.experimental.pallas import tpu as pltpu

_LN_EPS = 1e-5      # torch.nn.LayerNorm default eps
_MSG_EPS = 1e-7     # GENConv message epsilon
_NEG_INF = -1e30    # bias for padded class lanes (vanishes under log_softmax)


def _round_up(v, m):
    return (v + m - 1) // m * m


def _layernorm(h, gamma, beta):
    mu = jnp.mean(h, axis=-1, keepdims=True)
    var = jnp.mean((h - mu) ** 2, axis=-1, keepdims=True)
    return (h - mu) * jax.lax.rsqrt(var + _LN_EPS) * gamma + beta


# ----------------------------------------------------------------------------
# Fused Pallas kernel: one grid step == one DeeperGCN layer
# ----------------------------------------------------------------------------
def _deeper_gcn_kernel(
    adj_ref, x_ref, wenc_ref, benc_ref,                   # resident graph / encoder
    t_ref, preg_ref, preb_ref,                            # per-layer: t, res+ pre-norm
    w1_ref, b1_ref, mg_ref, mb_ref, w2_ref, b2_ref,       # per-layer: GENConv MLP
    ln0g_ref, ln0b_ref, wlin_ref, blin_ref,               # resident epilogue params
    o_ref,                                                # (N, C_pad) log-probs
    act_ref,                                              # VMEM scratch: (N, H) activation
):
    layer = pl.program_id(0)
    n_layers = pl.num_programs(0)
    hidden = act_ref.shape[1]

    # -- prologue (first grid step only): node encoder -----------------------
    @pl.when(layer == 0)
    def _():
        act_ref[...] = (
            jnp.dot(x_ref[...], wenc_ref[...], preferred_element_type=jnp.float32)
            + benc_ref[...]
        )

    x = act_ref[...]                                      # (N, H)

    # -- 'res+' pre-activation: LayerNorm -> ReLU -> dropout(eval) -----------
    # Layer 0 is the bare conv (no pre-norm, no residual): gate with a scalar.
    # TODO(synk): dropout (p=0.1) is identity in eval mode; no RNG applied.
    is_res = (layer > 0).astype(jnp.float32)
    h_pre = jnp.maximum(_layernorm(x, preg_ref[0], preb_ref[0]), 0.0)
    h_in = is_res * h_pre + (1.0 - is_res) * x

    # -- GENConv with softmax aggregation -------------------------------------
    m = jnp.maximum(h_in, 0.0) + _MSG_EPS                 # messages from each source node
    s = m * t_ref[0]                                      # learnable temperature
    s = s - jnp.max(s, axis=0, keepdims=True)             # shift-invariant stabilization
    e = jnp.exp(s)
    packed = jnp.concatenate([e * m, e], axis=1)          # (N, 2H): merge numer & denom
    agg2 = jnp.dot(adj_ref[...], packed, preferred_element_type=jnp.float32)
    numer = agg2[:, :hidden]
    denom = agg2[:, hidden:]
    agg = jnp.where(denom > 0.0, numer / jnp.maximum(denom, 1e-30), 0.0)

    out = agg + h_in                                      # + root node features
    # GENConv MLP: Linear(H,2H) -> LayerNorm(2H) -> ReLU -> Linear(2H,H)
    z = jnp.dot(out, w1_ref[0], preferred_element_type=jnp.float32) + b1_ref[0]
    z = jnp.maximum(_layernorm(z, mg_ref[0], mb_ref[0]), 0.0)
    y = jnp.dot(z, w2_ref[0], preferred_element_type=jnp.float32) + b2_ref[0]

    act_ref[...] = y + is_res * x                         # residual for res+ layers only

    # -- epilogue (last grid step): LN_0 -> ReLU -> Linear -> log_softmax ----
    @pl.when(layer == n_layers - 1)
    def _():
        xf = act_ref[...]
        zf = jnp.maximum(_layernorm(xf, ln0g_ref[...], ln0b_ref[...]), 0.0)
        logits = (
            jnp.dot(zf, wlin_ref[...], preferred_element_type=jnp.float32)
            + blin_ref[...]
        )                                                 # padded classes biased to -1e30
        mx = jnp.max(logits, axis=1, keepdims=True)
        sh = logits - mx
        lse = jnp.log(jnp.sum(jnp.exp(sh), axis=1, keepdims=True))
        o_ref[...] = (sh - lse).astype(o_ref.dtype)


# ----------------------------------------------------------------------------
# Wrapper: padding to lane-dense layouts + one pallas_call for the whole model
# ----------------------------------------------------------------------------
@jax.jit
def deeper_gcn_forward(params, x, adj):
    """x: (N, F_in) f32 node features, adj: dense (N, N) count matrix (adj[i,j] = #edges j->i)."""
    n, f_in = x.shape
    hidden = params["w_enc"].shape[0]
    num_classes = params["w_lin"].shape[0]
    layers = params["layers"]
    n_layers = len(layers)
    two_h = 2 * hidden

    # lane/sublane-dense padding (128 lanes / 8 sublanes)
    n_pad = _round_up(n, 8)
    f_pad = _round_up(f_in, 128)
    c_pad = _round_up(num_classes, 128)

    x_p = jnp.zeros((n_pad, f_pad), jnp.float32).at[:n, :f_in].set(x)
    adj_p = jnp.zeros((n_pad, n_pad), jnp.float32).at[:n, :n].set(adj)

    wenc = jnp.zeros((f_pad, hidden), jnp.float32).at[:f_in, :].set(params["w_enc"].T)
    benc = params["b_enc"].reshape(1, hidden)

    # stack per-layer params -> leading layer axis, streamed per grid step by BlockSpec
    t_all = jnp.stack([jnp.reshape(lp["t"], (1, 1)) for lp in layers])        # (L,1,1)
    pre_g = jnp.stack([lp["pre_g"].reshape(1, hidden) for lp in layers])      # (L,1,H)
    pre_b = jnp.stack([lp["pre_b"].reshape(1, hidden) for lp in layers])
    w1 = jnp.stack([lp["w1"].T for lp in layers])                             # (L,H,2H)
    b1 = jnp.stack([lp["b1"].reshape(1, two_h) for lp in layers])             # (L,1,2H)
    mg = jnp.stack([lp["ln_g"].reshape(1, two_h) for lp in layers])
    mb = jnp.stack([lp["ln_b"].reshape(1, two_h) for lp in layers])
    w2 = jnp.stack([lp["w2"].T for lp in layers])                             # (L,2H,H)
    b2 = jnp.stack([lp["b2"].reshape(1, hidden) for lp in layers])            # (L,1,H)

    ln0_g = layers[0]["pre_g"].reshape(1, hidden)   # final norm reuses layer 0's LN params
    ln0_b = layers[0]["pre_b"].reshape(1, hidden)

    # classifier padded to a full 128-lane output; padded lanes get a -1e30 bias
    # so they vanish under log_softmax; the wrapper slices them away afterwards.
    wlin = jnp.zeros((hidden, c_pad), jnp.float32).at[:, :num_classes].set(params["w_lin"].T)
    blin = jnp.full((1, c_pad), _NEG_INF, jnp.float32).at[0, :num_classes].set(params["b_lin"])

    resident = lambda a: pl.BlockSpec(a.shape, lambda i: (0,) * a.ndim)
    per_layer = lambda a: pl.BlockSpec((1,) + a.shape[1:],
                                       lambda i: (i,) + (0,) * (a.ndim - 1))

    out = pl.pallas_call(
        _deeper_gcn_kernel,
        out_shape=jax.ShapeDtypeStruct((n_pad, c_pad), jnp.float32),
        grid=(n_layers,),
        in_specs=[
            resident(adj_p), resident(x_p), resident(wenc), resident(benc),
            per_layer(t_all), per_layer(pre_g), per_layer(pre_b),
            per_layer(w1), per_layer(b1), per_layer(mg), per_layer(mb),
            per_layer(w2), per_layer(b2),
            resident(ln0_g), resident(ln0_b), resident(wlin), resident(blin),
        ],
        out_specs=pl.BlockSpec((n_pad, c_pad), lambda i: (0, 0)),
        scratch_shapes=[pltpu.VMEM((n_pad, hidden), jnp.float32)],
        compiler_params=pltpu.CompilerParams(
            dimension_semantics=("arbitrary",),   # layers are sequentially dependent
        ),
    )(adj_p, x_p, wenc, benc, t_all, pre_g, pre_b, w1, b1, mg, mb, w2, b2,
      ln0_g, ln0_b, wlin, blin)

    return out[:n, :num_classes]


# ----------------------------------------------------------------------------
# Pure-JAX reference of the same forward (for correctness checking)
# ----------------------------------------------------------------------------
def _reference_forward(params, x, adj):
    def ln(h, g, b):
        mu = jnp.mean(h, axis=-1, keepdims=True)
        var = jnp.mean((h - mu) ** 2, axis=-1, keepdims=True)
        return (h - mu) * jax.lax.rsqrt(var + _LN_EPS) * g + b

    def genconv(h, lp):
        m = jnp.maximum(h, 0.0) + _MSG_EPS
        s = m * lp["t"]
        e = jnp.exp(s - jnp.max(s, axis=0, keepdims=True))
        numer = adj @ (e * m)
        denom = adj @ e
        agg = jnp.where(denom > 0.0, numer / jnp.maximum(denom, 1e-30), 0.0)
        out = agg + h
        z = jnp.maximum(ln(out @ lp["w1"].T + lp["b1"], lp["ln_g"], lp["ln_b"]), 0.0)
        return z @ lp["w2"].T + lp["b2"]

    h = x @ params["w_enc"].T + params["b_enc"]
    h = genconv(h, params["layers"][0])
    for lp in params["layers"][1:]:
        z = jnp.maximum(ln(h, lp["pre_g"], lp["pre_b"]), 0.0)
        h = h + genconv(z, lp)
    h = jnp.maximum(ln(h, params["layers"][0]["pre_g"], params["layers"][0]["pre_b"]), 0.0)
    logits = h @ params["w_lin"].T + params["b_lin"]
    return jax.nn.log_softmax(logits, axis=1)


# ----------------------------------------------------------------------------
# Main
# ----------------------------------------------------------------------------
if __name__ == "__main__":
    # Accurate f32 matmuls for the pure-JAX reference (kernel path unaffected).
    jax.config.update("jax_default_matmul_precision", "highest")

    N, F_IN, HIDDEN, NUM_LAYERS, NUM_CLASSES, NUM_EDGES = 64, 48, 128, 3, 10, 256

    kiter = iter(jax.random.split(jax.random.PRNGKey(0), 64))
    nk = lambda: next(kiter)

    def dense(k, out_dim, in_dim):
        return jax.random.normal(k, (out_dim, in_dim), jnp.float32) / jnp.sqrt(
            jnp.float32(in_dim))

    x = jax.random.normal(nk(), (N, F_IN), jnp.float32)
    edge_index = jax.random.randint(nk(), (2, NUM_EDGES), 0, N)

    # Dense count adjacency adj[i, j] = #edges j -> i; built once and reused
    # (exactly reproduces per-edge scatter-softmax semantics incl. duplicates).
    adj = jnp.zeros((N, N), jnp.float32).at[edge_index[1], edge_index[0]].add(1.0)

    params = {
        "w_enc": dense(nk(), HIDDEN, F_IN),
        "b_enc": 0.05 * jax.random.normal(nk(), (HIDDEN,), jnp.float32),
        "w_lin": dense(nk(), NUM_CLASSES, HIDDEN),
        "b_lin": 0.05 * jax.random.normal(nk(), (NUM_CLASSES,), jnp.float32),
        "layers": [],
    }
    for _ in range(NUM_LAYERS):
        params["layers"].append({
            "t": jnp.array(1.0, jnp.float32),                   # learn_t init value
            "pre_g": 1.0 + 0.05 * jax.random.normal(nk(), (HIDDEN,), jnp.float32),
            "pre_b": 0.05 * jax.random.normal(nk(), (HIDDEN,), jnp.float32),
            "w1": dense(nk(), 2 * HIDDEN, HIDDEN),
            "b1": 0.05 * jax.random.normal(nk(), (2 * HIDDEN,), jnp.float32),
            "ln_g": 1.0 + 0.05 * jax.random.normal(nk(), (2 * HIDDEN,), jnp.float32),
            "ln_b": 0.05 * jax.random.normal(nk(), (2 * HIDDEN,), jnp.float32),
            "w2": dense(nk(), HIDDEN, 2 * HIDDEN),
            "b2": 0.05 * jax.random.normal(nk(), (HIDDEN,), jnp.float32),
        })

    out = deeper_gcn_forward(params, x, adj)
    out = jax.block_until_ready(out)

    assert out.shape == (N, NUM_CLASSES)
    assert bool(jnp.all(jnp.isfinite(out)))
    # log_softmax rows must exp-sum to ~1
    assert bool(jnp.allclose(jnp.sum(jnp.exp(out), axis=1), 1.0, atol=1e-3))
    # match the pure-JAX reference of the same forward pass
    ref = _reference_forward(params, x, adj)
    assert bool(jnp.allclose(out, ref, atol=2e-3, rtol=2e-3))

    print("KERNEL_OK")
</pallas_src>

<mosaic_0001>
module attributes {stable_mosaic.version = 11 : i64} {
  func.func @_deeper_gcn_kernel(%arg0: i32, %arg1: memref<64x64xf32, #tpu.memory_space<vmem>>, %arg2: memref<64x128xf32, #tpu.memory_space<vmem>>, %arg3: memref<128x128xf32, #tpu.memory_space<vmem>>, %arg4: memref<1x128xf32, #tpu.memory_space<vmem>>, %arg5: memref<1x1x1xf32, #tpu.memory_space<vmem>>, %arg6: memref<1x1x128xf32, #tpu.memory_space<vmem>>, %arg7: memref<1x1x128xf32, #tpu.memory_space<vmem>>, %arg8: memref<1x128x256xf32, #tpu.memory_space<vmem>>, %arg9: memref<1x1x256xf32, #tpu.memory_space<vmem>>, %arg10: memref<1x1x256xf32, #tpu.memory_space<vmem>>, %arg11: memref<1x1x256xf32, #tpu.memory_space<vmem>>, %arg12: memref<1x256x128xf32, #tpu.memory_space<vmem>>, %arg13: memref<1x1x128xf32, #tpu.memory_space<vmem>>, %arg14: memref<1x128xf32, #tpu.memory_space<vmem>>, %arg15: memref<1x128xf32, #tpu.memory_space<vmem>>, %arg16: memref<128x128xf32, #tpu.memory_space<vmem>>, %arg17: memref<1x128xf32, #tpu.memory_space<vmem>>, %arg18: memref<64x128xf32, #tpu.memory_space<vmem>>, %arg19: memref<64x128xf32, #tpu.memory_space<vmem>>) attributes {dimension_semantics = [#tpu.dimension_semantics<arbitrary>], iteration_bounds = array<i64: 3>, scalar_prefetch = 0 : i64, scratch_operands = 1 : i64, tpu.core_type = #tpu.core_type<tc>, window_params = [{pipeline_mode = #tpu.pipeline_mode<synchronous>, transform_indices = @transform_0, window_bounds = array<i64: 64, 64>}, {pipeline_mode = #tpu.pipeline_mode<synchronous>, transform_indices = @transform_1, window_bounds = array<i64: 64, 128>}, {pipeline_mode = #tpu.pipeline_mode<synchronous>, transform_indices = @transform_2, window_bounds = array<i64: 128, 128>}, {pipeline_mode = #tpu.pipeline_mode<synchronous>, transform_indices = @transform_3, window_bounds = array<i64: 1, 128>}, {transform_indices = @transform_4, window_bounds = array<i64: 1, 1, 1>}, {transform_indices = @transform_5, window_bounds = array<i64: 1, 1, 128>}, {transform_indices = @transform_6, window_bounds = array<i64: 1, 1, 128>}, {transform_indices = @transform_7, window_bounds = array<i64: 1, 128, 256>}, {transform_indices = @transform_8, window_bounds = array<i64: 1, 1, 256>}, {transform_indices = @transform_9, window_bounds = array<i64: 1, 1, 256>}, {transform_indices = @transform_10, window_bounds = array<i64: 1, 1, 256>}, {transform_indices = @transform_11, window_bounds = array<i64: 1, 256, 128>}, {transform_indices = @transform_12, window_bounds = array<i64: 1, 1, 128>}, {pipeline_mode = #tpu.pipeline_mode<synchronous>, transform_indices = @transform_13, window_bounds = array<i64: 1, 128>}, {pipeline_mode = #tpu.pipeline_mode<synchronous>, transform_indices = @transform_14, window_bounds = array<i64: 1, 128>}, {pipeline_mode = #tpu.pipeline_mode<synchronous>, transform_indices = @transform_15, window_bounds = array<i64: 128, 128>}, {pipeline_mode = #tpu.pipeline_mode<synchronous>, transform_indices = @transform_16, window_bounds = array<i64: 1, 128>}, {pipeline_mode = #tpu.pipeline_mode<synchronous>, transform_indices = @transform_17, window_bounds = array<i64: 64, 128>}]} {
    %c0_i32 = arith.constant 0 : i32
    %0 = arith.cmpi eq, %arg0, %c0_i32 : i32
    %1 = arith.extui %0 : i1 to i32
    %c0_i32_0 = arith.constant 0 : i32
    %2 = arith.cmpi ne, %1, %c0_i32_0 : i32
    scf.if %2 {
      %c0_56 = arith.constant 0 : index
      %c0_57 = arith.constant 0 : index
      %117 = vector.load %arg2[%c0_56, %c0_57] : memref<64x128xf32, #tpu.memory_space<vmem>>, vector<64x128xf32>
      %c0_58 = arith.constant 0 : index
      %c0_59 = arith.constant 0 : index
      %118 = vector.load %arg3[%c0_58, %c0_59] : memref<128x128xf32, #tpu.memory_space<vmem>>, vector<128x128xf32>
      %cst_60 = arith.constant dense<0.000000e+00> : vector<64x128xf32>
      %119 = tpu.matmul %117, %118, %cst_60 {dimension_numbers = #tpu.dot_dimension_numbers<[1], [0], [0], [1], [0, 0, 1, 1], [], []>, precision = #tpu.contract_precision<fp32>} : vector<64x128xf32>, vector<128x128xf32>, vector<64x128xf32> -> vector<64x128xf32>
      %c0_61 = arith.constant 0 : index
      %c0_62 = arith.constant 0 : index
      %120 = vector.load %arg4[%c0_61, %c0_62] : memref<1x128xf32, #tpu.memory_space<vmem>>, vector<1x128xf32>
      %121 = vector.broadcast %120 : vector<1x128xf32> to vector<64x128xf32>
      %122 = arith.addf %119, %121 : vector<64x128xf32>
      %c0_63 = arith.constant 0 : index
      %c0_64 = arith.constant 0 : index
      %123 = vector.load %arg19[%c0_63, %c0_64] : memref<64x128xf32, #tpu.memory_space<vmem>>, vector<64x128xf32>
      tpu.vector_store %arg19[%c0_63, %c0_64], %122 {strides = array<i32>} : memref<64x128xf32, #tpu.memory_space<vmem>>, vector<64x128xf32>,
    } else {
    }
    %c0 = arith.constant 0 : index
    %c0_1 = arith.constant 0 : index
    %3 = vector.load %arg19[%c0, %c0_1] : memref<64x128xf32, #tpu.memory_space<vmem>>, vector<64x128xf32>
    %c0_i32_2 = arith.constant 0 : i32
    %4 = arith.cmpi sgt, %arg0, %c0_i32_2 : i32
    %5 = arith.extui %4 : i1 to i32
    %6 = arith.sitofp %5 : i32 to f32
    %c0_3 = arith.constant 0 : index
    %c0_4 = arith.constant 0 : index
    %c0_5 = arith.constant 0 : index
    %7 = vector.load %arg6[%c0_3, %c0_4, %c0_5] : memref<1x1x128xf32, #tpu.memory_space<vmem>>, vector<1x1x128xf32>
    %8 = vector.shape_cast %7 : vector<1x1x128xf32> to vector<1x128xf32>
    %c0_6 = arith.constant 0 : index
    %c0_7 = arith.constant 0 : index
    %c0_8 = arith.constant 0 : index
    %9 = vector.load %arg7[%c0_6, %c0_7, %c0_8] : memref<1x1x128xf32, #tpu.memory_space<vmem>>, vector<1x1x128xf32>
    %10 = vector.shape_cast %9 : vector<1x1x128xf32> to vector<1x128xf32>
    %cst = arith.constant dense<0.000000e+00> : vector<64xf32>
    %11 = vector.multi_reduction <add>, %3, %cst [1] : vector<64x128xf32> to vector<64xf32>
    %12 = vector.shape_cast %11 : vector<64xf32> to vector<64x1xf32>
    %cst_9 = arith.constant 1.280000e+02 : f32
    %13 = vector.broadcast %cst_9 : f32 to vector<64x1xf32>
    %14 = arith.divf %12, %13 : vector<64x1xf32>
    %15 = vector.broadcast %14 : vector<64x1xf32> to vector<64x128xf32>
    %16 = arith.subf %3, %15 : vector<64x128xf32>
    %17 = arith.mulf %16, %16 : vector<64x128xf32>
    %cst_10 = arith.constant dense<0.000000e+00> : vector<64xf32>
    %18 = vector.multi_reduction <add>, %17, %cst_10 [1] : vector<64x128xf32> to vector<64xf32>
    %19 = vector.shape_cast %18 : vector<64xf32> to vector<64x1xf32>
    %cst_11 = arith.constant 1.280000e+02 : f32
    %20 = vector.broadcast %cst_11 : f32 to vector<64x1xf32>
    %21 = arith.divf %19, %20 : vector<64x1xf32>
    %22 = vector.broadcast %14 : vector<64x1xf32> to vector<64x128xf32>
    %23 = arith.subf %3, %22 : vector<64x128xf32>
    %cst_12 = arith.constant 9.99999974E-6 : f32
    %24 = vector.broadcast %cst_12 : f32 to vector<64x1xf32>
    %25 = arith.addf %21, %24 : vector<64x1xf32>
    %26 = math.rsqrt %25 : vector<64x1xf32>
    %27 = vector.broadcast %26 : vector<64x1xf32> to vector<64x128xf32>
    %28 = arith.mulf %23, %27 : vector<64x128xf32>
    %29 = vector.broadcast %8 : vector<1x128xf32> to vector<64x128xf32>
    %30 = arith.mulf %28, %29 : vector<64x128xf32>
    %31 = vector.broadcast %10 : vector<1x128xf32> to vector<64x128xf32>
    %32 = arith.addf %30, %31 : vector<64x128xf32>
    %cst_13 = arith.constant 0.000000e+00 : f32
    %33 = vector.broadcast %cst_13 : f32 to vector<64x128xf32>
    %34 = arith.maximumf %32, %33 : vector<64x128xf32>
    %35 = vector.broadcast %6 : f32 to vector<64x128xf32>
    %36 = arith.mulf %35, %34 : vector<64x128xf32>
    %cst_14 = arith.constant 1.000000e+00 : f32
    %37 = arith.subf %cst_14, %6 : f32
    %38 = vector.broadcast %37 : f32 to vector<64x128xf32>
    %39 = arith.mulf %38, %3 : vector<64x128xf32>
    %40 = arith.addf %36, %39 : vector<64x128xf32>
    %cst_15 = arith.constant 0.000000e+00 : f32
    %41 = vector.broadcast %cst_15 : f32 to vector<64x128xf32>
    %42 = arith.maximumf %40, %41 : vector<64x128xf32>
    %cst_16 = arith.constant 1.000000e-07 : f32
    %43 = vector.broadcast %cst_16 : f32 to vector<64x128xf32>
    %44 = arith.addf %42, %43 : vector<64x128xf32>
    %c0_17 = arith.constant 0 : index
    %c0_18 = arith.constant 0 : index
    %c0_19 = arith.constant 0 : index
    %45 = vector.load %arg5[%c0_17, %c0_18, %c0_19] : memref<1x1x1xf32, #tpu.memory_space<vmem>>, vector<1x1x1xf32>
    %46 = vector.shape_cast %45 : vector<1x1x1xf32> to vector<1x1xf32>
    %47 = vector.broadcast %46 : vector<1x1xf32> to vector<64x128xf32>
    %48 = arith.mulf %44, %47 : vector<64x128xf32>
    %cst_20 = arith.constant dense<0xFF800000> : vector<128xf32>
    %49 = vector.multi_reduction <maximumf>, %48, %cst_20 [0] : vector<64x128xf32> to vector<128xf32>
    %50 = vector.shape_cast %49 : vector<128xf32> to vector<1x128xf32>
    %51 = vector.broadcast %50 : vector<1x128xf32> to vector<64x128xf32>
    %52 = arith.subf %48, %51 : vector<64x128xf32>
    %53 = math.exp %52 : vector<64x128xf32>
    %54 = arith.mulf %53, %44 : vector<64x128xf32>
    %55 = tpu.concatenate %54, %53 in 1 : vector<64x128xf32>, vector<64x128xf32> -> vector<64x256xf32>
    %c0_21 = arith.constant 0 : index
    %c0_22 = arith.constant 0 : index
    %56 = vector.load %arg1[%c0_21, %c0_22] : memref<64x64xf32, #tpu.memory_space<vmem>>, vector<64x64xf32>
    %cst_23 = arith.constant dense<0.000000e+00> : vector<64x256xf32>
    %57 = tpu.matmul %56, %55, %cst_23 {dimension_numbers = #tpu.dot_dimension_numbers<[1], [0], [0], [1], [0, 0, 1, 1], [], []>, precision = #tpu.contract_precision<fp32>} : vector<64x64xf32>, vector<64x256xf32>, vector<64x256xf32> -> vector<64x256xf32>
    %58 = vector.extract_strided_slice %57 {offsets = [0, 0], sizes = [64, 128], strides = [1, 1]} : vector<64x256xf32> to vector<64x128xf32>
    %59 = vector.extract_strided_slice %57 {offsets = [0, 128], sizes = [64, 128], strides = [1, 1]} : vector<64x256xf32> to vector<64x128xf32>
    %cst_24 = arith.constant 0.000000e+00 : f32
    %60 = vector.broadcast %cst_24 : f32 to vector<64x128xf32>
    %61 = arith.cmpf ogt, %59, %60 : vector<64x128xf32>
    %cst_25 = arith.constant 1.000000e-30 : f32
    %62 = vector.broadcast %cst_25 : f32 to vector<64x128xf32>
    %63 = arith.maximumf %59, %62 : vector<64x128xf32>
    %64 = arith.divf %58, %63 : vector<64x128xf32>
    %cst_26 = arith.constant 0.000000e+00 : f32
    %65 = vector.broadcast %cst_26 : f32 to vector<64x128xf32>
    %66 = arith.select %61, %64, %65 : vector<64x128xi1>, vector<64x128xf32>
    %67 = arith.addf %66, %40 : vector<64x128xf32>
    %c0_27 = arith.constant 0 : index
    %c0_28 = arith.constant 0 : index
    %c0_29 = arith.constant 0 : index
    %68 = vector.load %arg8[%c0_27, %c0_28, %c0_29] : memref<1x128x256xf32, #tpu.memory_space<vmem>>, vector<1x128x256xf32>
    %69 = vector.shape_cast %68 : vector<1x128x256xf32> to vector<128x256xf32>
    %cst_30 = arith.constant dense<0.000000e+00> : vector<64x256xf32>
    %70 = tpu.matmul %67, %69, %cst_30 {dimension_numbers = #tpu.dot_dimension_numbers<[1], [0], [0], [1], [0, 0, 1, 1], [], []>, precision = #tpu.contract_precision<fp32>} : vector<64x128xf32>, vector<128x256xf32>, vector<64x256xf32> -> vector<64x256xf32>
    %c0_31 = arith.constant 0 : index
    %c0_32 = arith.constant 0 : index
    %c0_33 = arith.constant 0 : index
    %71 = vector.load %arg9[%c0_31, %c0_32, %c0_33] : memref<1x1x256xf32, #tpu.memory_space<vmem>>, vector<1x1x256xf32>
    %72 = vector.shape_cast %71 : vector<1x1x256xf32> to vector<1x256xf32>
    %73 = vector.broadcast %72 : vector<1x256xf32> to vector<64x256xf32>
    %74 = arith.addf %70, %73 : vector<64x256xf32>
    %c0_34 = arith.constant 0 : index
    %c0_35 = arith.constant 0 : index
    %c0_36 = arith.constant 0 : index
    %75 = vector.load %arg10[%c0_34, %c0_35, %c0_36] : memref<1x1x256xf32, #tpu.memory_space<vmem>>, vector<1x1x256xf32>
    %76 = vector.shape_cast %75 : vector<1x1x256xf32> to vector<1x256xf32>
    %c0_37 = arith.constant 0 : index
    %c0_38 = arith.constant 0 : index
    %c0_39 = arith.constant 0 : index
    %77 = vector.load %arg11[%c0_37, %c0_38, %c0_39] : memref<1x1x256xf32, #tpu.memory_space<vmem>>, vector<1x1x256xf32>
    %78 = vector.shape_cast %77 : vector<1x1x256xf32> to vector<1x256xf32>
    %cst_40 = arith.constant dense<0.000000e+00> : vector<64xf32>
    %79 = vector.multi_reduction <add>, %74, %cst_40 [1] : vector<64x256xf32> to vector<64xf32>
    %80 = vector.shape_cast %79 : vector<64xf32> to vector<64x1xf32>
    %cst_41 = arith.constant 2.560000e+02 : f32
    %81 = vector.broadcast %cst_41 : f32 to vector<64x1xf32>
    %82 = arith.divf %80, %81 : vector<64x1xf32>
    %83 = vector.broadcast %82 : vector<64x1xf32> to vector<64x256xf32>
    %84 = arith.subf %74, %83 : vector<64x256xf32>
    %85 = arith.mulf %84, %84 : vector<64x256xf32>
    %cst_42 = arith.constant dense<0.000000e+00> : vector<64xf32>
    %86 = vector.multi_reduction <add>, %85, %cst_42 [1] : vector<64x256xf32> to vector<64xf32>
    %87 = vector.shape_cast %86 : vector<64xf32> to vector<64x1xf32>
    %cst_43 = arith.constant 2.560000e+02 : f32
    %88 = vector.broadcast %cst_43 : f32 to vector<64x1xf32>
    %89 = arith.divf %87, %88 : vector<64x1xf32>
    %90 = vector.broadcast %82 : vector<64x1xf32> to vector<64x256xf32>
    %91 = arith.subf %74, %90 : vector<64x256xf32>
    %cst_44 = arith.constant 9.99999974E-6 : f32
    %92 = vector.broadcast %cst_44 : f32 to vector<64x1xf32>
    %93 = arith.addf %89, %92 : vector<64x1xf32>
    %94 = math.rsqrt %93 : vector<64x1xf32>
    %95 = vector.broadcast %94 : vector<64x1xf32> to vector<64x256xf32>
    %96 = arith.mulf %91, %95 : vector<64x256xf32>
    %97 = vector.broadcast %76 : vector<1x256xf32> to vector<64x256xf32>
    %98 = arith.mulf %96, %97 : vector<64x256xf32>
    %99 = vector.broadcast %78 : vector<1x256xf32> to vector<64x256xf32>
    %100 = arith.addf %98, %99 : vector<64x256xf32>
    %cst_45 = arith.constant 0.000000e+00 : f32
    %101 = vector.broadcast %cst_45 : f32 to vector<64x256xf32>
    %102 = arith.maximumf %100, %101 : vector<64x256xf32>
    %c0_46 = arith.constant 0 : index
    %c0_47 = arith.constant 0 : index
    %c0_48 = arith.constant 0 : index
    %103 = vector.load %arg12[%c0_46, %c0_47, %c0_48] : memref<1x256x128xf32, #tpu.memory_space<vmem>>, vector<1x256x128xf32>
    %104 = vector.shape_cast %103 : vector<1x256x128xf32> to vector<256x128xf32>
    %cst_49 = arith.constant dense<0.000000e+00> : vector<64x128xf32>
    %105 = tpu.matmul %102, %104, %cst_49 {dimension_numbers = #tpu.dot_dimension_numbers<[1], [0], [0], [1], [0, 0, 1, 1], [], []>, precision = #tpu.contract_precision<fp32>} : vector<64x256xf32>, vector<256x128xf32>, vector<64x128xf32> -> vector<64x128xf32>
    %c0_50 = arith.constant 0 : index
    %c0_51 = arith.constant 0 : index
    %c0_52 = arith.constant 0 : index
    %106 = vector.load %arg13[%c0_50, %c0_51, %c0_52] : memref<1x1x128xf32, #tpu.memory_space<vmem>>, vector<1x1x128xf32>
    %107 = vector.shape_cast %106 : vector<1x1x128xf32> to vector<1x128xf32>
    %108 = vector.broadcast %107 : vector<1x128xf32> to vector<64x128xf32>
    %109 = arith.addf %105, %108 : vector<64x128xf32>
    %110 = vector.broadcast %6 : f32 to vector<64x128xf32>
    %111 = arith.mulf %110, %3 : vector<64x128xf32>
    %112 = arith.addf %109, %111 : vector<64x128xf32>
    %c0_53 = arith.constant 0 : index
    %c0_54 = arith.constant 0 : index
    %113 = vector.load %arg19[%c0_53, %c0_54] : memref<64x128xf32, #tpu.memory_space<vmem>>, vector<64x128xf32>
    tpu.vector_store %arg19[%c0_53, %c0_54], %112 {strides = array<i32>} : memref<64x128xf32, #tpu.memory_space<vmem>>, vector<64x128xf32>,
    %c2_i32 = arith.constant 2 : i32
    %114 = arith.cmpi eq, %arg0, %c2_i32 : i32
    %115 = arith.extui %114 : i1 to i32
    %c0_i32_55 = arith.constant 0 : i32
    %116 = arith.cmpi ne, %115, %c0_i32_55 : i32
    scf.if %116 {
      %c0_56 = arith.constant 0 : index
      %c0_57 = arith.constant 0 : index
      %117 = vector.load %arg19[%c0_56, %c0_57] : memref<64x128xf32, #tpu.memory_space<vmem>>, vector<64x128xf32>
      %c0_58 = arith.constant 0 : index
      %c0_59 = arith.constant 0 : index
      %118 = vector.load %arg14[%c0_58, %c0_59] : memref<1x128xf32, #tpu.memory_space<vmem>>, vector<1x128xf32>
      %c0_60 = arith.constant 0 : index
      %c0_61 = arith.constant 0 : index
      %119 = vector.load %arg15[%c0_60, %c0_61] : memref<1x128xf32, #tpu.memory_space<vmem>>, vector<1x128xf32>
      %cst_62 = arith.constant dense<0.000000e+00> : vector<64xf32>
      %120 = vector.multi_reduction <add>, %117, %cst_62 [1] : vector<64x128xf32> to vector<64xf32>
      %121 = vector.shape_cast %120 : vector<64xf32> to vector<64x1xf32>
      %cst_63 = arith.constant 1.280000e+02 : f32
      %122 = vector.broadcast %cst_63 : f32 to vector<64x1xf32>
      %123 = arith.divf %121, %122 : vector<64x1xf32>
      %124 = vector.broadcast %123 : vector<64x1xf32> to vector<64x128xf32>
      %125 = arith.subf %117, %124 : vector<64x128xf32>
      %126 = arith.mulf %125, %125 : vector<64x128xf32>
      %cst_64 = arith.constant dense<0.000000e+00> : vector<64xf32>
      %127 = vector.multi_reduction <add>, %126, %cst_64 [1] : vector<64x128xf32> to vector<64xf32>
      %128 = vector.shape_cast %127 : vector<64xf32> to vector<64x1xf32>
      %cst_65 = arith.constant 1.280000e+02 : f32
      %129 = vector.broadcast %cst_65 : f32 to vector<64x1xf32>
      %130 = arith.divf %128, %129 : vector<64x1xf32>
      %131 = vector.broadcast %123 : vector<64x1xf32> to vector<64x128xf32>
      %132 = arith.subf %117, %131 : vector<64x128xf32>
      %cst_66 = arith.constant 9.99999974E-6 : f32
      %133 = vector.broadcast %cst_66 : f32 to vector<64x1xf32>
      %134 = arith.addf %130, %133 : vector<64x1xf32>
      %135 = math.rsqrt %134 : vector<64x1xf32>
      %136 = vector.broadcast %135 : vector<64x1xf32> to vector<64x128xf32>
      %137 = arith.mulf %132, %136 : vector<64x128xf32>
      %138 = vector.broadcast %118 : vector<1x128xf32> to vector<64x128xf32>
      %139 = arith.mulf %137, %138 : vector<64x128xf32>
      %140 = vector.broadcast %119 : vector<1x128xf32> to vector<64x128xf32>
      %141 = arith.addf %139, %140 : vector<64x128xf32>
      %cst_67 = arith.constant 0.000000e+00 : f32
      %142 = vector.broadcast %cst_67 : f32 to vector<64x128xf32>
      %143 = arith.maximumf %141, %142 : vector<64x128xf32>
      %c0_68 = arith.constant 0 : index
      %c0_69 = arith.constant 0 : index
      %144 = vector.load %arg16[%c0_68, %c0_69] : memref<128x128xf32, #tpu.memory_space<vmem>>, vector<128x128xf32>
      %cst_70 = arith.constant dense<0.000000e+00> : vector<64x128xf32>
      %145 = tpu.matmul %143, %144, %cst_70 {dimension_numbers = #tpu.dot_dimension_numbers<[1], [0], [0], [1], [0, 0, 1, 1], [], []>, precision = #tpu.contract_precision<fp32>} : vector<64x128xf32>, vector<128x128xf32>, vector<64x128xf32> -> vector<64x128xf32>
      %c0_71 = arith.constant 0 : index
      %c0_72 = arith.constant 0 : index
      %146 = vector.load %arg17[%c0_71, %c0_72] : memref<1x128xf32, #tpu.memory_space<vmem>>, vector<1x128xf32>
      %147 = vector.broadcast %146 : vector<1x128xf32> to vector<64x128xf32>
      %148 = arith.addf %145, %147 : vector<64x128xf32>
      %cst_73 = arith.constant dense<0xFF800000> : vector<64xf32>
      %149 = vector.multi_reduction <maximumf>, %148, %cst_73 [1] : vector<64x128xf32> to vector<64xf32>
      %150 = vector.shape_cast %149 : vector<64xf32> to vector<64x1xf32>
      %151 = vector.broadcast %150 : vector<64x1xf32> to vector<64x128xf32>
      %152 = arith.subf %148, %151 : vector<64x128xf32>
      %153 = math.exp %152 : vector<64x128xf32>
      %cst_74 = arith.constant dense<0.000000e+00> : vector<64xf32>
      %154 = vector.multi_reduction <add>, %153, %cst_74 [1] : vector<64x128xf32> to vector<64xf32>
      %155 = vector.shape_cast %154 : vector<64xf32> to vector<64x1xf32>
      %156 = math.log %155 : vector<64x1xf32>
      %157 = vector.broadcast %156 : vector<64x1xf32> to vector<64x128xf32>
      %158 = arith.subf %152, %157 : vector<64x128xf32>
      %c0_75 = arith.constant 0 : index
      %c0_76 = arith.constant 0 : index
      %159 = vector.load %arg18[%c0_75, %c0_76] : memref<64x128xf32, #tpu.memory_space<vmem>>, vector<64x128xf32>
      tpu.vector_store %arg18[%c0_75, %c0_76], %158 {strides = array<i32>} : memref<64x128xf32, #tpu.memory_space<vmem>>, vector<64x128xf32>,
    } else {
    }
    return
  }
  func.func @transform_0(%arg0: i32) -> (i32, i32) {
    %c0_i32 = arith.constant 0 : i32
    %c0_i32_0 = arith.constant 0 : i32
    %c0_i32_1 = arith.constant 0 : i32
    return %c0_i32, %c0_i32_0 : i32, i32
  }
  func.func @transform_1(%arg0: i32) -> (i32, i32) {
    %c0_i32 = arith.constant 0 : i32
    %c0_i32_0 = arith.constant 0 : i32
    %c0_i32_1 = arith.constant 0 : i32
    return %c0_i32, %c0_i32_0 : i32, i32
  }
  func.func @transform_2(%arg0: i32) -> (i32, i32) {
    %c0_i32 = arith.constant 0 : i32
    %c0_i32_0 = arith.constant 0 : i32
    %c0_i32_1 = arith.constant 0 : i32
    return %c0_i32, %c0_i32_0 : i32, i32
  }
  func.func @transform_3(%arg0: i32) -> (i32, i32) {
    %c0_i32 = arith.constant 0 : i32
    %c0_i32_0 = arith.constant 0 : i32
    %c0_i32_1 = arith.constant 0 : i32
    return %c0_i32, %c0_i32_0 : i32, i32
  }
  func.func @transform_4(%arg0: i32) -> (i32, i32, i32) {
    %c0_i32 = arith.constant 0 : i32
    %c0_i32_0 = arith.constant 0 : i32
    %c0_i32_1 = arith.constant 0 : i32
    return %arg0, %c0_i32, %c0_i32_0 : i32, i32, i32
  }
  func.func @transform_5(%arg0: i32) -> (i32, i32, i32) {
    %c0_i32 = arith.constant 0 : i32
    %c0_i32_0 = arith.constant 0 : i32
    %c0_i32_1 = arith.constant 0 : i32
    return %arg0, %c0_i32, %c0_i32_0 : i32, i32, i32
  }
  func.func @transform_6(%arg0: i32) -> (i32, i32, i32) {
    %c0_i32 = arith.constant 0 : i32
    %c0_i32_0 = arith.constant 0 : i32
    %c0_i32_1 = arith.constant 0 : i32
    return %arg0, %c0_i32, %c0_i32_0 : i32, i32, i32
  }
  func.func @transform_7(%arg0: i32) -> (i32, i32, i32) {
    %c0_i32 = arith.constant 0 : i32
    %c0_i32_0 = arith.constant 0 : i32
    %c0_i32_1 = arith.constant 0 : i32
    return %arg0, %c0_i32, %c0_i32_0 : i32, i32, i32
  }
  func.func @transform_8(%arg0: i32) -> (i32, i32, i32) {
    %c0_i32 = arith.constant 0 : i32
    %c0_i32_0 = arith.constant 0 : i32
    %c0_i32_1 = arith.constant 0 : i32
    return %arg0, %c0_i32, %c0_i32_0 : i32, i32, i32
  }
  func.func @transform_9(%arg0: i32) -> (i32, i32, i32) {
    %c0_i32 = arith.constant 0 : i32
    %c0_i32_0 = arith.constant 0 : i32
    %c0_i32_1 = arith.constant 0 : i32
    return %arg0, %c0_i32, %c0_i32_0 : i32, i32, i32
  }
  func.func @transform_10(%arg0: i32) -> (i32, i32, i32) {
    %c0_i32 = arith.constant 0 : i32
    %c0_i32_0 = arith.constant 0 : i32
    %c0_i32_1 = arith.constant 0 : i32
    return %arg0, %c0_i32, %c0_i32_0 : i32, i32, i32
  }
  func.func @transform_11(%arg0: i32) -> (i32, i32, i32) {
    %c0_i32 = arith.constant 0 : i32
    %c0_i32_0 = arith.constant 0 : i32
    %c0_i32_1 = arith.constant 0 : i32
    return %arg0, %c0_i32, %c0_i32_0 : i32, i32, i32
  }
  func.func @transform_12(%arg0: i32) -> (i32, i32, i32) {
    %c0_i32 = arith.constant 0 : i32
    %c0_i32_0 = arith.constant 0 : i32
    %c0_i32_1 = arith.constant 0 : i32
    return %arg0, %c0_i32, %c0_i32_0 : i32, i32, i32
  }
  func.func @transform_13(%arg0: i32) -> (i32, i32) {
    %c0_i32 = arith.constant 0 : i32
    %c0_i32_0 = arith.constant 0 : i32
    %c0_i32_1 = arith.constant 0 : i32
    return %c0_i32, %c0_i32_0 : i32, i32
  }
  func.func @transform_14(%arg0: i32) -> (i32, i32) {
    %c0_i32 = arith.constant 0 : i32
    %c0_i32_0 = arith.constant 0 : i32
    %c0_i32_1 = arith.constant 0 : i32
    return %c0_i32, %c0_i32_0 : i32, i32
  }
  func.func @transform_15(%arg0: i32) -> (i32, i32) {
    %c0_i32 = arith.constant 0 : i32
    %c0_i32_0 = arith.constant 0 : i32
    %c0_i32_1 = arith.constant 0 : i32
    return %c0_i32, %c0_i32_0 : i32, i32
  }
  func.func @transform_16(%arg0: i32) -> (i32, i32) {
    %c0_i32 = arith.constant 0 : i32
    %c0_i32_0 = arith.constant 0 : i32
    %c0_i32_1 = arith.constant 0 : i32
    return %c0_i32, %c0_i32_0 : i32, i32
  }
  func.func @transform_17(%arg0: i32) -> (i32, i32) {
    %c0_i32 = arith.constant 0 : i32
    %c0_i32_0 = arith.constant 0 : i32
    %c0_i32_1 = arith.constant 0 : i32
    return %c0_i32, %c0_i32_0 : i32, i32
  }
}

</mosaic_0001>

<bundles_post_ra>
// kernel: deeper_gcn_forward.1
= control target key start
LH: loop header
LB: loop body
LE: loop exit
PB: predicated region body
PF: predicated region fallthrough
CT: control target
= control target key end

     0   :  { %s6571_s24 = smov 0   ;;  %s10952_s0 = inlined_call_operand.vmem [shape: f32[64,64], index: 0, kind: input, shape index: {}]   ;;  %s10953_s1 = inlined_call_operand.vmem [shape: f32[64,128], index: 1, kind: input, shape index: {}]   ;;  %s10954_s2 = inlined_call_operand.vmem [shape: f32[128,128], index: 2, kind: input, shape index: {}]   ;;  %s10955_s3 = inlined_call_operand.vmem [shape: f32[1,128], index: 3, kind: input, shape index: {}]   ;;  %s10956_s4 = inlined_call_operand.vmem [shape: f32[3,1,1], index: 4, kind: input, shape index: {}]   ;;  %s10957_s5 = inlined_call_operand.vmem [shape: f32[3,1,128], index: 5, kind: input, shape index: {}]   ;;  %s10958_s6 = inlined_call_operand.vmem [shape: f32[3,1,128], index: 6, kind: input, shape index: {}]   ;;  %s10959_s7 = inlined_call_operand.vmem [shape: f32[3,128,256], index: 7, kind: input, shape index: {}]   ;;  %s10960_s8 = inlined_call_operand.vmem [shape: f32[3,1,256], index: 8, kind: input, shape index: {}]   ;;  %s10961_s9 = inlined_call_operand.vmem [shape: f32[3,1,256], index: 9, kind: input, shape index: {}]   ;;  %s10962_s10 = inlined_call_operand.vmem [shape: f32[3,1,256], index: 10, kind: input, shape index: {}]   ;;  %s10963_s11 = inlined_call_operand.vmem [shape: f32[3,256,128], index: 11, kind: input, shape index: {}]   ;;  %s10964_s12 = inlined_call_operand.vmem [shape: f32[3,1,128], index: 12, kind: input, shape index: {}]   ;;  %s10965_s13 = inlined_call_operand.vmem [shape: f32[1,128], index: 13, kind: input, shape index: {}]   ;;  %s10966_s14 = inlined_call_operand.vmem [shape: f32[1,128], index: 14, kind: input, shape index: {}]   ;;  %s10967_s15 = inlined_call_operand.vmem [shape: f32[128,128], index: 15, kind: input, shape index: {}]   ;;  %s10968_s16 = inlined_call_operand.vmem [shape: f32[1,128], index: 16, kind: input, shape index: {}]   ;;  %s10969_s17 = inlined_call_operand.vmem [shape: f32[64,128], index: 17, kind: output, shape index: {}]  }
   0x1   :  { %11087 = sst [smem:[#allocation60_spill]] %s10952_s0 }
   0x2   :  { %11088 = sst [smem:[#allocation61_spill]] %s10953_s1 }
   0x3   :  { %11089 = sst [smem:[#allocation62_spill]] %s10959_s7 }
   0x4   :  { %11090 = sst [smem:[#allocation63_spill]] %s10966_s14 }
   0x5   :  { %11091 = sst [smem:[#allocation64_spill]] %s10968_s16 }
   0x6   :  { %11092 = sst [smem:[#allocation65_spill]] %s10969_s17 }
   0x7 LB: > { %11093 = sst [smem:[#allocation3_spill]] %s6476_s24  ;;  %s6577_s25 = sadd.s32 4294967295, %s6476_s24   ;;  %s6476_s24 = sphi %s6571_s24, %s27_s24  }
   0x8   : > { %p6247_p0 = scmp.ge.s32.totalorder %s6476_s24, 1  ;;  %p551_p1 = scmp.lt.s32.totalorder %s6476_s24, 4 }
   0xa   : > { %p552_p2 = pnand %p6247_p0, %p551_p1 }
   0xc   : > { %555 = sbr.rel (%p552_p2) target bundleno = 2597 (0xa25), region = 88 }
  0x11   : > { %p627_p3 = scmp.lt.s32.totalorder %s6577_s25, 2  ;;  %s11094_s7 = sld [smem:[#allocation62_spill]] }
  0x12   : > { %p6255_p4 = scmp.ne.s32.totalorder %s6577_s25, 0 }
  0x13   : > { %s6583_s26 = scalar_select %p627_p3, %s6577_s25, 2 }
  0x14   : > { %664 = sbr.rel (%p6255_p4) target bundleno = 296 (0x128), region = 92  ;;  %s11095_s20 = sld [smem:[#allocation61_spill]] (!%p6255_p4) }
  0x15   : > { %s6259_s21 = sshll.u32 %s6583_s26, 8  ;;  %s6604_s27 = sshll.u32 %s6583_s26, 1 }
  0x16   : > { %s648_s19 = scalar_lea.vmem %s10961_s9, %s6604_s27  ;;  %s652_s29 = scalar_lea.vmem %s10962_s10, %s6604_s27 }
  0x17   : > { %s6601_s24 = scalar_lea.vmem %s11094_s7, %s6259_s21  ;;  %s6621_s7 = scalar_lea.vmem %s10963_s11, %s6259_s21 }
  0x18   : > { %s660_s17 = scalar_lea.vmem %s10964_s12, %s6583_s26 }
  0x19   : > { %v688_v0 = vld [vmem:[%s10954_s2 + $0x78] sm:$0xff]  ;;  %v687_v1 = vld [vmem:[%s10954_s2 + $0x70] sm:$0xff]  ;;  %v686_v2 = vld [vmem:[%s10954_s2 + $0x68] sm:$0xff] }
  0x1a   : > { %v6637_v3 = vand.u32 4294901760, %v688_v0  ;;  %v6639_v4 = vand.u32 4294901760, %v687_v1  ;;  %v6641_v5 = vand.u32 4294901760, %v686_v2  ;;  %v685_v6 = vld [vmem:[%s10954_s2 + $0x60] sm:$0xff]  ;;  %v684_v7 = vld [vmem:[%s10954_s2 + $0x58] sm:$0xff]  ;;  %v683_v8 = vld [vmem:[%s10954_s2 + $0x50] sm:$0xff] }
  0x1b   : > { %v6652_v9 = vand.u32 4294901760, %v685_v6  ;;  %v6654_v10 = vand.u32 4294901760, %v684_v7  ;;  %v6656_v11 = vand.u32 4294901760, %v683_v8  ;;  %v682_v12 = vld [vmem:[%s10954_s2 + $0x48] sm:$0xff]  ;;  %v681_v13 = vld [vmem:[%s10954_s2 + $0x40] sm:$0xff]  ;;  %v680_v17 = vld [vmem:[%s10954_s2 + $0x38] sm:$0xff] }
  0x1c   : > { %6261 = vmatpush.msra.mxu2 %v6637_v3  ;;  %v6666_v14 = vsub.f32 %v688_v0, %v6637_v3  ;;  %v6669_v15 = vsub.f32 %v687_v1, %v6639_v4  ;;  %v6672_v16 = vsub.f32 %v686_v2, %v6641_v5  ;;  %694 = vmatpush.msra.mxu0 %v6637_v3  ;;  %v6678_v18 = vand.u32 4294901760, %v682_v12  ;;  %v679_v25 = vld [vmem:[%s10954_s2 + $0x30] sm:$0xff]  ;;  %v678_v33 = vld [vmem:[%s10954_s2 + $0x28] sm:$0xff]  ;;  %v677_v42 = vld [vmem:[%s10954_s2 + $0x20] sm:$0xff] }
  0x1d   : > { %v6681_v19 = vsub.f32 %v685_v6, %v6652_v9  ;;  %v6684_v20 = vsub.f32 %v684_v7, %v6654_v10  ;;  %v6690_v24 = vand.u32 4294901760, %v681_v13  ;;  %v6697_v27 = vand.u32 4294901760, %v680_v17  ;;  %v669_v47 = vld [vmem:[%s11095_s20 + $0x20] sm:$0xff]  ;;  %v676_v49 = vld [vmem:[%s10954_s2 + $0x18] sm:$0xff]  ;;  %v675_v55 = vld [vmem:[%s10954_s2 + $0x10] sm:$0xff] }
  0x1e   : > { %6262 = vmatpush.msra.mxu2 %v6639_v4  ;;  %v792_v21 = vand.u32 4294901760, %v6666_v14  ;;  %v798_v22 = vand.u32 4294901760, %v6669_v15  ;;  %v804_v23 = vand.u32 4294901760, %v6672_v16  ;;  %696 = vmatpush.msra.mxu0 %v6639_v4  ;;  %v6700_v28 = vsub.f32 %v683_v8, %v6656_v11  ;;  %v674_v62 = vld [vmem:[%s10954_s2 + $0x8] sm:$0xff]  ;;  %v673_v2 = vld [vmem:[%s10954_s2] sm:$0xff] }
  0x1f   : > { %v810_v26 = vand.u32 4294901760, %v6681_v19  ;;  %v816_v32 = vand.u32 4294901760, %v6684_v20  ;;  %v6720_v35 = vand.u32 4294901760, %v679_v25  ;;  %v6723_v36 = vsub.f32 %v682_v12, %v6678_v18  ;;  %v665_v12 = vld [vmem:[%s11095_s20] sm:$0xff] }
  0x20   : > { %6263 = vmatpush.msra.mxu2 %v6641_v5  ;;  %v793_v29 = vsub.f32 %v6666_v14, %v792_v21  ;;  %v799_v30 = vsub.f32 %v6669_v15, %v798_v22  ;;  %v805_v31 = vsub.f32 %v6672_v16, %v804_v23  ;;  %698 = vmatpush.msra.mxu0 %v6641_v5  ;;  %v822_v39 = vand.u32 4294901760, %v6700_v28 }
  0x21   : > { %v811_v34 = vsub.f32 %v6681_v19, %v810_v26  ;;  %v6729_v40 = vsub.f32 %v681_v13, %v6690_v24  ;;  %v6731_v41 = vand.u32 4294901760, %v678_v33  ;;  %v817_v44 = vsub.f32 %v6684_v20, %v816_v32 }
  0x22   : > { %6264 = vmatpush.msra.mxu2 %v6652_v9  ;;  %v794_v37 = vand.u32 4294901760, %v793_v29  ;;  %v800_v38 = vand.u32 4294901760, %v799_v30  ;;  %700 = vmatpush.msra.mxu0 %v6652_v9  ;;  %v806_v43 = vand.u32 4294901760, %v805_v31  ;;  %v828_v45 = vand.u32 4294901760, %v6723_v36  ;;  %v670_v30 = vld [vmem:[%s11095_s20 + $0x28] sm:$0xff] }
  0x23   : > { %v6742_v46 = vsub.f32 %v680_v17, %v6697_v27  ;;  %v834_v48 = vand.u32 4294901760, %v6729_v40  ;;  %v812_v50 = vand.u32 4294901760, %v811_v34  ;;  %v823_v51 = vsub.f32 %v6700_v28, %v822_v39 }
  0x24   : > { %6265 = vmatpush.msra.mxu2 %v6654_v10  ;;  %6277 = vmatpush.msra.mxu3 %v794_v37  ;;  %v6756_v52 = vand.u32 4294901760, %v677_v42  ;;  %v6759_v53 = vsub.f32 %v679_v25, %v6720_v35  ;;  %v6766_v56 = vand.u32 4294901760, %v669_v47  ;;  %v818_v57 = vand.u32 4294901760, %v817_v44 }
  0x25   : > { %795 = vmatpush.msra.mxu1 %v794_v37  ;;  %702 = vmatpush.msra.mxu0 %v6654_v10  ;;  %v10982_v54 = vand.u32 4294901760, %v6742_v46  ;;  %v829_v58 = vsub.f32 %v6723_v36, %v828_v45  ;;  %v6772_v59 = vand.u32 4294901760, %v676_v49  ;;  %v6775_v60 = vsub.f32 %v678_v33, %v6731_v41 }
  0x26   : > { %6266 = vmatpush.msra.mxu2 %v6656_v11  ;;  %6278 = vmatpush.msra.mxu3 %v800_v38  ;;  %v835_v61 = vsub.f32 %v6729_v40, %v834_v48  ;;  %v824_v63 = vand.u32 4294901760, %v823_v51  ;;  %v6785_v0 = vand.u32 4294901760, %v675_v55  ;;  %v10979_v1 = vand.u32 4294901760, %v6759_v53 }
  0x27   : > { %801 = vmatpush.msra.mxu1 %v800_v38  ;;  %704 = vmatpush.msra.mxu0 %v6656_v11  ;;  %v6792_v6 = vsub.f32 %v677_v42, %v6756_v52  ;;  %v841_v7 = vsub.f32 %v6742_v46, %v10982_v54  ;;  %v6799_v8 = vsub.f32 %v669_v47, %v6766_v56  ;;  %v830_v13 = vand.u32 4294901760, %v829_v58 }
  0x28   : > { %6267 = vmatpush.msra.mxu2 %v6678_v18  ;;  %6279 = vmatpush.msra.mxu3 %v806_v43  ;;  %v6805_v17 = vand.u32 4294901760, %v674_v62  ;;  %v10977_v25 = vand.u32 4294901760, %v6775_v60  ;;  %v6809_v29 = vsub.f32 %v676_v49, %v6772_v59  ;;  %v836_v31 = vand.u32 4294901760, %v835_v61 }
  0x29   : > { %807 = vmatpush.msra.mxu1 %v806_v43  ;;  %706 = vmatpush.msra.mxu0 %v6678_v18  ;;  %v6814_v33 = vand.u32 4294901760, %v673_v2  ;;  %v847_v34 = vsub.f32 %v6759_v53, %v10979_v1  ;;  %v10976_v37 = vand.u32 4294901760, %v6792_v6  ;;  %v6823_v38 = vsub.f32 %v675_v55, %v6785_v0 }
  0x2a   : > { %6268 = vmatpush.msra.mxu2 %v6690_v24  ;;  %6280 = vmatpush.msra.mxu3 %v812_v50  ;;  %v6825_v42 = vand.u32 4294901760, %v665_v12  ;;  %v842_v43 = vand.u32 4294901760, %v841_v7  ;;  %v10974_v44 = vand.u32 4294901760, %v6799_v8  ;;  %v6829_v47 = vand.u32 4294901760, %v670_v30 }
  0x2b   : > { %813 = vmatpush.msra.mxu1 %v812_v50  ;;  %708 = vmatpush.msra.mxu0 %v6690_v24  ;;  %v853_v49 = vsub.f32 %v6775_v60, %v10977_v25  ;;  %v10975_v50 = vand.u32 4294901760, %v6809_v29  ;;  %v6837_v51 = vsub.f32 %v674_v62, %v6805_v17  ;;  %v859_v58 = vsub.f32 %v6792_v6, %v10976_v37 }
  0x2c   : > { %6269 = vmatpush.msra.mxu2 %v6697_v27  ;;  %6281 = vmatpush.msra.mxu3 %v818_v57  ;;  %v6840_v55 = vsub.f32 %v665_v12, %v6825_v42  ;;  %v10978_v61 = vand.u32 4294901760, %v6823_v38  ;;  %v760_v62 = vsub.f32 %v6799_v8, %v10974_v44  ;;  %v6856_v7 = vsub.f32 %v670_v30, %v6829_v47 }
  0x2d   : > { %819 = vmatpush.msra.mxu1 %v818_v57  ;;  %710 = vmatpush.msra.mxu0 %v6697_v27  ;;  %v848_v57 = vand.u32 4294901760, %v847_v34  ;;  %v10981_v34 = vand.u32 4294901760, %v6837_v51  ;;  %v860_v30 = vand.u32 4294901760, %v859_v58 }
  0x2e   : > { %6270 = vmatpush.msra.mxu2 %v6720_v35  ;;  %6282 = vmatpush.msra.mxu3 %v824_v63  ;;  %v10980_v12 = vand.u32 4294901760, %v6840_v55  ;;  %v761_v37 = vand.u32 4294901760, %v760_v62 }
  0x2f   : > { %825 = vmatpush.msra.mxu1 %v824_v63  ;;  %712 = vmatpush.msra.mxu0 %v6720_v35  ;;  %v6849_v63 = vsub.f32 %v673_v2, %v6814_v33  ;;  %v865_v2 = vsub.f32 %v6809_v29, %v10975_v50  ;;  %v666_v50 = vld [vmem:[%s11095_s20 + $0x8] sm:$0xff]  ;;  %v877_v1 = vsub.f32 %v6837_v51, %v10981_v34 }
  0x30   : > { %6271 = vmatpush.msra.mxu2 %v6731_v41  ;;  %6283 = vmatpush.msra.mxu3 %v830_v13  ;;  %v728_v58 = vsub.f32 %v6840_v55, %v10980_v12 }
  0x31   : > { %831 = vmatpush.msra.mxu1 %v830_v13  ;;  %714 = vmatpush.msra.mxu0 %v6731_v41  ;;  %v854_v13 = vand.u32 4294901760, %v853_v49  ;;  %v871_v49 = vsub.f32 %v6823_v38, %v10978_v61  ;;  %v882_v44 = vand.u32 4294901760, %v6849_v63  ;;  %v866_v61 = vand.u32 4294901760, %v865_v2 }
  0x32   : > { %6272 = vmatpush.msra.mxu2 %v6756_v52  ;;  %6284 = vmatpush.msra.mxu3 %v836_v31  ;;  %v729_v34 = vand.u32 4294901760, %v728_v58  ;;  %v878_v54 = vand.u32 4294901760, %v877_v1 }
  0x33   : > { %837 = vmatpush.msra.mxu1 %v836_v31  ;;  %716 = vmatpush.msra.mxu0 %v6756_v52  ;;  %v671_v31 = vld [vmem:[%s11095_s20 + $0x30] sm:$0xff]  ;;  %v872_v62 = vand.u32 4294901760, %v871_v49  ;;  %v883_v12 = vsub.f32 %v6849_v63, %v882_v44  ;;  %v672_v49 = vld [vmem:[%s11095_s20 + $0x38] sm:$0xff] }
  0x34   : > { %6273 = vmatpush.msra.mxu2 %v6772_v59  ;;  %6285 = vmatpush.msra.mxu3 %v842_v43  ;;  %v6881_v25 = vand.u32 4294901760, %v671_v31  ;;  %v6910_v1 = vand.u32 4294901760, %v672_v49 }
  0x35   : > { %843 = vmatpush.msra.mxu1 %v842_v43  ;;  %718 = vmatpush.msra.mxu0 %v6772_v59  ;;  %v767_v43 = vand.u32 4294901760, %v6856_v7 }
  0x36   : > { %6274 = vmatpush.msra.mxu2 %v6785_v0  ;;  %6286 = vmatpush.msra.mxu3 %v848_v57 }
  0x37   : > { %849 = vmatpush.msra.mxu1 %v848_v57  ;;  %720 = vmatpush.msra.mxu0 %v6785_v0  ;;  %v6888_v57 = vand.u32 4294901760, %v666_v50  ;;  %v768_v2 = vsub.f32 %v6856_v7, %v767_v43 }
  0x38   : > { %6275 = vmatpush.msra.mxu2 %v6805_v17  ;;  %6287 = vmatpush.msra.mxu3 %v854_v13 }
  0x39   : > { %855 = vmatpush.msra.mxu1 %v854_v13  ;;  %722 = vmatpush.msra.mxu0 %v6805_v17  ;;  %v6898_v13 = vsub.f32 %v671_v31, %v6881_v25  ;;  %v769_v31 = vand.u32 4294901760, %v768_v2 }
  0x3a   : > { %6276 = vmatpush.msra.mxu2 %v6814_v33  ;;  %6288 = vmatpush.msra.mxu3 %v860_v30 }
  0x3b   : > { %762 = vmatmul.f32.vlgmr.msra.gmra.mxu2 %v761_v37  ;;  %861 = vmatpush.msra.mxu1 %v860_v30  ;;  %v6906_v37 = vsub.f32 %v666_v50, %v6888_v57  ;;  %v884_v30 = vand.u32 4294901760, %v883_v12  ;;  %v775_v58 = vand.u32 4294901760, %v6898_v13 }
  0x3c   : > { %6289 = vmatpush.msra.mxu3 %v866_v61  ;;  %921 = vmatpush.msrb.mxu2 %v6666_v14 }
  0x3d   : > { %867 = vmatpush.msra.mxu1 %v866_v61  ;;  %724 = vmatpush.msra.mxu0 %v6814_v33  ;;  %v735_v50 = vand.u32 4294901760, %v6906_v37  ;;  %v667_v61 = vld [vmem:[%s11095_s20 + $0x10] sm:$0xff]  ;;  %v776_v12 = vsub.f32 %v6898_v13, %v775_v58 }
  0x3e   : > { %6290 = vmatpush.msra.mxu3 %v872_v62  ;;  %924 = vmatpush.msrb.mxu2 %v6669_v15 }
  0x3f   : > { %873 = vmatpush.msra.mxu1 %v872_v62  ;;  %730 = vmatmul.f32.vlgmr.msra.gmra.mxu0 %v729_v34  ;;  %v736_v14 = vsub.f32 %v6906_v37, %v735_v50  ;;  %v777_v34 = vand.u32 4294901760, %v776_v12 }
  0x40   : > { %6291 = vmatpush.msra.mxu3 %v878_v54  ;;  %927 = vmatpush.msrb.mxu2 %v6672_v16 }
  0x41   : > { %879 = vmatpush.msra.mxu1 %v878_v54  ;;  %1092 = vmatpush.msrb.mxu0 %v792_v21  ;;  %v6925_v54 = vsub.f32 %v672_v49, %v6910_v1  ;;  %v6934_v21 = vand.u32 4294901760, %v667_v61  ;;  %v737_v15 = vand.u32 4294901760, %v736_v14 }
  0x42   : > { %6292 = vmatpush.msra.mxu3 %v884_v30  ;;  %930 = vmatpush.msrb.mxu2 %v6681_v19 }
  0x43   : > { %770 = vmatmul.f32.gmra.mxu2 %v769_v31  ;;  %903 = vmatmul.f32.vlgmr.msra.gmra.mxu3 %v6766_v56  ;;  %v783_v62 = vand.u32 4294901760, %v6925_v54 }
  0x44   : > { %1009 = vmatpush.msrb.mxu3 %v6637_v3  ;;  %933 = vmatpush.msrb.mxu2 %v6684_v20 }
  0x45   : > { %885 = vmatpush.msra.mxu1 %v884_v30  ;;  %1096 = vmatpush.msrb.mxu0 %v798_v22  ;;  %v6948_v22 = vsub.f32 %v667_v61, %v6934_v21  ;;  %v784_v16 = vsub.f32 %v6925_v54, %v783_v62 }
  0x46   : > { %1011 = vmatpush.msrb.mxu3 %v6639_v4  ;;  %936 = vmatpush.msrb.mxu2 %v6700_v28 }
  0x47   : > { %887 = vmatmul.f32.vlgmr.msra.gmra.mxu1 %v6825_v42  ;;  %1100 = vmatpush.msrb.mxu0 %v804_v23  ;;  %v743_v19 = vand.u32 4294901760, %v6948_v22 }
  0x48   : > { %1013 = vmatpush.msrb.mxu3 %v6641_v5  ;;  %939 = vmatpush.msrb.mxu2 %v6723_v36  ;;  %v11100_v36 = vand.u32 4294901760, %v6840_v55 }
  0x49   : > { %1187 = vmatpush.msrb.mxu1 %v6637_v3  ;;  %1104 = vmatpush.msrb.mxu0 %v810_v26  ;;  %v668_v3 = vld [vmem:[%s11095_s20 + $0x18] sm:$0xff]  ;;  %v785_v26 = vand.u32 4294901760, %v784_v16 }
  0x4a   : > { %1015 = vmatpush.msrb.mxu3 %v6652_v9  ;;  %942 = vmatpush.msrb.mxu2 %v6729_v40  ;;  %v6965_v23 = vand.u32 4294901760, %v668_v3  ;;  %v11104_v40 = vand.u32 4294901760, %v6799_v8 }
  0x4b   : > { %778 = vmatmul.f32.gmra.mxu2 %v777_v34  ;;  %907 = vmatmul.f32.gmra.mxu3 %v6829_v47 }
  0x4c   : > { %1017 = vmatpush.msrb.mxu3 %v6654_v10  ;;  %945 = vmatpush.msrb.mxu2 %v6742_v46 }
  0x4d   : > { %1189 = vmatpush.msrb.mxu1 %v6639_v4  ;;  %738 = vmatmul.f32.gmra.mxu0 %v737_v15  ;;  %v744_v4 = vsub.f32 %v6948_v22, %v743_v19 }
  0x4e   : > { %1019 = vmatpush.msrb.mxu3 %v6656_v11  ;;  %948 = vmatpush.msrb.mxu2 %v6759_v53 }
  0x4f   : > { %1191 = vmatpush.msrb.mxu1 %v6641_v5  ;;  %1108 = vmatpush.msrb.mxu0 %v816_v32  ;;  %v750_v5 = vsub.f32 %v668_v3, %v6965_v23  ;;  %v11098_v32 = vand.u32 4294901760, %v6775_v60 }
  0x50   : > { %1021 = vmatpush.msrb.mxu3 %v6678_v18  ;;  %951 = vmatpush.msrb.mxu2 %v6775_v60 }
  0x51   : > { %1193 = vmatpush.msrb.mxu1 %v6652_v9  ;;  %1112 = vmatpush.msrb.mxu0 %v822_v39  ;;  %v745_v9 = vand.u32 4294901760, %v744_v4  ;;  %v751_v20 = vand.u32 4294901760, %v750_v5  ;;  %v11103_v39 = vand.u32 4294901760, %v6837_v51 }
  0x52   : > { %1023 = vmatpush.msrb.mxu3 %v6690_v24  ;;  %954 = vmatpush.msrb.mxu2 %v6792_v6 }
  0x53   : > { %786 = vmatmul.f32.gmra.mxu2 %v785_v26  ;;  %911 = vmatmul.f32.gmra.mxu3 %v6881_v25  ;;  %v752_v28 = vsub.f32 %v750_v5, %v751_v20 }
  0x54   : > { %1025 = vmatpush.msrb.mxu3 %v6697_v27  ;;  %957 = vmatpush.msrb.mxu2 %v6809_v29 }
  0x55   : > { %891 = vmatmul.f32.gmra.mxu1 %v6888_v57  ;;  %1116 = vmatpush.msrb.mxu0 %v828_v45 }
  0x56   : > { %1027 = vmatpush.msrb.mxu3 %v6720_v35  ;;  %1195 = vmatpush.msrb.mxu1 %v6654_v10  ;;  %v11096_v10 = vand.u32 4294901760, %v6742_v46 }
  0x57   : > { %960 = vmatpush.msrb.mxu2 %v6823_v38  ;;  %1120 = vmatpush.msrb.mxu0 %v834_v48 }
  0x58   : > { %1029 = vmatpush.msrb.mxu3 %v6731_v41  ;;  %1197 = vmatpush.msrb.mxu1 %v6656_v11  ;;  %v753_v11 = vand.u32 4294901760, %v752_v28 }
  0x59   : > { %963 = vmatpush.msrb.mxu2 %v6837_v51  ;;  %746 = vmatmul.f32.gmra.mxu0 %v745_v9 }
  0x5a   : > { %1031 = vmatpush.msrb.mxu3 %v6756_v52  ;;  %1199 = vmatpush.msrb.mxu1 %v6678_v18  ;;  %v11097_v18 = vand.u32 4294901760, %v6759_v53 }
  0x5b   : > { %966 = vmatpush.msrb.mxu2 %v6849_v63  ;;  %915 = vmatmul.f32.gmra.mxu3 %v6910_v1 }
  0x5c   : > { %969 = vmatmul.f32.vlgmr.msrb.gmra.mxu2 %v6840_v55  ;;  %1033 = vmatpush.msrb.mxu3 %v6772_v59 }
  0x5d   : > { %1124 = vmatpush.msrb.mxu0 %v11096_v10  ;;  %1201 = vmatpush.msrb.mxu1 %v6690_v24  ;;  %v11099_v24 = vand.u32 4294901760, %v6792_v6 }
  0x5e   : > { %895 = vmatmul.f32.gmra.mxu1 %v6934_v21  ;;  %1035 = vmatpush.msrb.mxu3 %v6785_v0 }
  0x5f   : > { %1128 = vmatpush.msrb.mxu0 %v11097_v18  ;;  %1203 = vmatpush.msrb.mxu1 %v6697_v27  ;;  %v11101_v27 = vand.u32 4294901760, %v6809_v29 }
  0x60   : > { %1037 = vmatpush.msrb.mxu3 %v6805_v17 }
  0x61   : > { %1132 = vmatpush.msrb.mxu0 %v11098_v32  ;;  %1205 = vmatpush.msrb.mxu1 %v6720_v35  ;;  %v11102_v35 = vand.u32 4294901760, %v6823_v38 }
  0x62   : > { %1039 = vmatpush.msrb.mxu3 %v6814_v33  ;;  %754 = vmatmul.f32.gmra.mxu0 %v753_v11 }
  0x63   : > { %1136 = vmatpush.msrb.mxu0 %v11099_v24  ;;  %1207 = vmatpush.msrb.mxu1 %v6731_v41 }
  0x64   : > { %974 = vmatmul.f32.gmra.mxu2 %v6906_v37  ;;  %1043 = vmatmul.f32.vlgmr.msrb.gmra.mxu3 %v11100_v36 }
  0x65   : > { %1140 = vmatpush.msrb.mxu0 %v11101_v27  ;;  %1209 = vmatpush.msrb.mxu1 %v6756_v52 }
  0x66   : > { %899 = vmatmul.f32.gmra.mxu1 %v6965_v23 }
  0x67   : > { %1144 = vmatpush.msrb.mxu0 %v11102_v35  ;;  %1211 = vmatpush.msrb.mxu1 %v6772_v59 }
  0x69   : > { %1148 = vmatpush.msrb.mxu0 %v11103_v39  ;;  %1213 = vmatpush.msrb.mxu1 %v6785_v0 }
  0x6b   : > { %1152 = vmatpush.msrb.mxu0 %v882_v44  ;;  %1215 = vmatpush.msrb.mxu1 %v6805_v17 }
  0x6c   : > { %979 = vmatmul.f32.gmra.mxu2 %v6948_v22  ;;  %1049 = vmatmul.f32.gmra.mxu3 %v735_v50 }
  0x6d   : > { %1154 = vmatmul.f32.vlgmr.msrb.gmra.mxu0 %v6825_v42  ;;  %1217 = vmatpush.msrb.mxu1 %v6814_v33 }
  0x6e   : > { %1219 = vmatmul.f32.vlgmr.msrb.gmra.mxu1 %v6825_v42 }
  0x74   : > { %984 = vmatmul.f32.gmra.mxu2 %v750_v5  ;;  %1055 = vmatmul.f32.gmra.mxu3 %v743_v19 }
  0x75   : > { %1158 = vmatmul.f32.gmra.mxu0 %v6888_v57 }
  0x76   : > { %1223 = vmatmul.f32.gmra.mxu1 %v6888_v57 }
  0x7c   : > { %989 = vmatmul.f32.gmra.mxu2 %v6799_v8  ;;  %1061 = vmatmul.f32.gmra.mxu3 %v751_v20 }
  0x7d   : > { %1162 = vmatmul.f32.gmra.mxu0 %v6934_v21 }
  0x7e   : > { %1227 = vmatmul.f32.gmra.mxu1 %v6934_v21 }
  0x84   : > { %994 = vmatmul.f32.gmra.mxu2 %v6856_v7  ;;  %1067 = vmatmul.f32.gmra.mxu3 %v11104_v40 }
  0x85   : > { %1166 = vmatmul.f32.gmra.mxu0 %v6965_v23 }
  0x86   : > { %1231 = vmatmul.f32.gmra.mxu1 %v6965_v23 }
  0x8c   : > { %999 = vmatmul.f32.gmra.mxu2 %v6898_v13  ;;  %1073 = vmatmul.f32.gmra.mxu3 %v767_v43 }
  0x8d   : > { %1170 = vmatmul.f32.gmra.mxu0 %v6766_v56 }
  0x8e   : > { %1235 = vmatmul.f32.gmra.mxu1 %v6766_v56 }
  0x94   : > { %1004 = vmatmul.f32.gmra.mxu2 %v6925_v54  ;;  %1079 = vmatmul.f32.gmra.mxu3 %v775_v58 }
  0x95   : > { %1174 = vmatmul.f32.gmra.mxu0 %v6829_v47 }
  0x96   : > { %1239 = vmatmul.f32.gmra.mxu1 %v6829_v47 }
  0x9c   : > { %1085 = vmatmul.f32.gmra.mxu3 %v783_v62 }
  0x9d   : > { %1178 = vmatmul.f32.gmra.mxu0 %v6881_v25 }
  0x9e   : > { %1243 = vmatmul.f32.gmra.mxu1 %v6881_v25  ;;  %v7080_v25 = vld [vmem:[%s10955_s3] ss:$0 sm:$0xff] }
  0xa5   : > { %1182 = vmatmul.f32.gmra.mxu0 %v6910_v1 }
  0xa6   : > { %1247 = vmatmul.f32.gmra.mxu1 %v6910_v1 }
  0xbc   : > { %v731_v45 = vpop.f32.mrf.mxu0 }
  0xbd   : > { %v732_v38 = vadd.f32 %v7080_v25, %v731_v45 }
  0xbe   : > { %v763_v41 = vpop.f32.mrf.mxu2 }
  0xbf   : > { %v764_v28 = vadd.f32 %v7080_v25, %v763_v41 }
  0xc4   : > { %v888_v52 = vpop.f32.mrf.mxu1 }
  0xc5   : > { %v889_v47 = vadd.f32 %v888_v52, %v732_v38 }
  0xc6   : > { %v7067_v46 = vpop.f32.mrf.mxu2  ;;  %v904_v48 = vpop.f32.mrf.mxu3 }
  0xc7   : > { %v905_v24 = vadd.f32 %v904_v48, %v764_v28  ;;  %v772_v40 = vadd.f32 %v7080_v25, %v7067_v46 }
  0xca   : > { %v739_v53 = vpop.f32.mrf.mxu0 }
  0xcb   : > { %v740_v7 = vadd.f32 %v7080_v25, %v739_v53 }
  0xce   : > { %v7069_v56 = vpop.f32.mrf.mxu2  ;;  %v7071_v59 = vpop.f32.mrf.mxu3 }
  0xcf   : > { %v780_v48 = vadd.f32 %v7080_v25, %v7069_v56 }
  0xd2   : > { %v892_v60 = vpop.f32.mrf.mxu1 }
  0xd3   : > { %v893_v49 = vadd.f32 %v892_v60, %v740_v7 }
  0xd6   : > { %v7073_v0 = vpop.f32.mrf.mxu2  ;;  %v7075_v6 = vpop.f32.mrf.mxu3 }
  0xd7   : > { %v747_v8 = vpop.f32.mrf.mxu0  ;;  %v913_v46 = vadd.f32 %v7075_v6, %v780_v48 }
  0xd8   : > { %v748_v1 = vadd.f32 %v7080_v25, %v747_v8  ;;  %v909_v8 = vadd.f32 %v7071_v59, %v772_v40  ;;  %v788_v59 = vadd.f32 %v7080_v25, %v7073_v0 }
  0xdb   : > { %v896_v17 = vpop.f32.mrf.mxu1 }
  0xdc   : > { %v897_v14 = vadd.f32 %v896_v17, %v748_v1 }
  0xde   : > { %v7082_v29 = vpop.f32.mrf.mxu3 }
  0xdf   : > { %v970_v33 = vpop.f32.mrf.mxu2  ;;  %v755_v42 = vpop.f32.mrf.mxu0  ;;  %v917_v56 = vadd.f32 %v7082_v29, %v788_v59 }
  0xe0   : > { %v971_v51 = vadd.f32 %v970_v33, %v889_v47  ;;  %v756_v22 = vadd.f32 %v7080_v25, %v755_v42 }
  0xe3   : > { %v900_v44 = vpop.f32.mrf.mxu1 }
  0xe4   : > { %v901_v26 = vadd.f32 %v900_v44, %v756_v22 }
  0xe7   : > { %v975_v55 = vpop.f32.mrf.mxu2  ;;  %v1044_v63 = vpop.f32.mrf.mxu3 }
  0xe8   : > { %v1045_v43 = vadd.f32 %v1044_v63, %v971_v51  ;;  %v976_v30 = vadd.f32 %v975_v55, %v893_v49 }
  0xea   : > { %v1155_v57 = vpop.f32.mrf.mxu0 }
  0xeb   : > { %v1156_v2 = vadd.f32 %v1155_v57, %v1045_v43  ;;  %v1220_v13 = vpop.f32.mrf.mxu1 }
  0xed   : > { %v1221_v37 = vadd.f32 %v1220_v13, %v1156_v2 }
  0xef   : > { %1251 = vst [vmem:[#allocation2 + $0x30] sm:$0xff] %v1221_v37  ;;  %v980_v31 = vpop.f32.mrf.mxu2  ;;  %v1050_v58 = vpop.f32.mrf.mxu3 }
  0xf0   : > { %v1051_v50 = vadd.f32 %v1050_v58, %v976_v30  ;;  %v981_v34 = vadd.f32 %v980_v31, %v897_v14 }
  0xf2   : > { %v1159_v61 = vpop.f32.mrf.mxu0 }
  0xf3   : > { %v1160_v12 = vadd.f32 %v1159_v61, %v1051_v50  ;;  %v1224_v54 = vpop.f32.mrf.mxu1 }
  0xf5   : > { %v1225_v21 = vadd.f32 %v1224_v54, %v1160_v12 }
  0xf7   : > { %1252 = vst [vmem:[#allocation2] sm:$0xff] %v1225_v21  ;;  %v985_v62 = vpop.f32.mrf.mxu2  ;;  %v1056_v15 = vpop.f32.mrf.mxu3 }
  0xf8   : > { %v1057_v16 = vadd.f32 %v1056_v15, %v981_v34  ;;  %v986_v5 = vadd.f32 %v985_v62, %v901_v26 }
  0xfa   : > { %v1163_v3 = vpop.f32.mrf.mxu0 }
  0xfb   : > { %v1164_v19 = vadd.f32 %v1163_v3, %v1057_v16  ;;  %v1228_v23 = vpop.f32.mrf.mxu1 }
  0xfd   : > { %v1229_v4 = vadd.f32 %v1228_v23, %v1164_v19 }
  0xff   : > { %1253 = vst [vmem:[#allocation2 + $0x18] sm:$0xff] %v1229_v4  ;;  %v990_v9 = vpop.f32.mrf.mxu2  ;;  %v1062_v20 = vpop.f32.mrf.mxu3 }
 0x100   : > { %v1063_v10 = vadd.f32 %v1062_v20, %v986_v5  ;;  %v991_v27 = vadd.f32 %v990_v9, %v905_v24 }
 0x102   : > { %v1167_v11 = vpop.f32.mrf.mxu0 }
 0x103   : > { %v1168_v18 = vadd.f32 %v1167_v11, %v1063_v10  ;;  %v1232_v32 = vpop.f32.mrf.mxu1 }
 0x105   : > { %v1233_v36 = vadd.f32 %v1232_v32, %v1168_v18 }
 0x107   : > { %1254 = vst [vmem:[#allocation2 + $0x10] sm:$0xff] %v1233_v36  ;;  %v995_v35 = vpop.f32.mrf.mxu2  ;;  %v1068_v39 = vpop.f32.mrf.mxu3 }
 0x108   : > { %v1069_v45 = vadd.f32 %v1068_v39, %v991_v27  ;;  %v996_v17 = vadd.f32 %v995_v35, %v909_v8 }
 0x10a   : > { %v1171_v52 = vpop.f32.mrf.mxu0 }
 0x10b   : > { %v1172_v53 = vadd.f32 %v1171_v52, %v1069_v45  ;;  %v1236_v60 = vpop.f32.mrf.mxu1 }
 0x10d   : > { %v1237_v41 = vadd.f32 %v1236_v60, %v1172_v53 }
 0x10f   : > { %1255 = vst [vmem:[#allocation2 + $0x8] sm:$0xff] %v1237_v41  ;;  %v1074_v33 = vpop.f32.mrf.mxu3  ;;  %v1000_v42 = vpop.f32.mrf.mxu2 }
 0x110   : > { %v1075_v38 = vadd.f32 %v1074_v33, %v996_v17  ;;  %v1001_v63 = vadd.f32 %v1000_v42, %v913_v46 }
 0x112   : > { %v1175_v44 = vpop.f32.mrf.mxu0 }
 0x113   : > { %v1176_v47 = vadd.f32 %v1175_v44, %v1075_v38  ;;  %v1240_v51 = vpop.f32.mrf.mxu1 }
 0x115   : > { %v1241_v55 = vadd.f32 %v1240_v51, %v1176_v47 }
 0x117   : > { %1256 = vst [vmem:[#allocation2 + $0x20] sm:$0xff] %v1241_v55  ;;  %v1080_v7 = vpop.f32.mrf.mxu3  ;;  %v1005_v2 = vpop.f32.mrf.mxu2 }
 0x118   : > { %v1081_v43 = vadd.f32 %v1080_v7, %v1001_v63  ;;  %v1006_v30 = vadd.f32 %v1005_v2, %v917_v56 }
 0x11a   : > { %v1179_v57 = vpop.f32.mrf.mxu0 }
 0x11b   : > { %v1180_v13 = vadd.f32 %v1179_v57, %v1081_v43  ;;  %v1244_v49 = vpop.f32.mrf.mxu1 }
 0x11d   : > { %v1245_v37 = vadd.f32 %v1244_v49, %v1180_v13 }
 0x11f   : > { %1257 = vst [vmem:[#allocation2 + $0x28] sm:$0xff] %v1245_v37  ;;  %v1086_v31 = vpop.f32.mrf.mxu3 }
 0x120   : > { %v1087_v58 = vadd.f32 %v1086_v31, %v1006_v30 }
 0x122   : > { %v1183_v6 = vpop.f32.mrf.mxu0 }
 0x123   : > { %v1184_v1 = vadd.f32 %v1183_v6, %v1087_v58  ;;  %v1248_v50 = vpop.f32.mrf.mxu1 }
 0x125   : > { %v1249_v61 = vadd.f32 %v1248_v50, %v1184_v1 }
 0x127   : > { %1258 = vst [vmem:[#allocation2 + $0x38] sm:$0xff] %v1249_v61 }
 0x128 PF: > { %v7098_v12 = vld [vmem:[#allocation2 + $0x8] sm:$0xff]  ;;  %v7100_v0 = vld [vmem:[#allocation2 + $0x18] sm:$0xff]  ;;  %v7102_v25 = vld [vmem:[#allocation2 + $0x30] sm:$0xff]  ;;  %v6478_v62 = vmov 128.0   ;;  %v6479_v20 = vmov 0   ;;  %s11106_s23 = scalar_lea.vmem %s10956_s4, %s6583_s26  ;;  %p1267_p5 = scmp.gt.s32.totalorder %s6577_s25, 0 }
 0x129   : > { %1280 = vadd.xlane.f32.xlu2 %v7098_v12  ;;  %1276 = vadd.xlane.f32.xlu1 %v7100_v0  ;;  %v7107_v29 = vld [vmem:[#allocation2 + $0x20] sm:$0xff]  ;;  %v7109_v54 = vld [vmem:[#allocation2 + $0x10] sm:$0xff]  ;;  %v7116_v21 = vld [vmem:[#allocation2 + $0x28] sm:$0xff]  ;;  %6343 = vrcp.f32 %v6478_v62  ;;  %s11115_s1 = scalar_lea.vmem %s10957_s5, %s6583_s26  ;;  %s11116_s0 = scalar_lea.vmem %s10958_s6, %s6583_s26 }
 0x12a   : > { %1272 = vadd.xlane.f32.xlu0 %v7102_v25  ;;  %v7111_v14 = vld [vmem:[#allocation2] sm:$0xff]  ;;  %6337 = vset.pattern.permute.xlu1 %v6479_v20  ;;  %s7270_s28 = scalar_select %p1267_p5, 1, 0 }
 0x12b   : > { %6338 = vset.pattern.permute.xlu0 %v6479_v20  ;;  %v6339_v7 = vld [vmem:[%s11106_s23] ss:$0 sm:$0xff]  ;;  %s11126_s18 = sld [smem:[#allocation60_spill]]  ;;  %p6256_p6 = scmp.ne.s32.totalorder %s6577_s25, 2 }
 0x12c   : > { %s1269_s14 = scvt.s32.f32 %s7270_s28 }
 0x12e   : > { %v7118_v34 = vld [vmem:[#allocation2 + $0x38] sm:$0xff]  ;;  %s1478_s22 = ssub.f32 1.0, %s1269_s14 }
 0x12f   : > { %v6344_v15 = vpop.eup %6343 }
 0x130   : > { %v1289_v22 = vmul.f32 128.0, %v6344_v15  ;;  %vm1293_vm0 = vweird.f32 %v6344_v15 }
 0x131   : > { %1282 = vadd.xlane.f32.xlu2 %v7107_v29  ;;  %1278 = vadd.xlane.f32.xlu1 %v7109_v54 }
 0x132   : > { %1274 = vadd.xlane.f32.xlu0 %v7111_v14  ;;  %v1290_v16 = vsub.f32 1.0, %v1289_v22 }
 0x134   : > { %v1291_v3 = vmul.f32 %v6344_v15, %v1290_v16 }
 0x136   : > { %v1292_v19 = vadd.f32 %v6344_v15, %v1291_v3 }
 0x138   : > { %v7122_v23 = vsel %vm1293_vm0, %v6344_v15, %v1292_v19 }
 0x139   : > { %1286 = vadd.xlane.f32.xlu1 %v7118_v34  ;;  %11105 = vst [vmem:[#allocation4_spill] sm:$0xff] %v7122_v23 }
 0x13a   : > { %1284 = vadd.xlane.f32.xlu0 %v7116_v21 }
 0x19c   : > { %v1281_v26 = vpop.xlane.xlu2 %1280  ;;  %v1277_v4 = vpop.xlane.xlu1 %1276 }
 0x19d   : > { %v1297_v5 = vmul.f32 %v7122_v23, %v1277_v4  ;;  %v1273_v9 = vpop.xlane.xlu0 %1272  ;;  %v1299_v52 = vmul.f32 %v7122_v23, %v1281_v26 }
 0x19e   : > { %v1295_v28 = vmul.f32 %v7122_v23, %v1273_v9 }
 0x19f   : > { %v7127_v10 = vsub.f32 %v7100_v0, %v1297_v5  ;;  %v7156_v33 = vsub.f32 %v7098_v12, %v1299_v52 }
 0x1a0   : > { %v7130_v11 = vsub.f32 %v7102_v25, %v1295_v28 }
 0x1a1   : > { %v1313_v18 = vmul.f32 %v7127_v10, %v7127_v10  ;;  %v1315_v47 = vmul.f32 %v7156_v33, %v7156_v33 }
 0x1a2   : > { %v1311_v32 = vmul.f32 %v7130_v11, %v7130_v11 }
 0x1a3   : > { %1323 = vadd.xlane.f32.xlu1 %v1313_v18 }
 0x1a4   : > { %1319 = vadd.xlane.f32.xlu2 %v1311_v32  ;;  %v1283_v24 = vpop.xlane.xlu2 %1282  ;;  %v1279_v27 = vpop.xlane.xlu1 %1278 }
 0x1a5   : > { %v1300_v36 = vmul.f32 %v7122_v23, %v1283_v24  ;;  %v1275_v35 = vpop.xlane.xlu0 %1274  ;;  %v1298_v39 = vmul.f32 %v7122_v23, %v1279_v27 }
 0x1a6   : > { %v1296_v40 = vmul.f32 %v7122_v23, %v1275_v35 }
 0x1a7   : > { %v7140_v45 = vsub.f32 %v7107_v29, %v1300_v36  ;;  %v7144_v53 = vsub.f32 %v7109_v54, %v1298_v39 }
 0x1a8   : > { %v7147_v60 = vsub.f32 %v7111_v14, %v1296_v40 }
 0x1a9   : > { %v1316_v8 = vmul.f32 %v7140_v45, %v7140_v45  ;;  %v1314_v41 = vmul.f32 %v7144_v53, %v7144_v53 }
 0x1aa   : > { %v1312_v17 = vmul.f32 %v7147_v60, %v7147_v60 }
 0x1ab   : > { %1329 = vadd.xlane.f32.xlu1 %v1316_v8 }
 0x1ac   : > { %1325 = vadd.xlane.f32.xlu2 %v1314_v41  ;;  %1321 = vadd.xlane.f32.xlu0 %v1312_v17  ;;  %v1287_v38 = vpop.xlane.xlu1 %1286 }
 0x1ad   : > { %v1285_v48 = vpop.xlane.xlu0 %1284  ;;  %v1302_v51 = vmul.f32 %v7122_v23, %v1287_v38 }
 0x1ae   : > { %v1301_v42 = vmul.f32 %v7122_v23, %v1285_v48 }
 0x1af   : > { %v7168_v55 = vsub.f32 %v7118_v34, %v1302_v51 }
 0x1b0   : > { %v7160_v44 = vsub.f32 %v7116_v21, %v1301_v42 }
 0x1b1   : > { %v1318_v63 = vmul.f32 %v7168_v55, %v7168_v55 }
 0x1b2   : > { %v1317_v46 = vmul.f32 %v7160_v44, %v7160_v44 }
 0x1b4   : > { %1327 = vadd.xlane.f32.xlu0 %v1315_v47  ;;  %1331 = vadd.xlane.f32.xlu2 %v1317_v46 }
 0x1bc   : > { %1333 = vadd.xlane.f32.xlu0 %v1318_v63 }
 0x1c4   : > { %1516 = vperm.xlu1 %6337, %v6339_v7  }
 0x216   : > { %v1324_v59 = vpop.xlane.xlu1 %1323 }
 0x217   : > { %v1337_v43 = vmul.f32 %v1324_v59, %v7122_v23  ;;  %v1320_v57 = vpop.xlane.xlu2 %1319 }
 0x218   : > { %v1335_v2 = vmul.f32 %v1320_v57, %v7122_v23 }
 0x219   : > { %v7179_v13 = vadd.f32 1e-05, %v1337_v43 }
 0x21a   : > { %v1343_v49 = vadd.f32 1e-05, %v1335_v2  ;;  %v7323_v2 = vstv %s1269_s14  ;;  %s11389_s14 = sld [smem:[#allocation64_spill]] (!%p6256_p6) }
 0x21b   : > { %6345 = vrsqrt.f32 %v7179_v13  ;;  %vm1377_vm4 = vweird.f32 %v7179_v13  ;;  %11117 = vst [vmem:[#allocation5_spill] sm:$0xff] %v7323_v2 }
 0x21c   : > { %6347 = vrsqrt.f32 %v1343_v49  ;;  %vm1357_vm6 = vweird.f32 %v1343_v49 }
 0x21e   : > { %v1330_v56 = vpop.xlane.xlu1 %1329 }
 0x21f   : > { %v1340_v37 = vmul.f32 %v1330_v56, %v7122_v23  ;;  %v1326_v30 = vpop.xlane.xlu2 %1325  ;;  %v1322_v31 = vpop.xlane.xlu0 %1321 }
 0x220   : > { %v1338_v58 = vmul.f32 %v1326_v30, %v7122_v23  ;;  %v1336_v6 = vmul.f32 %v1322_v31, %v7122_v23 }
 0x221   : > { %v7185_v1 = vpop.eup %6345  ;;  %v1348_v50 = vadd.f32 1e-05, %v1340_v37 }
 0x222   : > { %v7187_v61 = vpop.eup %6347  ;;  %v7189_v62 = vadd.f32 1e-05, %v1338_v58  ;;  %v1344_v15 = vadd.f32 1e-05, %v1336_v6  ;;  %v1372_v16 = vmul.f32 %v7185_v1, %v7179_v13  ;;  %vm1378_vm5 = vweird.f32 %v7185_v1 }
 0x223   : > { %v1352_v22 = vmul.f32 %v7187_v61, %v1343_v49  ;;  %6349 = vrsqrt.f32 %v1348_v50  ;;  %vm1358_vm1 = vweird.f32 %v7187_v61  ;;  %vm1407_vm2 = vweird.f32 %v1348_v50  ;;  %vm7258_vm14 = vmor %vm1377_vm4, %vm1378_vm5 }
 0x224   : > { %6351 = vrsqrt.f32 %v7189_v62  ;;  %v1373_v20 = vmul.f32 %v7185_v1, %v1372_v16  ;;  %vm7224_vm7 = vmor %vm1357_vm6, %vm1358_vm1  ;;  %vm1387_vm10 = vweird.f32 %v7189_v62  ;;  %vm1367_vm12 = vweird.f32 %v1344_v15 }
 0x225   : > { %6353 = vrsqrt.f32 %v1344_v15  ;;  %v1353_v3 = vmul.f32 %v7187_v61, %v1352_v22 }
 0x226   : > { %v1374_v52 = vmul.f32 0.5, %v1373_v20  ;;  %v7286_v20 = vld [vmem:[%s11115_s1] ss:$0 sm:$0xff] }
 0x227   : > { %v1332_v19 = vpop.xlane.xlu2 %1331  ;;  %v1328_v26 = vpop.xlane.xlu0 %1327  ;;  %v1354_v18 = vmul.f32 0.5, %v1353_v3 }
 0x228   : > { %v1341_v4 = vmul.f32 %v1332_v19, %v7122_v23  ;;  %v1339_v5 = vmul.f32 %v1328_v26, %v7122_v23  ;;  %v1375_v46 = vsub.f32 1.5, %v1374_v52 }
 0x229   : > { %v7198_v9 = vpop.eup %6349  ;;  %v1355_v41 = vsub.f32 1.5, %v1354_v18 }
 0x22a   : > { %v7201_v28 = vpop.eup %6351  ;;  %v1402_v32 = vmul.f32 %v7198_v9, %v1348_v50  ;;  %v7204_v24 = vadd.f32 1e-05, %v1341_v4  ;;  %v7210_v35 = vadd.f32 1e-05, %v1339_v5  ;;  %vm1408_vm3 = vweird.f32 %v7198_v9 }
 0x22b   : > { %v7206_v36 = vpop.eup %6353  ;;  %v1382_v27 = vmul.f32 %v7201_v28, %v7189_v62  ;;  %v1356_v63 = vmul.f32 %v7187_v61, %v1355_v41  ;;  %v1376_v58 = vmul.f32 %v7185_v1, %v1375_v46  ;;  %vm7237_vm9 = vmor %vm1407_vm2, %vm1408_vm3  ;;  %vm1388_vm11 = vweird.f32 %v7201_v28 }
 0x22c   : > { %v1403_v39 = vmul.f32 %v7198_v9, %v1402_v32  ;;  %v1362_v40 = vmul.f32 %v7206_v36, %v1344_v15  ;;  %6355 = vrsqrt.f32 %v7204_v24  ;;  %vm1368_vm8 = vweird.f32 %v7206_v36  ;;  %vm1389_vm15 = vmor %vm1387_vm10, %vm1388_vm11 }
 0x22d   : > { %v1383_v8 = vmul.f32 %v7201_v28, %v1382_v27  ;;  %6357 = vrsqrt.f32 %v7210_v35  ;;  %v1360_v6 = vsel %vm7224_vm7, %v7187_v61, %v1356_v63  ;;  %vm7249_vm13 = vmor %vm1367_vm12, %vm1368_vm8  ;;  %v1380_v13 = vsel %vm7258_vm14, %v7185_v1, %v1376_v58 }
 0x22e   : > { %v1404_v17 = vmul.f32 0.5, %v1403_v39  ;;  %v1363_v48 = vmul.f32 %v7206_v36, %v1362_v40  ;;  %v1431_v5 = vmul.f32 %v1360_v6, %v7130_v11  ;;  %vm1417_vm0 = vweird.f32 %v7204_v24 }
 0x22f   : > { %v1384_v38 = vmul.f32 0.5, %v1383_v8  ;;  %v1334_v42 = vpop.xlane.xlu0 %1333  ;;  %vm1397_vm4 = vweird.f32 %v7210_v35 }
 0x230   : > { %v1405_v47 = vsub.f32 1.5, %v1404_v17  ;;  %v1364_v51 = vmul.f32 0.5, %v1363_v48  ;;  %v1342_v43 = vmul.f32 %v1334_v42, %v7122_v23 }
 0x231   : > { %v1385_v7 = vsub.f32 1.5, %v1384_v38 }
 0x232   : > { %v1365_v59 = vsub.f32 1.5, %v1364_v51  ;;  %v6356_v57 = vpop.eup %6355  ;;  %v1406_v56 = vmul.f32 %v7198_v9, %v1405_v47  ;;  %v7247_v3 = vadd.f32 1e-05, %v1342_v43 }
 0x233   : > { %v1412_v30 = vmul.f32 %v6356_v57, %v7204_v24  ;;  %v6358_v31 = vpop.eup %6357  ;;  %v1386_v22 = vmul.f32 %v7201_v28, %v1385_v7  ;;  %vm1418_vm1 = vweird.f32 %v6356_v57 }
 0x234   : > { %v1366_v37 = vmul.f32 %v7206_v36, %v1365_v59  ;;  %v1392_v19 = vmul.f32 %v6358_v31, %v7210_v35  ;;  %v1410_v61 = vsel %vm7237_vm9, %v7198_v9, %v1406_v56  ;;  %6359 = vrsqrt.f32 %v7247_v3  ;;  %vm1419_vm2 = vmor %vm1417_vm0, %vm1418_vm1 }
 0x235   : > { %v1413_v16 = vmul.f32 %v6356_v57, %v1412_v30  ;;  %v1390_v18 = vsel %vm1389_vm15, %v7201_v28, %v1386_v22  ;;  %v1436_v11 = vmul.f32 %v1410_v61, %v7140_v45  ;;  %vm1398_vm3 = vweird.f32 %v6358_v31  ;;  %v7300_v28 = vld [vmem:[%s11116_s0] ss:$0 sm:$0xff] }
 0x236   : > { %v1370_v26 = vsel %vm7249_vm13, %v7206_v36, %v1366_v37  ;;  %v1393_v9 = vmul.f32 %v6358_v31, %v1392_v19  ;;  %v1433_v36 = vmul.f32 %v1380_v13, %v7127_v10  ;;  %v1434_v27 = vmul.f32 %v1390_v18, %v7144_v53  ;;  %vm1399_vm5 = vmor %vm1397_vm4, %vm1398_vm3 }
 0x237   : > { %v1414_v4 = vmul.f32 0.5, %v1413_v16  ;;  %v1432_v62 = vmul.f32 %v1370_v26, %v7147_v60  ;;  %v1442_v45 = vmul.f32 %v7286_v20, %v1431_v5  ;;  %v1447_v40 = vmul.f32 %v7286_v20, %v1436_v11 }
 0x238   : > { %v1394_v32 = vmul.f32 0.5, %v1393_v9  ;;  %v1444_v41 = vmul.f32 %v7286_v20, %v1433_v36  ;;  %v1445_v17 = vmul.f32 %v7286_v20, %v1434_v27  ;;  %v1479_v59 = vstv %s1478_s22  ;;  %s11312_s22 = scalar_lea.vmem %s10960_s8, %s6604_s27  ;;  %s11383_s27 = sld [smem:[#allocation63_spill]] (!%p6256_p6) }
 0x239   : > { %v1415_v1 = vsub.f32 1.5, %v1414_v4  ;;  %v1443_v10 = vmul.f32 %v7286_v20, %v1432_v62  ;;  %v1453_v35 = vadd.f32 %v7300_v28, %v1442_v45  ;;  %v1484_v30 = vmul.f32 %v1479_v59, %v7098_v12 }
 0x23a   : > { %v1395_v39 = vsub.f32 1.5, %v1394_v32  ;;  %v6360_v8 = vpop.eup %6359  ;;  %v1455_v43 = vadd.f32 %v7300_v28, %v1444_v41  ;;  %v1480_v6 = vmul.f32 %v1479_v59, %v7102_v25  ;;  %v1485_v50 = vmul.f32 %v1479_v59, %v7107_v29 }
 0x23b   : > { %v1416_v24 = vmul.f32 %v6356_v57, %v1415_v1  ;;  %v1422_v47 = vmul.f32 %v6360_v8, %v7247_v3  ;;  %v1454_v51 = vadd.f32 %v7300_v28, %v1443_v10  ;;  %vm1428_vm6 = vweird.f32 %v6360_v8 }
 0x23c   : > { %v1396_v52 = vmul.f32 %v6358_v31, %v1395_v39  ;;  %v1481_v19 = vmul.f32 %v1479_v59, %v7111_v14  ;;  %v1463_v15 = vmax.f32 %v1455_v43, 0.0  ;;  %vm1427_vm7 = vweird.f32 %v7247_v3 }
 0x23d   : > { %v1420_v60 = vsel %vm1419_vm2, %v6356_v57, %v1416_v24  ;;  %v1423_v7 = vmul.f32 %v6360_v8, %v1422_v47  ;;  %v1456_v57 = vadd.f32 %v7300_v28, %v1445_v17  ;;  %v1462_v58 = vmax.f32 %v1454_v51, 0.0  ;;  %vm1429_vm8 = vmor %vm1427_vm7, %vm1428_vm6 }
 0x23e   : > { %v1437_v53 = vmul.f32 %v1420_v60, %v7160_v44  ;;  %v1400_v38 = vsel %vm1399_vm5, %v6358_v31, %v1396_v52  ;;  %v1458_v44 = vadd.f32 %v7300_v28, %v1447_v40  ;;  %v1486_v12 = vmul.f32 %v1479_v59, %v7116_v21 }
 0x23f   : > { %v1435_v42 = vmul.f32 %v1400_v38, %v7156_v33  ;;  %v1461_v33 = vmax.f32 %v1453_v35, 0.0  ;;  %v1424_v37 = vmul.f32 0.5, %v1423_v7  ;;  %v1464_v61 = vmax.f32 %v1456_v57, 0.0  ;;  %v1517_v35 = vpop.permute.xlu1 %1516 }
 0x240   : > { %v1448_v48 = vmul.f32 %v7286_v20, %v1437_v53  ;;  %v1466_v31 = vmax.f32 %v1458_v44, 0.0  ;;  %v1471_v5 = vmul.f32 %v7323_v2, %v1462_v58  ;;  %v1482_v29 = vmul.f32 %v1479_v59, %v7100_v0 }
 0x241   : > { %v1446_v63 = vmul.f32 %v7286_v20, %v1435_v42  ;;  %v1425_v16 = vsub.f32 1.5, %v1424_v37  ;;  %v1470_v26 = vmul.f32 %v7323_v2, %v1461_v33  ;;  %v1483_v14 = vmul.f32 %v1479_v59, %v7109_v54 }
 0x242   : > { %v1459_v46 = vadd.f32 %v7300_v28, %v1448_v48  ;;  %v1475_v25 = vmul.f32 %v7323_v2, %v1466_v31  ;;  %v1472_v1 = vmul.f32 %v7323_v2, %v1463_v15  ;;  %v1473_v11 = vmul.f32 %v7323_v2, %v1464_v61 }
 0x243   : > { %v1457_v56 = vadd.f32 %v7300_v28, %v1446_v63  ;;  %v1426_v13 = vmul.f32 %v6360_v8, %v1425_v16  ;;  %v7344_v3 = vadd.f32 %v1480_v6, %v1470_v26  ;;  %v7348_v24 = vadd.f32 %v1481_v19, %v1471_v5 }
 0x244   : > { %v1467_v49 = vmax.f32 %v1459_v46, 0.0  ;;  %v7346_v32 = vadd.f32 %v1485_v50, %v1475_v25  ;;  %v7353_v54 = vadd.f32 %v1482_v29, %v1472_v1  ;;  %v7355_v27 = vadd.f32 %v1483_v14, %v1473_v11  ;;  %v1572_v14 = vld [vmem:[%s11126_s18] sm:$0xff] }
 0x245   : > { %v1465_v22 = vmax.f32 %v1457_v56, 0.0  ;;  %v1430_v18 = vsel %vm1429_vm8, %v6360_v8, %v1426_v13  ;;  %11119 = vst [vmem:[#allocation7_spill] sm:$0xff] %v7344_v3  ;;  %v1496_v60 = vmax.f32 %v7344_v3, 0.0  ;;  %v1497_v10 = vmax.f32 %v7348_v24, 0.0  ;;  %v2685_v3 = vld [vmem:[%s6601_s24 + $0xa0] sm:$0xff] }
 0x246   : > { %v1476_v9 = vmul.f32 %v7323_v2, %v1467_v49  ;;  %v1438_v21 = vmul.f32 %v1430_v18, %v7168_v55  ;;  %11120 = vst [vmem:[#allocation8_spill] sm:$0xff] %v7346_v32  ;;  %v1487_v55 = vmul.f32 %v1479_v59, %v7118_v34  ;;  %v1501_v40 = vmax.f32 %v7346_v32, 0.0 }
 0x247   : > { %v1474_v4 = vmul.f32 %v7323_v2, %v1465_v22  ;;  %11121 = vst [vmem:[#allocation9_spill] sm:$0xff] %v7348_v24  ;;  %v1499_v17 = vmax.f32 %v7355_v27, 0.0  ;;  %v7373_v48 = vadd.f32 1e-07, %v1497_v10  ;;  %vm1580_vm9 = vcmask 523264  }
 0x248   : > { %v7350_v36 = vadd.f32 %v1486_v12, %v1476_v9  ;;  %v1449_v0 = vmul.f32 %v7286_v20, %v1438_v21  ;;  %11123 = vst [vmem:[#allocation11_spill] sm:$0xff] %v7353_v54  ;;  %v1498_v20 = vmax.f32 %v7353_v54, 0.0  ;;  %v7371_v34 = vadd.f32 1e-07, %v1501_v40 }
 0x249   : > { %v7341_v62 = vadd.f32 %v1484_v30, %v1474_v4  ;;  %11124 = vst [vmem:[#allocation12_spill] sm:$0xff] %v7355_v27  ;;  %v1507_v46 = vadd.f32 1e-07, %v1499_v17  ;;  %v1520_v7 = vmul.f32 %v1517_v35, %v7373_v48 }
 0x24a   : > { %11122 = vst [vmem:[#allocation10_spill] sm:$0xff] %v7350_v36  ;;  %v1460_v45 = vadd.f32 %v7300_v28, %v1449_v0  ;;  %v1502_v53 = vmax.f32 %v7350_v36, 0.0  ;;  %v7369_v28 = vadd.f32 1e-07, %v1496_v60  ;;  %v7379_v47 = vadd.f32 1e-07, %v1498_v20 }
 0x24b   : > { %11118 = vst [vmem:[#allocation6_spill] sm:$0xff] %v7341_v62  ;;  %v1500_v39 = vmax.f32 %v7341_v62, 0.0  ;;  %v1524_v59 = vmul.f32 %v1517_v35, %v7371_v34  ;;  %v1522_v37 = vmul.f32 %v1517_v35, %v1507_v46 }
 0x24c   : > { %v1468_v52 = vmax.f32 %v1460_v45, 0.0  ;;  %v7375_v38 = vadd.f32 1e-07, %v1502_v53  ;;  %v1519_v63 = vmul.f32 %v1517_v35, %v7369_v28  ;;  %v1521_v33 = vmul.f32 %v1517_v35, %v7379_v47 }
 0x24d   : > { %v7365_v8 = vadd.f32 1e-07, %v1500_v39  ;;  %v1528_v31 = vmax.f32 %v1520_v7, %v1524_v59 }
 0x24e   : > { %v1477_v41 = vmul.f32 %v7323_v2, %v1468_v52  ;;  %v1525_v43 = vmul.f32 %v1517_v35, %v7375_v38  ;;  %v2689_v2 = vld [vmem:[%s6601_s24 + $0xc0] sm:$0xff] }
 0x24f   : > { %v1523_v44 = vmul.f32 %v1517_v35, %v7365_v8  ;;  %v7995_v32 = vand.u32 4294901760, %v2689_v2 }
 0x250   : > { %v7377_v42 = vadd.f32 %v1487_v55, %v1477_v41  ;;  %v1529_v58 = vmax.f32 %v1521_v33, %v1525_v43  ;;  %v1582_v55 = vsel %vm1580_vm9, %v1572_v14, 0 }
 0x251   : > { %v1527_v56 = vmax.f32 %v1519_v63, %v1523_v44  ;;  %v7392_v53 = vand.u32 4294901760, %v1582_v55 }
 0x252   : > { %11125 = vst [vmem:[#allocation13_spill] sm:$0xff] %v7377_v42  ;;  %v1503_v51 = vmax.f32 %v7377_v42, 0.0  ;;  %v2687_v42 = vld [vmem:[%s6601_s24 + $0xb0] sm:$0xff] }
 0x253   : > { %v1531_v6 = vmax.f32 %v1527_v56, %v1528_v31  ;;  %v7398_v17 = vsub.f32 %v1582_v55, %v7392_v53  ;;  %v7997_v62 = vand.u32 4294901760, %v2687_v42 }
 0x254   : > { %v1511_v57 = vadd.f32 1e-07, %v1503_v51 }
 0x255   : > { %11145 = vst [vmem:[#allocation23_spill] sm:$0xff] %v7997_v62 }
 0x256   : > { %v1526_v30 = vmul.f32 %v1517_v35, %v1511_v57 }
 0x258   : > { %v1530_v49 = vmax.f32 %v1522_v37, %v1526_v30 }
 0x25a   : > { %v1532_v22 = vmax.f32 %v1529_v58, %v1530_v49 }
 0x25c   : > { %v1533_v16 = vmax.f32 %v1531_v6, %v1532_v22 }
 0x25e   : > { %v1534_v50 = vrot.slane %v1533_v16, 4 }
 0x260   : > { %v1535_v19 = vmax.f32 %v1533_v16, %v1534_v50 }
 0x262   : > { %v1536_v15 = vrot.slane %v1535_v19, 2 }
 0x264   : > { %v1537_v61 = vmax.f32 %v1535_v19, %v1536_v15 }
 0x266   : > { %v1538_v26 = vrot.slane %v1537_v61, 1 }
 0x268   : > { %v1539_v4 = vmax.f32 %v1537_v61, %v1538_v26 }
 0x26a   : > { %v1543_v13 = vsub.f32 %v1522_v37, %v1539_v4  ;;  %v1547_v12 = vsub.f32 %v1526_v30, %v1539_v4  ;;  %v1546_v25 = vsub.f32 %v1525_v43, %v1539_v4  ;;  %v1545_v5 = vsub.f32 %v1524_v59, %v1539_v4 }
 0x26b   : > { %v1544_v9 = vsub.f32 %v1523_v44, %v1539_v4  ;;  %v1542_v29 = vsub.f32 %v1521_v33, %v1539_v4  ;;  %v1541_v21 = vsub.f32 %v1520_v7, %v1539_v4  ;;  %v1540_v39 = vsub.f32 %v1519_v63, %v1539_v4 }
 0x26c   : > { %v1554_v18 = vmul.f32 1.442695, %v1543_v13  ;;  %v1562_v1 = vmul.f32 1.442695, %v1547_v12  ;;  %v1560_v11 = vmul.f32 1.442695, %v1546_v25 }
 0x26d   : > { %v1558_v0 = vmul.f32 1.442695, %v1545_v5  ;;  %v1556_v45 = vmul.f32 1.442695, %v1544_v9  ;;  %v1552_v60 = vmul.f32 1.442695, %v1542_v29 }
 0x26e   : > { %6361 = vpow2.f32 %v1554_v18  ;;  %v1550_v40 = vmul.f32 1.442695, %v1541_v21  ;;  %v1548_v10 = vmul.f32 1.442695, %v1540_v39  ;;  %v7420_v30 = vand.u32 4294901760, %v7398_v17 }
 0x26f   : > { %6363 = vpow2.f32 %v1562_v1 }
 0x270   : > { %6365 = vpow2.f32 %v1560_v11  ;;  %v1632_v55 = vsub.f32 %v7398_v17, %v7420_v30 }
 0x271   : > { %6367 = vpow2.f32 %v1558_v0 }
 0x272   : > { %6369 = vpow2.f32 %v1556_v45 }
 0x273   : > { %6371 = vpow2.f32 %v1552_v60 }
 0x274   : > { %v7394_v52 = vpop.eup %6361  ;;  %6373 = vpow2.f32 %v1550_v40 }
 0x275   : > { %v6364_v20 = vpop.eup %6363  ;;  %v1567_v41 = vmul.f32 %v7394_v52, %v1507_v46  ;;  %6375 = vpow2.f32 %v1548_v10  ;;  %v1573_v46 = vld [vmem:[%s11126_s18 + $0x8] sm:$0xff] }
 0x276   : > { %v6366_v35 = vpop.eup %6365  ;;  %v1571_v44 = vmul.f32 %v6364_v20, %v1511_v57  ;;  %v7406_v33 = vand.u32 4294901760, %v6364_v20  ;;  %v1585_v19 = vsel %vm1580_vm9, %v1573_v46, 0 }
 0x277   : > { %v6368_v51 = vpop.eup %6367  ;;  %v1570_v63 = vmul.f32 %v6366_v35, %v7375_v38  ;;  %v7417_v38 = vand.u32 4294901760, %v1567_v41  ;;  %v7484_v1 = vand.u32 4294901760, %v1585_v19 }
 0x278   : > { %v7401_v7 = vpop.eup %6369  ;;  %v7403_v59 = vand.u32 4294901760, %v1571_v44  ;;  %v1569_v43 = vmul.f32 %v6368_v51, %v7371_v34  ;;  %v7454_v26 = vsub.f32 %v6364_v20, %v7406_v33  ;;  %v7475_v29 = vand.u32 4294901760, %v6368_v51 }
 0x279   : > { %v7411_v56 = vpop.eup %6371  ;;  %v7413_v37 = vand.u32 4294901760, %v1570_v63  ;;  %v1568_v57 = vmul.f32 %v7401_v7, %v7365_v8  ;;  %v7433_v8 = vand.u32 4294901760, %v6366_v35  ;;  %v7462_v13 = vsub.f32 %v1567_v41, %v7417_v38 }
 0x27a   : > { %v7422_v31 = vpop.eup %6373  ;;  %1614 = vmatpush.msra.mxu0 %v7403_v59  ;;  %1865 = vmatpush.msra.mxu3 %v7403_v59  ;;  %v7427_v34 = vsub.f32 %v1571_v44, %v7403_v59  ;;  %v7429_v58 = vand.u32 4294901760, %v1569_v43  ;;  %v1566_v49 = vmul.f32 %v7411_v56, %v7379_v47  ;;  %v10984_v39 = vand.u32 4294901760, %v7454_v26 }
 0x27b   : > { %v7435_v6 = vpop.eup %6375  ;;  %v7438_v22 = vsub.f32 %v1570_v63, %v7413_v37  ;;  %v7440_v16 = vand.u32 4294901760, %v1568_v57  ;;  %v1565_v50 = vmul.f32 %v7422_v31, %v7373_v48  ;;  %v7473_v9 = vsub.f32 %v6366_v35, %v7433_v8 }
 0x27c   : > { %1616 = vmatpush.msra.mxu0 %v7413_v37  ;;  %1793 = vmatpush.msra.mxu2 %v7427_v34  ;;  %v7448_v47 = vsub.f32 %v1569_v43, %v7429_v58  ;;  %v1704_v15 = vand.u32 4294901760, %v7427_v34  ;;  %v7451_v61 = vand.u32 4294901760, %v1566_v49  ;;  %v1564_v12 = vmul.f32 %v7435_v6, %v7369_v28 }
 0x27d   : > { %1867 = vmatpush.msra.mxu3 %v7413_v37  ;;  %v7458_v48 = vsub.f32 %v1568_v57, %v7440_v16  ;;  %v1710_v4 = vand.u32 4294901760, %v7438_v22  ;;  %v7481_v14 = vand.u32 4294901760, %v1565_v50  ;;  %v10985_v60 = vand.u32 4294901760, %v7462_v13 }
 0x27e   : > { %1618 = vmatpush.msra.mxu0 %v7429_v58  ;;  %1796 = vmatpush.msra.mxu2 %v7438_v22  ;;  %v1705_v25 = vsub.f32 %v7427_v34, %v1704_v15  ;;  %v10988_v5 = vand.u32 4294901760, %v7448_v47  ;;  %v7492_v0 = vsub.f32 %v1566_v49, %v7451_v61  ;;  %v7496_v45 = vand.u32 4294901760, %v1564_v12 }
 0x27f   : > { %1869 = vmatpush.msra.mxu3 %v7429_v58  ;;  %v1711_v28 = vsub.f32 %v7438_v22, %v1710_v4  ;;  %v10986_v18 = vand.u32 4294901760, %v7458_v48  ;;  %v10983_v20 = vand.u32 4294901760, %v7473_v9  ;;  %v7507_v41 = vsub.f32 %v6368_v51, %v7475_v29 }
 0x280   : > { %1620 = vmatpush.msra.mxu0 %v7440_v16  ;;  %1799 = vmatpush.msra.mxu2 %v7448_v47  ;;  %v1706_v11 = vand.u32 4294901760, %v1705_v25  ;;  %v1717_v21 = vsub.f32 %v7448_v47, %v10988_v5  ;;  %v7512_v35 = vsub.f32 %v1565_v50, %v7481_v14  ;;  %v7515_v44 = vand.u32 4294901760, %v7401_v7 }
 0x281   : > { %1871 = vmatpush.msra.mxu3 %v7440_v16  ;;  %v1712_v40 = vand.u32 4294901760, %v1711_v28  ;;  %v1723_v10 = vsub.f32 %v7458_v48, %v10986_v18  ;;  %v7518_v63 = vsub.f32 %v1585_v19, %v7484_v1  ;;  %v2159_v51 = vsub.f32 %v7454_v26, %v10984_v39 }
 0x282   : > { %1622 = vmatpush.msra.mxu0 %v7417_v38  ;;  %1707 = vmatpush.msra.mxu1 %v1706_v11  ;;  %v1718_v43 = vand.u32 4294901760, %v1717_v21  ;;  %v10987_v46 = vand.u32 4294901760, %v7492_v0  ;;  %v7526_v57 = vand.u32 4294901760, %v7394_v52  ;;  %v1729_v49 = vsub.f32 %v7462_v13, %v10985_v60 }
 0x283   : > { %1802 = vmatpush.msra.mxu2 %v7458_v48  ;;  %1873 = vmatpush.msra.mxu3 %v7417_v38  ;;  %v7534_v50 = vsub.f32 %v1564_v12, %v7496_v45  ;;  %v7538_v19 = vsub.f32 %v7401_v7, %v7515_v44  ;;  %v1724_v25 = vand.u32 4294901760, %v1723_v10  ;;  %v7541_v28 = vand.u32 4294901760, %v1632_v55  ;;  %v1574_v55 = vld [vmem:[%s11126_s18 + $0x10] sm:$0xff] }
 0x284   : > { %1624 = vmatpush.msra.mxu0 %v7451_v61  ;;  %1713 = vmatpush.msra.mxu1 %v1712_v40  ;;  %v2165_v11 = vsub.f32 %v7473_v9, %v10983_v20  ;;  %v10989_v21 = vand.u32 4294901760, %v7507_v41  ;;  %v1740_v12 = vand.u32 4294901760, %v7512_v35  ;;  %v7551_v7 = vand.u32 4294901760, %v7518_v63 }
 0x285   : > { %1805 = vmatpush.msra.mxu2 %v7462_v13  ;;  %1875 = vmatpush.msra.mxu3 %v7451_v61  ;;  %v7554_v40 = vand.u32 4294901760, %v7411_v56  ;;  %v2160_v10 = vand.u32 4294901760, %v2159_v51  ;;  %v10990_v20 = vand.u32 4294901760, %v7538_v19  ;;  %v7566_v39 = vsub.f32 %v7394_v52, %v7526_v57 }
 0x286   : > { %1626 = vmatpush.msra.mxu0 %v7481_v14  ;;  %1719 = vmatpush.msra.mxu1 %v1718_v43  ;;  %v1735_v43 = vsub.f32 %v7492_v0, %v10987_v46  ;;  %v1730_v60 = vand.u32 4294901760, %v1729_v49  ;;  %v10991_v18 = vand.u32 4294901760, %v7534_v50  ;;  %v2166_v51 = vand.u32 4294901760, %v2165_v11 }
 0x287   : > { %1808 = vmatpush.msra.mxu2 %v7492_v0  ;;  %1877 = vmatpush.msra.mxu3 %v7481_v14  ;;  %v2171_v46 = vsub.f32 %v7507_v41, %v10989_v21  ;;  %v7580_v52 = vsub.f32 %v7411_v56, %v7554_v40  ;;  %v1588_v5 = vsel %vm1580_vm9, %v1574_v55, 0  ;;  %v1741_v49 = vsub.f32 %v7512_v35, %v1740_v12 }
 0x288   : > { %1628 = vmatpush.msra.mxu0 %v7496_v45  ;;  %1725 = vmatpush.msra.mxu1 %v1724_v25  ;;  %v7572_v25 = vand.u32 4294901760, %v7422_v31  ;;  %v1640_v11 = vsub.f32 %v7518_v63, %v7551_v7  ;;  %v7593_v21 = vand.u32 4294901760, %v1588_v5  ;;  %v1736_v56 = vand.u32 4294901760, %v1735_v43 }
 0x289   : > { %1811 = vmatpush.msra.mxu2 %v7512_v35  ;;  %1879 = vmatpush.msra.mxu3 %v7496_v45  ;;  %v2177_v34 = vsub.f32 %v7538_v19, %v10990_v20  ;;  %v2172_v43 = vand.u32 4294901760, %v2171_v46  ;;  %v11127_v22 = vand.u32 4294901760, %v7448_v47  ;;  %v1575_v46 = vld [vmem:[%s11126_s18 + $0x18] sm:$0xff] }
 0x28a   : > { %1634 = vmatmul.f32.vlgmr.msra.gmra.mxu0 %v7541_v28  ;;  %1731 = vmatpush.msra.mxu1 %v1730_v60  ;;  %v1747_v60 = vsub.f32 %v7534_v50, %v10991_v18  ;;  %v7608_v55 = vsub.f32 %v7422_v31, %v7572_v25  ;;  %v7613_v20 = vsub.f32 %v1588_v5, %v7593_v21  ;;  %v7618_v18 = vand.u32 4294901760, %v1640_v11 }
 0x28b   : > { %2161 = vmatpush.msrb.mxu3 %v2160_v10  ;;  %1940 = vmatpush.msrb.mxu0 %v1704_v15  ;;  %v7591_v10 = vand.u32 4294901760, %v7435_v6  ;;  %v2182_v15 = vand.u32 4294901760, %v7566_v39  ;;  %v2178_v5 = vand.u32 4294901760, %v2177_v34 }
 0x28c   : > { %1814 = vmatpush.msra.mxu2 %v7534_v50  ;;  %1737 = vmatpush.msra.mxu1 %v1736_v56  ;;  %v1748_v11 = vand.u32 4294901760, %v1747_v60  ;;  %v7639_v34 = vand.u32 4294901760, %v7613_v20  ;;  %v11129_v60 = vand.u32 4294901760, %v7462_v13 }
 0x28d   : > { %2167 = vmatpush.msrb.mxu3 %v2166_v51  ;;  %1944 = vmatpush.msrb.mxu0 %v1710_v4  ;;  %v2188_v51 = vand.u32 4294901760, %v7580_v52  ;;  %v1742_v4 = vand.u32 4294901760, %v1741_v49  ;;  %v7622_v31 = vsub.f32 %v7435_v6, %v7591_v10  ;;  %v2183_v47 = vsub.f32 %v7566_v39, %v2182_v15 }
 0x28e   : > { %2068 = vmatpush.msrb.mxu2 %v7406_v33  ;;  %1883 = vmatmul.f32.vlgmr.msra.gmra.mxu3 %v7420_v30  ;;  %v11128_v49 = vand.u32 4294901760, %v7458_v48  ;;  %v2194_v6 = vand.u32 4294901760, %v7608_v55  ;;  %v1648_v13 = vsub.f32 %v7613_v20, %v7639_v34 }
 0x28f   : > { %1817 = vmatmul.f32.vlgmr.msra.gmra.mxu2 %v7398_v17  ;;  %1948 = vmatpush.msrb.mxu0 %v11127_v22  ;;  %v2189_v56 = vsub.f32 %v7580_v52, %v2188_v51  ;;  %v2200_v48 = vand.u32 4294901760, %v7622_v31  ;;  %v2184_v22 = vand.u32 4294901760, %v2183_v47  ;;  %v1576_v47 = vld [vmem:[%s11126_s18 + $0x20] sm:$0xff] }
 0x290   : > { %2070 = vmatpush.msrb.mxu2 %v7433_v8  ;;  %2173 = vmatpush.msrb.mxu3 %v2172_v43  ;;  %v1591_v43 = vsel %vm1580_vm9, %v1575_v46, 0 }
 0x291   : > { %1743 = vmatpush.msra.mxu1 %v1742_v4  ;;  %1952 = vmatpush.msrb.mxu0 %v11128_v49  ;;  %v2195_v4 = vsub.f32 %v7608_v55, %v2194_v6  ;;  %v7652_v46 = vand.u32 4294901760, %v1591_v43  ;;  %v2190_v49 = vand.u32 4294901760, %v2189_v56  ;;  %v1594_v56 = vsel %vm1580_vm9, %v1576_v47, 0 }
 0x292   : > { %2072 = vmatpush.msrb.mxu2 %v7475_v29  ;;  %2179 = vmatpush.msrb.mxu3 %v2178_v5  ;;  %v11130_v5 = vand.u32 4294901760, %v7492_v0  ;;  %v7686_v35 = vand.u32 4294901760, %v1594_v56 }
 0x293   : > { %1749 = vmatpush.msra.mxu1 %v1748_v11  ;;  %1642 = vmatmul.f32.gmra.mxu0 %v7618_v18  ;;  %v2196_v0 = vand.u32 4294901760, %v2195_v4  ;;  %v7675_v11 = vand.u32 4294901760, %v1648_v13 }
 0x294   : > { %1751 = vmatmul.f32.vlgmr.msra.gmra.mxu1 %v7392_v53  ;;  %1956 = vmatpush.msrb.mxu0 %v11129_v60  ;;  %v11131_v60 = vand.u32 4294901760, %v7534_v50  ;;  %v11132_v50 = vand.u32 4294901760, %v7454_v26 }
 0x295   : > { %2011 = vmatpush.msrb.mxu1 %v7403_v59  ;;  %2074 = vmatpush.msrb.mxu2 %v7515_v44  ;;  %v2201_v59 = vsub.f32 %v7622_v31, %v2200_v48 }
 0x296   : > { %2185 = vmatpush.msrb.mxu3 %v2184_v22  ;;  %1960 = vmatpush.msrb.mxu0 %v11130_v5 }
 0x297   : > { %2013 = vmatpush.msrb.mxu1 %v7413_v37  ;;  %2076 = vmatpush.msrb.mxu2 %v7526_v57  ;;  %v7671_v37 = vsub.f32 %v1591_v43, %v7652_v46  ;;  %v2202_v22 = vand.u32 4294901760, %v2201_v59  ;;  %v7703_v43 = vsub.f32 %v1594_v56, %v7686_v35 }
 0x298   : > { %2191 = vmatpush.msrb.mxu3 %v2190_v49  ;;  %1822 = vmatmul.f32.gmra.mxu2 %v7518_v63  ;;  %v11135_v49 = vand.u32 4294901760, %v7538_v19 }
 0x299   : > { %1889 = vmatmul.f32.gmra.mxu3 %v7551_v7  ;;  %1964 = vmatpush.msrb.mxu0 %v1740_v12 }
 0x29a   : > { %2015 = vmatpush.msrb.mxu1 %v7429_v58  ;;  %2078 = vmatpush.msrb.mxu2 %v7554_v40  ;;  %v7684_v58 = vand.u32 4294901760, %v7671_v37 }
 0x29b   : > { %2197 = vmatpush.msrb.mxu3 %v2196_v0  ;;  %1968 = vmatpush.msrb.mxu0 %v11131_v60 }
 0x29c   : > { %2017 = vmatpush.msrb.mxu1 %v7440_v16  ;;  %2080 = vmatpush.msrb.mxu2 %v7572_v25  ;;  %v1577_v16 = vld [vmem:[%s11126_s18 + $0x28] sm:$0xff]  ;;  %v1656_v12 = vsub.f32 %v7671_v37, %v7684_v58 }
 0x29d   : > { %2203 = vmatpush.msrb.mxu3 %v2202_v22  ;;  %2247 = vmatpush.msra.mxu0 %v7454_v26  ;;  %v1597_v4 = vsel %vm1580_vm9, %v1577_v16, 0 }
 0x29e   : > { %1650 = vmatmul.f32.gmra.mxu0 %v7675_v11  ;;  %1755 = vmatmul.f32.gmra.mxu1 %v7484_v1  ;;  %v7715_v26 = vand.u32 4294901760, %v1656_v12  ;;  %v7720_v5 = vand.u32 4294901760, %v1597_v4 }
 0x29f   : > { %2465 = vmatpush.msra.mxu3 %v7406_v33  ;;  %2082 = vmatpush.msrb.mxu2 %v7591_v10 }
 0x2a0   : > { %2019 = vmatpush.msrb.mxu1 %v7417_v38  ;;  %2250 = vmatpush.msra.mxu0 %v7473_v9  ;;  %v11133_v38 = vand.u32 4294901760, %v7473_v9  ;;  %v11134_v9 = vand.u32 4294901760, %v7507_v41 }
 0x2a1   : > { %2394 = vmatpush.msra.mxu2 %v11132_v50  ;;  %2467 = vmatpush.msra.mxu3 %v7433_v8 }
 0x2a2   : > { %2021 = vmatpush.msrb.mxu1 %v7451_v61  ;;  %2253 = vmatpush.msra.mxu0 %v7507_v41  ;;  %v7718_v61 = vand.u32 4294901760, %v7703_v43 }
 0x2a3   : > { %2398 = vmatpush.msra.mxu2 %v11133_v38  ;;  %2469 = vmatpush.msra.mxu3 %v7475_v29 }
 0x2a4   : > { %1827 = vmatmul.f32.gmra.mxu2 %v7613_v20  ;;  %1895 = vmatmul.f32.gmra.mxu3 %v7639_v34  ;;  %v1664_v41 = vsub.f32 %v7703_v43, %v7718_v61 }
 0x2a5   : > { %2023 = vmatpush.msrb.mxu1 %v7481_v14  ;;  %2256 = vmatpush.msra.mxu0 %v7538_v19  ;;  %v1578_v14 = vld [vmem:[%s11126_s18 + $0x30] sm:$0xff] }
 0x2a6   : > { %2402 = vmatpush.msra.mxu2 %v11134_v9  ;;  %2471 = vmatpush.msra.mxu3 %v7515_v44  ;;  %v1600_v13 = vsel %vm1580_vm9, %v1578_v14, 0 }
 0x2a7   : > { %2025 = vmatpush.msrb.mxu1 %v7496_v45  ;;  %2259 = vmatpush.msra.mxu0 %v7566_v39  ;;  %v7738_v45 = vsub.f32 %v1597_v4, %v7720_v5  ;;  %v7754_v59 = vand.u32 4294901760, %v1600_v13 }
 0x2a8   : > { %2406 = vmatpush.msra.mxu2 %v11135_v49  ;;  %2473 = vmatpush.msra.mxu3 %v7526_v57 }
 0x2a9   : > { %2319 = vmatpush.msra.mxu1 %v7406_v33  ;;  %1658 = vmatmul.f32.gmra.mxu0 %v7715_v26  ;;  %v1665_v33 = vand.u32 4294901760, %v1664_v41  ;;  %v7752_v19 = vand.u32 4294901760, %v7738_v45  ;;  %v7770_v39 = vsub.f32 %v1600_v13, %v7754_v59  ;;  %v2695_v13 = vld [vmem:[%s6601_s24 + $0xf0] sm:$0xff] }
 0x2aa   : > { %1759 = vmatmul.f32.gmra.mxu1 %v7593_v21  ;;  %2262 = vmatpush.msra.mxu0 %v7580_v52 }
 0x2ab   : > { %2321 = vmatpush.msra.mxu1 %v7433_v8  ;;  %2410 = vmatpush.msra.mxu2 %v2182_v15  ;;  %v1579_v8 = vld [vmem:[%s11126_s18 + $0x38] sm:$0xff]  ;;  %v7779_v15 = vand.u32 4294901760, %v7770_v39 }
 0x2ac   : > { %2475 = vmatpush.msra.mxu3 %v7554_v40  ;;  %2265 = vmatpush.msra.mxu0 %v7608_v55  ;;  %v1603_v52 = vsel %vm1580_vm9, %v1579_v8, 0 }
 0x2ad   : > { %2323 = vmatpush.msra.mxu1 %v7475_v29  ;;  %2414 = vmatpush.msra.mxu2 %v2188_v51  ;;  %v1672_v29 = vsub.f32 %v7738_v45, %v7752_v19  ;;  %v7781_v55 = vand.u32 4294901760, %v1603_v52 }
 0x2ae   : > { %2477 = vmatpush.msra.mxu3 %v7572_v25  ;;  %1832 = vmatmul.f32.gmra.mxu2 %v7671_v37 }
 0x2af   : > { %1901 = vmatmul.f32.gmra.mxu3 %v7684_v58  ;;  %2268 = vmatpush.msra.mxu0 %v7622_v31 }
 0x2b0   : > { %2325 = vmatpush.msra.mxu1 %v7515_v44  ;;  %2418 = vmatpush.msra.mxu2 %v2194_v6  ;;  %v1673_v44 = vand.u32 4294901760, %v1672_v29 }
 0x2b1   : > { %2479 = vmatpush.msra.mxu3 %v7591_v10  ;;  %1666 = vmatmul.f32.gmra.mxu0 %v1665_v33 }
 0x2b2   : > { %2327 = vmatpush.msra.mxu1 %v7526_v57  ;;  %2422 = vmatpush.msra.mxu2 %v2200_v48  ;;  %v1680_v57 = vsub.f32 %v7770_v39, %v7779_v15 }
 0x2b3   : > { %1763 = vmatmul.f32.gmra.mxu1 %v7652_v46 }
 0x2b4   : > { %2329 = vmatpush.msra.mxu1 %v7554_v40  ;;  %v7790_v40 = vsub.f32 %v1603_v52, %v7781_v55  ;;  %v1681_v51 = vand.u32 4294901760, %v1680_v57 }
 0x2b6   : > { %2331 = vmatpush.msra.mxu1 %v7572_v25  ;;  %1837 = vmatmul.f32.gmra.mxu2 %v7703_v43  ;;  %v7794_v31 = vand.u32 4294901760, %v7790_v40 }
 0x2b7   : > { %1907 = vmatmul.f32.gmra.mxu3 %v7718_v61 }
 0x2b8   : > { %2333 = vmatpush.msra.mxu1 %v7591_v10  ;;  %v1688_v25 = vsub.f32 %v7790_v40, %v7794_v31 }
 0x2b9   : > { %1674 = vmatmul.f32.gmra.mxu0 %v1673_v44 }
 0x2ba   : > { %v1689_v10 = vand.u32 4294901760, %v1688_v25 }
 0x2bb   : > { %1767 = vmatmul.f32.gmra.mxu1 %v7686_v35 }
 0x2be   : > { %1842 = vmatmul.f32.gmra.mxu2 %v7738_v45 }
 0x2bf   : > { %1913 = vmatmul.f32.gmra.mxu3 %v7752_v19 }
 0x2c1   : > { %1682 = vmatmul.f32.gmra.mxu0 %v1681_v51 }
 0x2c3   : > { %1771 = vmatmul.f32.gmra.mxu1 %v7720_v5 }
 0x2c6   : > { %1847 = vmatmul.f32.gmra.mxu2 %v7770_v39 }
 0x2c7   : > { %1919 = vmatmul.f32.gmra.mxu3 %v7779_v15 }
 0x2c9   : > { %1690 = vmatmul.f32.gmra.mxu0 %v1689_v10 }
 0x2cb   : > { %1775 = vmatmul.f32.gmra.mxu1 %v7754_v59 }
 0x2ce   : > { %1852 = vmatmul.f32.gmra.mxu2 %v7790_v40 }
 0x2cf   : > { %1925 = vmatmul.f32.gmra.mxu3 %v7794_v31 }
 0x2d1   : > { %1970 = vmatmul.f32.vlgmr.msrb.gmra.mxu0 %v7392_v53 }
 0x2d3   : > { %1779 = vmatmul.f32.gmra.mxu1 %v7781_v55 }
 0x2d6   : > { %2088 = vmatmul.f32.vlgmr.msrb.gmra.mxu2 %v7541_v28 }
 0x2d7   : > { %2205 = vmatmul.f32.vlgmr.msrb.gmra.mxu3 %v7392_v53 }
 0x2d9   : > { %1974 = vmatmul.f32.gmra.mxu0 %v7484_v1 }
 0x2db   : > { %2027 = vmatmul.f32.vlgmr.msrb.gmra.mxu1 %v7392_v53 }
 0x2de   : > { %2096 = vmatmul.f32.gmra.mxu2 %v7618_v18 }
 0x2df   : > { %2209 = vmatmul.f32.gmra.mxu3 %v7484_v1 }
 0x2e1   : > { %1978 = vmatmul.f32.gmra.mxu0 %v7593_v21 }
 0x2e3   : > { %2031 = vmatmul.f32.gmra.mxu1 %v7484_v1 }
 0x2e6   : > { %2104 = vmatmul.f32.gmra.mxu2 %v7675_v11 }
 0x2e7   : > { %2213 = vmatmul.f32.gmra.mxu3 %v7593_v21 }
 0x2e9   : > { %1982 = vmatmul.f32.gmra.mxu0 %v7652_v46 }
 0x2eb   : > { %2035 = vmatmul.f32.gmra.mxu1 %v7593_v21 }
 0x2ee   : > { %2112 = vmatmul.f32.gmra.mxu2 %v7715_v26 }
 0x2ef   : > { %2217 = vmatmul.f32.gmra.mxu3 %v7652_v46 }
 0x2f1   : > { %1986 = vmatmul.f32.gmra.mxu0 %v7686_v35 }
 0x2f3   : > { %2039 = vmatmul.f32.gmra.mxu1 %v7652_v46 }
 0x2f6   : > { %2120 = vmatmul.f32.gmra.mxu2 %v1665_v33  ;;  %v7942_v33 = vand.u32 4294901760, %v2695_v13 }
 0x2f7   : > { %2221 = vmatmul.f32.gmra.mxu3 %v7686_v35 }
 0x2f8   : > { %2704 = vmatpush.msrb.mxu0 %v7942_v33  ;;  %3019 = vmatpush.msrb.mxu3 %v7942_v33 }
 0x2f9   : > { %1990 = vmatmul.f32.gmra.mxu0 %v7720_v5 }
 0x2fb   : > { %2043 = vmatmul.f32.gmra.mxu1 %v7686_v35 }
 0x2fe   : > { %2128 = vmatmul.f32.gmra.mxu2 %v1673_v44  ;;  %v2693_v44 = vld [vmem:[%s6601_s24 + $0xe0] sm:$0xff] }
 0x2ff   : > { %2225 = vmatmul.f32.gmra.mxu3 %v7720_v5 }
 0x301   : > { %1994 = vmatmul.f32.gmra.mxu0 %v7754_v59 }
 0x303   : > { %2047 = vmatmul.f32.gmra.mxu1 %v7720_v5 }
 0x306   : > { %2136 = vmatmul.f32.gmra.mxu2 %v1681_v51 }
 0x307   : > { %2229 = vmatmul.f32.gmra.mxu3 %v7754_v59  ;;  %v7831_v18 = vpop.f32.mrf.mxu0 }
 0x309   : > { %1998 = vmatmul.f32.gmra.mxu0 %v7781_v55 }
 0x30b   : > { %2051 = vmatmul.f32.gmra.mxu1 %v7754_v59 }
 0x30e   : > { %2144 = vmatmul.f32.gmra.mxu2 %v1689_v10 }
 0x30f   : > { %2233 = vmatmul.f32.gmra.mxu3 %v7781_v55 }
 0x310   : > { %v7837_v28 = vpop.f32.mrf.mxu0 }
 0x311   : > { %2271 = vmatmul.f32.vlgmr.msra.gmra.mxu0 %v7398_v17  ;;  %v7840_v6 = vpop.f32.mrf.mxu1  ;;  %v7844_v47 = vpop.f32.mrf.mxu3 }
 0x312   : > { %v7842_v48 = vpop.f32.mrf.mxu2 }
 0x313   : > { %2055 = vmatmul.f32.gmra.mxu1 %v7781_v55 }
 0x316   : > { %2424 = vmatmul.f32.vlgmr.msra.gmra.mxu2 %v7392_v53 }
 0x317   : > { %2481 = vmatmul.f32.vlgmr.msra.gmra.mxu3 %v7392_v53 }
 0x319   : > { %2276 = vmatmul.f32.gmra.mxu0 %v7518_v63 }
 0x31b   : > { %2337 = vmatmul.f32.vlgmr.msra.gmra.mxu1 %v7420_v30  ;;  %v7850_v0 = vpop.f32.mrf.mxu0  ;;  %v7852_v17 = vpop.f32.mrf.mxu1 }
 0x31c   : > { %v7854_v11 = vpop.f32.mrf.mxu2  ;;  %v7857_v56 = vpop.f32.mrf.mxu3 }
 0x31e   : > { %2428 = vmatmul.f32.gmra.mxu2 %v7484_v1 }
 0x31f   : > { %2485 = vmatmul.f32.gmra.mxu3 %v7484_v1 }
 0x321   : > { %2281 = vmatmul.f32.gmra.mxu0 %v7613_v20 }
 0x323   : > { %2343 = vmatmul.f32.gmra.mxu1 %v7551_v7 }
 0x326   : > { %2432 = vmatmul.f32.gmra.mxu2 %v7593_v21  ;;  %v7863_v53 = vpop.f32.mrf.mxu0 }
 0x327   : > { %v7865_v30 = vpop.f32.mrf.mxu1  ;;  %2489 = vmatmul.f32.gmra.mxu3 %v7593_v21  ;;  %v7868_v63 = vpop.f32.mrf.mxu2 }
 0x328   : > { %v7870_v60 = vpop.f32.mrf.mxu3 }
 0x329   : > { %2286 = vmatmul.f32.gmra.mxu0 %v7671_v37 }
 0x32b   : > { %2349 = vmatmul.f32.gmra.mxu1 %v7639_v34 }
 0x32e   : > { %2436 = vmatmul.f32.gmra.mxu2 %v7652_v46  ;;  %v7875_v1 = vpop.f32.mrf.mxu0 }
 0x32f   : > { %2493 = vmatmul.f32.gmra.mxu3 %v7652_v46 }
 0x330   : > { %v7878_v20 = vpop.f32.mrf.mxu1 }
 0x331   : > { %v7880_v7 = vpop.f32.mrf.mxu2  ;;  %2291 = vmatmul.f32.gmra.mxu0 %v7703_v43 }
 0x332   : > { %v7883_v21 = vpop.f32.mrf.mxu3 }
 0x333   : > { %2355 = vmatmul.f32.gmra.mxu1 %v7684_v58 }
 0x336   : > { %2440 = vmatmul.f32.gmra.mxu2 %v7686_v35  ;;  %v7887_v37 = vpop.f32.mrf.mxu0 }
 0x337   : > { %2497 = vmatmul.f32.gmra.mxu3 %v7686_v35 }
 0x338   : > { %v7890_v34 = vpop.f32.mrf.mxu1 }
 0x339   : > { %v7892_v22 = vpop.f32.mrf.mxu2  ;;  %2296 = vmatmul.f32.gmra.mxu0 %v7738_v45 }
 0x33a   : > { %v7895_v46 = vpop.f32.mrf.mxu3 }
 0x33b   : > { %2361 = vmatmul.f32.gmra.mxu1 %v7718_v61 }
 0x33e   : > { %2444 = vmatmul.f32.gmra.mxu2 %v7720_v5  ;;  %v7899_v16 = vpop.f32.mrf.mxu0 }
 0x33f   : > { %2501 = vmatmul.f32.gmra.mxu3 %v7720_v5 }
 0x340   : > { %v7902_v58 = vpop.f32.mrf.mxu1 }
 0x341   : > { %v7904_v50 = vpop.f32.mrf.mxu2  ;;  %2301 = vmatmul.f32.gmra.mxu0 %v7770_v39 }
 0x342   : > { %v7907_v35 = vpop.f32.mrf.mxu3 }
 0x343   : > { %2367 = vmatmul.f32.gmra.mxu1 %v7752_v19 }
 0x346   : > { %2448 = vmatmul.f32.gmra.mxu2 %v7754_v59  ;;  %v7911_v12 = vpop.f32.mrf.mxu0 }
 0x347   : > { %2505 = vmatmul.f32.gmra.mxu3 %v7754_v59  ;;  %v7947_v59 = vsub.f32 %v2695_v13, %v7942_v33 }
 0x348   : > { %v7914_v43 = vpop.f32.mrf.mxu1 }
 0x349   : > { %v7916_v4 = vpop.f32.mrf.mxu2  ;;  %2306 = vmatmul.f32.gmra.mxu0 %v7790_v40  ;;  %2931 = vmatpush.msrb.mxu2 %v7947_v59  ;;  %v10992_v52 = vand.u32 4294901760, %v7947_v59 }
 0x34a   : > { %v7919_v38 = vpop.f32.mrf.mxu3 }
 0x34b   : > { %11136 = vst [vmem:[#allocation14_spill] sm:$0xff] %v7919_v38  ;;  %2373 = vmatmul.f32.gmra.mxu1 %v7779_v15  ;;  %v2691_v15 = vld [vmem:[%s6601_s24 + $0xd0] sm:$0xff]  ;;  %v2803_v40 = vsub.f32 %v7947_v59, %v10992_v52 }
 0x34c   : > { %v7963_v57 = vand.u32 4294901760, %v2691_v15 }
 0x34d   : > { %v2804_v25 = vand.u32 4294901760, %v2803_v40 }
 0x34e   : > { %2452 = vmatmul.f32.gmra.mxu2 %v7781_v55  ;;  %v7923_v26 = vpop.f32.mrf.mxu0  ;;  %v7976_v10 = vsub.f32 %v2691_v15, %v7963_v57 }
 0x34f   : > { %11137 = vst [vmem:[#allocation15_spill] sm:$0xff] %v7923_v26  ;;  %2509 = vmatmul.f32.gmra.mxu3 %v7781_v55  ;;  %v7961_v55 = vand.u32 4294901760, %v2693_v44  ;;  %2805 = vmatpush.msrb.mxu1 %v2804_v25 }
 0x350   : > { %v7926_v61 = vpop.f32.mrf.mxu1  ;;  %v11005_v40 = vand.u32 4294901760, %v7976_v10 }
 0x351   : > { %v7928_v5 = vpop.f32.mrf.mxu2  ;;  %2706 = vmatpush.msrb.mxu0 %v7961_v55  ;;  %3021 = vmatpush.msrb.mxu3 %v7961_v55 }
 0x352   : > { %v7930_v9 = vpop.f32.mrf.mxu3  ;;  %v2815_v25 = vsub.f32 %v7976_v10, %v11005_v40 }
 0x353   : > { %11138 = vst [vmem:[#allocation16_spill] sm:$0xff] %v7930_v9  ;;  %2379 = vmatmul.f32.gmra.mxu1 %v7794_v31  ;;  %v7971_v31 = vsub.f32 %v2693_v44, %v7961_v55  ;;  %2708 = vmatpush.msrb.mxu0 %v7963_v57 }
 0x354   : > { %3023 = vmatpush.msrb.mxu3 %v7963_v57  ;;  %v2816_v54 = vand.u32 4294901760, %v2815_v25 }
 0x355   : > { %2934 = vmatpush.msrb.mxu2 %v7971_v31  ;;  %v11002_v52 = vand.u32 4294901760, %v7971_v31  ;;  %2710 = vmatpush.msrb.mxu0 %v7995_v32 }
 0x356   : > { %v7933_v14 = vpop.f32.mrf.mxu0  ;;  %3025 = vmatpush.msrb.mxu3 %v7995_v32 }
 0x357   : > { %11139 = vst [vmem:[#allocation17_spill] sm:$0xff] %v7933_v14  ;;  %v2809_v15 = vsub.f32 %v7971_v31, %v11002_v52  ;;  %2937 = vmatpush.msrb.mxu2 %v7976_v10  ;;  %v8005_v52 = vsub.f32 %v2689_v2, %v7995_v32  ;;  %2712 = vmatpush.msrb.mxu0 %v7997_v62  ;;  %v2671_v14 = vld [vmem:[%s6601_s24 + $0x30] sm:$0xff] }
 0x358   : > { %v7935_v49 = vpop.f32.mrf.mxu1  ;;  %3027 = vmatpush.msrb.mxu3 %v7997_v62 }
 0x359   : > { %11140 = vst [vmem:[#allocation18_spill] sm:$0xff] %v7935_v49  ;;  %v7937_v41 = vpop.f32.mrf.mxu2  ;;  %v2810_v36 = vand.u32 4294901760, %v2809_v15  ;;  %v8010_v15 = vsub.f32 %v2687_v42, %v7997_v62  ;;  %2940 = vmatpush.msrb.mxu2 %v8005_v52  ;;  %v11007_v40 = vand.u32 4294901760, %v8005_v52 }
 0x35a   : > { %v7939_v45 = vpop.f32.mrf.mxu3 }
 0x35b   : > { %2811 = vmatpush.msrb.mxu1 %v2810_v36  ;;  %v2821_v42 = vsub.f32 %v8005_v52, %v11007_v40  ;;  %2943 = vmatpush.msrb.mxu2 %v8010_v15  ;;  %v11008_v25 = vand.u32 4294901760, %v8010_v15 }
 0x35d   : > { %2817 = vmatpush.msrb.mxu1 %v2816_v54  ;;  %v2827_v54 = vsub.f32 %v8010_v15, %v11008_v25 }
 0x35e   : > { %v7944_v19 = vpop.f32.mrf.mxu0 }
 0x35f   : > { %11141 = vst [vmem:[#allocation19_spill] sm:$0xff] %v7944_v19 }
 0x360   : > { %v7951_v8 = vpop.f32.mrf.mxu1 }
 0x361   : > { %11142 = vst [vmem:[#allocation20_spill] sm:$0xff] %v7951_v8  ;;  %v7954_v29 = vpop.f32.mrf.mxu2 }
 0x362   : > { %v7956_v39 = vpop.f32.mrf.mxu3 }
 0x366   : > { %v7968_v51 = vpop.f32.mrf.mxu0 }
 0x367   : > { %11143 = vst [vmem:[#allocation21_spill] sm:$0xff] %v7968_v51 }
 0x368   : > { %v7978_v13 = vpop.f32.mrf.mxu1 }
 0x369   : > { %11144 = vst [vmem:[#allocation22_spill] sm:$0xff] %v7978_v13  ;;  %v7983_v44 = vpop.f32.mrf.mxu2  ;;  %v8029_v13 = vand.u32 4294901760, %v2685_v3 }
 0x36a   : > { %v7986_v23 = vpop.f32.mrf.mxu3 }
 0x36b   : > { %11150 = vst [vmem:[#allocation28_spill] sm:$0xff] %v8029_v13  ;;  %v8039_v40 = vsub.f32 %v2685_v3, %v8029_v13  ;;  %2714 = vmatpush.msrb.mxu0 %v8029_v13  ;;  %3029 = vmatpush.msrb.mxu3 %v8029_v13 }
 0x36d   : > { %2946 = vmatpush.msrb.mxu2 %v8039_v40  ;;  %v11010_v25 = vand.u32 4294901760, %v8039_v40 }
 0x36e   : > { %v8002_v27 = vpop.f32.mrf.mxu0 }
 0x36f   : > { %11146 = vst [vmem:[#allocation24_spill] sm:$0xff] %v8002_v27  ;;  %v2822_v27 = vand.u32 4294901760, %v2821_v42 }
 0x370   : > { %v8012_v24 = vpop.f32.mrf.mxu1 }
 0x371   : > { %11147 = vst [vmem:[#allocation25_spill] sm:$0xff] %v8012_v24  ;;  %v8017_v2 = vpop.f32.mrf.mxu2  ;;  %v2683_v24 = vld [vmem:[%s6601_s24 + $0x90] sm:$0xff]  ;;  %2823 = vmatpush.msrb.mxu1 %v2822_v27 }
 0x372   : > { %11148 = vst [vmem:[#allocation26_spill] sm:$0xff] %v8017_v2  ;;  %v8020_v36 = vpop.f32.mrf.mxu3  ;;  %v8031_v8 = vand.u32 4294901760, %v2683_v24  ;;  %v2828_v2 = vand.u32 4294901760, %v2827_v54 }
 0x373   : > { %11149 = vst [vmem:[#allocation27_spill] sm:$0xff] %v8020_v36 }
 0x374   : > { %11151 = vst [vmem:[#allocation29_spill] sm:$0xff] %v8031_v8  ;;  %v8044_v42 = vsub.f32 %v2683_v24, %v8031_v8  ;;  %2716 = vmatpush.msrb.mxu0 %v8031_v8  ;;  %2829 = vmatpush.msrb.mxu1 %v2828_v2  ;;  %v2833_v24 = vsub.f32 %v8039_v40, %v11010_v25 }
 0x375   : > { %3031 = vmatpush.msrb.mxu3 %v8031_v8 }
 0x376   : > { %v8036_v36 = vpop.f32.mrf.mxu0  ;;  %2949 = vmatpush.msrb.mxu2 %v8044_v42  ;;  %v11012_v54 = vand.u32 4294901760, %v8044_v42 }
 0x377   : > { %11152 = vst [vmem:[#allocation30_spill] sm:$0xff] %v8036_v36  ;;  %v2834_v36 = vand.u32 4294901760, %v2833_v24 }
 0x378   : > { %v8046_v51 = vpop.f32.mrf.mxu1  ;;  %v2839_v2 = vsub.f32 %v8044_v42, %v11012_v54 }
 0x379   : > { %11153 = vst [vmem:[#allocation31_spill] sm:$0xff] %v8046_v51  ;;  %v8051_v27 = vpop.f32.mrf.mxu2  ;;  %v2681_v51 = vld [vmem:[%s6601_s24 + $0x80] sm:$0xff]  ;;  %2835 = vmatpush.msrb.mxu1 %v2834_v36  ;;  %v2679_v36 = vld [vmem:[%s6601_s24 + $0x70] sm:$0xff] }
 0x37a   : > { %11154 = vst [vmem:[#allocation32_spill] sm:$0xff] %v8051_v27  ;;  %v8054_v3 = vpop.f32.mrf.mxu3  ;;  %v8062_v13 = vand.u32 4294901760, %v2681_v51  ;;  %v2840_v25 = vand.u32 4294901760, %v2839_v2  ;;  %v8086_v19 = vand.u32 4294901760, %v2679_v36 }
 0x37b   : > { %11155 = vst [vmem:[#allocation33_spill] sm:$0xff] %v8054_v3 }
 0x37c   : > { %11156 = vst [vmem:[#allocation34_spill] sm:$0xff] %v8062_v13  ;;  %v8070_v3 = vsub.f32 %v2681_v51, %v8062_v13  ;;  %2718 = vmatpush.msrb.mxu0 %v8062_v13  ;;  %3033 = vmatpush.msrb.mxu3 %v8062_v13  ;;  %v2677_v13 = vld [vmem:[%s6601_s24 + $0x60] sm:$0xff] }
 0x37d   : > { %2841 = vmatpush.msrb.mxu1 %v2840_v25  ;;  %11164 = vst [vmem:[#allocation42_spill] sm:$0xff] %v8086_v19  ;;  %v8099_v25 = vand.u32 4294901760, %v2677_v13 }
 0x37e   : > { %v8067_v27 = vpop.f32.mrf.mxu0  ;;  %11158 = vst [vmem:[#allocation36_spill] sm:$0xff] %v8070_v3  ;;  %2952 = vmatpush.msrb.mxu2 %v8070_v3  ;;  %v11016_v49 = vand.u32 4294901760, %v8070_v3  ;;  %2720 = vmatpush.msrb.mxu0 %v8086_v19 }
 0x37f   : > { %11157 = vst [vmem:[#allocation35_spill] sm:$0xff] %v8067_v27  ;;  %3035 = vmatpush.msrb.mxu3 %v8086_v19 }
 0x380   : > { %v8074_v8 = vpop.f32.mrf.mxu1  ;;  %11168 = vst [vmem:[#allocation46_spill] sm:$0xff] %v8099_v25  ;;  %2722 = vmatpush.msrb.mxu0 %v8099_v25 }
 0x381   : > { %11159 = vst [vmem:[#allocation37_spill] sm:$0xff] %v8074_v8  ;;  %v8077_v24 = vpop.f32.mrf.mxu2  ;;  %3037 = vmatpush.msrb.mxu3 %v8099_v25 }
 0x382   : > { %11160 = vst [vmem:[#allocation38_spill] sm:$0xff] %v8077_v24  ;;  %v8079_v54 = vpop.f32.mrf.mxu3  ;;  %v8095_v24 = vsub.f32 %v2679_v36, %v8086_v19  ;;  %v2673_v19 = vld [vmem:[%s6601_s24 + $0x40] sm:$0xff] }
 0x383   : > { %11161 = vst [vmem:[#allocation39_spill] sm:$0xff] %v8079_v54 }
 0x384   : > { %11167 = vst [vmem:[#allocation45_spill] sm:$0xff] %v8095_v24  ;;  %2955 = vmatpush.msrb.mxu2 %v8095_v24 }
 0x386   : > { %v8081_v27 = vpop.f32.mrf.mxu0 }
 0x387   : > { %11162 = vst [vmem:[#allocation40_spill] sm:$0xff] %v8081_v27  ;;  %v8108_v27 = vsub.f32 %v2677_v13, %v8099_v25  ;;  %v8125_v25 = vand.u32 4294901760, %v2673_v19 }
 0x388   : > { %v8084_v51 = vpop.f32.mrf.mxu1 }
 0x389   : > { %11163 = vst [vmem:[#allocation41_spill] sm:$0xff] %v8084_v51  ;;  %v8088_v2 = vpop.f32.mrf.mxu2  ;;  %v2675_v51 = vld [vmem:[%s6601_s24 + $0x50] sm:$0xff]  ;;  %2958 = vmatpush.msrb.mxu2 %v8108_v27 }
 0x38a   : > { %11165 = vst [vmem:[#allocation43_spill] sm:$0xff] %v8088_v2  ;;  %v8091_v8 = vpop.f32.mrf.mxu3  ;;  %v2845_v2 = vsub.f32 %v8070_v3, %v11016_v49  ;;  %v8111_v36 = vand.u32 4294901760, %v2675_v51  ;;  %v11022_v3 = vand.u32 4294901760, %v8108_v27 }
 0x38b   : > { %11166 = vst [vmem:[#allocation44_spill] sm:$0xff] %v8091_v8  ;;  %v11019_v8 = vand.u32 4294901760, %v8095_v24 }
 0x38c   : > { %11169 = vst [vmem:[#allocation47_spill] sm:$0xff] %v8108_v27  ;;  %v2846_v62 = vand.u32 4294901760, %v2845_v2  ;;  %v8121_v13 = vsub.f32 %v2675_v51, %v8111_v36  ;;  %2724 = vmatpush.msrb.mxu0 %v8111_v36  ;;  %3039 = vmatpush.msrb.mxu3 %v8111_v36 }
 0x38d   : > { %11170 = vst [vmem:[#allocation48_spill] sm:$0xff] %v8111_v36  ;;  %v2851_v49 = vsub.f32 %v8095_v24, %v11019_v8  ;;  %v2857_v8 = vsub.f32 %v8108_v27, %v11022_v3  ;;  %v8135_v24 = vand.u32 4294901760, %v2671_v14  ;;  %v8140_v36 = vsub.f32 %v2673_v19, %v8125_v25 }
 0x38e   : > { %v2272_v54 = vpop.f32.mrf.mxu0  ;;  %11171 = vst [vmem:[#allocation49_spill] sm:$0xff] %v8121_v13  ;;  %2847 = vmatpush.msrb.mxu1 %v2846_v62  ;;  %2961 = vmatpush.msrb.mxu2 %v8121_v13  ;;  %v11025_v51 = vand.u32 4294901760, %v8121_v13  ;;  %v2669_v62 = vld [vmem:[%s6601_s24 + $0x20] sm:$0xff] }
 0x38f   : > { %11172 = vst [vmem:[#allocation50_spill] sm:$0xff] %v8125_v25  ;;  %v2852_v9 = vand.u32 4294901760, %v2851_v49  ;;  %2726 = vmatpush.msrb.mxu0 %v8125_v25  ;;  %3041 = vmatpush.msrb.mxu3 %v8125_v25  ;;  %v2858_v3 = vand.u32 4294901760, %v2857_v8  ;;  %v8151_v27 = vsub.f32 %v2671_v14, %v8135_v24  ;;  %v11028_v19 = vand.u32 4294901760, %v8140_v36  ;;  %v2667_v25 = vld [vmem:[%s6601_s24 + $0x10] sm:$0xff] }
 0x390   : > { %v8128_v2 = vpop.f32.mrf.mxu1  ;;  %11174 = vst [vmem:[#allocation52_spill] sm:$0xff] %v8135_v24  ;;  %2964 = vmatpush.msrb.mxu2 %v8140_v36  ;;  %v8164_v14 = vand.u32 4294901760, %v2667_v25 }
 0x391   : > { %11173 = vst [vmem:[#allocation51_spill] sm:$0xff] %v8128_v2  ;;  %v8137_v26 = vpop.f32.mrf.mxu2  ;;  %2853 = vmatpush.msrb.mxu1 %v2852_v9  ;;  %v2863_v2 = vsub.f32 %v8121_v13, %v11025_v51  ;;  %2728 = vmatpush.msrb.mxu0 %v8135_v24  ;;  %v11030_v8 = vand.u32 4294901760, %v8151_v27  ;;  %v2869_v13 = vsub.f32 %v8140_v36, %v11028_v19 }
 0x392   : > { %11175 = vst [vmem:[#allocation53_spill] sm:$0xff] %v8137_v26  ;;  %v8145_v49 = vpop.f32.mrf.mxu3  ;;  %v8153_v26 = vand.u32 4294901760, %v2669_v62  ;;  %3043 = vmatpush.msrb.mxu3 %v8135_v24  ;;  %2967 = vmatpush.msrb.mxu2 %v8151_v27 }
 0x393   : > { %11176 = vst [vmem:[#allocation54_spill] sm:$0xff] %v8140_v36  ;;  %2859 = vmatpush.msrb.mxu1 %v2858_v3  ;;  %v2864_v9 = vand.u32 4294901760, %v2863_v2  ;;  %v2665_v3 = vld [vmem:[%s6601_s24] sm:$0xff]  ;;  %v2870_v36 = vand.u32 4294901760, %v2869_v13 }
 0x394   : > { %11177 = vst [vmem:[#allocation55_spill] sm:$0xff] %v8145_v49  ;;  %v8162_v51 = vsub.f32 %v2669_v62, %v8153_v26  ;;  %v2207_v49 = vadd.f32 %v7939_v45, %v7937_v41  ;;  %2730 = vmatpush.msrb.mxu0 %v8153_v26  ;;  %v2875_v62 = vsub.f32 %v8151_v27, %v11030_v8  ;;  %v8182_v45 = vand.u32 4294901760, %v2665_v3 }
 0x395   : > { %11178 = vst [vmem:[#allocation56_spill] sm:$0xff] %v8151_v27  ;;  %2865 = vmatpush.msrb.mxu1 %v2864_v9  ;;  %3045 = vmatpush.msrb.mxu3 %v8153_v26  ;;  %v8180_v41 = vsub.f32 %v2667_v25, %v8164_v14 }
 0x396   : > { %11179 = vst [vmem:[#allocation57_spill] sm:$0xff] %v8153_v26  ;;  %v2277_v2 = vpop.f32.mrf.mxu0  ;;  %v11033_v24 = vand.u32 4294901760, %v8162_v51  ;;  %v2273_v19 = vadd.f32 %v2272_v54, %v2207_v49  ;;  %2970 = vmatpush.msrb.mxu2 %v8162_v51  ;;  %2732 = vmatpush.msrb.mxu0 %v8164_v14  ;;  %v2876_v38 = vand.u32 4294901760, %v2875_v62  ;;  %v8191_v26 = vsub.f32 %v2665_v3, %v8182_v45 }
 0x397   : > { %11180 = vst [vmem:[#allocation58_spill] sm:$0xff] %v8164_v14  ;;  %v11034_v27 = vand.u32 4294901760, %v8180_v41  ;;  %3047 = vmatpush.msrb.mxu3 %v8164_v14  ;;  %2871 = vmatpush.msrb.mxu1 %v2870_v36 }
 0x398   : > { %11181 = vst [vmem:[#allocation59_spill] sm:$0xff] %v8182_v45  ;;  %v2338_v9 = vpop.f32.mrf.mxu1  ;;  %v2881_v8 = vsub.f32 %v8162_v51, %v11033_v24  ;;  %2973 = vmatpush.msrb.mxu2 %v8180_v41  ;;  %v2892_v24 = vand.u32 4294901760, %v8191_v26  ;;  %2734 = vmatpush.msrb.mxu0 %v8182_v45 }
 0x399   : > { %v2339_v25 = vadd.f32 %v2338_v9, %v2273_v19  ;;  %v2425_v54 = vpop.f32.mrf.mxu2  ;;  %v2887_v62 = vsub.f32 %v8180_v41, %v11034_v27  ;;  %3049 = vmatpush.msrb.mxu3 %v8182_v45  ;;  %2877 = vmatpush.msrb.mxu1 %v2876_v38  ;;  %v2211_v27 = vadd.f32 %v7956_v39, %v7954_v29  ;;  %v11183_v38 = vand.u32 4294901760, %v7971_v31 }
 0x39a   : > { %v2482_v13 = vpop.f32.mrf.mxu3  ;;  %v2882_v49 = vand.u32 4294901760, %v2881_v8  ;;  %2976 = vmatpush.msrb.mxu2 %v8191_v26  ;;  %v2893_v36 = vsub.f32 %v8191_v26, %v2892_v24  ;;  %v11182_v8 = vand.u32 4294901760, %v7947_v59  ;;  %v1761_v59 = vadd.f32 %v7865_v30, %v7850_v0 }
 0x39b   : > { %v2426_v3 = vadd.f32 %v2425_v54, %v2339_v25  ;;  %v2888_v19 = vand.u32 4294901760, %v2887_v62  ;;  %v1753_v25 = vadd.f32 %v7840_v6, %v7831_v18  ;;  %v1757_v54 = vadd.f32 %v7852_v17, %v7837_v28  ;;  %v11192_v62 = vld [vmem:[#allocation17_spill] sm:$0xff] }
 0x39c   : > { %3102 = vmatpush.msra.mxu0 %v11182_v8  ;;  %2883 = vmatpush.msrb.mxu1 %v2882_v49  ;;  %v2894_v45 = vand.u32 4294901760, %v2893_v36  ;;  %v1765_v29 = vadd.f32 %v7878_v20, %v7863_v53  ;;  %v1769_v39 = vadd.f32 %v7890_v34, %v7875_v1  ;;  %v2278_v31 = vadd.f32 %v2277_v2, %v2211_v27  ;;  %v11190_v27 = vld [vmem:[#allocation15_spill] sm:$0xff] }
 0x39d   : > { %v8207_v9 = vadd.f32 %v2482_v13, %v2426_v3  ;;  %v11184_v18 = vand.u32 4294901760, %v7976_v10  ;;  %v1773_v28 = vadd.f32 %v7902_v58, %v7887_v37  ;;  %v1777_v6 = vadd.f32 %v7914_v43, %v7899_v16  ;;  %v11244_v26 = vld [vmem:[#allocation57_spill] sm:$0xff] }
 0x39e   : > { %v2282_v14 = vpop.f32.mrf.mxu0  ;;  %3106 = vmatpush.msra.mxu0 %v11183_v38  ;;  %2889 = vmatpush.msrb.mxu1 %v2888_v19  ;;  %v1781_v17 = vadd.f32 %v7926_v61, %v7911_v12  ;;  %v11185_v1 = vand.u32 4294901760, %v8005_v52  ;;  %v1819_v20 = vadd.f32 %v7842_v48, %v1753_v25  ;;  %v1824_v37 = vadd.f32 %v7854_v11, %v1757_v54  ;;  %v11197_v25 = vld [vmem:[#allocation19_spill] sm:$0xff] }
 0x39f   : > { %v8220_v13 = vmax.f32 %v8207_v9, 1e-30  ;;  %v1829_v34 = vadd.f32 %v7868_v63, %v1761_v59  ;;  %v1834_v16 = vadd.f32 %v7880_v7, %v1765_v29  ;;  %v1839_v58 = vadd.f32 %v7892_v22, %v1769_v39  ;;  %v11198_v39 = vld [vmem:[#allocation21_spill] sm:$0xff] }
 0x3a0   : > { %v2344_v49 = vpop.f32.mrf.mxu1  ;;  %3110 = vmatpush.msra.mxu0 %v11184_v18  ;;  %2895 = vmatpush.msrb.mxu1 %v2894_v45  ;;  %v11186_v12 = vand.u32 4294901760, %v8010_v15  ;;  %v1844_v61 = vadd.f32 %v7904_v50, %v1773_v28  ;;  %v2215_v48 = vadd.f32 %v7986_v23, %v7983_v44  ;;  %v1854_v11 = vadd.f32 %v7928_v5, %v1781_v17  ;;  %v11199_v28 = vld [vmem:[#allocation28_spill] sm:$0xff] }
 0x3a1   : > { %6377 = vrcp.f32 %v8220_v13  ;;  %v2429_v0 = vpop.f32.mrf.mxu2  ;;  %v2345_v53 = vadd.f32 %v2344_v49, %v2278_v31  ;;  %v11187_v22 = vand.u32 4294901760, %v8039_v40  ;;  %v1891_v50 = vadd.f32 %v7857_v56, %v1824_v37  ;;  %v11189_v56 = vld [vmem:[#allocation14_spill] sm:$0xff]  ;;  %v11202_v17 = vld [vmem:[#allocation20_spill] sm:$0xff] }
 0x3a2   : > { %v2486_v30 = vpop.f32.mrf.mxu3  ;;  %3197 = vmatpush.msra.mxu1 %v7942_v33  ;;  %3114 = vmatpush.msra.mxu0 %v11185_v1  ;;  %v1849_v33 = vadd.f32 %v7916_v4, %v1777_v6  ;;  %v1897_v4 = vadd.f32 %v7870_v60, %v1829_v34  ;;  %v2283_v10 = vadd.f32 %v2282_v14, %v2215_v48  ;;  %v11188_v40 = vand.u32 4294901760, %v8044_v42  ;;  %v11194_v42 = vld [vmem:[#allocation36_spill] sm:$0xff]  ;;  %v11200_v6 = vld [vmem:[#allocation45_spill] sm:$0xff] }
 0x3a3   : > { %v2430_v43 = vadd.f32 %v2429_v0, %v2345_v53  ;;  %v1903_v23 = vadd.f32 %v7883_v21, %v1834_v16  ;;  %v1909_v5 = vadd.f32 %v7895_v46, %v1839_v58  ;;  %v11191_v46 = vld [vmem:[#allocation16_spill] sm:$0xff]  ;;  %v1976_v3 = vadd.f32 %v11192_v62, %v1891_v50  ;;  %v11205_v16 = vld [vmem:[#allocation25_spill] sm:$0xff]  ;;  %v11211_v50 = vld [vmem:[#allocation30_spill] sm:$0xff] }
 0x3a4   : > { %3199 = vmatpush.msra.mxu1 %v7961_v55  ;;  %3118 = vmatpush.msra.mxu0 %v11186_v12  ;;  %v1885_v55 = vadd.f32 %v7844_v47, %v1819_v20  ;;  %v1915_v47 = vadd.f32 %v7907_v35, %v1844_v61  ;;  %v1921_v60 = vadd.f32 %v11189_v56, %v1849_v33  ;;  %v11195_v8 = vand.u32 4294901760, %v11194_v42  ;;  %v11196_v35 = vld [vmem:[#allocation18_spill] sm:$0xff]  ;;  %v11204_v20 = vld [vmem:[#allocation24_spill] sm:$0xff]  ;;  %v11207_v12 = vld [vmem:[#allocation27_spill] sm:$0xff] }
 0x3a5   : > { %v8251_v63 = vadd.f32 %v2486_v30, %v2430_v43  ;;  %v1927_v45 = vadd.f32 %v11191_v46, %v1854_v11  ;;  %v1980_v54 = vadd.f32 %v11197_v25, %v1897_v4  ;;  %v2540_v59 = vand.u32 2147483648, %v8220_v13  ;;  %v11203_v30 = vld [vmem:[#allocation22_spill] sm:$0xff]  ;;  %v11208_v11 = vld [vmem:[#allocation29_spill] sm:$0xff] }
 0x3a6   : > { %v8253_v7 = vpop.f32.mrf.mxu0  ;;  %3201 = vmatpush.msra.mxu1 %v7963_v57  ;;  %3122 = vmatpush.msra.mxu0 %v11187_v22  ;;  %v1972_v14 = vadd.f32 %v11190_v27, %v1885_v55  ;;  %v1984_v31 = vadd.f32 %v11198_v39, %v1903_v23  ;;  %v2538_v18 = vand.u32 2147483647, %v8220_v13  ;;  %v11201_v0 = vand.u32 4294901760, %v11200_v6  ;;  %v11206_v43 = vld [vmem:[#allocation26_spill] sm:$0xff]  ;;  %v11209_v22 = vld [vmem:[#allocation47_spill] sm:$0xff]  ;;  %v11219_v42 = vld [vmem:[#allocation37_spill] sm:$0xff] }
 0x3a7   : > { %v6378_v52 = vpop.eup %6377  ;;  %v8265_v15 = vmax.f32 %v8251_v63, 1e-30  ;;  %v8288_v53 = vadd.f32 %v11202_v17, %v1976_v3  ;;  %v8291_v1 = vadd.f32 %v11203_v30, %v1980_v54  ;;  %v1988_v37 = vadd.f32 %v11204_v20, %v1909_v5  ;;  %v11215_v27 = vld [vmem:[#allocation35_spill] sm:$0xff]  ;;  %v11216_v46 = vld [vmem:[#allocation34_spill] sm:$0xff]  ;;  %v11228_v20 = vld [vmem:[#allocation56_spill] sm:$0xff] }
 0x3a8   : > { %v2530_v44 = vmul.f32 %v6378_v52, %v8220_v13  ;;  %v2350_v57 = vpop.f32.mrf.mxu1  ;;  %3203 = vmatpush.msra.mxu1 %v7995_v32  ;;  %3126 = vmatpush.msra.mxu0 %v11188_v40  ;;  %v11193_v32 = vld [vmem:[#allocation23_spill] sm:$0xff]  ;;  %v2029_v38 = vadd.f32 %v11196_v35, %v1972_v14  ;;  %vm2535_vm10 = vweird.f32 %v6378_v52  ;;  %v8297_v58 = vadd.f32 %v11205_v16, %v1984_v31  ;;  %v11213_v40 = vld [vmem:[#allocation32_spill] sm:$0xff]  ;;  %v11227_v30 = vld [vmem:[#allocation46_spill] sm:$0xff] }
 0x3a9   : > { %v2351_v21 = vadd.f32 %v2350_v57, %v2283_v10  ;;  %v2433_v2 = vpop.f32.mrf.mxu2  ;;  %6379 = vrcp.f32 %v8265_v15  ;;  %v2219_v61 = vadd.f32 %v11207_v12, %v11206_v43  ;;  %vm2534_vm11 = vweird.f32 %v8220_v13  ;;  %v11212_v10 = vld [vmem:[#allocation31_spill] sm:$0xff]  ;;  %v11214_v13 = vld [vmem:[#allocation33_spill] sm:$0xff]  ;;  %v11225_v31 = vld [vmem:[#allocation40_spill] sm:$0xff] }
 0x3aa   : > { %v2531_v19 = vsub.f32 1.0, %v2530_v44  ;;  %v2490_v36 = vpop.f32.mrf.mxu3  ;;  %3205 = vmatpush.msra.mxu1 %v11193_v32  ;;  %3130 = vmatpush.msra.mxu0 %v11195_v8  ;;  %v11210_v55 = vand.u32 4294901760, %v11209_v22  ;;  %v1992_v4 = vadd.f32 %v11211_v50, %v1915_v47  ;;  %v8307_v23 = vadd.f32 %v11212_v10, %v1988_v37  ;;  %vm2536_vm12 = vmor %vm2534_vm11, %vm2535_vm10  ;;  %v11217_v47 = vld [vmem:[#allocation49_spill] sm:$0xff]  ;;  %v11230_v16 = vld [vmem:[#allocation7_spill] sm:$0xff] }
 0x3ab   : > { %v2434_v29 = vadd.f32 %v2433_v2, %v2351_v21  ;;  %v2541_v5 = vor.u32 1.1754944e-38, %v2540_v59  ;;  %v2223_v56 = vadd.f32 %v11214_v13, %v11213_v40  ;;  %v1996_v14 = vadd.f32 %v11215_v27, %v1921_v60  ;;  %v11220_v60 = vld [vmem:[#allocation38_spill] sm:$0xff]  ;;  %v11231_v12 = vld [vmem:[#allocation43_spill] sm:$0xff] }
 0x3ac   : > { %v2532_v49 = vmul.f32 %v6378_v52, %v2531_v19  ;;  %3207 = vmatpush.msra.mxu1 %v11199_v28  ;;  %3134 = vmatpush.msra.mxu0 %v11201_v0  ;;  %vm2539_vm13 = vcmp.eq.f32.partialorder %v2538_v18, 8.507059e+37  ;;  %v11218_v62 = vand.u32 4294901760, %v11217_v47  ;;  %v8323_v8 = vadd.f32 %v11219_v42, %v1992_v4  ;;  %v11222_v59 = vld [vmem:[#allocation42_spill] sm:$0xff]  ;;  %v11226_v28 = vld [vmem:[#allocation41_spill] sm:$0xff]  ;;  %v11235_v50 = vld [vmem:[#allocation55_spill] sm:$0xff] }
 0x3ad   : > { %v8294_v34 = vadd.f32 %v2490_v36, %v2434_v29  ;;  %v2288_v36 = vadd.f32 %v8253_v7, %v2219_v61  ;;  %v11223_v29 = vld [vmem:[#allocation54_spill] sm:$0xff]  ;;  %vm2513_vm14 = vcmp.gt.f32.partialorder %v8207_v9, 0.0  ;;  %v8335_v6 = vadd.f32 %v11226_v28, %v1996_v14  ;;  %v11232_v61 = vld [vmem:[#allocation44_spill] sm:$0xff]  ;;  %v11245_v28 = vld [vmem:[#allocation9_spill] sm:$0xff] }
 0x3ae   : > { %v2533_v33 = vadd.f32 %v6378_v52, %v2532_v49  ;;  %v2292_v48 = vpop.f32.mrf.mxu0  ;;  %3209 = vmatpush.msra.mxu1 %v11208_v11  ;;  %3138 = vmatpush.msra.mxu0 %v11210_v55  ;;  %v11224_v39 = vand.u32 4294901760, %v11223_v29  ;;  %v2000_v49 = vadd.f32 %v11225_v31, %v1927_v45  ;;  %v2553_v17 = vand.u32 2147483647, %v8265_v15  ;;  %v11233_v11 = vld [vmem:[#allocation51_spill] sm:$0xff]  ;;  %v11234_v55 = vld [vmem:[#allocation53_spill] sm:$0xff]  ;;  %v11243_v29 = vld [vmem:[#allocation52_spill] sm:$0xff] }
 0x3af   : > { %v8311_v44 = vmax.f32 %v8294_v34, 1e-30  ;;  %v6380_v57 = vpop.eup %6379  ;;  %v11229_v37 = vand.u32 4294901760, %v11228_v20  ;;  %v8352_v4 = vadd.f32 %v11235_v50, %v11234_v55  ;;  %vm2514_vm0 = vcmp.gt.f32.partialorder %v8251_v63, 0.0  ;;  %v11246_v63 = vld [vmem:[#allocation58_spill] sm:$0xff] }
 0x3b0   : > { %v2537_v21 = vsel %vm2536_vm12, %v6378_v52, %v2533_v33  ;;  %v2356_v2 = vpop.f32.mrf.mxu1  ;;  %3211 = vmatpush.msra.mxu1 %v11216_v46  ;;  %3142 = vmatpush.msra.mxu0 %v11218_v62  ;;  %v2545_v19 = vmul.f32 %v6380_v57, %v8265_v15  ;;  %v11221_v52 = vld [vmem:[#allocation39_spill] sm:$0xff]  ;;  %vm2550_vm15 = vweird.f32 %v6380_v57  ;;  %v8345_v33 = vadd.f32 %v11232_v61, %v11231_v12 }
 0x3b1   : > { %v2542_v3 = vsel %vm2539_vm13, %v2541_v5, %v2537_v21  ;;  %6381 = vrcp.f32 %v8311_v44  ;;  %v2437_v32 = vpop.f32.mrf.mxu2  ;;  %v8327_v35 = vadd.f32 %v11221_v52, %v11220_v60  ;;  %v2357_v18 = vadd.f32 %v2356_v2, %v2288_v36  ;;  %v11236_v5 = vld [vmem:[#allocation48_spill] sm:$0xff] }
 0x3b2   : > { %v2543_v25 = vmul.f32 %v2542_v3, %v2029_v38  ;;  %v2494_v54 = vpop.f32.mrf.mxu3  ;;  %3213 = vmatpush.msra.mxu1 %v11222_v59  ;;  %3146 = vmatpush.msra.mxu0 %v11224_v39  ;;  %v2546_v7 = vsub.f32 1.0, %v2545_v19  ;;  %v2555_v38 = vand.u32 2147483648, %v8265_v15  ;;  %v8348_v22 = vadd.f32 %v11233_v11, %v2000_v49  ;;  %v2696_v3 = vld [vmem:[%s6601_s24 + $0xf8] sm:$0xff]  ;;  %v11240_v19 = vld [vmem:[#allocation50_spill] sm:$0xff]  ;;  %v8388_v59 = vld [vmem:[%s6601_s24 + $0xe8] sm:$0xff] }
 0x3b3   : > { %v2438_v9 = vadd.f32 %v2437_v32, %v2357_v18  ;;  %v11237_v40 = vand.u32 4294901760, %v8162_v51  ;;  %vm2549_vm1 = vweird.f32 %v8265_v15  ;;  %vm2554_vm3 = vcmp.eq.f32.partialorder %v2553_v17, 8.507059e+37  ;;  %v11247_v11 = vld [vmem:[#allocation59_spill] sm:$0xff] }
 0x3b4   : > { %v2649_v0 = vsel %vm2513_vm14, %v2543_v25, 0.0  ;;  %3215 = vmatpush.msra.mxu1 %v11227_v30  ;;  %3150 = vmatpush.msra.mxu0 %v11229_v37  ;;  %v2547_v45 = vmul.f32 %v6380_v57, %v2546_v7  ;;  %vm8365_vm2 = vmor %vm2549_vm1, %vm2550_vm15  ;;  %v2556_v46 = vor.u32 1.1754944e-38, %v2555_v38  ;;  %v2293_v51 = vadd.f32 %v2292_v48, %v2223_v56 }
 0x3b5   : > { %v2657_v43 = vadd.f32 %v2649_v0, %v11230_v16  ;;  %v8363_v21 = vadd.f32 %v2494_v54, %v2438_v9  ;;  %v11241_v36 = vand.u32 4294901760, %v8180_v41  ;;  %v2570_v42 = vand.u32 2147483648, %v8311_v44 }
 0x3b6   : > { %v2297_v10 = vpop.f32.mrf.mxu0  ;;  %3217 = vmatpush.msra.mxu1 %v11236_v5  ;;  %3154 = vmatpush.msra.mxu0 %v11237_v40  ;;  %v2548_v14 = vadd.f32 %v6380_v57, %v2547_v45  ;;  %v8385_v41 = vand.u32 4294901760, %v2696_v3  ;;  %vm2515_vm4 = vcmp.gt.f32.partialorder %v8294_v34, 0.0  ;;  %v2568_v39 = vand.u32 2147483647, %v8311_v44 }
 0x3b7   : > { %v8358_v13 = vpop.eup %6381  ;;  %v8360_v27 = vand.u32 4294901760, %v2657_v43  ;;  %v8382_v60 = vmax.f32 %v8363_v21, 1e-30  ;;  %vm2564_vm6 = vweird.f32 %v8311_v44  ;;  %v8412_v18 = vand.u32 4294901760, %v8388_v59 }
 0x3b8   : > { %v2560_v47 = vmul.f32 %v8358_v13, %v8311_v44  ;;  %v2362_v62 = vpop.f32.mrf.mxu1  ;;  %3219 = vmatpush.msra.mxu1 %v11240_v19  ;;  %3158 = vmatpush.msra.mxu0 %v11241_v36  ;;  %v2552_v32 = vsel %vm8365_vm2, %v6380_v57, %v2548_v14  ;;  %vm2565_vm5 = vweird.f32 %v8358_v13  ;;  %v2571_v38 = vor.u32 1.1754944e-38, %v2570_v42 }
 0x3b9   : > { %v8376_v15 = vsub.f32 %v2657_v43, %v8360_v27  ;;  %2897 = vmatmul.f32.vlgmr.msrb.gmra.mxu1 %v8360_v27  ;;  %v2441_v48 = vpop.f32.mrf.mxu2  ;;  %v2557_v56 = vsel %vm2554_vm3, %v2556_v46, %v2552_v32  ;;  %v2363_v25 = vadd.f32 %v2362_v62, %v2293_v51  ;;  %6383 = vrcp.f32 %v8382_v60  ;;  %3262 = vmatpush.msra.mxu2 %v8385_v41  ;;  %vm2566_vm7 = vmor %vm2564_vm6, %vm2565_vm5  ;;  %v2692_v51 = vld [vmem:[%s6601_s24 + $0xd8] sm:$0xff] }
 0x3ba   : > { %v2561_v52 = vsub.f32 1.0, %v2560_v47  ;;  %v2498_v54 = vpop.f32.mrf.mxu3  ;;  %3221 = vmatpush.msra.mxu1 %v11243_v29  ;;  %3162 = vmatpush.msra.mxu0 %v2892_v24  ;;  %v2558_v57 = vmul.f32 %v2557_v56, %v8288_v53  ;;  %v8409_v53 = vsub.f32 %v2696_v3, %v8385_v41  ;;  %v2583_v44 = vand.u32 2147483647, %v8382_v60  ;;  %v11251_v32 = vld [vmem:[#allocation11_spill] sm:$0xff] }
 0x3bb   : > { %11242 = vst [vmem:[#allocation14_spill] sm:$0xff] %v8376_v15  ;;  %2979 = vmatmul.f32.vlgmr.msrb.gmra.mxu2 %v8376_v15  ;;  %v2442_v49 = vadd.f32 %v2441_v48, %v2363_v25  ;;  %v8401_v7 = vand.u32 4294901760, %v8376_v15  ;;  %v2298_v37 = vadd.f32 %v2297_v10, %v8327_v35  ;;  %vm2569_vm8 = vcmp.eq.f32.partialorder %v2568_v39, 8.507059e+37 }
 0x3bc   : > { %v2562_v31 = vmul.f32 %v8358_v13, %v2561_v52  ;;  %3223 = vmatpush.msra.mxu1 %v11244_v26  ;;  %v2650_v24 = vsel %vm2514_vm0, %v2558_v57, 0.0  ;;  %v11044_v43 = vand.u32 4294901760, %v8409_v53  ;;  %3264 = vmatpush.msra.mxu2 %v8412_v18  ;;  %vm2579_vm9 = vweird.f32 %v8382_v60  ;;  %v2690_v52 = vld [vmem:[%s6601_s24 + $0xc8] sm:$0xff] }
 0x3bd   : > { %v2658_v0 = vadd.f32 %v2650_v24, %v11245_v28  ;;  %v8416_v30 = vadd.f32 %v2498_v54, %v2442_v49  ;;  %3053 = vmatmul.f32.vlgmr.msrb.gmra.mxu3 %v8401_v7  ;;  %v2738_v16 = vsub.f32 %v8376_v15, %v8401_v7  ;;  %vm8450_vm11 = vcmp.eq.f32.partialorder %v2583_v44, 8.507059e+37 }
 0x3be   : > { %v2563_v17 = vadd.f32 %v8358_v13, %v2562_v31  ;;  %v2302_v20 = vpop.f32.mrf.mxu0  ;;  %3225 = vmatpush.msra.mxu1 %v11246_v63  ;;  %v3361_v5 = vsub.f32 %v8409_v53, %v11044_v43  ;;  %v2585_v47 = vand.u32 2147483648, %v8382_v60  ;;  %vm2516_vm12 = vcmp.gt.f32.partialorder %v8363_v21, 0.0 }
 0x3bf   : > { %v8428_v45 = vand.u32 4294901760, %v2658_v0  ;;  %v8432_v12 = vmax.f32 %v8416_v30, 1e-30  ;;  %v8435_v55 = vpop.eup %6383  ;;  %v8437_v10 = vand.u32 4294901760, %v2738_v16  ;;  %v8470_v34 = vsub.f32 %v8388_v59, %v8412_v18 }
 0x3c0   : > { %v2567_v9 = vsel %vm2566_vm7, %v8358_v13, %v2563_v17  ;;  %v2368_v61 = vpop.f32.mrf.mxu1  ;;  %3227 = vmatpush.msra.mxu1 %v11247_v11  ;;  %v2575_v14 = vmul.f32 %v8435_v55, %v8382_v60  ;;  %vm2580_vm10 = vweird.f32 %v8435_v55  ;;  %v8480_v57 = vand.u32 4294901760, %v2692_v51 }
 0x3c1   : > { %v2572_v35 = vsel %vm2569_vm8, %v2571_v38, %v2567_v9  ;;  %v2369_v50 = vadd.f32 %v2368_v61, %v2298_v37  ;;  %v2445_v40 = vpop.f32.mrf.mxu2  ;;  %6385 = vrcp.f32 %v8432_v12  ;;  %2901 = vmatmul.f32.gmra.mxu1 %v8428_v45  ;;  %2740 = vmatmul.f32.vlgmr.msrb.gmra.mxu0 %v8437_v10  ;;  %v8461_v36 = vsub.f32 %v2658_v0, %v8428_v45  ;;  %vm2581_vm13 = vmor %vm2579_vm9, %vm2580_vm10 }
 0x3c2   : > { %3577 = vmatpush.msrb.mxu1 %v8385_v41  ;;  %v2573_v13 = vmul.f32 %v2572_v35, %v8291_v1  ;;  %v2502_v2 = vpop.f32.mrf.mxu3  ;;  %v3362_v1 = vand.u32 4294901760, %v3361_v5  ;;  %v2576_v3 = vsub.f32 1.0, %v2575_v14  ;;  %3489 = vmatpush.msrb.mxu0 %v8409_v53  ;;  %v2598_v48 = vand.u32 2147483647, %v8432_v12 }
 0x3c3   : > { %v2446_v19 = vadd.f32 %v2445_v40, %v2369_v50  ;;  %11250 = vst [vmem:[#allocation15_spill] sm:$0xff] %v8461_v36  ;;  %v2600_v56 = vand.u32 2147483648, %v8432_v12  ;;  %2984 = vmatmul.f32.gmra.mxu2 %v8461_v36  ;;  %v8478_v29 = vand.u32 4294901760, %v8461_v36  ;;  %v2586_v31 = vor.u32 1.1754944e-38, %v2585_v47  ;;  %v2688_v50 = vld [vmem:[%s6601_s24 + $0xb8] sm:$0xff] }
 0x3c4   : > { %3579 = vmatpush.msrb.mxu1 %v8412_v18  ;;  %v2651_v62 = vsel %vm2515_vm4, %v2573_v13, 0.0  ;;  %3363 = vmatpush.msra.mxu3 %v3362_v1  ;;  %v2577_v25 = vmul.f32 %v8435_v55, %v2576_v3  ;;  %v2303_v49 = vadd.f32 %v2302_v20, %v8345_v33  ;;  %v11043_v59 = vand.u32 4294901760, %v8470_v34 }
 0x3c5   : > { %v2659_v42 = vadd.f32 %v2651_v62, %v11251_v32  ;;  %v8475_v54 = vadd.f32 %v2502_v2, %v2446_v19  ;;  %3492 = vmatpush.msrb.mxu0 %v8470_v34  ;;  %3059 = vmatmul.f32.gmra.mxu3 %v8478_v29  ;;  %v2746_v33 = vsub.f32 %v8461_v36, %v8478_v29  ;;  %v8497_v38 = vand.u32 4294901760, %v2690_v52  ;;  %v11255_v19 = vld [vmem:[#allocation12_spill] sm:$0xff] }
 0x3c6   : > { %v2578_v24 = vadd.f32 %v8435_v55, %v2577_v25  ;;  %3266 = vmatpush.msra.mxu2 %v8480_v57  ;;  %v2307_v0 = vpop.f32.mrf.mxu0  ;;  %vm2594_vm14 = vweird.f32 %v8432_v12  ;;  %v3367_v63 = vsub.f32 %v8470_v34, %v11043_v59  ;;  %3581 = vmatpush.msrb.mxu1 %v8480_v57  ;;  %vm8511_vm15 = vcmp.eq.f32.partialorder %v2598_v48, 8.507059e+37  ;;  %v2672_v59 = vld [vmem:[%s6601_s24 + $0x38] sm:$0xff] }
 0x3c7   : > { %v8482_v39 = vand.u32 4294901760, %v2659_v42  ;;  %v8487_v26 = vpop.eup %6385  ;;  %v8491_v28 = vmax.f32 %v8475_v54, 1e-30  ;;  %v2601_v60 = vor.u32 1.1754944e-38, %v2600_v56  ;;  %vm2517_vm0 = vcmp.gt.f32.partialorder %v8416_v30, 0.0 }
 0x3c8   : > { %v2374_v17 = vpop.f32.mrf.mxu1  ;;  %v2590_v20 = vmul.f32 %v8487_v26, %v8432_v12  ;;  %v2582_v37 = vsel %vm2581_vm13, %v8435_v55, %v2578_v24  ;;  %3268 = vmatpush.msra.mxu2 %v8497_v38  ;;  %v3368_v35 = vand.u32 4294901760, %v3367_v63  ;;  %v2308_v55 = vadd.f32 %v2307_v0, %v8352_v4  ;;  %3583 = vmatpush.msrb.mxu1 %v8497_v38 }
 0x3c9   : > { %v2375_v44 = vadd.f32 %v2374_v17, %v2303_v49  ;;  %6387 = vrcp.f32 %v8491_v28  ;;  %2905 = vmatmul.f32.gmra.mxu1 %v8482_v39  ;;  %v2449_v9 = vpop.f32.mrf.mxu2  ;;  %v2587_v61 = vsel %vm8450_vm11, %v2586_v31, %v2582_v37  ;;  %vm2595_vm1 = vweird.f32 %v8487_v26 }
 0x3ca   : > { %v2591_v11 = vsub.f32 1.0, %v2590_v20  ;;  %v2588_v5 = vmul.f32 %v2587_v61, %v8297_v58  ;;  %v8526_v40 = vand.u32 4294901760, %v2746_v33  ;;  %v8529_v13 = vsub.f32 %v2692_v51, %v8480_v57  ;;  %v2506_v14 = vpop.f32.mrf.mxu3  ;;  %3369 = vmatpush.msra.mxu3 %v3368_v35  ;;  %v8537_v58 = vld [vmem:[%s6601_s24 + $0xa8] sm:$0xff]  ;;  %vm2596_vm2 = vmor %vm2594_vm14, %vm2595_vm1 }
 0x3cb   : > { %v2613_v46 = vand.u32 2147483647, %v8491_v28  ;;  %v2450_v4 = vadd.f32 %v2449_v9, %v2375_v44  ;;  %v8534_v47 = vsub.f32 %v2659_v42, %v8482_v39  ;;  %v8544_v62 = vsub.f32 %v2690_v52, %v8497_v38 }
 0x3cc   : > { %v2592_v2 = vmul.f32 %v8487_v26, %v2591_v11  ;;  %v2652_v1 = vsel %vm2516_vm12, %v2588_v5, 0.0  ;;  %2748 = vmatmul.f32.gmra.mxu0 %v8526_v40  ;;  %v11041_v51 = vand.u32 4294901760, %v8529_v13  ;;  %v8546_v3 = vand.u32 4294901760, %v2688_v50  ;;  %v2684_v5 = vld [vmem:[%s6601_s24 + $0x98] sm:$0xff] }
 0x3cd   : > { %11254 = vst [vmem:[#allocation16_spill] sm:$0xff] %v8534_v47  ;;  %v2660_v32 = vadd.f32 %v2652_v1, %v11255_v19  ;;  %2989 = vmatmul.f32.gmra.mxu2 %v8534_v47  ;;  %v8551_v42 = vadd.f32 %v2506_v14, %v2450_v4  ;;  %v8554_v21 = vand.u32 4294901760, %v8534_v47  ;;  %3495 = vmatpush.msrb.mxu0 %v8529_v13  ;;  %v2615_v52 = vand.u32 2147483648, %v8491_v28  ;;  %v11259_v14 = vld [vmem:[#allocation6_spill] sm:$0xff] }
 0x3ce   : > { %v2593_v48 = vadd.f32 %v8487_v26, %v2592_v2  ;;  %v3373_v25 = vsub.f32 %v8529_v13, %v11041_v51  ;;  %v11040_v31 = vand.u32 4294901760, %v8544_v62  ;;  %3270 = vmatpush.msra.mxu2 %v8546_v3  ;;  %v8570_v24 = vand.u32 4294901760, %v8537_v58  ;;  %3585 = vmatpush.msrb.mxu1 %v8546_v3 }
 0x3cf   : > { %11256 = vst [vmem:[#allocation17_spill] sm:$0xff] %v8554_v21  ;;  %v8557_v56 = vpop.eup %6387  ;;  %v8573_v0 = vand.u32 4294901760, %v2660_v32  ;;  %3065 = vmatmul.f32.gmra.mxu3 %v8554_v21  ;;  %v8580_v33 = vsub.f32 %v2688_v50, %v8546_v3  ;;  %3498 = vmatpush.msrb.mxu0 %v8544_v62  ;;  %vm2609_vm3 = vweird.f32 %v8491_v28  ;;  %v8587_v44 = vmax.f32 %v8551_v42, 1e-30 }
 0x3d0   : > { %v2380_v49 = vpop.f32.mrf.mxu1  ;;  %v2597_v12 = vsel %vm2596_vm2, %v8487_v26, %v2593_v48  ;;  %v2605_v17 = vmul.f32 %v8557_v56, %v8491_v28  ;;  %v3374_v63 = vand.u32 4294901760, %v3373_v25  ;;  %3272 = vmatpush.msra.mxu2 %v8570_v24  ;;  %3587 = vmatpush.msrb.mxu1 %v8570_v24  ;;  %v3379_v9 = vsub.f32 %v8544_v62, %v11040_v31  ;;  %v2682_v48 = vld [vmem:[%s6601_s24 + $0x88] sm:$0xff] }
 0x3d1   : > { %v2602_v20 = vsel %vm8511_vm15, %v2601_v60, %v2597_v12  ;;  %v2381_v16 = vadd.f32 %v2380_v49, %v2308_v55  ;;  %2909 = vmatmul.f32.gmra.mxu1 %v8573_v0  ;;  %3501 = vmatpush.msrb.mxu0 %v8580_v33  ;;  %vm2518_vm4 = vcmp.gt.f32.partialorder %v8475_v54, 0.0  ;;  %vm2610_vm5 = vweird.f32 %v8557_v56  ;;  %v2453_v61 = vpop.f32.mrf.mxu2 }
 0x3d2   : > { %v2603_v26 = vmul.f32 %v2602_v20, %v8307_v23  ;;  %v2606_v37 = vsub.f32 1.0, %v2605_v17  ;;  %vm8599_vm6 = vcmp.eq.f32.partialorder %v2613_v46, 8.507059e+37  ;;  %v2616_v23 = vor.u32 1.1754944e-38, %v2615_v52  ;;  %3375 = vmatpush.msra.mxu3 %v3374_v63  ;;  %v2510_v19 = vpop.f32.mrf.mxu3  ;;  %vm2611_vm7 = vmor %vm2609_vm3, %vm2610_vm5 }
 0x3d3   : > { %6389 = vrcp.f32 %v8587_v44  ;;  %v3380_v55 = vand.u32 4294901760, %v3379_v9  ;;  %v2754_v50 = vsub.f32 %v8534_v47, %v8554_v21  ;;  %v2628_v46 = vand.u32 2147483647, %v8587_v44 }
 0x3d4   : > { %v2653_v11 = vsel %vm2517_vm0, %v2603_v26, 0.0  ;;  %v2607_v35 = vmul.f32 %v8557_v56, %v2606_v37  ;;  %v2630_v4 = vand.u32 2147483648, %v8587_v44  ;;  %v11039_v1 = vand.u32 4294901760, %v8580_v33 }
 0x3d5   : > { %v2661_v2 = vadd.f32 %v2653_v11, %v11259_v14  ;;  %3381 = vmatpush.msra.mxu3 %v3380_v55  ;;  %v8616_v52 = vand.u32 4294901760, %v2754_v50  ;;  %v2454_v25 = vadd.f32 %v2453_v61, %v2381_v16  ;;  %v8619_v49 = vsub.f32 %v2660_v32, %v8573_v0 }
 0x3d6   : > { %v2608_v30 = vadd.f32 %v8557_v56, %v2607_v35  ;;  %v3385_v17 = vsub.f32 %v8580_v33, %v11039_v1  ;;  %v8632_v20 = vsub.f32 %v8537_v58, %v8570_v24  ;;  %v8634_v63 = vand.u32 4294901760, %v2684_v5 }
 0x3d7   : > { %11260 = vst [vmem:[#allocation23_spill] sm:$0xff] %v8619_v49  ;;  %v8621_v12 = vand.u32 4294901760, %v2661_v2  ;;  %2756 = vmatmul.f32.gmra.mxu0 %v8616_v52  ;;  %2994 = vmatmul.f32.gmra.mxu2 %v8619_v49  ;;  %v8639_v26 = vadd.f32 %v2510_v19, %v2454_v25  ;;  %v8642_v28 = vand.u32 4294901760, %v8619_v49  ;;  %v8644_v37 = vand.u32 4294901760, %v2682_v48 }
 0x3d8   : > { %v2612_v32 = vsel %vm2611_vm7, %v8557_v56, %v2608_v30  ;;  %v3386_v16 = vand.u32 4294901760, %v3385_v17  ;;  %v11037_v61 = vand.u32 4294901760, %v8632_v20  ;;  %3274 = vmatpush.msra.mxu2 %v8634_v63  ;;  %v8653_v56 = vsub.f32 %v2684_v5, %v8634_v63  ;;  %3504 = vmatpush.msrb.mxu0 %v8632_v20  ;;  %v11265_v30 = vld [vmem:[#allocation8_spill] sm:$0xff]  ;;  %v2680_v17 = vld [vmem:[%s6601_s24 + $0x78] sm:$0xff] }
 0x3d9   : > { %11261 = vst [vmem:[#allocation36_spill] sm:$0xff] %v8642_v28  ;;  %v8646_v9 = vpop.eup %6389  ;;  %v2617_v58 = vsel %vm8599_vm6, %v2616_v23, %v2612_v32  ;;  %vm2624_vm8 = vweird.f32 %v8587_v44  ;;  %vm8660_vm9 = vcmp.eq.f32.partialorder %v2628_v46, 8.507059e+37  ;;  %3071 = vmatmul.f32.gmra.mxu3 %v8642_v28  ;;  %2913 = vmatmul.f32.gmra.mxu1 %v8621_v12  ;;  %v8667_v23 = vmax.f32 %v8639_v26, 1e-30 }
 0x3da   : > { %v2618_v11 = vmul.f32 %v2617_v58, %v8323_v8  ;;  %v2620_v35 = vmul.f32 %v8646_v9, %v8587_v44  ;;  %3387 = vmatpush.msra.mxu3 %v3386_v16  ;;  %v3391_v8 = vsub.f32 %v8632_v20, %v11037_v61  ;;  %v2762_v55 = vsub.f32 %v8619_v49, %v8642_v28  ;;  %v2678_v16 = vld [vmem:[%s6601_s24 + $0x68] sm:$0xff] }
 0x3db   : > { %v11038_v50 = vand.u32 4294901760, %v8653_v56  ;;  %3276 = vmatpush.msra.mxu2 %v8644_v37  ;;  %v8679_v46 = vsub.f32 %v2661_v2, %v8621_v12  ;;  %v8682_v19 = vsub.f32 %v2682_v48, %v8644_v37  ;;  %3507 = vmatpush.msrb.mxu0 %v8653_v56  ;;  %vm2519_vm10 = vcmp.gt.f32.partialorder %v8551_v42, 0.0 }
 0x3dc   : > { %v2654_v5 = vsel %vm2518_vm4, %v2618_v11, 0.0  ;;  %v2621_v14 = vsub.f32 1.0, %v2620_v35  ;;  %3589 = vmatpush.msrb.mxu1 %v8634_v63  ;;  %vm2625_vm11 = vweird.f32 %v8646_v9  ;;  %v2631_v54 = vor.u32 1.1754944e-38, %v2630_v4 }
 0x3dd   : > { %11264 = vst [vmem:[#allocation18_spill] sm:$0xff] %v8679_v46  ;;  %v2662_v25 = vadd.f32 %v2654_v5, %v11265_v30  ;;  %6391 = vrcp.f32 %v8667_v23  ;;  %v2645_v48 = vand.u32 2147483648, %v8667_v23  ;;  %v3392_v32 = vand.u32 4294901760, %v3391_v8  ;;  %3510 = vmatpush.msrb.mxu0 %v8682_v19  ;;  %vm2626_vm12 = vmor %vm2624_vm8, %vm2625_vm11 }
 0x3de   : > { %v2622_v2 = vmul.f32 %v8646_v9, %v2621_v14  ;;  %v8693_v58 = vand.u32 4294901760, %v2762_v55  ;;  %3591 = vmatpush.msrb.mxu1 %v8644_v37  ;;  %v2643_v35 = vand.u32 2147483647, %v8667_v23  ;;  %v3397_v4 = vsub.f32 %v8653_v56, %v11038_v50  ;;  %v2676_v14 = vld [vmem:[%s6601_s24 + $0x58] sm:$0xff] }
 0x3df   : > { %v8698_v11 = vand.u32 4294901760, %v2662_v25  ;;  %v8705_v5 = vand.u32 4294901760, %v8679_v46  ;;  %v8709_v55 = vor.u32 1.1754944e-38, %v2645_v48  ;;  %3393 = vmatpush.msra.mxu3 %v3392_v32  ;;  %v11042_v30 = vand.u32 4294901760, %v8682_v19  ;;  %2999 = vmatmul.f32.gmra.mxu2 %v8679_v46 }
 0x3e0   : > { %v2623_v8 = vadd.f32 %v8646_v9, %v2622_v2  ;;  %2764 = vmatmul.f32.gmra.mxu0 %v8693_v58  ;;  %v8713_v61 = vand.u32 4294901760, %v2680_v17  ;;  %v3398_v50 = vand.u32 4294901760, %v3397_v4  ;;  %v8725_v32 = vand.u32 4294901760, %v2678_v16 }
 0x3e1   : > { %11266 = vst [vmem:[#allocation19_spill] sm:$0xff] %v8705_v5  ;;  %v2770_v2 = vsub.f32 %v8679_v46, %v8705_v5  ;;  %v8723_v48 = vsub.f32 %v2662_v25, %v8698_v11  ;;  %vm2639_vm13 = vweird.f32 %v8667_v23  ;;  %3077 = vmatmul.f32.gmra.mxu3 %v8705_v5  ;;  %v3403_v44 = vsub.f32 %v8682_v19, %v11042_v30 }
 0x3e2   : > { %v2627_v1 = vsel %vm2626_vm12, %v8646_v9, %v2623_v8  ;;  %3278 = vmatpush.msra.mxu2 %v8713_v61  ;;  %v8735_v4 = vsub.f32 %v2680_v17, %v8713_v61  ;;  %v8737_v25 = vand.u32 4294901760, %v2676_v14  ;;  %3399 = vmatpush.msra.mxu3 %v3398_v50  ;;  %v8750_v30 = vsub.f32 %v2678_v16, %v8725_v32  ;;  %v2674_v17 = vld [vmem:[%s6601_s24 + $0x48] sm:$0xff]  ;;  %v11271_v50 = vld [vmem:[#allocation10_spill] sm:$0xff] }
 0x3e3   : > { %11267 = vst [vmem:[#allocation21_spill] sm:$0xff] %v8723_v48  ;;  %v8739_v31 = vpop.eup %6391  ;;  %v2632_v9 = vsel %vm8660_vm9, %v2631_v54, %v2627_v1  ;;  %v8743_v8 = vand.u32 4294901760, %v2770_v2  ;;  %2917 = vmatmul.f32.gmra.mxu1 %v8698_v11  ;;  %v8747_v51 = vand.u32 4294901760, %v8723_v48  ;;  %vm8758_vm15 = vcmp.eq.f32.partialorder %v2643_v35, 8.507059e+37  ;;  %v2670_v54 = vld [vmem:[%s6601_s24 + $0x28] sm:$0xff] }
 0x3e4   : > { %v2633_v43 = vmul.f32 %v2632_v9, %v8335_v6  ;;  %v2635_v46 = vmul.f32 %v8739_v31, %v8667_v23  ;;  %vm2640_vm14 = vweird.f32 %v8739_v31  ;;  %v3404_v60 = vand.u32 4294901760, %v3403_v44  ;;  %3280 = vmatpush.msra.mxu2 %v8725_v32  ;;  %3513 = vmatpush.msrb.mxu0 %v8735_v4 }
 0x3e5   : > { %11268 = vst [vmem:[#allocation28_spill] sm:$0xff] %v8747_v51  ;;  %v2778_v6 = vsub.f32 %v8723_v48, %v8747_v51  ;;  %v8769_v16 = vsub.f32 %v2676_v14, %v8737_v25  ;;  %3593 = vmatpush.msrb.mxu1 %v8713_v61  ;;  %v8775_v44 = vand.u32 4294901760, %v2674_v17  ;;  %v8777_v9 = vand.u32 4294901760, %v2672_v59  ;;  %vm2641_vm0 = vmor %vm2639_vm13, %vm2640_vm14 }
 0x3e6   : > { %v2655_v35 = vsel %vm2519_vm10, %v2633_v43, 0.0  ;;  %v2636_v2 = vsub.f32 1.0, %v2635_v46  ;;  %3405 = vmatpush.msra.mxu3 %v3404_v60  ;;  %3282 = vmatpush.msra.mxu2 %v8737_v25  ;;  %v11272_v14 = vand.u32 4294901760, %v8735_v4  ;;  %v11273_v42 = vand.u32 4294901760, %v8750_v30 }
 0x3e7   : > { %v2663_v49 = vadd.f32 %v2655_v35, %v11271_v50  ;;  %v8787_v46 = vand.u32 4294901760, %v2778_v6  ;;  %3516 = vmatpush.msrb.mxu0 %v8750_v30  ;;  %3595 = vmatpush.msrb.mxu1 %v8725_v32  ;;  %v8796_v35 = vsub.f32 %v2674_v17, %v8775_v44  ;;  %v2668_v6 = vld [vmem:[%s6601_s24 + $0x18] sm:$0xff]  ;;  %v8806_v36 = vand.u32 4294901760, %v2670_v54 }
 0x3e8   : > { %v3409_v5 = vsub.f32 %v8735_v4, %v11272_v14  ;;  %v3415_v43 = vsub.f32 %v8750_v30, %v11273_v42  ;;  %v2637_v60 = vmul.f32 %v8739_v31, %v2636_v2  ;;  %2772 = vmatmul.f32.gmra.mxu0 %v8743_v8  ;;  %3284 = vmatpush.msra.mxu2 %v8775_v44  ;;  %v2666_v42 = vld [vmem:[%s6601_s24 + $0x8] sm:$0xff]  ;;  %v11274_v17 = vand.u32 4294901760, %v8769_v16  ;;  %s11390_s24 = sld [smem:[#allocation65_spill]] (!%p6256_p6) }
 0x3e9   : > { %v8799_v14 = vsub.f32 %v2672_v59, %v8777_v9  ;;  %v8803_v47 = vand.u32 4294901760, %v2663_v49  ;;  %3004 = vmatmul.f32.gmra.mxu2 %v8723_v48  ;;  %3519 = vmatpush.msrb.mxu0 %v8769_v16  ;;  %v8830_v21 = vand.u32 4294901760, %v2666_v42  ;;  %vm2520_vm1 = vcmp.gt.f32.partialorder %v8639_v26, 0.0 }
 0x3ea   : > { %v3410_v28 = vand.u32 4294901760, %v3409_v5  ;;  %v3416_v2 = vand.u32 4294901760, %v3415_v43  ;;  %v2638_v50 = vadd.f32 %v8739_v31, %v2637_v60  ;;  %3083 = vmatmul.f32.gmra.mxu3 %v8747_v51  ;;  %v3421_v59 = vsub.f32 %v8769_v16, %v11274_v17  ;;  %3286 = vmatpush.msra.mxu2 %v8777_v9 }
 0x3eb   : > { %2921 = vmatmul.f32.gmra.mxu1 %v8803_v47  ;;  %v8823_v43 = vsub.f32 %v2663_v49, %v8803_v47  ;;  %v8826_v60 = vsub.f32 %v2670_v54, %v8806_v36  ;;  %v8828_v17 = vand.u32 4294901760, %v2668_v6  ;;  %v11275_v51 = vand.u32 4294901760, %v8796_v35  ;;  %3522 = vmatpush.msrb.mxu0 %v8796_v35 }
 0x3ec   : > { %3411 = vmatpush.msra.mxu3 %v3410_v28  ;;  %v2642_v5 = vsel %vm2641_vm0, %v8739_v31, %v2638_v50  ;;  %v3422_v48 = vand.u32 4294901760, %v3421_v59  ;;  %v11276_v28 = vand.u32 4294901760, %v8799_v14  ;;  %3288 = vmatpush.msra.mxu2 %v8806_v36 }
 0x3ed   : > { %v3427_v23 = vsub.f32 %v8796_v35, %v11275_v51  ;;  %3597 = vmatpush.msrb.mxu1 %v8737_v25  ;;  %v2647_v49 = vsel %vm8758_vm15, %v8709_v55, %v2642_v5  ;;  %v8845_v31 = vand.u32 4294901760, %v8823_v43  ;;  %v3438_v54 = vand.u32 4294901760, %v8826_v60  ;;  %3525 = vmatpush.msrb.mxu0 %v8799_v14 }
 0x3ee   : > { %v3433_v15 = vsub.f32 %v8799_v14, %v11276_v28  ;;  %3417 = vmatpush.msra.mxu3 %v3416_v2  ;;  %v8849_v51 = vsub.f32 %v2668_v6, %v8828_v17  ;;  %v2648_v50 = vmul.f32 %v2647_v49, %v8348_v22  ;;  %3290 = vmatpush.msra.mxu2 %v8828_v17  ;;  %v11278_v49 = vand.u32 4294901760, %v8409_v53  ;;  %s11391_s0 = smov (!%p6256_p6), %s11390_s24 }
 0x3ef   : > { %v3428_v59 = vand.u32 4294901760, %v3427_v23  ;;  %v8855_v28 = vsub.f32 %v2666_v42, %v8830_v21  ;;  %3599 = vmatpush.msrb.mxu1 %v8775_v44  ;;  %v3439_v1 = vsub.f32 %v8826_v60, %v3438_v54  ;;  %v2786_v42 = vsub.f32 %v8823_v43, %v8845_v31  ;;  %3528 = vmatpush.msrb.mxu0 %v8826_v60 }
 0x3f0   : > { %3423 = vmatpush.msra.mxu3 %v3422_v48  ;;  %v3434_v55 = vand.u32 4294901760, %v3433_v15  ;;  %v3444_v6 = vand.u32 4294901760, %v8849_v51  ;;  %v2656_v22 = vsel %vm2520_vm1, %v2648_v50, 0.0  ;;  %2780 = vmatmul.f32.gmra.mxu0 %v8787_v46  ;;  %v11277_v48 = vld [vmem:[#allocation13_spill] sm:$0xff] }
 0x3f1   : > { %3292 = vmatpush.msra.mxu2 %v8830_v21  ;;  %v3450_v26 = vand.u32 4294901760, %v8855_v28  ;;  %v2664_v15 = vadd.f32 %v2656_v22, %v11277_v48  ;;  %v3440_v2 = vand.u32 4294901760, %v3439_v1  ;;  %3601 = vmatpush.msrb.mxu1 %v8777_v9  ;;  %v11279_v1 = vand.u32 4294901760, %v8470_v34 }
 0x3f2   : > { %3009 = vmatmul.f32.gmra.mxu2 %v8823_v43  ;;  %3429 = vmatpush.msra.mxu3 %v3428_v59  ;;  %v3445_v5 = vsub.f32 %v8849_v51, %v3444_v6  ;;  %v8883_v59 = vand.u32 4294901760, %v2786_v42  ;;  %v11281_v34 = vand.u32 4294901760, %v8544_v62  ;;  %v11284_v62 = vand.u32 4294901760, %v8653_v56 }
 0x3f3   : > { %3089 = vmatmul.f32.gmra.mxu3 %v8845_v31  ;;  %v3451_v23 = vsub.f32 %v8855_v28, %v3450_v26  ;;  %3660 = vmatpush.msrb.mxu2 %v11278_v49  ;;  %v8880_v50 = vand.u32 4294901760, %v2664_v15  ;;  %v11280_v49 = vand.u32 4294901760, %v8529_v13  ;;  %v11282_v13 = vand.u32 4294901760, %v8580_v33 }
 0x3f4   : > { %3435 = vmatpush.msra.mxu3 %v3434_v55  ;;  %v3446_v22 = vand.u32 4294901760, %v3445_v5  ;;  %3603 = vmatpush.msrb.mxu1 %v8806_v36  ;;  %v11286_v33 = vand.u32 4294901760, %v8735_v4 }
 0x3f5   : > { %3664 = vmatpush.msrb.mxu2 %v11279_v1  ;;  %2925 = vmatmul.f32.gmra.mxu1 %v8880_v50  ;;  %v8890_v48 = vsub.f32 %v2664_v15, %v8880_v50  ;;  %v3452_v53 = vand.u32 4294901760, %v3451_v23 }
 0x3f6   : > { %3441 = vmatpush.msra.mxu3 %v3440_v2  ;;  %3531 = vmatpush.msrb.mxu0 %v8849_v51  ;;  %v11283_v2 = vand.u32 4294901760, %v8632_v20  ;;  %v11291_v20 = vld [vmem:[#allocation14_spill] sm:$0xff]  ;;  %v11301_v51 = vld [vmem:[#allocation21_spill] sm:$0xff] }
 0x3f7   : > { %3668 = vmatpush.msrb.mxu2 %v11280_v49  ;;  %v8896_v55 = vand.u32 4294901760, %v8890_v48  ;;  %3605 = vmatpush.msrb.mxu1 %v8828_v17 }
 0x3f8   : > { %3447 = vmatpush.msra.mxu3 %v3446_v22  ;;  %2788 = vmatmul.f32.gmra.mxu0 %v8883_v59 }
 0x3f9   : > { %3672 = vmatpush.msrb.mxu2 %v11281_v34  ;;  %v2794_v42 = vsub.f32 %v8890_v48, %v8896_v55  ;;  %3534 = vmatpush.msrb.mxu0 %v8855_v28 }
 0x3fa   : > { %3014 = vmatmul.f32.gmra.mxu2 %v8890_v48  ;;  %3453 = vmatpush.msra.mxu3 %v3452_v53 }
 0x3fb   : > { %3095 = vmatmul.f32.gmra.mxu3 %v8896_v55  ;;  %3676 = vmatpush.msrb.mxu2 %v11282_v13  ;;  %v2795_v15 = vand.u32 4294901760, %v2794_v42 }
 0x3fc   : > { %3755 = vmatpush.msrb.mxu3 %v8385_v41  ;;  %3607 = vmatpush.msrb.mxu1 %v8830_v21  ;;  %v11285_v41 = vand.u32 4294901760, %v8682_v19 }
 0x3fd   : > { %3680 = vmatpush.msrb.mxu2 %v11283_v2  ;;  %3229 = vmatmul.f32.vlgmr.msra.gmra.mxu1 %v8360_v27 }
 0x3fe   : > { %3757 = vmatpush.msrb.mxu3 %v8412_v18  ;;  %v11287_v18 = vand.u32 4294901760, %v8750_v30 }
 0x3ff   : > { %3684 = vmatpush.msrb.mxu2 %v11284_v62 }
 0x400   : > { %3759 = vmatpush.msrb.mxu3 %v8480_v57  ;;  %2796 = vmatmul.f32.gmra.mxu0 %v2795_v15  ;;  %v11288_v57 = vand.u32 4294901760, %v8769_v16  ;;  %v11297_v16 = vld [vmem:[#allocation23_spill] sm:$0xff] }
 0x401   : > { %3688 = vmatpush.msrb.mxu2 %v11285_v41 }
 0x402   : > { %3298 = vmatmul.f32.vlgmr.msra.gmra.mxu2 %v8437_v10  ;;  %3761 = vmatpush.msrb.mxu3 %v8497_v38  ;;  %v11289_v10 = vand.u32 4294901760, %v8796_v35  ;;  %v11290_v38 = vand.u32 4294901760, %v8799_v14  ;;  %v11298_v35 = vld [vmem:[#allocation28_spill] sm:$0xff]  ;;  %v11299_v14 = vld [vmem:[#allocation18_spill] sm:$0xff] }
 0x403   : > { %3455 = vmatmul.f32.vlgmr.msra.gmra.mxu3 %v8360_v27  ;;  %3692 = vmatpush.msrb.mxu2 %v11286_v33 }
 0x404   : > { %3763 = vmatpush.msrb.mxu3 %v8546_v3 }
 0x405   : > { %3696 = vmatpush.msrb.mxu2 %v11287_v18  ;;  %3233 = vmatmul.f32.gmra.mxu1 %v8428_v45 }
 0x406   : > { %3765 = vmatpush.msrb.mxu3 %v8570_v24 }
 0x407   : > { %3700 = vmatpush.msrb.mxu2 %v11288_v57 }
 0x408   : > { %3767 = vmatpush.msrb.mxu3 %v8634_v63  ;;  %3164 = vmatmul.f32.vlgmr.msra.gmra.mxu0 %v8360_v27 }
 0x409   : > { %3704 = vmatpush.msrb.mxu2 %v11289_v10 }
 0x40a   : > { %3306 = vmatmul.f32.gmra.mxu2 %v8526_v40  ;;  %3769 = vmatpush.msrb.mxu3 %v8644_v37 }
 0x40b   : > { %3459 = vmatmul.f32.gmra.mxu3 %v8428_v45  ;;  %3708 = vmatpush.msrb.mxu2 %v11290_v38 }
 0x40c   : > { %3771 = vmatpush.msrb.mxu3 %v8713_v61  ;;  %v11292_v61 = vld [vmem:[#allocation17_spill] sm:$0xff] }
 0x40d   : > { %3712 = vmatpush.msrb.mxu2 %v3438_v54  ;;  %3237 = vmatmul.f32.gmra.mxu1 %v8482_v39 }
 0x40e   : > { %3773 = vmatpush.msrb.mxu3 %v8725_v32  ;;  %v11295_v32 = vld [vmem:[#allocation16_spill] sm:$0xff] }
 0x40f   : > { %3716 = vmatpush.msrb.mxu2 %v3444_v6 }
 0x410   : > { %3775 = vmatpush.msrb.mxu3 %v8737_v25  ;;  %3168 = vmatmul.f32.gmra.mxu0 %v8428_v45 }
 0x411   : > { %3720 = vmatpush.msrb.mxu2 %v3450_v26 }
 0x412   : > { %3314 = vmatmul.f32.gmra.mxu2 %v8616_v52  ;;  %3777 = vmatpush.msrb.mxu3 %v8775_v44 }
 0x413   : > { %3463 = vmatmul.f32.gmra.mxu3 %v8482_v39 }
 0x414   : > { %3779 = vmatpush.msrb.mxu3 %v8777_v9 }
 0x415   : > { %3241 = vmatmul.f32.gmra.mxu1 %v8573_v0 }
 0x416   : > { %3781 = vmatpush.msrb.mxu3 %v8806_v36 }
 0x418   : > { %3783 = vmatpush.msrb.mxu3 %v8828_v17  ;;  %3172 = vmatmul.f32.gmra.mxu0 %v8482_v39 }
 0x41a   : > { %3322 = vmatmul.f32.gmra.mxu2 %v8693_v58  ;;  %3785 = vmatpush.msrb.mxu3 %v8830_v21 }
 0x41b   : > { %3467 = vmatmul.f32.gmra.mxu3 %v8573_v0 }
 0x41d   : > { %3245 = vmatmul.f32.gmra.mxu1 %v8621_v12 }
 0x420   : > { %3176 = vmatmul.f32.gmra.mxu0 %v8573_v0 }
 0x422   : > { %3330 = vmatmul.f32.gmra.mxu2 %v8743_v8 }
 0x423   : > { %3471 = vmatmul.f32.gmra.mxu3 %v8621_v12 }
 0x425   : > { %3249 = vmatmul.f32.gmra.mxu1 %v8698_v11 }
 0x428   : > { %3180 = vmatmul.f32.gmra.mxu0 %v8621_v12 }
 0x42a   : > { %3338 = vmatmul.f32.gmra.mxu2 %v8787_v46 }
 0x42b   : > { %3475 = vmatmul.f32.gmra.mxu3 %v8698_v11 }
 0x42d   : > { %3253 = vmatmul.f32.gmra.mxu1 %v8803_v47 }
 0x430   : > { %3184 = vmatmul.f32.gmra.mxu0 %v8698_v11 }
 0x432   : > { %3346 = vmatmul.f32.gmra.mxu2 %v8883_v59 }
 0x433   : > { %3479 = vmatmul.f32.gmra.mxu3 %v8803_v47 }
 0x435   : > { %3257 = vmatmul.f32.gmra.mxu1 %v8880_v50 }
 0x436   : > { %v8977_v36 = vpop.f32.mrf.mxu1 }
 0x438   : > { %3188 = vmatmul.f32.gmra.mxu0 %v8803_v47 }
 0x43a   : > { %3354 = vmatmul.f32.gmra.mxu2 %v2795_v15 }
 0x43b   : > { %3483 = vmatmul.f32.gmra.mxu3 %v8880_v50 }
 0x43d   : > { %3611 = vmatmul.f32.vlgmr.msrb.gmra.mxu1 %v8401_v7 }
 0x43e   : > { %v8982_v40 = vpop.f32.mrf.mxu1  ;;  %v8984_v3 = vpop.f32.mrf.mxu2 }
 0x43f   : > { %v8990_v24 = vpop.f32.mrf.mxu0 }
 0x440   : > { %3192 = vmatmul.f32.gmra.mxu0 %v8880_v50  ;;  %v8987_v21 = vpop.f32.mrf.mxu3 }
 0x442   : > { %3722 = vmatmul.f32.vlgmr.msrb.gmra.mxu2 %v8360_v27 }
 0x443   : > { %3787 = vmatmul.f32.vlgmr.msrb.gmra.mxu3 %v8360_v27  ;;  %v11293_v27 = vld [vmem:[#allocation15_spill] sm:$0xff] }
 0x445   : > { %3617 = vmatmul.f32.gmra.mxu1 %v8478_v29 }
 0x446   : > { %v8994_v52 = vpop.f32.mrf.mxu1  ;;  %v8997_v7 = vpop.f32.mrf.mxu2 }
 0x448   : > { %3537 = vmatmul.f32.vlgmr.msrb.gmra.mxu0 %v11291_v20  ;;  %v9001_v63 = vpop.f32.mrf.mxu3 }
 0x449   : > { %v9003_v37 = vpop.f32.mrf.mxu0 }
 0x44a   : > { %3726 = vmatmul.f32.gmra.mxu2 %v8428_v45 }
 0x44b   : > { %3791 = vmatmul.f32.gmra.mxu3 %v8428_v45  ;;  %v11294_v45 = vld [vmem:[#allocation36_spill] sm:$0xff] }
 0x44d   : > { %3623 = vmatmul.f32.gmra.mxu1 %v11292_v61 }
 0x44e   : > { %v9006_v56 = vpop.f32.mrf.mxu1 }
 0x450   : > { %3542 = vmatmul.f32.gmra.mxu0 %v11293_v27  ;;  %v9010_v29 = vpop.f32.mrf.mxu2 }
 0x452   : > { %3730 = vmatmul.f32.gmra.mxu2 %v8482_v39  ;;  %v9013_v19 = vpop.f32.mrf.mxu3 }
 0x453   : > { %3795 = vmatmul.f32.gmra.mxu3 %v8482_v39  ;;  %v11296_v39 = vld [vmem:[#allocation19_spill] sm:$0xff] }
 0x454   : > { %v9015_v58 = vpop.f32.mrf.mxu0 }
 0x455   : > { %3629 = vmatmul.f32.gmra.mxu1 %v11294_v45 }
 0x456   : > { %v9018_v30 = vpop.f32.mrf.mxu1 }
 0x458   : > { %3547 = vmatmul.f32.gmra.mxu0 %v11295_v32  ;;  %v2697_v32 = vld [vmem:[%s11312_s22] sm:$0x3] }
 0x45a   : > { %3734 = vmatmul.f32.gmra.mxu2 %v8573_v0  ;;  %v9023_v4 = vpop.f32.mrf.mxu2 }
 0x45b   : > { %3799 = vmatmul.f32.gmra.mxu3 %v8573_v0 }
 0x45c   : > { %v9027_v8 = vpop.f32.mrf.mxu3 }
 0x45d   : > { %v9025_v25 = vpop.f32.mrf.mxu0  ;;  %3635 = vmatmul.f32.gmra.mxu1 %v11296_v39 }
 0x460   : > { %3552 = vmatmul.f32.gmra.mxu0 %v11297_v16  ;;  %v9031_v44 = vpop.f32.mrf.mxu1 }
 0x462   : > { %3738 = vmatmul.f32.gmra.mxu2 %v8621_v12  ;;  %v9035_v9 = vpop.f32.mrf.mxu2 }
 0x463   : > { %3803 = vmatmul.f32.gmra.mxu3 %v8621_v12 }
 0x464   : > { %v9039_v0 = vpop.f32.mrf.mxu3 }
 0x465   : > { %v9037_v46 = vpop.f32.mrf.mxu0  ;;  %3641 = vmatmul.f32.gmra.mxu1 %v11298_v35 }
 0x468   : > { %3557 = vmatmul.f32.gmra.mxu0 %v11299_v14  ;;  %v9043_v60 = vpop.f32.mrf.mxu1  ;;  %v9123_v14 = vperm.slane %v2697_v32, 0 }
 0x469   : > { %11300 = vst [vmem:[#allocation45_spill] sm:$0xff] %v9043_v60 }
 0x46a   : > { %3742 = vmatmul.f32.gmra.mxu2 %v8698_v11 }
 0x46b   : > { %3807 = vmatmul.f32.gmra.mxu3 %v8698_v11 }
 0x46c   : > { %v9047_v17 = vpop.f32.mrf.mxu2 }
 0x46d   : > { %v9049_v54 = vpop.f32.mrf.mxu0  ;;  %v9051_v12 = vpop.f32.mrf.mxu3  ;;  %3647 = vmatmul.f32.gmra.mxu1 %v8845_v31 }
 0x470   : > { %3562 = vmatmul.f32.gmra.mxu0 %v11301_v51  ;;  %v2742_v51 = vadd.f32 %v8990_v24, %v9123_v14 }
 0x472   : > { %3746 = vmatmul.f32.gmra.mxu2 %v8803_v47  ;;  %v9057_v28 = vpop.f32.mrf.mxu1 }
 0x473   : > { %3811 = vmatmul.f32.gmra.mxu3 %v8803_v47  ;;  %11302 = vst [vmem:[#allocation20_spill] sm:$0xff] %v9057_v28 }
 0x475   : > { %v9059_v6 = vpop.f32.mrf.mxu2  ;;  %v9061_v26 = vpop.f32.mrf.mxu0  ;;  %3653 = vmatmul.f32.gmra.mxu1 %v8896_v55 }
 0x476   : > { %11303 = vst [vmem:[#allocation22_spill] sm:$0xff] %v9059_v6  ;;  %v9063_v11 = vpop.f32.mrf.mxu3 }
 0x477   : > { %11304 = vst [vmem:[#allocation24_spill] sm:$0xff] %v9063_v11  ;;  %v2899_v11 = vadd.f32 %v8977_v36, %v2742_v51 }
 0x478   : > { %3567 = vmatmul.f32.gmra.mxu0 %v8823_v43 }
 0x47a   : > { %3750 = vmatmul.f32.gmra.mxu2 %v8880_v50  ;;  %v9069_v31 = vpop.f32.mrf.mxu1 }
 0x47b   : > { %3815 = vmatmul.f32.gmra.mxu3 %v8880_v50 }
 0x47d   : > { %v9071_v5 = vpop.f32.mrf.mxu2  ;;  %v9073_v47 = vpop.f32.mrf.mxu0 }
 0x47e   : > { %11305 = vst [vmem:[#allocation25_spill] sm:$0xff] %v9071_v5  ;;  %v9075_v23 = vpop.f32.mrf.mxu3 }
 0x47f   : > { %11306 = vst [vmem:[#allocation26_spill] sm:$0xff] %v9073_v47 }
 0x480   : > { %11307 = vst [vmem:[#allocation27_spill] sm:$0xff] %v9075_v23  ;;  %3572 = vmatmul.f32.gmra.mxu0 %v8890_v48 }
 0x482   : > { %v9078_v22 = vpop.f32.mrf.mxu1 }
 0x485   : > { %v3299_v59 = vpop.f32.mrf.mxu2  ;;  %v3165_v1 = vpop.f32.mrf.mxu0 }
 0x486   : > { %v3456_v53 = vpop.f32.mrf.mxu3 }
 0x48a   : > { %v9080_v43 = vpop.f32.mrf.mxu1 }
 0x48d   : > { %v3307_v49 = vpop.f32.mrf.mxu2  ;;  %v3169_v55 = vpop.f32.mrf.mxu0 }
 0x48e   : > { %v3460_v50 = vpop.f32.mrf.mxu3 }
 0x492   : > { %v9082_v34 = vpop.f32.mrf.mxu1 }
 0x495   : > { %v3315_v42 = vpop.f32.mrf.mxu2  ;;  %v9084_v13 = vpop.f32.mrf.mxu0 }
 0x496   : > { %v3464_v15 = vpop.f32.mrf.mxu3 }
 0x49a   : > { %v9086_v2 = vpop.f32.mrf.mxu1 }
 0x49d   : > { %v9088_v48 = vpop.f32.mrf.mxu2  ;;  %v9090_v62 = vpop.f32.mrf.mxu0 }
 0x49e   : > { %v9092_v41 = vpop.f32.mrf.mxu3 }
 0x4a2   : > { %v9094_v33 = vpop.f32.mrf.mxu1 }
 0x4a3   : > { %11308 = vst [vmem:[#allocation29_spill] sm:$0xff] %v9094_v33  ;;  %v2981_v33 = vadd.f32 %v8984_v3, %v2899_v11  ;;  %v2758_v3 = vadd.f32 %v9015_v58, %v9123_v14 }
 0x4a5   : > { %v9096_v18 = vpop.f32.mrf.mxu2  ;;  %v9098_v57 = vpop.f32.mrf.mxu0 }
 0x4a6   : > { %v9100_v10 = vpop.f32.mrf.mxu3 }
 0x4aa   : > { %v9102_v38 = vpop.f32.mrf.mxu1 }
 0x4ab   : > { %11309 = vst [vmem:[#allocation47_spill] sm:$0xff] %v9102_v38  ;;  %v9127_v38 = vperm.slane %v2697_v32, 1 }
 0x4ad   : > { %v9104_v20 = vpop.f32.mrf.mxu2  ;;  %v9106_v61 = vpop.f32.mrf.mxu0  ;;  %v3308_v36 = vadd.f32 %v3307_v49, %v9127_v38 }
 0x4ae   : > { %11310 = vst [vmem:[#allocation30_spill] sm:$0xff] %v9106_v61  ;;  %v9108_v27 = vpop.f32.mrf.mxu3 }
 0x4af   : > { %v3461_v11 = vadd.f32 %v3460_v50, %v3308_v36 }
 0x4b2   : > { %v9110_v45 = vpop.f32.mrf.mxu1 }
 0x4b3   : > { %11311 = vst [vmem:[#allocation31_spill] sm:$0xff] %v9110_v45 }
 0x4b5   : > { %v9117_v39 = vpop.f32.mrf.mxu2  ;;  %v9119_v16 = vpop.f32.mrf.mxu0 }
 0x4b6   : > { %11313 = vst [vmem:[#allocation32_spill] sm:$0xff] %v9117_v39  ;;  %v9121_v35 = vpop.f32.mrf.mxu3 }
 0x4b7   : > { %11314 = vst [vmem:[#allocation33_spill] sm:$0xff] %v9119_v16  ;;  %v3300_v16 = vadd.f32 %v3299_v59, %v9127_v38 }
 0x4b8   : > { %11315 = vst [vmem:[#allocation35_spill] sm:$0xff] %v9121_v35  ;;  %v2750_v35 = vadd.f32 %v9003_v37, %v9123_v14 }
 0x4b9   : > { %v3457_v24 = vadd.f32 %v3456_v53, %v3300_v16 }
 0x4ba   : > { %v3612_v23 = vpop.f32.mrf.mxu1 }
 0x4bd   : > { %v9129_v45 = vpop.f32.mrf.mxu2  ;;  %v9131_v5 = vpop.f32.mrf.mxu0 }
 0x4be   : > { %11316 = vst [vmem:[#allocation34_spill] sm:$0xff] %v9129_v45  ;;  %v9133_v28 = vpop.f32.mrf.mxu3  ;;  %v3055_v45 = vadd.f32 %v8987_v21, %v2981_v33 }
 0x4bf   : > { %11317 = vst [vmem:[#allocation49_spill] sm:$0xff] %v9131_v5  ;;  %v2903_v5 = vadd.f32 %v8982_v40, %v2750_v35 }
 0x4c0   : > { %11318 = vst [vmem:[#allocation37_spill] sm:$0xff] %v9133_v28  ;;  %v3166_v28 = vadd.f32 %v3165_v1, %v3055_v45 }
 0x4c1   : > { %v2986_v59 = vadd.f32 %v8997_v7, %v2903_v5 }
 0x4c2   : > { %v3618_v47 = vpop.f32.mrf.mxu1  ;;  %v9149_v21 = vadd.f32 %v9069_v31, %v3166_v28  ;;  %v2766_v28 = vadd.f32 %v9025_v25, %v9123_v14 }
 0x4c3   : > { %v3061_v1 = vadd.f32 %v9001_v63, %v2986_v59 }
 0x4c5   : > { %v3723_v6 = vpop.f32.mrf.mxu2  ;;  %v3538_v32 = vpop.f32.mrf.mxu0  ;;  %v3170_v58 = vadd.f32 %v3169_v55, %v3061_v1 }
 0x4c6   : > { %v3788_v39 = vpop.f32.mrf.mxu3  ;;  %v3539_v61 = vadd.f32 %v3538_v32, %v3457_v24  ;;  %v2774_v32 = vadd.f32 %v9037_v46, %v9123_v14 }
 0x4c8   : > { %v3613_v51 = vadd.f32 %v3612_v23, %v3539_v61  ;;  %v2907_v23 = vadd.f32 %v8994_v52, %v2758_v3  ;;  %v9162_v52 = vadd.f32 %v9078_v22, %v3170_v58 }
 0x4ca   : > { %v3724_v37 = vadd.f32 %v3723_v6, %v3613_v51  ;;  %v3624_v16 = vpop.f32.mrf.mxu1  ;;  %v3316_v6 = vadd.f32 %v3315_v42, %v9127_v38  ;;  %v2991_v50 = vadd.f32 %v9010_v29, %v2907_v23 }
 0x4cc   : > { %v9146_v53 = vadd.f32 %v3788_v39, %v3724_v37  ;;  %v3465_v61 = vadd.f32 %v3464_v15, %v3316_v6  ;;  %v3067_v55 = vadd.f32 %v9013_v19, %v2991_v50  ;;  %v2915_v37 = vadd.f32 %v9018_v30, %v2774_v32 }
 0x4cd   : > { %v3727_v60 = vpop.f32.mrf.mxu2  ;;  %v3543_v40 = vpop.f32.mrf.mxu0  ;;  %v2790_v50 = vadd.f32 %v9061_v26, %v9123_v14 }
 0x4ce   : > { %v3792_v33 = vpop.f32.mrf.mxu3  ;;  %v3544_v49 = vadd.f32 %v3543_v40, %v3461_v11  ;;  %v3821_v7 = vadd.f32 %v9146_v53, %v9149_v21  ;;  %v3174_v25 = vadd.f32 %v9084_v13, %v3067_v55 }
 0x4d0   : > { %v3619_v5 = vadd.f32 %v3618_v47, %v3544_v49  ;;  %3822 = vadd.xlane.f32.xlu2 %v3821_v7  ;;  %v2911_v47 = vadd.f32 %v9006_v56, %v2766_v28  ;;  %v9178_v59 = vadd.f32 %v9080_v43, %v3174_v25  ;;  %v3001_v43 = vadd.f32 %v9035_v9, %v2915_v37 }
 0x4d2   : > { %v3728_v31 = vadd.f32 %v3727_v60, %v3619_v5  ;;  %v3630_v24 = vpop.f32.mrf.mxu1  ;;  %v3324_v60 = vadd.f32 %v9088_v48, %v9127_v38  ;;  %v2996_v22 = vadd.f32 %v9023_v4, %v2911_v47  ;;  %v11320_v47 = vld [vmem:[#allocation30_spill] sm:$0xff] }
 0x4d4   : > { %v9159_v45 = vadd.f32 %v3792_v33, %v3728_v31  ;;  %v3469_v56 = vadd.f32 %v9092_v41, %v3324_v60  ;;  %v3073_v48 = vadd.f32 %v9027_v8, %v2996_v22  ;;  %v3332_v41 = vadd.f32 %v9096_v18, %v9127_v38  ;;  %v11323_v60 = vld [vmem:[#allocation26_spill] sm:$0xff]  ;;  %v11324_v22 = vld [vmem:[#allocation35_spill] sm:$0xff] }
 0x4d5   : > { %v3731_v63 = vpop.f32.mrf.mxu2  ;;  %v3548_v39 = vpop.f32.mrf.mxu0  ;;  %v2782_v33 = vadd.f32 %v9049_v54, %v9123_v14  ;;  %v3079_v18 = vadd.f32 %v9039_v0, %v3001_v43  ;;  %v11329_v43 = vld [vmem:[#allocation34_spill] sm:$0xff] }
 0x4d6   : > { %v3796_v35 = vpop.f32.mrf.mxu3  ;;  %v3549_v42 = vadd.f32 %v3548_v39, %v3465_v61  ;;  %v3824_v29 = vadd.f32 %v9159_v45, %v9162_v52  ;;  %v3178_v46 = vadd.f32 %v9090_v62, %v3073_v48  ;;  %v3473_v30 = vadd.f32 %v9100_v10, %v3332_v41  ;;  %v11319_v39 = vld [vmem:[#allocation45_spill] sm:$0xff]  ;;  %v11326_v48 = vld [vmem:[#allocation24_spill] sm:$0xff] }
 0x4d7   : > { %v2919_v58 = vadd.f32 %v9031_v44, %v2782_v33  ;;  %v3182_v54 = vadd.f32 %v9098_v57, %v3079_v18  ;;  %v3340_v10 = vadd.f32 %v9104_v20, %v9127_v38  ;;  %v3356_v33 = vadd.f32 %v11329_v43, %v9127_v38  ;;  %v11331_v18 = vld [vmem:[#allocation37_spill] sm:$0xff] }
 0x4d8   : > { %v3625_v15 = vadd.f32 %v3624_v16, %v3549_v42  ;;  %3825 = vadd.xlane.f32.xlu0 %v3824_v29  ;;  %v9194_v49 = vadd.f32 %v9082_v34, %v3178_v46 }
 0x4d9   : > { %v3006_v34 = vadd.f32 %v9047_v17, %v2919_v58  ;;  %v3477_v44 = vadd.f32 %v9108_v27, %v3340_v10  ;;  %v9210_v61 = vadd.f32 %v9086_v2, %v3182_v54  ;;  %v11321_v27 = vld [vmem:[#allocation32_spill] sm:$0xff]  ;;  %v11322_v2 = vld [vmem:[#allocation22_spill] sm:$0xff]  ;;  %v3485_v58 = vadd.f32 %v11331_v18, %v3356_v33  ;;  %v4101_v18 = vld [vmem:[%s6621_s7 + $0x78] sm:$0xff] }
 0x4da   : > { %v3732_v19 = vadd.f32 %v3731_v63, %v3625_v15  ;;  %v3636_v40 = vpop.f32.mrf.mxu1  ;;  %v3348_v29 = vadd.f32 %v11321_v27, %v9127_v38  ;;  %v2798_v15 = vadd.f32 %v11323_v60, %v9123_v14  ;;  %v11328_v14 = vld [vmem:[#allocation33_spill] sm:$0xff] }
 0x4db   : > { %v3085_v20 = vadd.f32 %v9051_v12, %v3006_v34 }
 0x4dc   : > { %v9175_v36 = vadd.f32 %v3796_v35, %v3732_v19  ;;  %v2923_v35 = vadd.f32 %v11319_v39, %v2790_v50  ;;  %v3481_v32 = vadd.f32 %v11324_v22, %v3348_v29 }
 0x4dd   : > { %v3735_v51 = vpop.f32.mrf.mxu2  ;;  %v3553_v13 = vpop.f32.mrf.mxu0  ;;  %v3186_v42 = vadd.f32 %v11320_v47, %v3085_v20  ;;  %v6480_v47 = vmov 256.0  }
 0x4de   : > { %v3800_v3 = vpop.f32.mrf.mxu3  ;;  %v3554_v11 = vadd.f32 %v3553_v13, %v3469_v56  ;;  %v3827_v4 = vadd.f32 %v9175_v36, %v9178_v59  ;;  %v3011_v25 = vadd.f32 %v11322_v2, %v2923_v35  ;;  %v11325_v56 = vld [vmem:[#allocation29_spill] sm:$0xff]  ;;  %6393 = vrcp.f32 %v6480_v47 }
 0x4e0   : > { %v3631_v16 = vadd.f32 %v3630_v24, %v3554_v11  ;;  %3828 = vadd.xlane.f32.xlu2 %v3827_v4  ;;  %v3091_v37 = vadd.f32 %v11326_v48, %v3011_v25  ;;  %v11327_v11 = vld [vmem:[#allocation20_spill] sm:$0xff] }
 0x4e1   : > { %v2927_v4 = vadd.f32 %v11327_v11, %v2798_v15 }
 0x4e2   : > { %v3736_v8 = vadd.f32 %v3735_v51, %v3631_v16  ;;  %v3642_v0 = vpop.f32.mrf.mxu1  ;;  %v9226_v51 = vadd.f32 %v11325_v56, %v3186_v42 }
 0x4e4   : > { %v9191_v1 = vadd.f32 %v3800_v3, %v3736_v8  ;;  %v6394_v42 = vpop.eup %6393 }
 0x4e5   : > { %v3739_v23 = vpop.f32.mrf.mxu2  ;;  %v3558_v62 = vpop.f32.mrf.mxu0  ;;  %v3846_v27 = vmul.f32 256.0, %v6394_v42  ;;  %vm3850_vm2 = vweird.f32 %v6394_v42 }
 0x4e6   : > { %v3804_v7 = vpop.f32.mrf.mxu3  ;;  %v3559_v6 = vadd.f32 %v3558_v62, %v3473_v30  ;;  %v3830_v9 = vadd.f32 %v9191_v1, %v9194_v49 }
 0x4e7   : > { %v3847_v29 = vsub.f32 1.0, %v3846_v27 }
 0x4e8   : > { %v3637_v5 = vadd.f32 %v3636_v40, %v3559_v6  ;;  %3831 = vadd.xlane.f32.xlu0 %v3830_v9  ;;  %v3190_v40 = vadd.f32 %v11328_v14, %v3091_v37  ;;  %v11332_v9 = vld [vmem:[#allocation47_spill] sm:$0xff] }
 0x4ea   : > { %v3740_v28 = vadd.f32 %v3739_v23, %v3637_v5  ;;  %v3648_v13 = vpop.f32.mrf.mxu1  ;;  %v11330_v23 = vld [vmem:[#allocation25_spill] sm:$0xff]  ;;  %v9240_v54 = vadd.f32 %v11332_v9, %v3190_v40  ;;  %v11333_v5 = vld [vmem:[#allocation27_spill] sm:$0xff] }
 0x4eb   : > { %v3016_v62 = vadd.f32 %v11330_v23, %v2927_v4  ;;  %v4099_v9 = vld [vmem:[%s6621_s7 + $0x68] sm:$0xff] }
 0x4ec   : > { %v9207_v31 = vadd.f32 %v3804_v7, %v3740_v28 }
 0x4ed   : > { %v3563_v57 = vpop.f32.mrf.mxu0  ;;  %v3743_v63 = vpop.f32.mrf.mxu2  ;;  %v3097_v34 = vadd.f32 %v11333_v5, %v3016_v62  ;;  %v4098_v5 = vld [vmem:[%s6621_s7 + $0x60] sm:$0xff] }
 0x4ee   : > { %v3564_v55 = vadd.f32 %v3563_v57, %v3477_v44  ;;  %v3833_v17 = vadd.f32 %v9207_v31, %v9210_v61  ;;  %v3808_v26 = vpop.f32.mrf.mxu3 }
 0x4f0   : > { %v3643_v24 = vadd.f32 %v3642_v0, %v3564_v55  ;;  %3834 = vadd.xlane.f32.xlu2 %v3833_v17  ;;  %v11334_v0 = vld [vmem:[#allocation49_spill] sm:$0xff]  ;;  %v11335_v55 = vld [vmem:[#allocation31_spill] sm:$0xff] }
 0x4f1   : > { %v3194_v44 = vadd.f32 %v11334_v0, %v3097_v34  ;;  %v4097_v34 = vld [vmem:[%s6621_s7 + $0x58] sm:$0xff]  ;;  %v9318_v0 = vand.u32 4294901760, %v4098_v5 }
 0x4f2   : > { %v3744_v12 = vadd.f32 %v3743_v63, %v3643_v24  ;;  %v3654_v28 = vpop.f32.mrf.mxu1  ;;  %v3848_v24 = vmul.f32 %v6394_v42, %v3847_v29 }
 0x4f3   : > { %v9249_v17 = vadd.f32 %v11335_v55, %v3194_v44  ;;  %v9320_v44 = vand.u32 4294901760, %v4097_v34  ;;  %v9340_v55 = vsub.f32 %v4098_v5, %v9318_v0 }
 0x4f4   : > { %v9223_v19 = vadd.f32 %v3808_v26, %v3744_v12  ;;  %v3849_v2 = vadd.f32 %v6394_v42, %v3848_v24 }
 0x4f5   : > { %v3568_v3 = vpop.f32.mrf.mxu0  ;;  %v3747_v16 = vpop.f32.mrf.mxu2 }
 0x4f6   : > { %v3569_v46 = vadd.f32 %v3568_v3, %v3481_v32  ;;  %v3836_v41 = vadd.f32 %v9223_v19, %v9226_v51  ;;  %v3812_v30 = vpop.f32.mrf.mxu3  ;;  %v9253_v25 = vsel %vm3850_vm2, %v6394_v42, %v3849_v2  ;;  %v4239_v2 = vand.u32 4294901760, %v9340_v55 }
 0x4f8   : > { %v3649_v8 = vadd.f32 %v3648_v13, %v3569_v46  ;;  %3837 = vadd.xlane.f32.xlu0 %v3836_v41 }
 0x4fa   : > { %v3748_v7 = vadd.f32 %v3747_v16, %v3649_v8 }
 0x4fc   : > { %v9237_v6 = vadd.f32 %v3812_v30, %v3748_v7 }
 0x4fd   : > { %v3573_v10 = vpop.f32.mrf.mxu0  ;;  %v3751_v63 = vpop.f32.mrf.mxu2 }
 0x4fe   : > { %v3574_v50 = vadd.f32 %v3573_v10, %v3485_v58  ;;  %v3839_v38 = vadd.f32 %v9237_v6, %v9240_v54  ;;  %v3816_v39 = vpop.f32.mrf.mxu3  ;;  %v4100_v58 = vld [vmem:[%s6621_s7 + $0x70] sm:$0xff] }
 0x4ff   : > { %v9305_v10 = vand.u32 4294901760, %v4100_v58 }
 0x500   : > { %v3655_v57 = vadd.f32 %v3654_v28, %v3574_v50  ;;  %3840 = vadd.xlane.f32.xlu2 %v3839_v38  ;;  %v4096_v50 = vld [vmem:[%s6621_s7 + $0x50] sm:$0xff] }
 0x502   : > { %v3752_v20 = vadd.f32 %v3751_v63, %v3655_v57  ;;  %v9328_v63 = vsub.f32 %v4100_v58, %v9305_v10 }
 0x504   : > { %v9246_v35 = vadd.f32 %v3816_v39, %v3752_v20  ;;  %v9333_v20 = vand.u32 4294901760, %v4096_v50  ;;  %v4227_v42 = vand.u32 4294901760, %v9328_v63 }
 0x506   : > { %v3842_v26 = vadd.f32 %v9246_v35, %v9249_v17  ;;  %v9351_v29 = vsub.f32 %v4096_v50, %v9333_v20 }
 0x508   : > { %3843 = vadd.xlane.f32.xlu0 %v3842_v26  ;;  %v9343_v26 = vsub.f32 %v4097_v34, %v9320_v44 }
 0x543   : > { %v3823_v60 = vpop.xlane.xlu2 %3822 }
 0x544   : > { %v3852_v15 = vmul.f32 %v9253_v25, %v3823_v60 }
 0x546   : > { %v9257_v12 = vsub.f32 %v9149_v21, %v3852_v15  ;;  %v9260_v22 = vsub.f32 %v9146_v53, %v3852_v15 }
 0x548   : > { %v3876_v32 = vmul.f32 %v9257_v12, %v9257_v12  ;;  %v3877_v56 = vmul.f32 %v9260_v22, %v9260_v22 }
 0x54a   : > { %v3892_v13 = vadd.f32 %v3877_v56, %v3876_v32  ;;  %v4228_v32 = vsub.f32 %v9328_v63, %v4227_v42 }
 0x54b   : > { %v3826_v3 = vpop.xlane.xlu0 %3825 }
 0x54c   : > { %v3853_v48 = vmul.f32 %v9253_v25, %v3826_v3  ;;  %3893 = vadd.xlane.f32.xlu1 %v3892_v13  ;;  %v4245_v13 = vand.u32 4294901760, %v9343_v26 }
 0x54e   : > { %v9268_v37 = vsub.f32 %v9162_v52, %v3853_v48  ;;  %v9271_v21 = vsub.f32 %v9159_v45, %v3853_v48  ;;  %v4095_v48 = vld [vmem:[%s6621_s7 + $0x48] sm:$0xff] }
 0x550   : > { %v3878_v53 = vmul.f32 %v9268_v37, %v9268_v37  ;;  %v3879_v11 = vmul.f32 %v9271_v21, %v9271_v21 }
 0x552   : > { %v3895_v4 = vadd.f32 %v3879_v11, %v3878_v53  ;;  %v4229_v11 = vand.u32 4294901760, %v4228_v32 }
 0x553   : > { %v3829_v46 = vpop.xlane.xlu2 %3828 }
 0x554   : > { %v3854_v41 = vmul.f32 %v9253_v25, %v3829_v46  ;;  %3896 = vadd.xlane.f32.xlu2 %v3895_v4  ;;  %v4240_v4 = vsub.f32 %v9340_v55, %v4239_v2  ;;  %v4251_v46 = vand.u32 4294901760, %v9351_v29 }
 0x556   : > { %v9279_v16 = vsub.f32 %v9178_v59, %v3854_v41  ;;  %v9282_v52 = vsub.f32 %v9175_v36, %v3854_v41 }
 0x558   : > { %v3880_v45 = vmul.f32 %v9279_v16, %v9279_v16  ;;  %v3881_v14 = vmul.f32 %v9282_v52, %v9282_v52 }
 0x55a   : > { %v3898_v40 = vadd.f32 %v3881_v14, %v3880_v45 }
 0x55b   : > { %v3832_v43 = vpop.xlane.xlu0 %3831 }
 0x55c   : > { %v3855_v33 = vmul.f32 %v9253_v25, %v3832_v43  ;;  %3899 = vadd.xlane.f32.xlu0 %v3898_v40  ;;  %v4246_v40 = vsub.f32 %v9343_v26, %v4245_v13  ;;  %v9387_v43 = vand.u32 4294901760, %v4095_v48 }
 0x55e   : > { %v9290_v59 = vsub.f32 %v9194_v49, %v3855_v33  ;;  %v9293_v36 = vsub.f32 %v9191_v1, %v3855_v33  ;;  %v9303_v49 = vand.u32 4294901760, %v4101_v18  ;;  %v9307_v1 = vand.u32 4294901760, %v4099_v9 }
 0x560   : > { %v3882_v8 = vmul.f32 %v9290_v59, %v9290_v59  ;;  %v3883_v30 = vmul.f32 %v9293_v36, %v9293_v36  ;;  %v9323_v57 = vsub.f32 %v4101_v18, %v9303_v49  ;;  %4123 = vmatpush.msra.mxu0 %v9303_v49  ;;  %4438 = vmatpush.msra.mxu3 %v9303_v49 }
 0x562   : > { %v3901_v23 = vadd.f32 %v3883_v30, %v3882_v8  ;;  %4350 = vmatpush.msra.mxu2 %v9323_v57  ;;  %v4221_v47 = vand.u32 4294901760, %v9323_v57  ;;  %4125 = vmatpush.msra.mxu0 %v9305_v10  ;;  %v4252_v8 = vsub.f32 %v9351_v29, %v4251_v46 }
 0x563   : > { %v3835_v62 = vpop.xlane.xlu2 %3834  ;;  %4440 = vmatpush.msra.mxu3 %v9305_v10 }
 0x564   : > { %v3856_v7 = vmul.f32 %v9253_v25, %v3835_v62  ;;  %3902 = vadd.xlane.f32.xlu2 %v3901_v23  ;;  %v4222_v15 = vsub.f32 %v9323_v57, %v4221_v47  ;;  %4353 = vmatpush.msra.mxu2 %v9328_v63  ;;  %v4247_v62 = vand.u32 4294901760, %v4246_v40  ;;  %v4253_v58 = vand.u32 4294901760, %v4252_v8 }
 0x565   : > { %4127 = vmatpush.msra.mxu0 %v9307_v1  ;;  %4442 = vmatpush.msra.mxu3 %v9307_v1 }
 0x566   : > { %v9313_v38 = vsub.f32 %v9210_v61, %v3856_v7  ;;  %v9316_v28 = vsub.f32 %v9207_v31, %v3856_v7  ;;  %v9331_v61 = vsub.f32 %v4099_v9, %v9307_v1  ;;  %v4223_v53 = vand.u32 4294901760, %v4222_v15 }
 0x567   : > { %4129 = vmatpush.msra.mxu0 %v9318_v0  ;;  %4444 = vmatpush.msra.mxu3 %v9318_v0  ;;  %v9403_v7 = vsub.f32 %v4095_v48, %v9387_v43  ;;  %v4093_v48 = vld [vmem:[%s6621_s7 + $0x38] sm:$0xff] }
 0x568   : > { %v3884_v31 = vmul.f32 %v9313_v38, %v9313_v38  ;;  %v3885_v39 = vmul.f32 %v9316_v28, %v9316_v28  ;;  %v4233_v27 = vand.u32 4294901760, %v9331_v61  ;;  %4356 = vmatpush.msra.mxu2 %v9331_v61  ;;  %4224 = vmatpush.msra.mxu1 %v4223_v53 }
 0x569   : > { %4131 = vmatpush.msra.mxu0 %v9320_v44  ;;  %4446 = vmatpush.msra.mxu3 %v9320_v44  ;;  %v11060_v53 = vand.u32 4294901760, %v9403_v7 }
 0x56a   : > { %v3904_v24 = vadd.f32 %v3885_v39, %v3884_v31  ;;  %v4234_v56 = vsub.f32 %v9331_v61, %v4233_v27  ;;  %4359 = vmatpush.msra.mxu2 %v9340_v55  ;;  %4230 = vmatpush.msra.mxu1 %v4229_v11  ;;  %v4092_v11 = vld [vmem:[%s6621_s7 + $0x30] sm:$0xff] }
 0x56b   : > { %v3838_v60 = vpop.xlane.xlu0 %3837  ;;  %4133 = vmatpush.msra.mxu0 %v9333_v20  ;;  %4448 = vmatpush.msra.mxu3 %v9333_v20 }
 0x56c   : > { %v3857_v3 = vmul.f32 %v9253_v25, %v3838_v60  ;;  %3905 = vadd.xlane.f32.xlu0 %v3904_v24  ;;  %v4235_v14 = vand.u32 4294901760, %v4234_v56  ;;  %4362 = vmatpush.msra.mxu2 %v9343_v26  ;;  %v4094_v56 = vld [vmem:[%s6621_s7 + $0x40] sm:$0xff] }
 0x56d   : > { %4135 = vmatpush.msra.mxu0 %v9387_v43  ;;  %4450 = vmatpush.msra.mxu3 %v9387_v43 }
 0x56e   : > { %v9377_v41 = vsub.f32 %v9226_v51, %v3857_v3  ;;  %v9380_v45 = vsub.f32 %v9223_v19, %v3857_v3  ;;  %v4241_v19 = vand.u32 4294901760, %v4240_v4  ;;  %4236 = vmatpush.msra.mxu1 %v4235_v14  ;;  %4365 = vmatpush.msra.mxu2 %v9351_v29  ;;  %v9431_v3 = vand.u32 4294901760, %v4094_v56 }
 0x56f   : > { %v4258_v4 = vsub.f32 %v9403_v7, %v11060_v53 }
 0x570   : > { %v3886_v33 = vmul.f32 %v9377_v41, %v9377_v41  ;;  %v3887_v51 = vmul.f32 %v9380_v45, %v9380_v45  ;;  %4242 = vmatpush.msra.mxu1 %v4241_v19  ;;  %4368 = vmatpush.msra.mxu2 %v9403_v7 }
 0x571   : > { %4137 = vmatpush.msra.mxu0 %v9431_v3  ;;  %4452 = vmatpush.msra.mxu3 %v9431_v3  ;;  %v4259_v19 = vand.u32 4294901760, %v4258_v4 }
 0x572   : > { %v3907_v30 = vadd.f32 %v3887_v51, %v3886_v33  ;;  %4248 = vmatpush.msra.mxu1 %v4247_v62  ;;  %v9452_v33 = vand.u32 4294901760, %v4092_v11  ;;  %v4091_v51 = vld [vmem:[%s6621_s7 + $0x28] sm:$0xff] }
 0x573   : > { %v3841_v23 = vpop.xlane.xlu2 %3840  ;;  %v9466_v62 = vand.u32 4294901760, %v4091_v51 }
 0x574   : > { %v3858_v18 = vmul.f32 %v9253_v25, %v3841_v23  ;;  %3908 = vadd.xlane.f32.xlu2 %v3907_v30  ;;  %4254 = vmatpush.msra.mxu1 %v4253_v58  ;;  %v9462_v23 = vsub.f32 %v4092_v11, %v9452_v33  ;;  %v4088_v11 = vld [vmem:[%s6621_s7 + $0x10] sm:$0xff] }
 0x576   : > { %v9409_v9 = vsub.f32 %v9240_v54, %v3858_v18  ;;  %v9412_v5 = vsub.f32 %v9237_v6, %v3858_v18  ;;  %v4090_v18 = vld [vmem:[%s6621_s7 + $0x20] sm:$0xff]  ;;  %4260 = vmatpush.msra.mxu1 %v4259_v19 }
 0x578   : > { %v3888_v34 = vmul.f32 %v9409_v9, %v9409_v9  ;;  %v3889_v50 = vmul.f32 %v9412_v5, %v9412_v5 }
 0x57a   : > { %v3910_v31 = vadd.f32 %v3889_v50, %v3888_v34  ;;  %v11056_v50 = vand.u32 4294901760, %v9462_v23 }
 0x57b   : > { %v3844_v39 = vpop.xlane.xlu0 %3843 }
 0x57c   : > { %v3859_v54 = vmul.f32 %v9253_v25, %v3844_v39  ;;  %3911 = vadd.xlane.f32.xlu0 %v3910_v31  ;;  %v9474_v31 = vand.u32 4294901760, %v4090_v18  ;;  %v9477_v39 = vsub.f32 %v4091_v51, %v9466_v62 }
 0x57e   : > { %v9421_v6 = vsub.f32 %v9249_v17, %v3859_v54  ;;  %v9424_v24 = vsub.f32 %v9246_v35, %v3859_v54  ;;  %v9436_v17 = vsub.f32 %v4094_v56, %v9431_v3  ;;  %v9440_v35 = vand.u32 4294901760, %v4093_v48  ;;  %v4089_v54 = vld [vmem:[%s6621_s7 + $0x18] sm:$0xff] }
 0x57f   : > { %v9488_v56 = vand.u32 4294901760, %v4089_v54  ;;  %v11341_v29 = vand.u32 4294901760, %v9477_v39 }
 0x580   : > { %11336 = vst [vmem:[#allocation38_spill] sm:$0xff] %v9424_v24  ;;  %v3890_v60 = vmul.f32 %v9421_v6, %v9421_v6  ;;  %v3891_v15 = vmul.f32 %v9424_v24, %v9424_v24  ;;  %4371 = vmatpush.msra.mxu2 %v9436_v17  ;;  %v11059_v14 = vand.u32 4294901760, %v9436_v17  ;;  %v9449_v40 = vsub.f32 %v4093_v48, %v9440_v35 }
 0x581   : > { %4139 = vmatpush.msra.mxu0 %v9440_v35  ;;  %4454 = vmatpush.msra.mxu3 %v9440_v35  ;;  %v11055_v48 = vand.u32 4294901760, %v9477_v39  ;;  %v9497_v19 = vsub.f32 %v4089_v54, %v9488_v56 }
 0x582   : > { %v3913_v32 = vadd.f32 %v3891_v15, %v3890_v60  ;;  %v4264_v8 = vsub.f32 %v9436_v17, %v11059_v14  ;;  %4374 = vmatpush.msra.mxu2 %v9449_v40  ;;  %v11058_v30 = vand.u32 4294901760, %v9449_v40  ;;  %v4276_v15 = vsub.f32 %v9462_v23, %v11056_v50  ;;  %v4086_v50 = vld [vmem:[%s6621_s7] sm:$0xff] }
 0x583   : > { %4141 = vmatpush.msra.mxu0 %v9452_v33  ;;  %4456 = vmatpush.msra.mxu3 %v9452_v33  ;;  %v4293_v54 = vand.u32 4294901760, %v9497_v19 }
 0x584   : > { %3914 = vadd.xlane.f32.xlu2 %v3913_v32  ;;  %v4265_v58 = vand.u32 4294901760, %v4264_v8  ;;  %v4270_v34 = vsub.f32 %v9449_v40, %v11058_v30  ;;  %4377 = vmatpush.msra.mxu2 %v9462_v23  ;;  %v9486_v32 = vsub.f32 %v4090_v18, %v9474_v31  ;;  %v4277_v4 = vand.u32 4294901760, %v4276_v15 }
 0x585   : > { %4143 = vmatpush.msra.mxu0 %v9466_v62  ;;  %4458 = vmatpush.msra.mxu3 %v9466_v62  ;;  %v9499_v8 = vand.u32 4294901760, %v4088_v11  ;;  %v4282_v18 = vsub.f32 %v9477_v39, %v11055_v48 }
 0x586   : > { %4266 = vmatpush.msra.mxu1 %v4265_v58  ;;  %v4271_v60 = vand.u32 4294901760, %v4270_v34  ;;  %4380 = vmatpush.msra.mxu2 %v9477_v39  ;;  %v11057_v51 = vand.u32 4294901760, %v9486_v32  ;;  %v4087_v58 = vld [vmem:[%s6621_s7 + $0x8] sm:$0xff] }
 0x587   : > { %4145 = vmatpush.msra.mxu0 %v9474_v31  ;;  %4460 = vmatpush.msra.mxu3 %v9474_v31  ;;  %v9515_v15 = vand.u32 4294901760, %v4087_v58  ;;  %v4283_v48 = vand.u32 4294901760, %v4282_v18  ;;  %v9529_v18 = vand.u32 4294901760, %v4086_v50 }
 0x588   : > { %4272 = vmatpush.msra.mxu1 %v4271_v60  ;;  %4383 = vmatpush.msra.mxu2 %v9486_v32  ;;  %v4288_v34 = vsub.f32 %v9486_v32, %v11057_v51  ;;  %v9513_v60 = vsub.f32 %v4088_v11, %v9499_v8  ;;  %v4294_v51 = vsub.f32 %v9497_v19, %v4293_v54 }
 0x589   : > { %4147 = vmatpush.msra.mxu0 %v9488_v56  ;;  %4462 = vmatpush.msra.mxu3 %v9488_v56  ;;  %v9526_v11 = vsub.f32 %v4087_v58, %v9515_v15 }
 0x58a   : > { %4278 = vmatpush.msra.mxu1 %v4277_v4  ;;  %4386 = vmatpush.msra.mxu2 %v9497_v19  ;;  %v4289_v4 = vand.u32 4294901760, %v4288_v34  ;;  %v11061_v30 = vand.u32 4294901760, %v9513_v60  ;;  %v4295_v14 = vand.u32 4294901760, %v4294_v51  ;;  %v11343_v39 = vand.u32 4294901760, %v9513_v60 }
 0x58b   : > { %4149 = vmatpush.msra.mxu0 %v9499_v8  ;;  %4464 = vmatpush.msra.mxu3 %v9499_v8  ;;  %v11062_v53 = vand.u32 4294901760, %v9526_v11 }
 0x58c   : > { %4284 = vmatpush.msra.mxu1 %v4283_v48  ;;  %4389 = vmatpush.msra.mxu2 %v9513_v60  ;;  %v4300_v34 = vsub.f32 %v9513_v60, %v11061_v30  ;;  %v9539_v48 = vsub.f32 %v4086_v50, %v9529_v18 }
 0x58d   : > { %4151 = vmatpush.msra.mxu0 %v9515_v15  ;;  %4466 = vmatpush.msra.mxu3 %v9515_v15  ;;  %v4306_v51 = vsub.f32 %v9526_v11, %v11062_v53 }
 0x58e   : > { %4290 = vmatpush.msra.mxu1 %v4289_v4  ;;  %4392 = vmatpush.msra.mxu2 %v9526_v11  ;;  %v4301_v58 = vand.u32 4294901760, %v4300_v34  ;;  %v4311_v30 = vand.u32 4294901760, %v9539_v48 }
 0x58f   : > { %4468 = vmatpush.msra.mxu3 %v9529_v18  ;;  %4153 = vmatpush.msra.mxu0 %v9529_v18  ;;  %v4307_v4 = vand.u32 4294901760, %v4306_v51 }
 0x590   : > { %4296 = vmatpush.msra.mxu1 %v4295_v14  ;;  %4395 = vmatpush.msra.mxu2 %v9539_v48  ;;  %v4312_v50 = vsub.f32 %v9539_v48, %v4311_v30 }
 0x591   : > { %4521 = vmatpush.msrb.mxu0 %v4221_v47  ;;  %v11339_v47 = vand.u32 4294901760, %v9449_v40 }
 0x592   : > { %4302 = vmatpush.msra.mxu1 %v4301_v58  ;;  %v4313_v34 = vand.u32 4294901760, %v4312_v50  ;;  %v11344_v58 = vand.u32 4294901760, %v9526_v11 }
 0x593   : > { %4525 = vmatpush.msrb.mxu0 %v4227_v42  ;;  %v11340_v42 = vand.u32 4294901760, %v9462_v23 }
 0x594   : > { %4308 = vmatpush.msra.mxu1 %v4307_v4  ;;  %v4117_v4 = vld [vmem:[%s6621_s7 + $0xf8] sm:$0xff] }
 0x595   : > { %4529 = vmatpush.msrb.mxu0 %v4233_v27  ;;  %v9626_v50 = vand.u32 4294901760, %v4117_v4 }
 0x596   : > { %4314 = vmatpush.msra.mxu1 %v4313_v34 }
 0x597   : > { %4533 = vmatpush.msrb.mxu0 %v4239_v2  ;;  %v9589_v2 = vld [vmem:[%s648_s19] sm:$0x3]  ;;  %4681 = vmatpush.msrb.mxu2 %v9626_v50 }
 0x598   : > { %4616 = vmatpush.msrb.mxu1 %v9303_v49  ;;  %v11337_v49 = vand.u32 4294901760, %v9403_v7 }
 0x599   : > { %4537 = vmatpush.msrb.mxu0 %v4245_v13 }
 0x59a   : > { %4618 = vmatpush.msrb.mxu1 %v9305_v10  ;;  %v11338_v10 = vand.u32 4294901760, %v9436_v17 }
 0x59b   : > { %4541 = vmatpush.msrb.mxu0 %v4251_v46  ;;  %v11342_v46 = vand.u32 4294901760, %v9486_v32 }
 0x59c   : > { %4620 = vmatpush.msrb.mxu1 %v9307_v1 }
 0x59d   : > { %4545 = vmatpush.msrb.mxu0 %v11337_v49 }
 0x59e   : > { %4622 = vmatpush.msrb.mxu1 %v9318_v0 }
 0x59f   : > { %4549 = vmatpush.msrb.mxu0 %v11338_v10 }
 0x5a0   : > { %4624 = vmatpush.msrb.mxu1 %v9320_v44 }
 0x5a1   : > { %4553 = vmatpush.msrb.mxu0 %v11339_v47 }
 0x5a2   : > { %4626 = vmatpush.msrb.mxu1 %v9333_v20 }
 0x5a3   : > { %4557 = vmatpush.msrb.mxu0 %v11340_v42 }
 0x5a4   : > { %4628 = vmatpush.msrb.mxu1 %v9387_v43 }
 0x5a5   : > { %4561 = vmatpush.msrb.mxu0 %v11341_v29 }
 0x5a6   : > { %4630 = vmatpush.msrb.mxu1 %v9431_v3  ;;  %v9601_v3 = vld [vmem:[%s652_s29] sm:$0x3] }
 0x5a7   : > { %4565 = vmatpush.msrb.mxu0 %v11342_v46 }
 0x5a8   : > { %4632 = vmatpush.msrb.mxu1 %v9440_v35  ;;  %v9607_v35 = vperm.slane %v9589_v2, 0 }
 0x5a9   : > { %4569 = vmatpush.msrb.mxu0 %v4293_v54 }
 0x5aa   : > { %4634 = vmatpush.msrb.mxu1 %v9452_v33  ;;  %v9616_v33 = vperm.slane %v9601_v3, 0 }
 0x5ab   : > { %4573 = vmatpush.msrb.mxu0 %v11343_v39 }
 0x5ac   : > { %4636 = vmatpush.msrb.mxu1 %v9466_v62 }
 0x5ad   : > { %4577 = vmatpush.msrb.mxu0 %v11344_v58 }
 0x5ae   : > { %4638 = vmatpush.msrb.mxu1 %v9474_v31 }
 0x5af   : > { %4581 = vmatpush.msrb.mxu0 %v4311_v30 }
 0x5b0   : > { %4640 = vmatpush.msrb.mxu1 %v9488_v56 }
 0x5b2   : > { %4642 = vmatpush.msrb.mxu1 %v9499_v8 }
 0x5b4   : > { %4644 = vmatpush.msrb.mxu1 %v9515_v15 }
 0x5b6   : > { %4646 = vmatpush.msrb.mxu1 %v9529_v18 }
 0x5bf   : > { %v3894_v53 = vpop.xlane.xlu1 %3893 }
 0x5c0   : > { %v3916_v14 = vmul.f32 %v3894_v53, %v9253_v25 }
 0x5c2   : > { %v3924_v57 = vadd.f32 1e-05, %v3916_v14 }
 0x5c4   : > { %6395 = vrsqrt.f32 %v3924_v57  ;;  %vm3938_vm4 = vweird.f32 %v3924_v57 }
 0x5c7   : > { %v3897_v63 = vpop.xlane.xlu2 %3896 }
 0x5c8   : > { %v3917_v61 = vmul.f32 %v3897_v63, %v9253_v25  ;;  %v4116_v63 = vld [vmem:[%s6621_s7 + $0xf0] sm:$0xff] }
 0x5ca   : > { %v6396_v55 = vpop.eup %6395  ;;  %v3925_v26 = vadd.f32 1e-05, %v3917_v61 }
 0x5cb   : > { %v3933_v1 = vmul.f32 %v6396_v55, %v3924_v57  ;;  %vm3939_vm3 = vweird.f32 %v6396_v55  ;;  %v9641_v57 = vsub.f32 %v4117_v4, %v9626_v50 }
 0x5cc   : > { %6397 = vrsqrt.f32 %v3925_v26  ;;  %vm3940_vm5 = vmor %vm3938_vm4, %vm3939_vm3  ;;  %vm3948_vm7 = vweird.f32 %v3925_v26 }
 0x5cd   : > { %v3934_v0 = vmul.f32 %v6396_v55, %v3933_v1 }
 0x5cf   : > { %v3935_v44 = vmul.f32 0.5, %v3934_v0  ;;  %v3900_v27 = vpop.xlane.xlu0 %3899  ;;  %v11070_v0 = vand.u32 4294901760, %v9641_v57 }
 0x5d0   : > { %v3918_v20 = vmul.f32 %v3900_v27, %v9253_v25  ;;  %v9667_v27 = vperm.slane %v9589_v2, 1 }
 0x5d1   : > { %v3936_v13 = vsub.f32 1.5, %v3935_v44  ;;  %v4114_v44 = vld [vmem:[%s6621_s7 + $0xe0] sm:$0xff] }
 0x5d2   : > { %v6398_v43 = vpop.eup %6397  ;;  %v9594_v7 = vadd.f32 1e-05, %v3918_v20 }
 0x5d3   : > { %v3937_v53 = vmul.f32 %v6396_v55, %v3936_v13  ;;  %v3943_v17 = vmul.f32 %v6398_v43, %v3925_v26  ;;  %vm3949_vm6 = vweird.f32 %v6398_v43  ;;  %v4115_v26 = vld [vmem:[%s6621_s7 + $0xe8] sm:$0xff] }
 0x5d4   : > { %6399 = vrsqrt.f32 %v9594_v7  ;;  %vm3950_vm8 = vmor %vm3948_vm7, %vm3949_vm6  ;;  %v9672_v13 = vand.u32 4294901760, %v4115_v26  ;;  %vm3958_vm10 = vweird.f32 %v9594_v7 }
 0x5d5   : > { %v9610_v40 = vsel %vm3940_vm5, %v6396_v55, %v3937_v53  ;;  %v3944_v23 = vmul.f32 %v6398_v43, %v3943_v17  ;;  %v9649_v55 = vand.u32 4294901760, %v4116_v63  ;;  %v4780_v17 = vsub.f32 %v9641_v57, %v11070_v0 }
 0x5d6   : > { %v4012_v32 = vmul.f32 %v9610_v40, %v9257_v12  ;;  %v4013_v58 = vmul.f32 %v9610_v40, %v9260_v22 }
 0x5d7   : > { %v3945_v19 = vmul.f32 0.5, %v3944_v23  ;;  %v3903_v54 = vpop.xlane.xlu2 %3902  ;;  %4683 = vmatpush.msrb.mxu2 %v9649_v55  ;;  %v9660_v42 = vsub.f32 %v4116_v63, %v9649_v55  ;;  %v4781_v4 = vand.u32 4294901760, %v4780_v17  ;;  %v4112_v17 = vld [vmem:[%s6621_s7 + $0xd0] sm:$0xff] }
 0x5d8   : > { %v4033_v51 = vmul.f32 %v9607_v35, %v4012_v32  ;;  %v3919_v62 = vmul.f32 %v3903_v54, %v9253_v25  ;;  %v4113_v54 = vld [vmem:[%s6621_s7 + $0xd8] sm:$0xff] }
 0x5d9   : > { %v3946_v60 = vsub.f32 1.5, %v3945_v19  ;;  %4685 = vmatpush.msrb.mxu2 %v9672_v13  ;;  %v11069_v19 = vand.u32 4294901760, %v9660_v42  ;;  %4782 = vmatpush.msrb.mxu3 %v4781_v4  ;;  %v9710_v40 = vand.u32 4294901760, %v4113_v54 }
 0x5da   : > { %v6400_v12 = vpop.eup %6399  ;;  %v4054_v31 = vadd.f32 %v9616_v33, %v4033_v51  ;;  %v9632_v11 = vadd.f32 1e-05, %v3919_v62 }
 0x5db   : > { %v3947_v34 = vmul.f32 %v6398_v43, %v3946_v60  ;;  %v3953_v14 = vmul.f32 %v6400_v12, %v9594_v7  ;;  %vm3959_vm9 = vweird.f32 %v6400_v12  ;;  %v9684_v7 = vand.u32 4294901760, %v4114_v44 }
 0x5dc   : > { %6401 = vrsqrt.f32 %v9632_v11  ;;  %v4070_v56 = vmax.f32 %v4054_v31, 0.0  ;;  %vm3960_vm11 = vmor %vm3958_vm10, %vm3959_vm9  ;;  %vm3968_vm13 = vweird.f32 %v9632_v11 }
 0x5dd   : > { %v9638_v48 = vsel %vm3950_vm8, %v6398_v43, %v3947_v34  ;;  %v3954_v30 = vmul.f32 %v6400_v12, %v3953_v14  ;;  %4687 = vmatpush.msrb.mxu2 %v9684_v7  ;;  %v4786_v34 = vsub.f32 %v9660_v42, %v11069_v19  ;;  %v9703_v14 = vsub.f32 %v4115_v26, %v9672_v13 }
 0x5de   : > { %v4014_v49 = vmul.f32 %v9638_v48, %v9268_v37  ;;  %v9647_v61 = vand.u32 4294901760, %v4070_v56 }
 0x5df   : > { %v3955_v8 = vmul.f32 0.5, %v3954_v30  ;;  %v3906_v10 = vpop.xlane.xlu0 %3905  ;;  %v4787_v63 = vand.u32 4294901760, %v4786_v34  ;;  %4689 = vmatpush.msrb.mxu2 %v9710_v40  ;;  %v4111_v34 = vld [vmem:[%s6621_s7 + $0xc8] sm:$0xff] }
 0x5e0   : > { %v4035_v1 = vmul.f32 %v9607_v35, %v4014_v49  ;;  %v3920_v47 = vmul.f32 %v3906_v10, %v9253_v25  ;;  %4316 = vmatmul.f32.vlgmr.msra.gmra.mxu1 %v9647_v61  ;;  %v4155_v37 = vsub.f32 %v4070_v56, %v9647_v61  ;;  %v11067_v49 = vand.u32 4294901760, %v9703_v14 }
 0x5e1   : > { %v3956_v15 = vsub.f32 1.5, %v3955_v8  ;;  %4996 = vmatpush.msra.mxu1 %v9626_v50  ;;  %4788 = vmatpush.msrb.mxu3 %v4787_v63 }
 0x5e2   : > { %v9664_v18 = vpop.eup %6401  ;;  %v9669_v29 = vadd.f32 1e-05, %v3920_v47  ;;  %v4056_v20 = vadd.f32 %v9616_v33, %v4035_v1  ;;  %4398 = vmatmul.f32.vlgmr.msra.gmra.mxu2 %v4155_v37  ;;  %v4156_v53 = vand.u32 4294901760, %v4155_v37  ;;  %v9721_v1 = vsub.f32 %v4114_v44, %v9684_v7 }
 0x5e3   : > { %v3957_v46 = vmul.f32 %v6400_v12, %v3956_v15  ;;  %v3963_v43 = vmul.f32 %v9664_v18, %v9632_v11  ;;  %4998 = vmatpush.msra.mxu1 %v9649_v55  ;;  %vm3969_vm12 = vweird.f32 %v9664_v18  ;;  %v9729_v11 = vsub.f32 %v4113_v54, %v9710_v40 }
 0x5e4   : > { %6403 = vrsqrt.f32 %v9669_v29  ;;  %v4072_v2 = vmax.f32 %v4056_v20, 0.0  ;;  %4472 = vmatmul.f32.vlgmr.msra.gmra.mxu3 %v4156_v53  ;;  %v4157_v32 = vsub.f32 %v4155_v37, %v4156_v53  ;;  %v9732_v20 = vperm.slane %v9601_v3, 1  ;;  %vm3970_vm14 = vmor %vm3968_vm13, %vm3969_vm12 }
 0x5e5   : > { %v9686_v23 = vsel %vm3960_vm11, %v6400_v12, %v3957_v46  ;;  %v3964_v39 = vmul.f32 %v9664_v18, %v3963_v43  ;;  %5000 = vmatpush.msra.mxu1 %v9672_v13  ;;  %v4792_v46 = vsub.f32 %v9703_v14, %v11067_v49  ;;  %vm3978_vm0 = vweird.f32 %v9669_v29  ;;  %v4106_v49 = vld [vmem:[%s6621_s7 + $0xa0] sm:$0xff] }
 0x5e6   : > { %v4016_v51 = vmul.f32 %v9686_v23, %v9279_v16  ;;  %v9696_v62 = vand.u32 4294901760, %v4072_v2  ;;  %v4158_v31 = vand.u32 4294901760, %v4157_v32 }
 0x5e7   : > { %v3965_v60 = vmul.f32 0.5, %v3964_v39  ;;  %v3909_v12 = vpop.xlane.xlu2 %3908  ;;  %5002 = vmatpush.msra.mxu1 %v9684_v7  ;;  %v4034_v39 = vmul.f32 %v9667_v27, %v4013_v58 }
 0x5e8   : > { %v4037_v22 = vmul.f32 %v9607_v35, %v4016_v51  ;;  %v3921_v16 = vmul.f32 %v3909_v12, %v9253_v25  ;;  %4320 = vmatmul.f32.gmra.mxu1 %v9696_v62  ;;  %4159 = vmatmul.f32.vlgmr.msra.gmra.mxu0 %v4158_v31  ;;  %v4163_v30 = vsub.f32 %v4072_v2, %v9696_v62  ;;  %v11066_v2 = vand.u32 4294901760, %v9721_v1 }
 0x5e9   : > { %v3966_v56 = vsub.f32 1.5, %v3965_v60  ;;  %4908 = vmatpush.msra.mxu0 %v9641_v57  ;;  %5004 = vmatpush.msra.mxu1 %v9710_v40  ;;  %v4793_v51 = vand.u32 4294901760, %v4792_v46  ;;  %v11065_v31 = vand.u32 4294901760, %v9729_v11  ;;  %v9778_v46 = vand.u32 4294901760, %v4111_v34 }
 0x5ea   : > { %v9714_v8 = vpop.eup %6403  ;;  %v9717_v10 = vadd.f32 1e-05, %v3921_v16  ;;  %v4058_v26 = vadd.f32 %v9616_v33, %v4037_v22  ;;  %4403 = vmatmul.f32.gmra.mxu2 %v4163_v30  ;;  %v4164_v37 = vand.u32 4294901760, %v4163_v30  ;;  %v4798_v12 = vsub.f32 %v9721_v1, %v11066_v2 }
 0x5eb   : > { %v3967_v47 = vmul.f32 %v9664_v18, %v3966_v56  ;;  %v3973_v15 = vmul.f32 %v9714_v8, %v9669_v29  ;;  %4911 = vmatpush.msra.mxu0 %v9660_v42  ;;  %vm3979_vm15 = vweird.f32 %v9714_v8  ;;  %4794 = vmatpush.msrb.mxu3 %v4793_v51  ;;  %v9763_v22 = vand.u32 4294901760, %v4112_v17  ;;  %v4110_v51 = vld [vmem:[%s6621_s7 + $0xc0] sm:$0xff] }
 0x5ec   : > { %6405 = vrsqrt.f32 %v9717_v10  ;;  %v4074_v44 = vmax.f32 %v4058_v26, 0.0  ;;  %4478 = vmatmul.f32.gmra.mxu3 %v4164_v37  ;;  %v4165_v53 = vsub.f32 %v4163_v30, %v4164_v37  ;;  %v4799_v30 = vand.u32 4294901760, %v4798_v12  ;;  %vm3980_vm1 = vmor %vm3978_vm0, %vm3979_vm15 }
 0x5ed   : > { %v9743_v43 = vsel %vm3970_vm14, %v9664_v18, %v3967_v47  ;;  %v3974_v3 = vmul.f32 %v9714_v8, %v3973_v15  ;;  %4914 = vmatpush.msra.mxu0 %v9703_v14  ;;  %v4804_v63 = vsub.f32 %v9729_v11, %v11065_v31  ;;  %4691 = vmatpush.msrb.mxu2 %v9763_v22  ;;  %vm3988_vm3 = vweird.f32 %v9717_v10  ;;  %v4107_v31 = vld [vmem:[%s6621_s7 + $0xa8] sm:$0xff] }
 0x5ee   : > { %v4018_v32 = vmul.f32 %v9743_v43, %v9290_v59  ;;  %v9751_v54 = vand.u32 4294901760, %v4074_v44  ;;  %v4166_v60 = vand.u32 4294901760, %v4165_v53  ;;  %v9776_v37 = vsub.f32 %v4112_v17, %v9763_v22  ;;  %4800 = vmatpush.msrb.mxu3 %v4799_v30  ;;  %5006 = vmatpush.msra.mxu1 %v9763_v22 }
 0x5ef   : > { %v3975_v18 = vmul.f32 0.5, %v3974_v3  ;;  %v3912_v4 = vpop.xlane.xlu0 %3911  ;;  %4917 = vmatpush.msra.mxu0 %v9721_v1  ;;  %4693 = vmatpush.msrb.mxu2 %v9778_v46  ;;  %v9798_v12 = vadd.f32 %v9732_v20, %v4034_v39  ;;  %v9811_v39 = vand.u32 4294901760, %v4110_v51 }
 0x5f0   : > { %v4039_v58 = vmul.f32 %v9607_v35, %v4018_v32  ;;  %v3922_v59 = vmul.f32 %v3912_v4, %v9253_v25  ;;  %4324 = vmatmul.f32.gmra.mxu1 %v9751_v54  ;;  %4167 = vmatmul.f32.gmra.mxu0 %v4166_v60  ;;  %v4171_v56 = vsub.f32 %v4074_v44, %v9751_v54  ;;  %v4805_v32 = vand.u32 4294901760, %v4804_v63 }
 0x5f1   : > { %v3976_v16 = vsub.f32 1.5, %v3975_v18  ;;  %4920 = vmatpush.msra.mxu0 %v9729_v11  ;;  %v11063_v60 = vand.u32 4294901760, %v9776_v37  ;;  %5008 = vmatpush.msra.mxu1 %v9778_v46 }
 0x5f2   : > { %v9769_v26 = vpop.eup %6405  ;;  %v9771_v47 = vadd.f32 1e-05, %v3922_v59  ;;  %v4060_v15 = vadd.f32 %v9616_v33, %v4039_v58  ;;  %4408 = vmatmul.f32.gmra.mxu2 %v4171_v56  ;;  %v4172_v53 = vand.u32 4294901760, %v4171_v56  ;;  %4806 = vmatpush.msrb.mxu3 %v4805_v32 }
 0x5f3   : > { %v3977_v44 = vmul.f32 %v9714_v8, %v3976_v16  ;;  %v3983_v3 = vmul.f32 %v9769_v26, %v9717_v10  ;;  %4923 = vmatpush.msra.mxu0 %v9776_v37  ;;  %v4810_v63 = vsub.f32 %v9776_v37, %v11063_v60  ;;  %vm3989_vm2 = vweird.f32 %v9769_v26  ;;  %4695 = vmatpush.msrb.mxu2 %v9811_v39  ;;  %v4108_v10 = vld [vmem:[%s6621_s7 + $0xb0] sm:$0xff] }
 0x5f4   : > { %6407 = vrsqrt.f32 %v9771_v47  ;;  %v4076_v17 = vmax.f32 %v4060_v15, 0.0  ;;  %4484 = vmatmul.f32.gmra.mxu3 %v4172_v53  ;;  %v4173_v4 = vsub.f32 %v4171_v56, %v4172_v53  ;;  %v4109_v15 = vld [vmem:[%s6621_s7 + $0xb8] sm:$0xff]  ;;  %5010 = vmatpush.msra.mxu1 %v9811_v39  ;;  %vm3990_vm4 = vmor %vm3988_vm3, %vm3989_vm2  ;;  %vm3998_vm6 = vweird.f32 %v9771_v47 }
 0x5f5   : > { %v9792_v29 = vsel %vm3980_vm1, %v9714_v8, %v3977_v44  ;;  %v3984_v18 = vmul.f32 %v9769_v26, %v3983_v3  ;;  %v9805_v8 = vsub.f32 %v4111_v34, %v9778_v46  ;;  %v4811_v53 = vand.u32 4294901760, %v4810_v63 }
 0x5f6   : > { %v4020_v58 = vmul.f32 %v9792_v29, %v9313_v38  ;;  %v9802_v59 = vand.u32 4294901760, %v4076_v17  ;;  %v4174_v30 = vand.u32 4294901760, %v4173_v4 }
 0x5f7   : > { %v3985_v16 = vmul.f32 0.5, %v3984_v18  ;;  %v3915_v56 = vpop.xlane.xlu2 %3914  ;;  %v11064_v32 = vand.u32 4294901760, %v9805_v8  ;;  %v9823_v18 = vsub.f32 %v4110_v51, %v9811_v39  ;;  %4926 = vmatpush.msra.mxu0 %v9805_v8  ;;  %4812 = vmatpush.msrb.mxu3 %v4811_v53 }
 0x5f8   : > { %11345 = vst [vmem:[#allocation39_spill] sm:$0xff] %v9802_v59  ;;  %v4041_v38 = vmul.f32 %v9607_v35, %v4020_v58  ;;  %v3923_v34 = vmul.f32 %v3915_v56, %v9253_v25  ;;  %4328 = vmatmul.f32.gmra.mxu1 %v9802_v59  ;;  %v4179_v44 = vsub.f32 %v4076_v17, %v9802_v59  ;;  %v9830_v56 = vand.u32 4294901760, %v4109_v15 }
 0x5f9   : > { %v3986_v3 = vsub.f32 1.5, %v3985_v16  ;;  %4175 = vmatmul.f32.gmra.mxu0 %v4174_v30  ;;  %v4816_v16 = vsub.f32 %v9805_v8, %v11064_v32  ;;  %v11068_v32 = vand.u32 4294901760, %v9823_v18 }
 0x5fa   : > { %v9825_v4 = vpop.eup %6407  ;;  %v9827_v58 = vadd.f32 1e-05, %v3923_v34  ;;  %v4180_v60 = vand.u32 4294901760, %v4179_v44  ;;  %v4062_v25 = vadd.f32 %v9616_v33, %v4041_v38  ;;  %4413 = vmatmul.f32.gmra.mxu2 %v4179_v44  ;;  %4929 = vmatpush.msra.mxu0 %v9823_v18 }
 0x5fb   : > { %v3987_v17 = vmul.f32 %v9769_v26, %v3986_v3  ;;  %v3993_v51 = vmul.f32 %v9825_v4, %v9771_v47  ;;  %4697 = vmatpush.msrb.mxu2 %v9830_v56  ;;  %v4817_v53 = vand.u32 4294901760, %v4816_v16  ;;  %5012 = vmatpush.msra.mxu1 %v9830_v56  ;;  %v9869_v16 = vand.u32 4294901760, %v4108_v10 }
 0x5fc   : > { %6409 = vrsqrt.f32 %v9827_v58  ;;  %v4181_v63 = vsub.f32 %v4179_v44, %v4180_v60  ;;  %v4078_v38 = vmax.f32 %v4062_v25, 0.0  ;;  %4490 = vmatmul.f32.gmra.mxu3 %v4180_v60  ;;  %v9857_v44 = vmul.f32 %v9638_v48, %v9271_v21 }
 0x5fd   : > { %v9849_v34 = vsel %vm3990_vm4, %v9769_v26, %v3987_v17  ;;  %v3994_v3 = vmul.f32 %v9825_v4, %v3993_v51  ;;  %4818 = vmatpush.msrb.mxu3 %v4817_v53  ;;  %v4822_v60 = vsub.f32 %v9823_v18, %v11068_v32  ;;  %v9867_v51 = vsub.f32 %v4109_v15, %v9830_v56 }
 0x5fe   : > { %v4022_v25 = vmul.f32 %v9849_v34, %v9377_v41  ;;  %v4182_v2 = vand.u32 4294901760, %v4181_v63  ;;  %v9861_v26 = vand.u32 4294901760, %v4078_v38  ;;  %vm3999_vm5 = vweird.f32 %v9825_v4  ;;  %4699 = vmatpush.msrb.mxu2 %v9869_v16  ;;  %5014 = vmatpush.msra.mxu1 %v9869_v16 }
 0x5ff   : > { %v3995_v17 = vmul.f32 0.5, %v3994_v3  ;;  %v9876_v48 = vand.u32 4294901760, %v4107_v31  ;;  %v4823_v3 = vand.u32 4294901760, %v4822_v60  ;;  %v11071_v53 = vand.u32 4294901760, %v9867_v51  ;;  %4932 = vmatpush.msra.mxu0 %v9867_v51  ;;  %vm4000_vm7 = vmor %vm3998_vm6, %vm3999_vm5 }
 0x600   : > { %11346 = vst [vmem:[#allocation42_spill] sm:$0xff] %v9861_v26  ;;  %v4043_v21 = vmul.f32 %v9607_v35, %v4022_v25  ;;  %4332 = vmatmul.f32.gmra.mxu1 %v9861_v26  ;;  %v4187_v41 = vsub.f32 %v4078_v38, %v9861_v26  ;;  %v9881_v15 = vsub.f32 %v4108_v10, %v9869_v16  ;;  %v9889_v38 = vand.u32 4294901760, %v4106_v49  ;;  %v4102_v26 = vld [vmem:[%s6621_s7 + $0x80] sm:$0xff] }
 0x601   : > { %11347 = vst [vmem:[#allocation54_spill] sm:$0xff] %v9876_v48  ;;  %v3996_v63 = vsub.f32 1.5, %v3995_v17  ;;  %4183 = vmatmul.f32.gmra.mxu0 %v4182_v2  ;;  %v9887_v0 = vsub.f32 %v4107_v31, %v9876_v48  ;;  %4824 = vmatpush.msrb.mxu3 %v4823_v3  ;;  %v4828_v31 = vsub.f32 %v9867_v51, %v11071_v53  ;;  %vm4008_vm8 = vweird.f32 %v9827_v58 }
 0x602   : > { %v9883_v32 = vpop.eup %6409  ;;  %v4188_v25 = vand.u32 4294901760, %v4187_v41  ;;  %v4064_v19 = vadd.f32 %v9616_v33, %v4043_v21  ;;  %11348 = vst [vmem:[#allocation40_spill] sm:$0xff] %v9889_v38  ;;  %4418 = vmatmul.f32.gmra.mxu2 %v4187_v41  ;;  %v11072_v21 = vand.u32 4294901760, %v9881_v15  ;;  %4935 = vmatpush.msra.mxu0 %v9881_v15  ;;  %v9911_v30 = vsub.f32 %v4106_v49, %v9889_v38 }
 0x603   : > { %v3997_v2 = vmul.f32 %v9825_v4, %v3996_v63  ;;  %v4003_v10 = vmul.f32 %v9883_v32, %v9827_v58  ;;  %4701 = vmatpush.msrb.mxu2 %v9876_v48  ;;  %v4829_v53 = vand.u32 4294901760, %v4828_v31  ;;  %5016 = vmatpush.msra.mxu1 %v9876_v48  ;;  %v4104_v31 = vld [vmem:[%s6621_s7 + $0x90] sm:$0xff]  ;;  %vm4009_vm9 = vweird.f32 %v9883_v32 }
 0x604   : > { %v4189_v17 = vsub.f32 %v4187_v41, %v4188_v25  ;;  %v4080_v60 = vmax.f32 %v4064_v19, 0.0  ;;  %4496 = vmatmul.f32.gmra.mxu3 %v4188_v25  ;;  %v4105_v19 = vld [vmem:[%s6621_s7 + $0x98] sm:$0xff]  ;;  %4938 = vmatpush.msra.mxu0 %v9887_v0  ;;  %v4834_v49 = vsub.f32 %v9881_v15, %v11072_v21  ;;  %v4103_v21 = vld [vmem:[%s6621_s7 + $0x88] sm:$0xff]  ;;  %v11351_v24 = vand.u32 4294901760, %v9911_v30  ;;  %vm4010_vm10 = vmor %vm4008_vm8, %vm4009_vm9 }
 0x605   : > { %v9907_v63 = vsel %vm4000_vm7, %v9825_v4, %v3997_v2  ;;  %v4004_v3 = vmul.f32 %v9883_v32, %v4003_v10  ;;  %4703 = vmatpush.msrb.mxu2 %v9889_v38  ;;  %4830 = vmatpush.msrb.mxu3 %v4829_v53  ;;  %v11350_v2 = vand.u32 4294901760, %v9887_v0 }
 0x606   : > { %v4024_v41 = vmul.f32 %v9907_v63, %v9409_v9  ;;  %v4190_v47 = vand.u32 4294901760, %v4189_v17  ;;  %v9918_v4 = vand.u32 4294901760, %v4080_v60  ;;  %5018 = vmatpush.msra.mxu1 %v9889_v38  ;;  %4941 = vmatpush.msra.mxu0 %v9911_v30  ;;  %v4835_v10 = vand.u32 4294901760, %v4834_v49 }
 0x607   : > { %v4005_v25 = vmul.f32 0.5, %v4004_v3  ;;  %v4840_v9 = vsub.f32 %v9887_v0, %v11350_v2  ;;  %v9935_v3 = vand.u32 4294901760, %v4105_v19  ;;  %v9952_v49 = vand.u32 4294901760, %v4103_v21 }
 0x608   : > { %11349 = vst [vmem:[#allocation41_spill] sm:$0xff] %v9918_v4  ;;  %v4045_v17 = vmul.f32 %v9607_v35, %v4024_v41  ;;  %4336 = vmatmul.f32.gmra.mxu1 %v9918_v4  ;;  %v4195_v53 = vsub.f32 %v4080_v60, %v9918_v4  ;;  %v4846_v41 = vsub.f32 %v9911_v30, %v11351_v24  ;;  %v9948_v4 = vand.u32 4294901760, %v4104_v31 }
 0x609   : > { %v4006_v2 = vsub.f32 1.5, %v4005_v25  ;;  %4191 = vmatmul.f32.gmra.mxu0 %v4190_v47  ;;  %v4841_v59 = vand.u32 4294901760, %v4840_v9  ;;  %4705 = vmatpush.msrb.mxu2 %v9935_v3  ;;  %v9946_v60 = vsub.f32 %v4105_v19, %v9935_v3  ;;  %11352 = vst [vmem:[#allocation46_spill] sm:$0xff] %v9952_v49  ;;  %v9954_v24 = vand.u32 4294901760, %v4102_v26 }
 0x60a   : > { %v4196_v38 = vand.u32 4294901760, %v4195_v53  ;;  %v4066_v48 = vadd.f32 %v9616_v33, %v4045_v17  ;;  %5020 = vmatpush.msra.mxu1 %v9935_v3  ;;  %4423 = vmatmul.f32.gmra.mxu2 %v4195_v53  ;;  %v4847_v25 = vand.u32 4294901760, %v4846_v41  ;;  %v9970_v41 = vsub.f32 %v4103_v21, %v9952_v49 }
 0x60b   : > { %v4007_v47 = vmul.f32 %v9883_v32, %v4006_v2  ;;  %4836 = vmatpush.msrb.mxu3 %v4835_v10  ;;  %4707 = vmatpush.msrb.mxu2 %v9948_v4  ;;  %v9963_v2 = vsub.f32 %v4104_v31, %v9948_v4  ;;  %v9973_v58 = vsub.f32 %v4102_v26, %v9954_v24 }
 0x60c   : > { %v4197_v19 = vsub.f32 %v4195_v53, %v4196_v38  ;;  %v4082_v9 = vmax.f32 %v4066_v48, 0.0  ;;  %4944 = vmatpush.msra.mxu0 %v9946_v60  ;;  %4502 = vmatmul.f32.gmra.mxu3 %v4196_v38  ;;  %v4036_v48 = vmul.f32 %v9667_v27, %v9857_v44 }
 0x60d   : > { %v9967_v10 = vsel %vm4010_vm10, %v9883_v32, %v4007_v47  ;;  %5022 = vmatpush.msra.mxu1 %v9948_v4  ;;  %4842 = vmatpush.msrb.mxu3 %v4841_v59  ;;  %v11354_v32 = vand.u32 4294901760, %v9946_v60  ;;  %v11083_v26 = vand.u32 4294901760, %v9963_v2 }
 0x60e   : > { %v4026_v31 = vmul.f32 %v9967_v10, %v9421_v6  ;;  %v4198_v53 = vand.u32 4294901760, %v4197_v19  ;;  %v9980_v17 = vand.u32 4294901760, %v4082_v9  ;;  %4709 = vmatpush.msrb.mxu2 %v9952_v49  ;;  %4947 = vmatpush.msra.mxu0 %v9963_v2  ;;  %v11355_v6 = vmax.f32 %v9798_v12, 0.0 }
 0x60f   : > { %v4852_v38 = vsub.f32 %v9946_v60, %v11354_v32  ;;  %5024 = vmatpush.msra.mxu1 %v9952_v49  ;;  %4848 = vmatpush.msrb.mxu3 %v4847_v25  ;;  %v4869_v19 = vand.u32 4294901760, %v9973_v58  ;;  %v4017_v32 = vmul.f32 %v9686_v23, %v9282_v52  ;;  %v4858_v49 = vsub.f32 %v9963_v2, %v11083_v26 }
 0x610   : > { %11353 = vst [vmem:[#allocation56_spill] sm:$0xff] %v9980_v17  ;;  %v9992_v44 = vand.u32 4294901760, %v11355_v6  ;;  %v4047_v59 = vmul.f32 %v9607_v35, %v4026_v31  ;;  %4340 = vmatmul.f32.gmra.mxu1 %v9980_v17  ;;  %v4203_v47 = vsub.f32 %v4082_v9, %v9980_v17  ;;  %v11356_v6 = vand.u32 4294901760, %v9970_v41  ;;  %4711 = vmatpush.msrb.mxu2 %v9954_v24 }
 0x611   : > { %4199 = vmatmul.f32.gmra.mxu0 %v4198_v53  ;;  %v4853_v21 = vand.u32 4294901760, %v4852_v38  ;;  %v4870_v9 = vsub.f32 %v9973_v58, %v4869_v19  ;;  %v11357_v52 = vand.u32 4294901760, %v9641_v57  ;;  %v4057_v23 = vadd.f32 %v9732_v20, %v4036_v48  ;;  %5026 = vmatpush.msra.mxu1 %v9954_v24 }
 0x612   : > { %v4864_v35 = vsub.f32 %v9970_v41, %v11356_v6  ;;  %v4204_v31 = vand.u32 4294901760, %v4203_v47  ;;  %v4068_v25 = vadd.f32 %v9616_v33, %v4047_v59  ;;  %4428 = vmatmul.f32.gmra.mxu2 %v4203_v47  ;;  %v4859_v53 = vand.u32 4294901760, %v4858_v49  ;;  %4950 = vmatpush.msra.mxu0 %v9970_v41 }
 0x613   : > { %5079 = vmatpush.msra.mxu2 %v11357_v52  ;;  %4854 = vmatpush.msrb.mxu3 %v4853_v21  ;;  %v11358_v17 = vand.u32 4294901760, %v9660_v42  ;;  %v11359_v33 = vmax.f32 %v9798_v12, 0.0  ;;  %v4038_v48 = vmul.f32 %v9667_v27, %v4017_v32  ;;  %v4073_v59 = vmax.f32 %v4057_v23, 0.0 }
 0x614   : > { %v4205_v38 = vsub.f32 %v4203_v47, %v4204_v31  ;;  %v4084_v6 = vmax.f32 %v4068_v25, 0.0  ;;  %v4865_v26 = vand.u32 4294901760, %v4864_v35  ;;  %4508 = vmatmul.f32.gmra.mxu3 %v4204_v31  ;;  %v4871_v49 = vand.u32 4294901760, %v4870_v9  ;;  %4953 = vmatpush.msra.mxu0 %v9973_v58 }
 0x615   : > { %5083 = vmatpush.msra.mxu2 %v11358_v17  ;;  %v10021_v57 = vsub.f32 %v11359_v33, %v9992_v44  ;;  %4860 = vmatpush.msrb.mxu3 %v4859_v53  ;;  %v11360_v47 = vand.u32 4294901760, %v9703_v14  ;;  %v4019_v12 = vmul.f32 %v9743_v43, %v9293_v36  ;;  %v10034_v32 = vand.u32 4294901760, %v4073_v59 }
 0x616   : > { %v4206_v52 = vand.u32 4294901760, %v4205_v38  ;;  %v10024_v21 = vand.u32 4294901760, %v4084_v6  ;;  %v4059_v35 = vadd.f32 %v9732_v20, %v4038_v48  ;;  %v11361_v14 = vand.u32 4294901760, %v9721_v1 }
 0x617   : > { %5087 = vmatpush.msra.mxu2 %v11360_v47  ;;  %4866 = vmatpush.msrb.mxu3 %v4865_v26  ;;  %v4714_v17 = vand.u32 4294901760, %v10021_v57  ;;  %v11362_v26 = vand.u32 4294901760, %v9729_v11  ;;  %v4040_v36 = vmul.f32 %v9667_v27, %v4019_v12  ;;  %v10047_v9 = vsub.f32 %v4073_v59, %v10034_v32 }
 0x618   : > { %4344 = vmatmul.f32.gmra.mxu1 %v10024_v21  ;;  %v4211_v42 = vsub.f32 %v4084_v6, %v10024_v21  ;;  %v4075_v1 = vmax.f32 %v4059_v35, 0.0  ;;  %v4021_v11 = vmul.f32 %v9792_v29, %v9316_v28  ;;  %v11365_v28 = vand.u32 4294901760, %v9823_v18 }
 0x619   : > { %4207 = vmatmul.f32.gmra.mxu0 %v4206_v52  ;;  %5091 = vmatpush.msra.mxu2 %v11361_v14  ;;  %v4715_v43 = vsub.f32 %v10021_v57, %v4714_v17  ;;  %v4722_v38 = vand.u32 4294901760, %v10047_v9  ;;  %v4061_v33 = vadd.f32 %v9732_v20, %v4040_v36  ;;  %v11374_v35 = vand.u32 4294901760, %v9970_v41  ;;  %v11376_v14 = vld [vmem:[#allocation39_spill] sm:$0xff] }
 0x61a   : > { %v4212_v31 = vand.u32 4294901760, %v4211_v42  ;;  %4872 = vmatpush.msrb.mxu3 %v4871_v49  ;;  %4433 = vmatmul.f32.gmra.mxu2 %v4211_v42  ;;  %v10057_v6 = vand.u32 4294901760, %v4075_v1 }
 0x61b   : > { %5095 = vmatpush.msra.mxu2 %v11362_v26  ;;  %v4716_v53 = vand.u32 4294901760, %v4715_v43 }
 0x61c   : > { %5174 = vmatpush.msra.mxu3 %v9626_v50  ;;  %v4213_v25 = vsub.f32 %v4211_v42, %v4212_v31  ;;  %v11363_v50 = vand.u32 4294901760, %v9776_v37  ;;  %v4723_v37 = vsub.f32 %v10047_v9, %v4722_v38  ;;  %v10072_v29 = vsub.f32 %v4075_v1, %v10057_v6  ;;  %v11378_v1 = vld [vmem:[#allocation42_spill] sm:$0xff] }
 0x61d   : > { %4514 = vmatmul.f32.gmra.mxu3 %v4212_v31  ;;  %v11377_v31 = vld [vmem:[#allocation46_spill] sm:$0xff] }
 0x61e   : > { %v4214_v23 = vand.u32 4294901760, %v4213_v25  ;;  %5176 = vmatpush.msra.mxu3 %v9649_v55  ;;  %5099 = vmatpush.msra.mxu2 %v11363_v50  ;;  %v11364_v55 = vand.u32 4294901760, %v9805_v8  ;;  %v4077_v8 = vmax.f32 %v4061_v33, 0.0  ;;  %v4724_v18 = vand.u32 4294901760, %v4723_v37  ;;  %v11380_v37 = vld [vmem:[#allocation56_spill] sm:$0xff] }
 0x61f   : > { %v4730_v48 = vand.u32 4294901760, %v10072_v29 }
 0x620   : > { %4648 = vmatmul.f32.vlgmr.msrb.gmra.mxu1 %v9647_v61  ;;  %5178 = vmatpush.msra.mxu3 %v9672_v13  ;;  %v4042_v13 = vmul.f32 %v9667_v27, %v4021_v11  ;;  %v10083_v59 = vand.u32 4294901760, %v4077_v8 }
 0x621   : > { %4215 = vmatmul.f32.gmra.mxu0 %v4214_v23  ;;  %5103 = vmatpush.msra.mxu2 %v11364_v55 }
 0x622   : > { %5180 = vmatpush.msra.mxu3 %v9684_v7  ;;  %4717 = vmatmul.f32.vlgmr.msrb.gmra.mxu2 %v4716_v53  ;;  %v11366_v7 = vand.u32 4294901760, %v9867_v51  ;;  %v4063_v52 = vadd.f32 %v9732_v20, %v4042_v13  ;;  %v11379_v53 = vld [vmem:[#allocation41_spill] sm:$0xff] }
 0x623   : > { %5107 = vmatpush.msra.mxu2 %v11365_v28 }
 0x624   : > { %5182 = vmatpush.msra.mxu3 %v9710_v40  ;;  %v4023_v40 = vmul.f32 %v9849_v34, %v9380_v45  ;;  %v11368_v45 = vand.u32 4294901760, %v9887_v0  ;;  %v10098_v34 = vsub.f32 %v4077_v8, %v10083_v59  ;;  %v4079_v51 = vmax.f32 %v4063_v52, 0.0 }
 0x625   : > { %4874 = vmatmul.f32.vlgmr.msrb.gmra.mxu3 %v9992_v44  ;;  %5111 = vmatpush.msra.mxu2 %v11366_v7  ;;  %v4025_v0 = vmul.f32 %v9907_v63, %v9412_v5  ;;  %v11373_v5 = vand.u32 4294901760, %v9963_v2 }
 0x626   : > { %5184 = vmatpush.msra.mxu3 %v9763_v22  ;;  %v11367_v22 = vand.u32 4294901760, %v9881_v15  ;;  %v4738_v49 = vand.u32 4294901760, %v10098_v34  ;;  %v10109_v47 = vand.u32 4294901760, %v4079_v51 }
 0x628   : > { %4652 = vmatmul.f32.gmra.mxu1 %v9696_v62  ;;  %5186 = vmatpush.msra.mxu3 %v9778_v46  ;;  %v4731_v46 = vsub.f32 %v10072_v29, %v4730_v48  ;;  %v4739_v63 = vsub.f32 %v10098_v34, %v4738_v49  ;;  %v10124_v12 = vsub.f32 %v4079_v51, %v10109_v47 }
 0x629   : > { %4583 = vmatmul.f32.vlgmr.msrb.gmra.mxu0 %v9647_v61  ;;  %5115 = vmatpush.msra.mxu2 %v11367_v22  ;;  %v4044_v61 = vmul.f32 %v9667_v27, %v4023_v40  ;;  %v10193_v22 = vld [vmem:[%s660_s17] ss:$0 sm:$0xff] }
 0x62a   : > { %5188 = vmatpush.msra.mxu3 %v9811_v39  ;;  %4725 = vmatmul.f32.gmra.mxu2 %v4724_v18  ;;  %v11369_v39 = vand.u32 4294901760, %v9911_v30  ;;  %v4732_v15 = vand.u32 4294901760, %v4731_v46  ;;  %v11372_v30 = vld [vmem:[#allocation40_spill] sm:$0xff]  ;;  %v4740_v25 = vand.u32 4294901760, %v4739_v63  ;;  %v4746_v26 = vand.u32 4294901760, %v10124_v12 }
 0x62b   : > { %5119 = vmatpush.msra.mxu2 %v11368_v45  ;;  %v4065_v42 = vadd.f32 %v9732_v20, %v4044_v61 }
 0x62c   : > { %5190 = vmatpush.msra.mxu3 %v9830_v56  ;;  %v11370_v56 = vld [vmem:[#allocation54_spill] sm:$0xff] }
 0x62d   : > { %4878 = vmatmul.f32.gmra.mxu3 %v10034_v32  ;;  %5123 = vmatpush.msra.mxu2 %v11369_v39 }
 0x62e   : > { %5192 = vmatpush.msra.mxu3 %v9869_v16  ;;  %v11371_v16 = vand.u32 4294901760, %v9946_v60  ;;  %v4081_v60 = vmax.f32 %v4065_v42, 0.0 }
 0x630   : > { %4656 = vmatmul.f32.gmra.mxu1 %v9751_v54  ;;  %5194 = vmatpush.msra.mxu3 %v11370_v56  ;;  %v10135_v36 = vand.u32 4294901760, %v4081_v60 }
 0x631   : > { %4587 = vmatmul.f32.gmra.mxu0 %v9696_v62  ;;  %5127 = vmatpush.msra.mxu2 %v11371_v16  ;;  %v4046_v62 = vmul.f32 %v9667_v27, %v4025_v0 }
 0x632   : > { %5196 = vmatpush.msra.mxu3 %v11372_v30  ;;  %4733 = vmatmul.f32.gmra.mxu2 %v4732_v15 }
 0x633   : > { %5131 = vmatpush.msra.mxu2 %v11373_v5  ;;  %v4067_v43 = vadd.f32 %v9732_v20, %v4046_v62 }
 0x634   : > { %5198 = vmatpush.msra.mxu3 %v9935_v3  ;;  %v11375_v3 = vld [vmem:[#allocation38_spill] sm:$0xff] }
 0x635   : > { %4882 = vmatmul.f32.gmra.mxu3 %v10057_v6  ;;  %5135 = vmatpush.msra.mxu2 %v11374_v35  ;;  %v4027_v2 = vmul.f32 %v9967_v10, %v11375_v3  ;;  %v10147_v10 = vsub.f32 %v4081_v60, %v10135_v36  ;;  %v4083_v41 = vmax.f32 %v4067_v43, 0.0 }
 0x636   : > { %5200 = vmatpush.msra.mxu3 %v9948_v4 }
 0x637   : > { %5139 = vmatpush.msra.mxu2 %v4869_v19  ;;  %v4048_v4 = vmul.f32 %v9667_v27, %v4027_v2  ;;  %v10152_v19 = vand.u32 4294901760, %v4083_v41 }
 0x638   : > { %4660 = vmatmul.f32.gmra.mxu1 %v11376_v14  ;;  %5202 = vmatpush.msra.mxu3 %v11377_v31 }
 0x639   : > { %4591 = vmatmul.f32.gmra.mxu0 %v9751_v54  ;;  %v4747_v54 = vsub.f32 %v10124_v12, %v4746_v26  ;;  %v4069_v27 = vadd.f32 %v9732_v20, %v4048_v4  ;;  %v10160_v50 = vsub.f32 %v4083_v41, %v10152_v19 }
 0x63a   : > { %5204 = vmatpush.msra.mxu3 %v9954_v24  ;;  %4741 = vmatmul.f32.gmra.mxu2 %v4740_v25  ;;  %v4754_v24 = vand.u32 4294901760, %v10147_v10 }
 0x63b   : > { %v4748_v58 = vand.u32 4294901760, %v4747_v54  ;;  %v4085_v11 = vmax.f32 %v4069_v27, 0.0  ;;  %v4762_v55 = vand.u32 4294901760, %v10160_v50 }
 0x63c   : > { %v4755_v23 = vsub.f32 %v10147_v10, %v4754_v24 }
 0x63d   : > { %4886 = vmatmul.f32.gmra.mxu3 %v10083_v59  ;;  %v10165_v28 = vand.u32 4294901760, %v4085_v11  ;;  %v4763_v20 = vsub.f32 %v10160_v50, %v4762_v55 }
 0x63e   : > { %v4756_v33 = vand.u32 4294901760, %v4755_v23 }
 0x63f   : > { %v10172_v13 = vsub.f32 %v4085_v11, %v10165_v28  ;;  %v4764_v8 = vand.u32 4294901760, %v4763_v20 }
 0x640   : > { %4664 = vmatmul.f32.gmra.mxu1 %v11378_v1 }
 0x641   : > { %4595 = vmatmul.f32.gmra.mxu0 %v11376_v14  ;;  %v4770_v7 = vand.u32 4294901760, %v10172_v13 }
 0x642   : > { %4749 = vmatmul.f32.gmra.mxu2 %v4748_v58 }
 0x643   : > { %v4771_v40 = vsub.f32 %v10172_v13, %v4770_v7 }
 0x645   : > { %4890 = vmatmul.f32.gmra.mxu3 %v10109_v47  ;;  %v4772_v18 = vand.u32 4294901760, %v4771_v40 }
 0x648   : > { %4668 = vmatmul.f32.gmra.mxu1 %v11379_v53 }
 0x649   : > { %4599 = vmatmul.f32.gmra.mxu0 %v11378_v1 }
 0x64a   : > { %4757 = vmatmul.f32.gmra.mxu2 %v4756_v33 }
 0x64d   : > { %4894 = vmatmul.f32.gmra.mxu3 %v10135_v36 }
 0x650   : > { %4672 = vmatmul.f32.gmra.mxu1 %v11380_v37 }
 0x651   : > { %4603 = vmatmul.f32.gmra.mxu0 %v11379_v53 }
 0x652   : > { %4765 = vmatmul.f32.gmra.mxu2 %v4764_v8 }
 0x655   : > { %4898 = vmatmul.f32.gmra.mxu3 %v10152_v19 }
 0x658   : > { %4676 = vmatmul.f32.gmra.mxu1 %v10024_v21 }
 0x659   : > { %4607 = vmatmul.f32.gmra.mxu0 %v11380_v37 }
 0x65a   : > { %4773 = vmatmul.f32.gmra.mxu2 %v4772_v18 }
 0x65d   : > { %4902 = vmatmul.f32.gmra.mxu3 %v10165_v28  ;;  %v4317_v52 = vpop.f32.mrf.mxu1 }
 0x660   : > { %5030 = vmatmul.f32.vlgmr.msra.gmra.mxu1 %v4714_v17 }
 0x661   : > { %4611 = vmatmul.f32.gmra.mxu0 %v10024_v21 }
 0x662   : > { %5141 = vmatmul.f32.vlgmr.msra.gmra.mxu2 %v9992_v44 }
 0x665   : > { %5206 = vmatmul.f32.vlgmr.msra.gmra.mxu3 %v9992_v44  ;;  %v4321_v45 = vpop.f32.mrf.mxu1  ;;  %v4160_v61 = vpop.f32.mrf.mxu0 }
 0x666   : > { %v4399_v46 = vpop.f32.mrf.mxu2  ;;  %v4161_v51 = vadd.f32 %v10193_v22, %v4160_v61 }
 0x667   : > { %v4473_v39 = vpop.f32.mrf.mxu3 }
 0x668   : > { %5036 = vmatmul.f32.gmra.mxu1 %v4722_v38  ;;  %v4318_v21 = vadd.f32 %v4317_v52, %v4161_v51 }
 0x669   : > { %4956 = vmatmul.f32.vlgmr.msra.gmra.mxu0 %v10021_v57 }
 0x66a   : > { %v4400_v17 = vadd.f32 %v4399_v46, %v4318_v21  ;;  %5145 = vmatmul.f32.gmra.mxu2 %v10034_v32 }
 0x66c   : > { %v10201_v0 = vadd.f32 %v4473_v39, %v4400_v17 }
 0x66d   : > { %5210 = vmatmul.f32.gmra.mxu3 %v10034_v32  ;;  %v4325_v44 = vpop.f32.mrf.mxu1  ;;  %v4168_v56 = vpop.f32.mrf.mxu0 }
 0x66e   : > { %v4404_v15 = vpop.f32.mrf.mxu2  ;;  %v4169_v42 = vadd.f32 %v10193_v22, %v4168_v56 }
 0x66f   : > { %v4479_v16 = vpop.f32.mrf.mxu3 }
 0x670   : > { %5042 = vmatmul.f32.gmra.mxu1 %v4730_v48  ;;  %v4322_v38 = vadd.f32 %v4321_v45, %v4169_v42 }
 0x671   : > { %4961 = vmatmul.f32.gmra.mxu0 %v10047_v9 }
 0x672   : > { %v4405_v57 = vadd.f32 %v4404_v15, %v4322_v38  ;;  %5149 = vmatmul.f32.gmra.mxu2 %v10057_v6 }
 0x674   : > { %v10209_v30 = vadd.f32 %v4479_v16, %v4405_v57 }
 0x675   : > { %5214 = vmatmul.f32.gmra.mxu3 %v10057_v6  ;;  %v4329_v32 = vpop.f32.mrf.mxu1 }
 0x676   : > { %v4176_v5 = vpop.f32.mrf.mxu0  ;;  %v4409_v62 = vpop.f32.mrf.mxu2 }
 0x677   : > { %v4177_v63 = vadd.f32 %v10193_v22, %v4176_v5  ;;  %v4485_v60 = vpop.f32.mrf.mxu3 }
 0x678   : > { %5048 = vmatmul.f32.gmra.mxu1 %v4738_v49 }
 0x679   : > { %v4326_v48 = vadd.f32 %v4325_v44, %v4177_v63  ;;  %4966 = vmatmul.f32.gmra.mxu0 %v10072_v29 }
 0x67a   : > { %5153 = vmatmul.f32.gmra.mxu2 %v10083_v59 }
 0x67b   : > { %v4410_v9 = vadd.f32 %v4409_v62, %v4326_v48 }
 0x67d   : > { %v10217_v35 = vadd.f32 %v4485_v60, %v4410_v9  ;;  %5218 = vmatmul.f32.gmra.mxu3 %v10083_v59  ;;  %v4333_v6 = vpop.f32.mrf.mxu1 }
 0x67e   : > { %v4184_v3 = vpop.f32.mrf.mxu0  ;;  %v4414_v2 = vpop.f32.mrf.mxu2 }
 0x67f   : > { %v4185_v14 = vadd.f32 %v10193_v22, %v4184_v3  ;;  %v4491_v31 = vpop.f32.mrf.mxu3 }
 0x680   : > { %5054 = vmatmul.f32.gmra.mxu1 %v4746_v26 }
 0x681   : > { %v4330_v49 = vadd.f32 %v4329_v32, %v4185_v14  ;;  %4971 = vmatmul.f32.gmra.mxu0 %v10098_v34 }
 0x682   : > { %5157 = vmatmul.f32.gmra.mxu2 %v10109_v47 }
 0x683   : > { %v4415_v29 = vadd.f32 %v4414_v2, %v4330_v49 }
 0x685   : > { %v10225_v25 = vadd.f32 %v4491_v31, %v4415_v29  ;;  %5222 = vmatmul.f32.gmra.mxu3 %v10109_v47  ;;  %v4337_v59 = vpop.f32.mrf.mxu1 }
 0x686   : > { %v4192_v43 = vpop.f32.mrf.mxu0  ;;  %v4419_v4 = vpop.f32.mrf.mxu2 }
 0x687   : > { %v4193_v54 = vadd.f32 %v10193_v22, %v4192_v43  ;;  %v4497_v41 = vpop.f32.mrf.mxu3 }
 0x688   : > { %5060 = vmatmul.f32.gmra.mxu1 %v4754_v24 }
 0x689   : > { %v4334_v26 = vadd.f32 %v4333_v6, %v4193_v54  ;;  %4976 = vmatmul.f32.gmra.mxu0 %v10124_v12 }
 0x68a   : > { %5161 = vmatmul.f32.gmra.mxu2 %v10135_v36 }
 0x68b   : > { %v4420_v34 = vadd.f32 %v4419_v4, %v4334_v26 }
 0x68d   : > { %v10233_v1 = vadd.f32 %v4497_v41, %v4420_v34  ;;  %5226 = vmatmul.f32.gmra.mxu3 %v10135_v36  ;;  %v4341_v47 = vpop.f32.mrf.mxu1 }
 0x68e   : > { %v4200_v58 = vpop.f32.mrf.mxu0  ;;  %v4424_v27 = vpop.f32.mrf.mxu2 }
 0x68f   : > { %v4201_v23 = vadd.f32 %v10193_v22, %v4200_v58  ;;  %v4503_v11 = vpop.f32.mrf.mxu3 }
 0x690   : > { %5066 = vmatmul.f32.gmra.mxu1 %v4762_v55 }
 0x691   : > { %v4338_v24 = vadd.f32 %v4337_v59, %v4201_v23  ;;  %4981 = vmatmul.f32.gmra.mxu0 %v10147_v10 }
 0x692   : > { %5165 = vmatmul.f32.gmra.mxu2 %v10152_v19 }
 0x693   : > { %v4425_v12 = vadd.f32 %v4424_v27, %v4338_v24 }
 0x695   : > { %v10241_v53 = vadd.f32 %v4503_v11, %v4425_v12  ;;  %5230 = vmatmul.f32.gmra.mxu3 %v10152_v19  ;;  %v4345_v36 = vpop.f32.mrf.mxu1 }
 0x696   : > { %v4208_v33 = vpop.f32.mrf.mxu0  ;;  %v4429_v20 = vpop.f32.mrf.mxu2 }
 0x697   : > { %v4209_v37 = vadd.f32 %v10193_v22, %v4208_v33  ;;  %v4509_v8 = vpop.f32.mrf.mxu3 }
 0x698   : > { %5072 = vmatmul.f32.gmra.mxu1 %v4770_v7 }
 0x699   : > { %v4342_v55 = vadd.f32 %v4341_v47, %v4209_v37  ;;  %4986 = vmatmul.f32.gmra.mxu0 %v10160_v50 }
 0x69a   : > { %5169 = vmatmul.f32.gmra.mxu2 %v10165_v28 }
 0x69b   : > { %v4430_v10 = vadd.f32 %v4429_v20, %v4342_v55  ;;  %v11381_v55 = vld [vmem:[#allocation5_spill] sm:$0xff] }
 0x69d   : > { %v10249_v40 = vadd.f32 %v4509_v8, %v4430_v10  ;;  %5234 = vmatmul.f32.gmra.mxu3 %v10165_v28  ;;  %v4649_v19 = vpop.f32.mrf.mxu1  ;;  %v6411_v8 = vld [vmem:[#allocation2 + $0x30] sm:$0xff] }
 0x69e   : > { %v4216_v18 = vpop.f32.mrf.mxu0  ;;  %v4434_v52 = vpop.f32.mrf.mxu2  ;;  %v5238_v10 = vmul.f32 %v6411_v8, %v11381_v55 }
 0x69f   : > { %v4217_v45 = vadd.f32 %v10193_v22, %v4216_v18 }
 0x6a0   : > { %v4515_v61 = vpop.f32.mrf.mxu3 }
 0x6a1   : > { %v4346_v46 = vadd.f32 %v4345_v36, %v4217_v45  ;;  %4991 = vmatmul.f32.gmra.mxu0 %v10172_v13 }
 0x6a3   : > { %v4435_v7 = vadd.f32 %v4434_v52, %v4346_v46 }
 0x6a5   : > { %v10254_v51 = vadd.f32 %v4515_v61, %v4435_v7  ;;  %v4653_v50 = vpop.f32.mrf.mxu1 }
 0x6a6   : > { %v4584_v39 = vpop.f32.mrf.mxu0  ;;  %v4718_v21 = vpop.f32.mrf.mxu2 }
 0x6a7   : > { %v4585_v59 = vadd.f32 %v4584_v39, %v10201_v0 }
 0x6a8   : > { %v4875_v17 = vpop.f32.mrf.mxu3 }
 0x6a9   : > { %v4650_v43 = vadd.f32 %v4649_v19, %v4585_v59 }
 0x6ab   : > { %v4719_v34 = vadd.f32 %v4718_v21, %v4650_v43 }
 0x6ad   : > { %v4657_v44 = vpop.f32.mrf.mxu1  ;;  %v4876_v58 = vadd.f32 %v4875_v17, %v4719_v34 }
 0x6ae   : > { %v4588_v56 = vpop.f32.mrf.mxu0  ;;  %v4726_v15 = vpop.f32.mrf.mxu2 }
 0x6af   : > { %v4589_v47 = vadd.f32 %v4588_v56, %v10209_v30  ;;  %v6412_v56 = vld [vmem:[#allocation2] sm:$0xff] }
 0x6b0   : > { %v4879_v28 = vpop.f32.mrf.mxu3 }
 0x6b1   : > { %v4654_v27 = vadd.f32 %v4653_v50, %v4589_v47 }
 0x6b3   : > { %v4727_v33 = vadd.f32 %v4726_v15, %v4654_v27  ;;  %v5239_v15 = vmul.f32 %v6412_v56, %v11381_v55 }
 0x6b5   : > { %v4661_v42 = vpop.f32.mrf.mxu1  ;;  %v4880_v19 = vadd.f32 %v4879_v28, %v4727_v33 }
 0x6b6   : > { %v4592_v16 = vpop.f32.mrf.mxu0  ;;  %v4734_v38 = vpop.f32.mrf.mxu2 }
 0x6b7   : > { %v4593_v0 = vadd.f32 %v4592_v16, %v10217_v35 }
 0x6b8   : > { %v4883_v57 = vpop.f32.mrf.mxu3 }
 0x6b9   : > { %v4658_v18 = vadd.f32 %v4657_v44, %v4593_v0 }
 0x6bb   : > { %v4735_v39 = vadd.f32 %v4734_v38, %v4658_v18 }
 0x6bd   : > { %v10256_v22 = vpop.f32.mrf.mxu1  ;;  %v4884_v16 = vadd.f32 %v4883_v57, %v4735_v39 }
 0x6be   : > { %v4596_v32 = vpop.f32.mrf.mxu0  ;;  %v4742_v5 = vpop.f32.mrf.mxu2 }
 0x6bf   : > { %v4597_v21 = vadd.f32 %v4596_v32, %v10225_v25 }
 0x6c0   : > { %v10258_v13 = vpop.f32.mrf.mxu3 }
 0x6c1   : > { %v4662_v59 = vadd.f32 %v4661_v42, %v4597_v21 }
 0x6c3   : > { %v4743_v27 = vadd.f32 %v4742_v5, %v4662_v59 }
 0x6c5   : > { %v10260_v62 = vpop.f32.mrf.mxu1 }
 0x6c6   : > { %v4600_v63 = vpop.f32.mrf.mxu0  ;;  %v10262_v60 = vpop.f32.mrf.mxu2 }
 0x6c7   : > { %v4601_v38 = vadd.f32 %v4600_v63, %v10233_v1 }
 0x6c8   : > { %v10264_v48 = vpop.f32.mrf.mxu3 }
 0x6c9   : > { %v4666_v42 = vadd.f32 %v10256_v22, %v4601_v38 }
 0x6cb   : > { %v4751_v5 = vadd.f32 %v10262_v60, %v4666_v42 }
 0x6cd   : > { %v10266_v9 = vpop.f32.mrf.mxu1  ;;  %v4892_v22 = vadd.f32 %v10264_v48, %v4751_v5 }
 0x6ce   : > { %v10268_v6 = vpop.f32.mrf.mxu0  ;;  %v10270_v3 = vpop.f32.mrf.mxu2 }
 0x6cf   : > { %v4605_v1 = vadd.f32 %v10268_v6, %v10241_v53 }
 0x6d0   : > { %v10272_v2 = vpop.f32.mrf.mxu3 }
 0x6d5   : > { %v10274_v14 = vpop.f32.mrf.mxu1 }
 0x6d6   : > { %v10276_v31 = vpop.f32.mrf.mxu0  ;;  %v10278_v49 = vpop.f32.mrf.mxu2 }
 0x6d7   : > { %v4609_v53 = vadd.f32 %v10276_v31, %v10249_v40 }
 0x6d8   : > { %v10280_v29 = vpop.f32.mrf.mxu3 }
 0x6d9   : > { %v4674_v21 = vadd.f32 %v10266_v9, %v4609_v53 }
 0x6db   : > { %v4767_v59 = vadd.f32 %v10278_v49, %v4674_v21 }
 0x6dd   : > { %v5031_v4 = vpop.f32.mrf.mxu1 }
 0x6de   : > { %v10283_v54 = vpop.f32.mrf.mxu0  ;;  %v10285_v41 = vpop.f32.mrf.mxu2 }
 0x6df   : > { %v4613_v40 = vadd.f32 %v10283_v54, %v10254_v51 }
 0x6e0   : > { %v10287_v26 = vpop.f32.mrf.mxu3 }
 0x6e1   : > { %v4678_v9 = vadd.f32 %v10274_v14, %v4613_v40 }
 0x6e3   : > { %v4775_v49 = vadd.f32 %v10285_v41, %v4678_v9 }
 0x6e5   : > { %v5037_v23 = vpop.f32.mrf.mxu1 }
 0x6e6   : > { %v4957_v11 = vpop.f32.mrf.mxu0  ;;  %v5142_v24 = vpop.f32.mrf.mxu2 }
 0x6e7   : > { %v4958_v12 = vadd.f32 %v4957_v11, %v4876_v58 }
 0x6e8   : > { %v5207_v36 = vpop.f32.mrf.mxu3 }
 0x6e9   : > { %v5032_v20 = vadd.f32 %v5031_v4, %v4958_v12 }
 0x6eb   : > { %v5143_v37 = vadd.f32 %v5142_v24, %v5032_v20  ;;  %v4888_v24 = vadd.f32 %v10258_v13, %v4743_v27 }
 0x6ed   : > { %v5208_v52 = vadd.f32 %v5207_v36, %v5143_v37  ;;  %v5043_v45 = vpop.f32.mrf.mxu1 }
 0x6ee   : > { %v4962_v30 = vpop.f32.mrf.mxu0  ;;  %v5146_v61 = vpop.f32.mrf.mxu2 }
 0x6ef   : > { %v5246_v46 = vadd.f32 %v5238_v10, %v5208_v52  ;;  %v4963_v7 = vadd.f32 %v4962_v30, %v4880_v19  ;;  %v6414_v10 = vld [vmem:[#allocation2 + $0x10] sm:$0xff]  ;;  %v4670_v19 = vadd.f32 %v10260_v62, %v4605_v1 }
 0x6f0   : > { %v5211_v50 = vpop.f32.mrf.mxu3  ;;  %v5241_v13 = vmul.f32 %v6414_v10, %v11381_v55 }
 0x6f1   : > { %5254 = vst [vmem:[#allocation2 + $0x30] sm:$0xff] %v5246_v46  ;;  %v5038_v17 = vadd.f32 %v5037_v23, %v4963_v7  ;;  %v6413_v23 = vld [vmem:[#allocation2 + $0x18] sm:$0xff]  ;;  %v4759_v46 = vadd.f32 %v10270_v3, %v4670_v19 }
 0x6f2   : > { %v5240_v11 = vmul.f32 %v6413_v23, %v11381_v55 }
 0x6f3   : > { %v5147_v35 = vadd.f32 %v5146_v61, %v5038_v17  ;;  %v4896_v62 = vadd.f32 %v10272_v2, %v4759_v46  ;;  %v4900_v2 = vadd.f32 %v10280_v29, %v4767_v59 }
 0x6f5   : > { %v5212_v28 = vadd.f32 %v5211_v50, %v5147_v35  ;;  %v5049_v47 = vpop.f32.mrf.mxu1  ;;  %v6415_v50 = vld [vmem:[#allocation2 + $0x8] sm:$0xff] }
 0x6f6   : > { %v4967_v44 = vpop.f32.mrf.mxu0  ;;  %v5150_v43 = vpop.f32.mrf.mxu2  ;;  %v5242_v39 = vmul.f32 %v6415_v50, %v11381_v55 }
 0x6f7   : > { %v5247_v4 = vadd.f32 %v5239_v15, %v5212_v28  ;;  %v4968_v34 = vadd.f32 %v4967_v44, %v4884_v16  ;;  %v6416_v44 = vld [vmem:[#allocation2 + $0x20] sm:$0xff] }
 0x6f8   : > { %v5215_v58 = vpop.f32.mrf.mxu3 }
 0x6f9   : > { %5255 = vst [vmem:[#allocation2] sm:$0xff] %v5247_v4  ;;  %v5044_v25 = vadd.f32 %v5043_v45, %v4968_v34 }
 0x6fb   : > { %v5151_v32 = vadd.f32 %v5150_v43, %v5044_v25  ;;  %v5243_v43 = vmul.f32 %v6416_v44, %v11381_v55 }
 0x6fd   : > { %v5216_v57 = vadd.f32 %v5215_v58, %v5151_v32  ;;  %v5055_v37 = vpop.f32.mrf.mxu1  ;;  %v6417_v32 = vld [vmem:[#allocation2 + $0x28] sm:$0xff] }
 0x6fe   : > { %v4972_v12 = vpop.f32.mrf.mxu0  ;;  %v5154_v36 = vpop.f32.mrf.mxu2  ;;  %v5244_v23 = vmul.f32 %v6417_v32, %v11381_v55 }
 0x6ff   : > { %v5248_v33 = vadd.f32 %v5240_v11, %v5216_v57  ;;  %v4973_v0 = vadd.f32 %v4972_v12, %v4888_v24  ;;  %v4904_v11 = vadd.f32 %v10287_v26, %v4775_v49 }
 0x700   : > { %v5219_v20 = vpop.f32.mrf.mxu3 }
 0x701   : > { %5256 = vst [vmem:[#allocation2 + $0x18] sm:$0xff] %v5248_v33  ;;  %v5050_v63 = vadd.f32 %v5049_v47, %v4973_v0  ;;  %v6418_v0 = vld [vmem:[#allocation2 + $0x38] sm:$0xff] }
 0x702   : > { %v5245_v41 = vmul.f32 %v6418_v0, %v11381_v55 }
 0x703   : > { %v5155_v8 = vadd.f32 %v5154_v36, %v5050_v63 }
 0x705   : > { %v5220_v18 = vadd.f32 %v5219_v20, %v5155_v8  ;;  %v5061_v48 = vpop.f32.mrf.mxu1 }
 0x706   : > { %v4977_v52 = vpop.f32.mrf.mxu0  ;;  %v5158_v45 = vpop.f32.mrf.mxu2 }
 0x707   : > { %v5249_v30 = vadd.f32 %v5241_v13, %v5220_v18  ;;  %v4978_v61 = vadd.f32 %v4977_v52, %v4892_v22 }
 0x708   : > { %v5223_v60 = vpop.f32.mrf.mxu3 }
 0x709   : > { %5257 = vst [vmem:[#allocation2 + $0x10] sm:$0xff] %v5249_v30  ;;  %v5056_v6 = vadd.f32 %v5055_v37, %v4978_v61 }
 0x70b   : > { %v5159_v7 = vadd.f32 %v5158_v45, %v5056_v6 }
 0x70d   : > { %v5224_v17 = vadd.f32 %v5223_v60, %v5159_v7  ;;  %v5067_v34 = vpop.f32.mrf.mxu1 }
 0x70e   : > { %v4982_v35 = vpop.f32.mrf.mxu0  ;;  %v5162_v56 = vpop.f32.mrf.mxu2 }
 0x70f   : > { %v5250_v15 = vadd.f32 %v5242_v39, %v5224_v17  ;;  %v4983_v16 = vadd.f32 %v4982_v35, %v4896_v62 }
 0x710   : > { %v5227_v3 = vpop.f32.mrf.mxu3 }
 0x711   : > { %5258 = vst [vmem:[#allocation2 + $0x8] sm:$0xff] %v5250_v15  ;;  %v5062_v31 = vadd.f32 %v5061_v48, %v4983_v16 }
 0x713   : > { %v5163_v28 = vadd.f32 %v5162_v56, %v5062_v31 }
 0x715   : > { %v5228_v4 = vadd.f32 %v5227_v3, %v5163_v28  ;;  %v5073_v57 = vpop.f32.mrf.mxu1 }
 0x716   : > { %v4987_v47 = vpop.f32.mrf.mxu0  ;;  %v5166_v38 = vpop.f32.mrf.mxu2 }
 0x717   : > { %v5251_v58 = vadd.f32 %v5243_v43, %v5228_v4  ;;  %v4988_v27 = vadd.f32 %v4987_v47, %v4900_v2 }
 0x718   : > { %v5231_v54 = vpop.f32.mrf.mxu3 }
 0x719   : > { %5259 = vst [vmem:[#allocation2 + $0x20] sm:$0xff] %v5251_v58  ;;  %v5068_v51 = vadd.f32 %v5067_v34, %v4988_v27 }
 0x71b   : > { %v5167_v25 = vadd.f32 %v5166_v38, %v5068_v51 }
 0x71d   : > { %v5232_v29 = vadd.f32 %v5231_v54, %v5167_v25 }
 0x71e   : > { %v4992_v24 = vpop.f32.mrf.mxu0  ;;  %v5170_v36 = vpop.f32.mrf.mxu2 }
 0x71f   : > { %v5252_v14 = vadd.f32 %v5244_v23, %v5232_v29  ;;  %v4993_v42 = vadd.f32 %v4992_v24, %v4904_v11 }
 0x720   : > { %v5235_v20 = vpop.f32.mrf.mxu3 }
 0x721   : > { %5260 = vst [vmem:[#allocation2 + $0x28] sm:$0xff] %v5252_v14  ;;  %v5074_v12 = vadd.f32 %v5073_v57, %v4993_v42 }
 0x723   : > { %v5171_v33 = vadd.f32 %v5170_v36, %v5074_v12 }
 0x725   : > { %v5236_v5 = vadd.f32 %v5235_v20, %v5171_v33  ;;  %5265 = sbr.rel (%p6256_p6) target bundleno = 2597 (0xa25), region = 96 }
 0x727   : > { %v5253_v1 = vadd.f32 %v5245_v41, %v5236_v5 }
 0x729   : > { %5261 = vst [vmem:[#allocation2 + $0x38] sm:$0xff] %v5253_v1 }
 0x72a   : > { %v5270_v26 = vld [vmem:[#allocation2 + $0x8] sm:$0xff]  ;;  %v5267_v63 = vld [vmem:[#allocation2] sm:$0xff]  ;;  %v5266_v37 = vld [vmem:[#allocation2 + $0x30] sm:$0xff] }
 0x72b   : > { %5284 = vadd.xlane.f32.xlu0 %v5270_v26  ;;  %5278 = vadd.xlane.f32.xlu2 %v5267_v63  ;;  %v5271_v8 = vld [vmem:[#allocation2 + $0x20] sm:$0xff]  ;;  %v5272_v13 = vld [vmem:[#allocation2 + $0x28] sm:$0xff]  ;;  %v5268_v55 = vld [vmem:[#allocation2 + $0x18] sm:$0xff] }
 0x72c   : > { %5276 = vadd.xlane.f32.xlu1 %v5266_v37  ;;  %v5269_v22 = vld [vmem:[#allocation2 + $0x10] sm:$0xff]  ;;  %v11382_v52 = vld [vmem:[#allocation4_spill] sm:$0xff]  ;;  %v5481_v58 = vld [vmem:[%s10967_s15 + $0x78] sm:$0xff] }
 0x72d   : > { %v10364_v27 = vand.u32 4294901760, %v5481_v58  ;;  %v5480_v38 = vld [vmem:[%s10967_s15 + $0x70] sm:$0xff]  ;;  %v5479_v54 = vld [vmem:[%s10967_s15 + $0x68] sm:$0xff]  ;;  %v5478_v11 = vld [vmem:[%s10967_s15 + $0x60] sm:$0xff] }
 0x72e   : > { %v10372_v51 = vand.u32 4294901760, %v5480_v38  ;;  %v10383_v23 = vand.u32 4294901760, %v5479_v54  ;;  %v10397_v42 = vand.u32 4294901760, %v5478_v11  ;;  %v5477_v0 = vld [vmem:[%s10967_s15 + $0x58] sm:$0xff] }
 0x72f   : > { %v10370_v49 = vsub.f32 %v5481_v58, %v10364_v27  ;;  %5487 = vmatpush.msra.mxu0 %v10364_v27  ;;  %6293 = vmatpush.msra.mxu2 %v10364_v27  ;;  %v10413_v41 = vand.u32 4294901760, %v5477_v0 }
 0x730   : > { %v5273_v10 = vld [vmem:[#allocation2 + $0x38] sm:$0xff]  ;;  %v10381_v32 = vsub.f32 %v5480_v38, %v10372_v51  ;;  %v10395_v14 = vsub.f32 %v5479_v54, %v10383_v23  ;;  %v10406_v33 = vsub.f32 %v5478_v11, %v10397_v42  ;;  %v5470_v54 = vld [vmem:[%s10967_s15 + $0x20] sm:$0xff] }
 0x731   : > { %v5585_v25 = vand.u32 4294901760, %v10370_v49  ;;  %5489 = vmatpush.msra.mxu0 %v10372_v51  ;;  %6294 = vmatpush.msra.mxu2 %v10372_v51 }
 0x732   : > { %v5591_v24 = vand.u32 4294901760, %v10381_v32  ;;  %v5597_v36 = vand.u32 4294901760, %v10395_v14  ;;  %v5603_v1 = vand.u32 4294901760, %v10406_v33 }
 0x733   : > { %5286 = vadd.xlane.f32.xlu0 %v5271_v8  ;;  %5290 = vadd.xlane.f32.xlu2 %v5273_v10  ;;  %v5586_v29 = vsub.f32 %v10370_v49, %v5585_v25 }
 0x734   : > { %5288 = vadd.xlane.f32.xlu1 %v5272_v13  ;;  %5491 = vmatpush.msra.mxu0 %v10383_v23  ;;  %v5592_v12 = vsub.f32 %v10381_v32, %v5591_v24  ;;  %v5598_v5 = vsub.f32 %v10395_v14, %v5597_v36 }
 0x735   : > { %6295 = vmatpush.msra.mxu2 %v10383_v23  ;;  %v5587_v57 = vand.u32 4294901760, %v5586_v29 }
 0x736   : > { %5493 = vmatpush.msra.mxu0 %v10397_v42  ;;  %v5593_v20 = vand.u32 4294901760, %v5592_v12  ;;  %v10509_v12 = vand.u32 4294901760, %v5470_v54 }
 0x737   : > { %6296 = vmatpush.msra.mxu2 %v10397_v42  ;;  %5588 = vmatpush.msra.mxu1 %v5587_v57 }
 0x738   : > { %6309 = vmatpush.msra.mxu3 %v5587_v57  ;;  %5495 = vmatpush.msra.mxu0 %v10413_v41 }
 0x739   : > { %6297 = vmatpush.msra.mxu2 %v10413_v41  ;;  %5594 = vmatpush.msra.mxu1 %v5593_v20 }
 0x73a   : > { %6310 = vmatpush.msra.mxu3 %v5593_v20 }
 0x73b   : > { %5280 = vadd.xlane.f32.xlu0 %v5268_v55 }
 0x73c   : > { %5282 = vadd.xlane.f32.xlu1 %v5269_v22 }
 0x79e   : > { %v5285_v19 = vpop.xlane.xlu0 %5284  ;;  %v5279_v18 = vpop.xlane.xlu2 %5278 }
 0x79f   : > { %v5296_v45 = vmul.f32 %v5285_v19, %v11382_v52  ;;  %v5277_v30 = vpop.xlane.xlu1 %5276  ;;  %v5293_v17 = vmul.f32 %v5279_v18, %v11382_v52 }
 0x7a0   : > { %v5292_v61 = vmul.f32 %v5277_v30, %v11382_v52 }
 0x7a1   : > { %v10323_v60 = vsub.f32 %v5270_v26, %v5296_v45  ;;  %v10347_v40 = vsub.f32 %v5267_v63, %v5293_v17  ;;  %v5476_v26 = vld [vmem:[%s10967_s15 + $0x50] sm:$0xff]  ;;  %v10423_v63 = vsub.f32 %v5477_v0, %v10413_v41  ;;  %v5474_v45 = vld [vmem:[%s10967_s15 + $0x40] sm:$0xff]  ;;  %v5469_v0 = vld [vmem:[%s10967_s15 + $0x18] sm:$0xff] }
 0x7a2   : > { %v10325_v46 = vsub.f32 %v5266_v37, %v5292_v61  ;;  %v10425_v37 = vand.u32 4294901760, %v5476_v26 }
 0x7a3   : > { %v5312_v53 = vmul.f32 %v10323_v60, %v10323_v60  ;;  %v5309_v2 = vmul.f32 %v10347_v40, %v10347_v40 }
 0x7a4   : > { %v5308_v6 = vmul.f32 %v10325_v46, %v10325_v46  ;;  %5497 = vmatpush.msra.mxu0 %v10425_v37  ;;  %6298 = vmatpush.msra.mxu2 %v10425_v37 }
 0x7a5   : > { %5324 = vadd.xlane.f32.xlu2 %v5312_v53 }
 0x7a6   : > { %5316 = vadd.xlane.f32.xlu1 %v5308_v6  ;;  %v5287_v7 = vpop.xlane.xlu0 %5286  ;;  %v5291_v50 = vpop.xlane.xlu2 %5290  ;;  %v10453_v6 = vand.u32 4294901760, %v5474_v45 }
 0x7a7   : > { %v5297_v39 = vmul.f32 %v5287_v7, %v11382_v52  ;;  %v5299_v48 = vmul.f32 %v5291_v50, %v11382_v52  ;;  %v5289_v62 = vpop.xlane.xlu1 %5288 }
 0x7a8   : > { %v5298_v21 = vmul.f32 %v5289_v62, %v11382_v52  ;;  %v5473_v62 = vld [vmem:[%s10967_s15 + $0x38] sm:$0xff] }
 0x7a9   : > { %v10335_v35 = vsub.f32 %v5271_v8, %v5297_v39  ;;  %v10337_v56 = vsub.f32 %v5273_v10, %v5299_v48  ;;  %v5599_v8 = vand.u32 4294901760, %v5598_v5  ;;  %v5604_v10 = vsub.f32 %v10406_v33, %v5603_v1 }
 0x7aa   : > { %v10339_v15 = vsub.f32 %v5272_v13, %v5298_v21  ;;  %v5475_v13 = vld [vmem:[%s10967_s15 + $0x48] sm:$0xff]  ;;  %v10462_v48 = vsub.f32 %v5474_v45, %v10453_v6  ;;  %v10469_v21 = vand.u32 4294901760, %v5473_v62 }
 0x7ab   : > { %v5313_v16 = vmul.f32 %v10335_v35, %v10335_v35  ;;  %v5315_v3 = vmul.f32 %v10337_v56, %v10337_v56  ;;  %v10439_v19 = vand.u32 4294901760, %v5475_v13  ;;  %5600 = vmatpush.msra.mxu1 %v5599_v8  ;;  %6311 = vmatpush.msra.mxu3 %v5599_v8  ;;  %v5605_v18 = vand.u32 4294901760, %v5604_v10 }
 0x7ac   : > { %v5314_v59 = vmul.f32 %v10339_v15, %v10339_v15  ;;  %v10521_v8 = vsub.f32 %v5470_v54, %v10509_v12  ;;  %v10525_v10 = vand.u32 4294901760, %v5469_v0 }
 0x7ad   : > { %5326 = vadd.xlane.f32.xlu0 %v5313_v16  ;;  %v10451_v53 = vsub.f32 %v5475_v13, %v10439_v19  ;;  %5499 = vmatpush.msra.mxu0 %v10439_v19  ;;  %v5468_v13 = vld [vmem:[%s10967_s15 + $0x10] sm:$0xff] }
 0x7ae   : > { %5330 = vadd.xlane.f32.xlu1 %v5315_v3  ;;  %5328 = vadd.xlane.f32.xlu2 %v5314_v59  ;;  %v5281_v31 = vpop.xlane.xlu0 %5280  ;;  %v5627_v3 = vand.u32 4294901760, %v10462_v48  ;;  %v5472_v59 = vld [vmem:[%s10967_s15 + $0x30] sm:$0xff] }
 0x7af   : > { %v5294_v28 = vmul.f32 %v5281_v31, %v11382_v52  ;;  %v5283_v44 = vpop.xlane.xlu1 %5282  ;;  %6299 = vmatpush.msra.mxu2 %v10439_v19  ;;  %5606 = vmatpush.msra.mxu1 %v5605_v18  ;;  %v5621_v39 = vand.u32 4294901760, %v10451_v53  ;;  %v10479_v31 = vsub.f32 %v5473_v62, %v10469_v21  ;;  %v5467_v62 = vld [vmem:[%s10967_s15 + $0x8] sm:$0xff] }
 0x7b0   : > { %v5295_v9 = vmul.f32 %v5283_v44, %v11382_v52  ;;  %6312 = vmatpush.msra.mxu3 %v5605_v18  ;;  %5501 = vmatpush.msra.mxu0 %v10453_v6 }
 0x7b1   : > { %v10350_v43 = vsub.f32 %v5268_v55, %v5294_v28  ;;  %v5609_v55 = vand.u32 4294901760, %v10423_v63  ;;  %6300 = vmatpush.msra.mxu2 %v10453_v6  ;;  %v5622_v16 = vsub.f32 %v10451_v53, %v5621_v39  ;;  %v10481_v28 = vand.u32 4294901760, %v5472_v59 }
 0x7b2   : > { %v10357_v34 = vsub.f32 %v5269_v22, %v5295_v9  ;;  %v10437_v22 = vsub.f32 %v5476_v26, %v10425_v37  ;;  %5503 = vmatpush.msra.mxu0 %v10469_v21  ;;  %v5471_v9 = vld [vmem:[%s10967_s15 + $0x28] sm:$0xff] }
 0x7b3   : > { %v5310_v4 = vmul.f32 %v10350_v43, %v10350_v43  ;;  %v5610_v30 = vsub.f32 %v10423_v63, %v5609_v55  ;;  %6301 = vmatpush.msra.mxu2 %v10469_v21  ;;  %v5623_v44 = vand.u32 4294901760, %v5622_v16  ;;  %v10495_v58 = vand.u32 4294901760, %v5471_v9 }
 0x7b4   : > { %v5311_v47 = vmul.f32 %v10357_v34, %v10357_v34  ;;  %v5615_v61 = vand.u32 4294901760, %v10437_v22  ;;  %5505 = vmatpush.msra.mxu0 %v10481_v28 }
 0x7b5   : > { %5318 = vadd.xlane.f32.xlu0 %v5309_v2  ;;  %v5611_v7 = vand.u32 4294901760, %v5610_v30  ;;  %v5628_v2 = vsub.f32 %v10462_v48, %v5627_v3  ;;  %6302 = vmatpush.msra.mxu2 %v10481_v28  ;;  %v10507_v57 = vsub.f32 %v5471_v9, %v10495_v58  ;;  %v5651_v30 = vand.u32 4294901760, %v10521_v8  ;;  %v5466_v9 = vld [vmem:[%s10967_s15] sm:$0xff] }
 0x7b6   : > { %5320 = vadd.xlane.f32.xlu2 %v5310_v4  ;;  %v5616_v50 = vsub.f32 %v10437_v22, %v5615_v61  ;;  %v5633_v4 = vand.u32 4294901760, %v10479_v31  ;;  %5507 = vmatpush.msra.mxu0 %v10495_v58 }
 0x7b7   : > { %5612 = vmatpush.msra.mxu1 %v5611_v7  ;;  %6313 = vmatpush.msra.mxu3 %v5611_v7  ;;  %v5629_v38 = vand.u32 4294901760, %v5628_v2  ;;  %v5645_v26 = vand.u32 4294901760, %v10507_v57  ;;  %v10534_v7 = vand.u32 4294901760, %v5468_v13  ;;  %v5652_v16 = vsub.f32 %v10521_v8, %v5651_v30 }
 0x7b8   : > { %v5617_v17 = vand.u32 4294901760, %v5616_v50  ;;  %v5634_v11 = vsub.f32 %v10479_v31, %v5633_v4  ;;  %6303 = vmatpush.msra.mxu2 %v10495_v58  ;;  %5509 = vmatpush.msra.mxu0 %v10509_v12  ;;  %v10537_v50 = vsub.f32 %v5469_v0, %v10525_v10  ;;  %v10562_v0 = vand.u32 4294901760, %v5466_v9 }
 0x7b9   : > { %v5646_v45 = vsub.f32 %v10507_v57, %v5645_v26 }
 0x7ba   : > { %5618 = vmatpush.msra.mxu1 %v5617_v17  ;;  %6314 = vmatpush.msra.mxu3 %v5617_v17  ;;  %v5635_v20 = vand.u32 4294901760, %v5634_v11  ;;  %v5657_v2 = vand.u32 4294901760, %v10537_v50 }
 0x7bb   : > { %6304 = vmatpush.msra.mxu2 %v10509_v12  ;;  %5511 = vmatpush.msra.mxu0 %v10525_v10  ;;  %v5647_v17 = vand.u32 4294901760, %v5646_v45 }
 0x7bc   : > { %5624 = vmatpush.msra.mxu1 %v5623_v44  ;;  %6315 = vmatpush.msra.mxu3 %v5623_v44  ;;  %v10550_v44 = vand.u32 4294901760, %v5467_v62 }
 0x7bd   : > { %5322 = vadd.xlane.f32.xlu0 %v5311_v47  ;;  %v10493_v47 = vsub.f32 %v5472_v59, %v10481_v28  ;;  %6305 = vmatpush.msra.mxu2 %v10525_v10  ;;  %v10548_v59 = vsub.f32 %v5468_v13, %v10534_v7 }
 0x7be   : > { %5630 = vmatpush.msra.mxu1 %v5629_v38  ;;  %6316 = vmatpush.msra.mxu3 %v5629_v38  ;;  %v5653_v38 = vand.u32 4294901760, %v5652_v16  ;;  %v10560_v11 = vsub.f32 %v5467_v62, %v10550_v44 }
 0x7bf   : > { %v5639_v29 = vand.u32 4294901760, %v10493_v47  ;;  %5513 = vmatpush.msra.mxu0 %v10534_v7  ;;  %6306 = vmatpush.msra.mxu2 %v10534_v7  ;;  %v5663_v54 = vand.u32 4294901760, %v10548_v59 }
 0x7c0   : > { %5636 = vmatpush.msra.mxu1 %v5635_v20  ;;  %6317 = vmatpush.msra.mxu3 %v5635_v20  ;;  %v5658_v20 = vsub.f32 %v10537_v50, %v5657_v2  ;;  %v11086_v13 = vand.u32 4294901760, %v10560_v11 }
 0x7c1   : > { %v5640_v5 = vsub.f32 %v10493_v47, %v5639_v29  ;;  %5515 = vmatpush.msra.mxu0 %v10550_v44  ;;  %6307 = vmatpush.msra.mxu2 %v10550_v44 }
 0x7c2   : > { %v5659_v45 = vand.u32 4294901760, %v5658_v20 }
 0x7c3   : > { %v5641_v18 = vand.u32 4294901760, %v5640_v5  ;;  %v5664_v5 = vsub.f32 %v10548_v59, %v5663_v54  ;;  %5517 = vmatpush.msra.mxu0 %v10562_v0  ;;  %6308 = vmatpush.msra.mxu2 %v10562_v0 }
 0x7c5   : > { %5642 = vmatpush.msra.mxu1 %v5641_v18  ;;  %6318 = vmatpush.msra.mxu3 %v5641_v18  ;;  %v10574_v18 = vsub.f32 %v5466_v9, %v10562_v0  ;;  %v5665_v62 = vand.u32 4294901760, %v5664_v5 }
 0x7c6   : > { %5714 = vmatpush.msrb.mxu2 %v10370_v49  ;;  %5885 = vmatpush.msrb.mxu0 %v5585_v25 }
 0x7c7   : > { %5648 = vmatpush.msra.mxu1 %v5647_v17  ;;  %6319 = vmatpush.msra.mxu3 %v5647_v17  ;;  %v5670_v17 = vsub.f32 %v10560_v11, %v11086_v13  ;;  %v5675_v16 = vand.u32 4294901760, %v10574_v18 }
 0x7c8   : > { %5717 = vmatpush.msrb.mxu2 %v10381_v32  ;;  %5889 = vmatpush.msrb.mxu0 %v5591_v24 }
 0x7c9   : > { %5654 = vmatpush.msra.mxu1 %v5653_v38  ;;  %6320 = vmatpush.msra.mxu3 %v5653_v38  ;;  %v5671_v9 = vand.u32 4294901760, %v5670_v17  ;;  %v5676_v38 = vsub.f32 %v10574_v18, %v5675_v16 }
 0x7ca   : > { %5720 = vmatpush.msrb.mxu2 %v10395_v14  ;;  %5893 = vmatpush.msrb.mxu0 %v5597_v36 }
 0x7cb   : > { %5660 = vmatpush.msra.mxu1 %v5659_v45  ;;  %6321 = vmatpush.msra.mxu3 %v5659_v45  ;;  %v5677_v49 = vand.u32 4294901760, %v5676_v38 }
 0x7cc   : > { %5723 = vmatpush.msrb.mxu2 %v10406_v33  ;;  %5897 = vmatpush.msrb.mxu0 %v5603_v1 }
 0x7cd   : > { %5666 = vmatpush.msra.mxu1 %v5665_v62  ;;  %6322 = vmatpush.msra.mxu3 %v5665_v62 }
 0x7ce   : > { %5726 = vmatpush.msrb.mxu2 %v10423_v63  ;;  %5901 = vmatpush.msrb.mxu0 %v5609_v55 }
 0x7cf   : > { %5672 = vmatpush.msra.mxu1 %v5671_v9  ;;  %6323 = vmatpush.msra.mxu3 %v5671_v9 }
 0x7d0   : > { %5729 = vmatpush.msrb.mxu2 %v10437_v22  ;;  %5905 = vmatpush.msrb.mxu0 %v5615_v61 }
 0x7d1   : > { %5678 = vmatpush.msra.mxu1 %v5677_v49  ;;  %6324 = vmatpush.msra.mxu3 %v5677_v49 }
 0x7d2   : > { %5732 = vmatpush.msrb.mxu2 %v10451_v53  ;;  %5909 = vmatpush.msrb.mxu0 %v5621_v39 }
 0x7d3   : > { %5802 = vmatpush.msrb.mxu3 %v10364_v27  ;;  %5980 = vmatpush.msrb.mxu1 %v10364_v27 }
 0x7d4   : > { %5735 = vmatpush.msrb.mxu2 %v10462_v48  ;;  %5913 = vmatpush.msrb.mxu0 %v5627_v3 }
 0x7d5   : > { %5804 = vmatpush.msrb.mxu3 %v10372_v51  ;;  %5982 = vmatpush.msrb.mxu1 %v10372_v51 }
 0x7d6   : > { %5738 = vmatpush.msrb.mxu2 %v10479_v31  ;;  %5917 = vmatpush.msrb.mxu0 %v5633_v4 }
 0x7d7   : > { %5806 = vmatpush.msrb.mxu3 %v10383_v23  ;;  %5984 = vmatpush.msrb.mxu1 %v10383_v23 }
 0x7d8   : > { %5741 = vmatpush.msrb.mxu2 %v10493_v47  ;;  %5921 = vmatpush.msrb.mxu0 %v5639_v29 }
 0x7d9   : > { %5808 = vmatpush.msrb.mxu3 %v10397_v42  ;;  %5986 = vmatpush.msrb.mxu1 %v10397_v42 }
 0x7da   : > { %5744 = vmatpush.msrb.mxu2 %v10507_v57  ;;  %5925 = vmatpush.msrb.mxu0 %v5645_v26 }
 0x7db   : > { %5810 = vmatpush.msrb.mxu3 %v10413_v41  ;;  %5988 = vmatpush.msrb.mxu1 %v10413_v41 }
 0x7dc   : > { %5747 = vmatpush.msrb.mxu2 %v10521_v8  ;;  %5929 = vmatpush.msrb.mxu0 %v5651_v30 }
 0x7dd   : > { %5812 = vmatpush.msrb.mxu3 %v10425_v37  ;;  %5990 = vmatpush.msrb.mxu1 %v10425_v37 }
 0x7de   : > { %5750 = vmatpush.msrb.mxu2 %v10537_v50  ;;  %5933 = vmatpush.msrb.mxu0 %v5657_v2 }
 0x7df   : > { %5814 = vmatpush.msrb.mxu3 %v10439_v19  ;;  %5992 = vmatpush.msrb.mxu1 %v10439_v19 }
 0x7e0   : > { %5753 = vmatpush.msrb.mxu2 %v10548_v59  ;;  %5937 = vmatpush.msrb.mxu0 %v5663_v54  ;;  %v11384_v59 = vand.u32 4294901760, %v10560_v11 }
 0x7e1   : > { %5816 = vmatpush.msrb.mxu3 %v10453_v6  ;;  %5994 = vmatpush.msrb.mxu1 %v10453_v6  ;;  %v10689_v6 = vld [vmem:[%s10965_s13] ss:$0 sm:$0xff] }
 0x7e2   : > { %5756 = vmatpush.msrb.mxu2 %v10560_v11  ;;  %5941 = vmatpush.msrb.mxu0 %v11384_v59 }
 0x7e3   : > { %5818 = vmatpush.msrb.mxu3 %v10469_v21  ;;  %5996 = vmatpush.msrb.mxu1 %v10469_v21 }
 0x7e4   : > { %5759 = vmatpush.msrb.mxu2 %v10574_v18  ;;  %5945 = vmatpush.msrb.mxu0 %v5675_v16 }
 0x7e5   : > { %5820 = vmatpush.msrb.mxu3 %v10481_v28  ;;  %5998 = vmatpush.msrb.mxu1 %v10481_v28 }
 0x7e7   : > { %5822 = vmatpush.msrb.mxu3 %v10495_v58  ;;  %6000 = vmatpush.msrb.mxu1 %v10495_v58 }
 0x7e9   : > { %5824 = vmatpush.msrb.mxu3 %v10509_v12  ;;  %6002 = vmatpush.msrb.mxu1 %v10509_v12 }
 0x7eb   : > { %5826 = vmatpush.msrb.mxu3 %v10525_v10  ;;  %6004 = vmatpush.msrb.mxu1 %v10525_v10 }
 0x7ed   : > { %5828 = vmatpush.msrb.mxu3 %v10534_v7  ;;  %6006 = vmatpush.msrb.mxu1 %v10534_v7 }
 0x7ef   : > { %5830 = vmatpush.msrb.mxu3 %v10550_v44  ;;  %6008 = vmatpush.msrb.mxu1 %v10550_v44 }
 0x7f1   : > { %6010 = vmatpush.msrb.mxu1 %v10562_v0  ;;  %5832 = vmatpush.msrb.mxu3 %v10562_v0 }
 0x818   : > { %v5325_v20 = vpop.xlane.xlu2 %5324 }
 0x819   : > { %v5336_v5 = vmul.f32 %v5325_v20, %v11382_v52  ;;  %v5317_v13 = vpop.xlane.xlu1 %5316 }
 0x81a   : > { %v5332_v25 = vmul.f32 %v5317_v13, %v11382_v52 }
 0x81b   : > { %v10596_v45 = vadd.f32 1e-05, %v5336_v5 }
 0x81c   : > { %v10601_v32 = vadd.f32 1e-05, %v5332_v25 }
 0x81d   : > { %6422 = vrsqrt.f32 %v10596_v45  ;;  %vm5394_vm14 = vweird.f32 %v10596_v45 }
 0x81e   : > { %6424 = vrsqrt.f32 %v10601_v32  ;;  %vm5354_vm12 = vweird.f32 %v10601_v32 }
 0x820   : > { %v5327_v24 = vpop.xlane.xlu0 %5326 }
 0x821   : > { %v5337_v14 = vmul.f32 %v5327_v24, %v11382_v52  ;;  %v5329_v27 = vpop.xlane.xlu2 %5328  ;;  %v5331_v36 = vpop.xlane.xlu1 %5330 }
 0x822   : > { %v5338_v33 = vmul.f32 %v5329_v27, %v11382_v52  ;;  %v5339_v1 = vmul.f32 %v5331_v36, %v11382_v52 }
 0x823   : > { %v10623_v51 = vpop.eup %6422  ;;  %v10625_v63 = vadd.f32 1e-05, %v5337_v14 }
 0x824   : > { %v10629_v55 = vpop.eup %6424  ;;  %v5389_v23 = vmul.f32 %v10623_v51, %v10596_v45  ;;  %v10633_v22 = vadd.f32 1e-05, %v5338_v33  ;;  %v10635_v61 = vadd.f32 1e-05, %v5339_v1  ;;  %vm5395_vm11 = vweird.f32 %v10623_v51  ;;  %v10719_v45 = vld [vmem:[%s11383_s27] ss:$0 sm:$0xff] }
 0x825   : > { %v5349_v53 = vmul.f32 %v10629_v55, %v10601_v32  ;;  %6426 = vrsqrt.f32 %v10625_v63  ;;  %vm5355_vm13 = vweird.f32 %v10629_v55  ;;  %vm5396_vm15 = vmor %vm5394_vm14, %vm5395_vm11  ;;  %vm5404_vm0 = vweird.f32 %v10625_v63 }
 0x826   : > { %v5390_v42 = vmul.f32 %v10623_v51, %v5389_v23  ;;  %6428 = vrsqrt.f32 %v10633_v22  ;;  %vm5356_vm1 = vmor %vm5354_vm12, %vm5355_vm13  ;;  %vm5414_vm2 = vweird.f32 %v10633_v22  ;;  %vm5424_vm3 = vweird.f32 %v10635_v61 }
 0x827   : > { %v5350_v39 = vmul.f32 %v10629_v55, %v5349_v53  ;;  %6430 = vrsqrt.f32 %v10635_v61 }
 0x828   : > { %v5391_v48 = vmul.f32 0.5, %v5390_v42  ;;  %v5319_v3 = vpop.xlane.xlu0 %5318 }
 0x829   : > { %v5351_v41 = vmul.f32 0.5, %v5350_v39  ;;  %v5333_v13 = vmul.f32 %v5319_v3, %v11382_v52  ;;  %v5321_v31 = vpop.xlane.xlu2 %5320 }
 0x82a   : > { %v5392_v4 = vsub.f32 1.5, %v5391_v48  ;;  %v5334_v37 = vmul.f32 %v5321_v31, %v11382_v52 }
 0x82b   : > { %v10665_v47 = vpop.eup %6426  ;;  %v5352_v29 = vsub.f32 1.5, %v5351_v41  ;;  %v10669_v62 = vadd.f32 1e-05, %v5333_v13 }
 0x82c   : > { %v10673_v19 = vpop.eup %6428  ;;  %v5393_v17 = vmul.f32 %v10623_v51, %v5392_v4  ;;  %v5399_v57 = vmul.f32 %v10665_v47, %v10625_v63  ;;  %v10679_v26 = vadd.f32 1e-05, %v5334_v37  ;;  %vm5405_vm4 = vweird.f32 %v10665_v47 }
 0x82d   : > { %v10684_v9 = vpop.eup %6430  ;;  %v5353_v38 = vmul.f32 %v10629_v55, %v5352_v29  ;;  %v5409_v20 = vmul.f32 %v10673_v19, %v10633_v22  ;;  %6432 = vrsqrt.f32 %v10669_v62  ;;  %vm5415_vm6 = vweird.f32 %v10673_v19  ;;  %vm10752_vm7 = vmor %vm5404_vm0, %vm5405_vm4 }
 0x82e   : > { %v5397_v8 = vsel %vm5396_vm15, %v10623_v51, %v5393_v17  ;;  %v5400_v30 = vmul.f32 %v10665_v47, %v5399_v57  ;;  %v5419_v5 = vmul.f32 %v10684_v9, %v10635_v61  ;;  %6434 = vrsqrt.f32 %v10679_v26  ;;  %vm5416_vm11 = vmor %vm5414_vm2, %vm5415_vm6 }
 0x82f   : > { %v5432_v21 = vmul.f32 %v5397_v8, %v10323_v60  ;;  %v5357_v49 = vsel %vm5356_vm1, %v10629_v55, %v5353_v38  ;;  %v5410_v25 = vmul.f32 %v10673_v19, %v5409_v20  ;;  %vm5425_vm5 = vweird.f32 %v10684_v9 }
 0x830   : > { %v5428_v50 = vmul.f32 %v5357_v49, %v10325_v46  ;;  %v5401_v2 = vmul.f32 0.5, %v5400_v30  ;;  %v5420_v60 = vmul.f32 %v10684_v9, %v5419_v5  ;;  %v5323_v32 = vpop.xlane.xlu0 %5322  ;;  %vm5364_vm8 = vweird.f32 %v10669_v62  ;;  %vm10767_vm9 = vmor %vm5424_vm3, %vm5425_vm5 }
 0x831   : > { %v5443_v24 = vmul.f32 %v10689_v6, %v5432_v21  ;;  %v5411_v14 = vmul.f32 0.5, %v5410_v25  ;;  %v5335_v28 = vmul.f32 %v5323_v32, %v11382_v52  ;;  %vm5374_vm10 = vweird.f32 %v10679_v26 }
 0x832   : > { %v5439_v46 = vmul.f32 %v10689_v6, %v5428_v50  ;;  %v5402_v27 = vsub.f32 1.5, %v5401_v2  ;;  %v5421_v36 = vmul.f32 0.5, %v5420_v60 }
 0x833   : > { %v10739_v54 = vpop.eup %6432  ;;  %v5412_v33 = vsub.f32 1.5, %v5411_v14  ;;  %v10742_v52 = vadd.f32 1e-05, %v5335_v28  ;;  %v5454_v58 = vadd.f32 %v10719_v45, %v5443_v24 }
 0x834   : > { %v5403_v1 = vmul.f32 %v10665_v47, %v5402_v27  ;;  %v5422_v51 = vsub.f32 1.5, %v5421_v36  ;;  %v5359_v55 = vmul.f32 %v10739_v54, %v10669_v62  ;;  %v5450_v23 = vadd.f32 %v10719_v45, %v5439_v46  ;;  %v6435_v18 = vpop.eup %6434 }
 0x835   : > { %v5413_v12 = vmul.f32 %v10673_v19, %v5412_v33  ;;  %6436 = vrsqrt.f32 %v10742_v52  ;;  %v5462_v42 = vmax.f32 %v5454_v58, 0.0  ;;  %vm5365_vm12 = vweird.f32 %v10739_v54 }
 0x836   : > { %v5407_v16 = vsel %vm10752_vm7, %v10665_v47, %v5403_v1  ;;  %v5423_v61 = vmul.f32 %v10684_v9, %v5422_v51  ;;  %v5360_v53 = vmul.f32 %v10739_v54, %v5359_v55  ;;  %v5369_v10 = vmul.f32 %v6435_v18, %v10679_v26  ;;  %vm5366_vm15 = vmor %vm5364_vm8, %vm5365_vm12 }
 0x837   : > { %v5433_v39 = vmul.f32 %v5407_v16, %v10335_v35  ;;  %v5417_v48 = vsel %vm5416_vm11, %v10673_v19, %v5413_v12  ;;  %v5458_v13 = vmax.f32 %v5450_v23, 0.0  ;;  %v10797_v37 = vand.u32 4294901760, %v5462_v42 }
 0x838   : > { %v5434_v22 = vmul.f32 %v5417_v48, %v10339_v15  ;;  %v5427_v3 = vsel %vm10767_vm9, %v10684_v9, %v5423_v61  ;;  %v5361_v41 = vmul.f32 0.5, %v5360_v53  ;;  %v5370_v4 = vmul.f32 %v6435_v18, %v5369_v10 }
 0x839   : > { %v5444_v35 = vmul.f32 %v10689_v6, %v5433_v39  ;;  %v5435_v31 = vmul.f32 %v5427_v3, %v10337_v56  ;;  %vm5384_vm13 = vweird.f32 %v10742_v52  ;;  %v10803_v47 = vand.u32 4294901760, %v5458_v13  ;;  %5696 = vmatmul.f32.vlgmr.msra.gmra.mxu3 %v10797_v37 }
 0x83a   : > { %v5445_v7 = vmul.f32 %v10689_v6, %v5434_v22  ;;  %v5362_v15 = vsub.f32 1.5, %v5361_v41  ;;  %v5371_v17 = vmul.f32 0.5, %v5370_v4  ;;  %v10808_v56 = vsub.f32 %v5462_v42, %v10797_v37 }
 0x83b   : > { %v6437_v29 = vpop.eup %6436  ;;  %v5446_v19 = vmul.f32 %v10689_v6, %v5435_v31  ;;  %v5455_v57 = vadd.f32 %v10719_v45, %v5444_v35  ;;  %vm5375_vm14 = vweird.f32 %v6435_v18  ;;  %5680 = vmatmul.f32.vlgmr.msra.gmra.mxu1 %v10803_v47  ;;  %v10816_v38 = vsub.f32 %v5458_v13, %v10803_v47 }
 0x83c   : > { %v5363_v44 = vmul.f32 %v10739_v54, %v5362_v15  ;;  %v5379_v9 = vmul.f32 %v6437_v29, %v10742_v52  ;;  %v5372_v20 = vsub.f32 1.5, %v5371_v17  ;;  %v5552_v8 = vand.u32 4294901760, %v10808_v56  ;;  %vm5376_vm1 = vmor %vm5374_vm10, %vm5375_vm14 }
 0x83d   : > { %v5463_v30 = vmax.f32 %v5455_v57, 0.0  ;;  %v5456_v5 = vadd.f32 %v10719_v45, %v5445_v7  ;;  %vm5385_vm0 = vweird.f32 %v6437_v29  ;;  %v5520_v25 = vand.u32 4294901760, %v10816_v38 }
 0x83e   : > { %v5367_v21 = vsel %vm5366_vm15, %v10739_v54, %v5363_v44  ;;  %v5380_v49 = vmul.f32 %v6437_v29, %v5379_v9  ;;  %v5373_v0 = vmul.f32 %v6435_v18, %v5372_v20  ;;  %v5553_v62 = vsub.f32 %v10808_v56, %v5552_v8  ;;  %vm5386_vm2 = vmor %vm5384_vm13, %vm5385_vm0 }
 0x83f   : > { %v5429_v50 = vmul.f32 %v5367_v21, %v10347_v40  ;;  %v10831_v2 = vand.u32 4294901760, %v5463_v30  ;;  %v5521_v32 = vsub.f32 %v10816_v38, %v5520_v25  ;;  %v5464_v24 = vmax.f32 %v5456_v5, 0.0 }
 0x840   : > { %v5381_v60 = vmul.f32 0.5, %v5380_v49  ;;  %v5457_v14 = vadd.f32 %v10719_v45, %v5446_v19  ;;  %v5377_v28 = vsel %vm5376_vm1, %v6435_v18, %v5373_v0  ;;  %v5554_v46 = vand.u32 4294901760, %v5553_v62 }
 0x841   : > { %v5440_v40 = vmul.f32 %v10689_v6, %v5429_v50  ;;  %v10842_v27 = vsub.f32 %v5463_v30, %v10831_v2  ;;  %v5430_v36 = vmul.f32 %v5377_v28, %v10350_v43  ;;  %v5522_v26 = vand.u32 4294901760, %v5521_v32  ;;  %5700 = vmatmul.f32.gmra.mxu3 %v10831_v2  ;;  %v10896_v32 = vld [vmem:[%s11389_s14] ss:$0 sm:$0xff] }
 0x842   : > { %v5382_v59 = vsub.f32 1.5, %v5381_v60  ;;  %v10845_v54 = vand.u32 4294901760, %v5464_v24  ;;  %5555 = vmatmul.f32.vlgmr.msra.gmra.mxu2 %v5554_v46  ;;  %v5465_v12 = vmax.f32 %v5457_v14, 0.0 }
 0x843   : > { %v5560_v33 = vand.u32 4294901760, %v10842_v27  ;;  %v5451_v58 = vadd.f32 %v10719_v45, %v5440_v40  ;;  %v5441_v1 = vmul.f32 %v10689_v6, %v5430_v36  ;;  %5523 = vmatmul.f32.vlgmr.msra.gmra.mxu0 %v5522_v26 }
 0x844   : > { %v5383_v11 = vmul.f32 %v6437_v29, %v5382_v59  ;;  %v10858_v55 = vsub.f32 %v5464_v24, %v10845_v54  ;;  %v5574_v48 = vand.u32 4294901760, %v5465_v12 }
 0x845   : > { %v5561_v43 = vsub.f32 %v10842_v27, %v5560_v33  ;;  %v5459_v51 = vmax.f32 %v5451_v58, 0.0  ;;  %v5452_v23 = vadd.f32 %v10719_v45, %v5441_v1 }
 0x846   : > { %v5387_v63 = vsel %vm5386_vm2, %v6437_v29, %v5383_v11  ;;  %v5568_v39 = vand.u32 4294901760, %v10858_v55  ;;  %v5575_v35 = vsub.f32 %v5465_v12, %v5574_v48 }
 0x847   : > { %v5431_v18 = vmul.f32 %v5387_v63, %v10357_v34  ;;  %v5562_v16 = vand.u32 4294901760, %v5561_v43  ;;  %v5526_v61 = vand.u32 4294901760, %v5459_v51  ;;  %v5460_v53 = vmax.f32 %v5452_v23, 0.0 }
 0x848   : > { %v5569_v34 = vsub.f32 %v10858_v55, %v5568_v39  ;;  %v5576_v29 = vand.u32 4294901760, %v5575_v35 }
 0x849   : > { %v5442_v52 = vmul.f32 %v10689_v6, %v5431_v18  ;;  %5684 = vmatmul.f32.gmra.mxu1 %v5526_v61  ;;  %v5527_v42 = vsub.f32 %v5459_v51, %v5526_v61  ;;  %v5534_v10 = vand.u32 4294901760, %v5460_v53  ;;  %5704 = vmatmul.f32.gmra.mxu3 %v10845_v54 }
 0x84a   : > { %5563 = vmatmul.f32.gmra.mxu2 %v5562_v16  ;;  %v5570_v15 = vand.u32 4294901760, %v5569_v34  ;;  %v5577_v57 = vsub.f32 %v5575_v35, %v5576_v29 }
 0x84b   : > { %v5528_v22 = vand.u32 4294901760, %v5527_v42  ;;  %v5453_v3 = vadd.f32 %v10719_v45, %v5442_v52  ;;  %v5535_v41 = vsub.f32 %v5460_v53, %v5534_v10 }
 0x84c   : > { %v5578_v9 = vand.u32 4294901760, %v5577_v57 }
 0x84d   : > { %v5529_v13 = vsub.f32 %v5527_v42, %v5528_v22  ;;  %v5461_v31 = vmax.f32 %v5453_v3, 0.0  ;;  %v5536_v6 = vand.u32 4294901760, %v5535_v41 }
 0x84f   : > { %v5530_v4 = vand.u32 4294901760, %v5529_v13  ;;  %v5542_v7 = vand.u32 4294901760, %v5461_v31  ;;  %v5537_v19 = vsub.f32 %v5535_v41, %v5536_v6 }
 0x851   : > { %5531 = vmatmul.f32.gmra.mxu0 %v5530_v4  ;;  %5688 = vmatmul.f32.gmra.mxu1 %v5534_v10  ;;  %v5543_v17 = vsub.f32 %v5461_v31, %v5542_v7  ;;  %v5538_v44 = vand.u32 4294901760, %v5537_v19 }
 0x852   : > { %5571 = vmatmul.f32.gmra.mxu2 %v5570_v15  ;;  %5708 = vmatmul.f32.gmra.mxu3 %v5574_v48 }
 0x853   : > { %v5544_v45 = vand.u32 4294901760, %v5543_v17 }
 0x855   : > { %v5545_v20 = vsub.f32 %v5543_v17, %v5544_v45 }
 0x857   : > { %v5546_v30 = vand.u32 4294901760, %v5545_v20 }
 0x859   : > { %5539 = vmatmul.f32.gmra.mxu0 %v5538_v44  ;;  %5692 = vmatmul.f32.gmra.mxu1 %v5542_v7 }
 0x85a   : > { %5579 = vmatmul.f32.gmra.mxu2 %v5578_v9  ;;  %5836 = vmatmul.f32.vlgmr.msrb.gmra.mxu3 %v5520_v25 }
 0x861   : > { %5547 = vmatmul.f32.gmra.mxu0 %v5546_v30  ;;  %6012 = vmatmul.f32.vlgmr.msrb.gmra.mxu1 %v10803_v47 }
 0x862   : > { %5762 = vmatmul.f32.vlgmr.msrb.gmra.mxu2 %v10816_v38  ;;  %5842 = vmatmul.f32.gmra.mxu3 %v5528_v22 }
 0x869   : > { %5947 = vmatmul.f32.vlgmr.msrb.gmra.mxu0 %v10803_v47  ;;  %6016 = vmatmul.f32.gmra.mxu1 %v5526_v61 }
 0x86a   : > { %5767 = vmatmul.f32.gmra.mxu2 %v5527_v42  ;;  %5848 = vmatmul.f32.gmra.mxu3 %v5536_v6 }
 0x871   : > { %5951 = vmatmul.f32.gmra.mxu0 %v5526_v61  ;;  %6020 = vmatmul.f32.gmra.mxu1 %v5534_v10 }
 0x872   : > { %5772 = vmatmul.f32.gmra.mxu2 %v5535_v41  ;;  %5854 = vmatmul.f32.gmra.mxu3 %v5544_v45 }
 0x879   : > { %5955 = vmatmul.f32.gmra.mxu0 %v5534_v10  ;;  %6024 = vmatmul.f32.gmra.mxu1 %v5542_v7 }
 0x87a   : > { %5777 = vmatmul.f32.gmra.mxu2 %v5543_v17  ;;  %5860 = vmatmul.f32.gmra.mxu3 %v5552_v8 }
 0x881   : > { %5959 = vmatmul.f32.gmra.mxu0 %v5542_v7  ;;  %6028 = vmatmul.f32.gmra.mxu1 %v10797_v37 }
 0x882   : > { %5782 = vmatmul.f32.gmra.mxu2 %v10808_v56  ;;  %5866 = vmatmul.f32.gmra.mxu3 %v5560_v33 }
 0x889   : > { %5963 = vmatmul.f32.gmra.mxu0 %v10797_v37  ;;  %6032 = vmatmul.f32.gmra.mxu1 %v10831_v2 }
 0x88a   : > { %5787 = vmatmul.f32.gmra.mxu2 %v10842_v27  ;;  %5872 = vmatmul.f32.gmra.mxu3 %v5568_v39 }
 0x891   : > { %5967 = vmatmul.f32.gmra.mxu0 %v10831_v2  ;;  %6036 = vmatmul.f32.gmra.mxu1 %v10845_v54 }
 0x892   : > { %5792 = vmatmul.f32.gmra.mxu2 %v10858_v55  ;;  %5878 = vmatmul.f32.gmra.mxu3 %v5576_v29 }
 0x899   : > { %5971 = vmatmul.f32.gmra.mxu0 %v10845_v54  ;;  %6040 = vmatmul.f32.gmra.mxu1 %v5574_v48 }
 0x89a   : > { %5797 = vmatmul.f32.gmra.mxu2 %v5575_v35 }
 0x8a1   : > { %5975 = vmatmul.f32.gmra.mxu0 %v5574_v48 }
 0x8b8   : > { %v5681_v56 = vpop.f32.mrf.mxu1 }
 0x8bc   : > { %v5697_v47 = vpop.f32.mrf.mxu3 }
 0x8c0   : > { %v5524_v8 = vpop.f32.mrf.mxu0 }
 0x8c1   : > { %v5525_v46 = vadd.f32 %v10896_v32, %v5524_v8 }
 0x8c3   : > { %v5682_v27 = vadd.f32 %v5681_v56, %v5525_v46 }
 0x8c4   : > { %v10885_v38 = vpop.f32.mrf.mxu3 }
 0x8c5   : > { %v5556_v37 = vpop.f32.mrf.mxu2 }
 0x8c6   : > { %v5685_v5 = vpop.f32.mrf.mxu1  ;;  %v5557_v15 = vadd.f32 %v10896_v32, %v5556_v37 }
 0x8c8   : > { %v5698_v57 = vadd.f32 %v5697_v47, %v5557_v15 }
 0x8cc   : > { %v10887_v49 = vpop.f32.mrf.mxu3 }
 0x8cd   : > { %v5564_v21 = vpop.f32.mrf.mxu2 }
 0x8ce   : > { %v5532_v25 = vpop.f32.mrf.mxu0  ;;  %v5689_v50 = vpop.f32.mrf.mxu1  ;;  %v5565_v56 = vadd.f32 %v10896_v32, %v5564_v21 }
 0x8cf   : > { %v5533_v58 = vadd.f32 %v10896_v32, %v5532_v25 }
 0x8d1   : > { %v5686_v43 = vadd.f32 %v5685_v5, %v5533_v58 }
 0x8d5   : > { %v10889_v0 = vpop.f32.mrf.mxu2  ;;  %v10891_v62 = vpop.f32.mrf.mxu3 }
 0x8d6   : > { %v5540_v2 = vpop.f32.mrf.mxu0  ;;  %v5693_v60 = vpop.f32.mrf.mxu1  ;;  %v5573_v47 = vadd.f32 %v10896_v32, %v10889_v0 }
 0x8d7   : > { %v5541_v18 = vadd.f32 %v10896_v32, %v5540_v2 }
 0x8d9   : > { %v5690_v52 = vadd.f32 %v5689_v50, %v5541_v18  ;;  %v5702_v50 = vadd.f32 %v10885_v38, %v5565_v56 }
 0x8dd   : > { %v10898_v24 = vpop.f32.mrf.mxu2  ;;  %v5837_v14 = vpop.f32.mrf.mxu3 }
 0x8de   : > { %v5548_v40 = vpop.f32.mrf.mxu0  ;;  %v6013_v28 = vpop.f32.mrf.mxu1  ;;  %v5581_v38 = vadd.f32 %v10896_v32, %v10898_v24 }
 0x8df   : > { %v5549_v3 = vadd.f32 %v10896_v32, %v5548_v40 }
 0x8e1   : > { %v5694_v35 = vadd.f32 %v5693_v60, %v5549_v3 }
 0x8e5   : > { %v5763_v36 = vpop.f32.mrf.mxu2  ;;  %v5843_v59 = vpop.f32.mrf.mxu3 }
 0x8e6   : > { %v5764_v26 = vadd.f32 %v5763_v36, %v5682_v27  ;;  %v5948_v54 = vpop.f32.mrf.mxu0  ;;  %v6017_v33 = vpop.f32.mrf.mxu1  ;;  %v5706_v27 = vadd.f32 %v10887_v49, %v5573_v47 }
 0x8e8   : > { %v5838_v1 = vadd.f32 %v5837_v14, %v5764_v26 }
 0x8ea   : > { %v5949_v11 = vadd.f32 %v5948_v54, %v5838_v1 }
 0x8ec   : > { %v10902_v51 = vadd.f32 %v6013_v28, %v5949_v11  ;;  %v5710_v11 = vadd.f32 %v10891_v62, %v5581_v38 }
 0x8ed   : > { %v5768_v55 = vpop.f32.mrf.mxu2  ;;  %v5849_v12 = vpop.f32.mrf.mxu3 }
 0x8ee   : > { %v5769_v63 = vadd.f32 %v5768_v55, %v5686_v43  ;;  %6044 = vmax.xlane.f32.xlu1 %v10902_v51  ;;  %v5952_v23 = vpop.f32.mrf.mxu0  ;;  %v6021_v61 = vpop.f32.mrf.mxu1 }
 0x8f0   : > { %v5844_v16 = vadd.f32 %v5843_v59, %v5769_v63 }
 0x8f2   : > { %v5953_v53 = vadd.f32 %v5952_v23, %v5844_v16 }
 0x8f4   : > { %v10906_v42 = vadd.f32 %v6017_v33, %v5953_v53 }
 0x8f5   : > { %v5773_v39 = vpop.f32.mrf.mxu2  ;;  %v5855_v22 = vpop.f32.mrf.mxu3 }
 0x8f6   : > { %v5774_v48 = vadd.f32 %v5773_v39, %v5690_v52  ;;  %6046 = vmax.xlane.f32.xlu2 %v10906_v42  ;;  %v5956_v10 = vpop.f32.mrf.mxu0  ;;  %v6025_v34 = vpop.f32.mrf.mxu1 }
 0x8f8   : > { %v5850_v41 = vadd.f32 %v5849_v12, %v5774_v48 }
 0x8fa   : > { %v5957_v13 = vadd.f32 %v5956_v10, %v5850_v41 }
 0x8fc   : > { %v10910_v31 = vadd.f32 %v6021_v61, %v5957_v13 }
 0x8fd   : > { %v5778_v4 = vpop.f32.mrf.mxu2  ;;  %v5861_v19 = vpop.f32.mrf.mxu3 }
 0x8fe   : > { %v5779_v6 = vadd.f32 %v5778_v4, %v5694_v35  ;;  %6048 = vmax.xlane.f32.xlu0 %v10910_v31  ;;  %v5960_v7 = vpop.f32.mrf.mxu0  ;;  %v6029_v45 = vpop.f32.mrf.mxu1 }
 0x900   : > { %v5856_v29 = vadd.f32 %v5855_v22, %v5779_v6 }
 0x902   : > { %v5961_v17 = vadd.f32 %v5960_v7, %v5856_v29 }
 0x904   : > { %v6026_v44 = vadd.f32 %v6025_v34, %v5961_v17 }
 0x905   : > { %v5783_v9 = vpop.f32.mrf.mxu2  ;;  %v5867_v25 = vpop.f32.mrf.mxu3 }
 0x906   : > { %v5784_v20 = vadd.f32 %v5783_v9, %v5698_v57  ;;  %6050 = vmax.xlane.f32.xlu1 %v6026_v44  ;;  %v5964_v30 = vpop.f32.mrf.mxu0  ;;  %v6033_v40 = vpop.f32.mrf.mxu1 }
 0x908   : > { %v5862_v8 = vadd.f32 %v5861_v19, %v5784_v20 }
 0x90a   : > { %v5965_v5 = vadd.f32 %v5964_v30, %v5862_v8 }
 0x90c   : > { %v6030_v2 = vadd.f32 %v6029_v45, %v5965_v5 }
 0x90d   : > { %v5788_v60 = vpop.f32.mrf.mxu2  ;;  %v5873_v21 = vpop.f32.mrf.mxu3 }
 0x90e   : > { %v5789_v37 = vadd.f32 %v5788_v60, %v5702_v50  ;;  %6052 = vmax.xlane.f32.xlu2 %v6030_v2  ;;  %v5968_v14 = vpop.f32.mrf.mxu0  ;;  %v6037_v58 = vpop.f32.mrf.mxu1 }
 0x910   : > { %v5868_v28 = vadd.f32 %v5867_v25, %v5789_v37 }
 0x912   : > { %v5969_v46 = vadd.f32 %v5968_v14, %v5868_v28 }
 0x914   : > { %v6034_v36 = vadd.f32 %v6033_v40, %v5969_v46 }
 0x915   : > { %v5793_v59 = vpop.f32.mrf.mxu2  ;;  %v5879_v12 = vpop.f32.mrf.mxu3 }
 0x916   : > { %v5794_v26 = vadd.f32 %v5793_v59, %v5706_v27  ;;  %6054 = vmax.xlane.f32.xlu0 %v6034_v36  ;;  %v5972_v54 = vpop.f32.mrf.mxu0  ;;  %v6041_v18 = vpop.f32.mrf.mxu1 }
 0x918   : > { %v5874_v33 = vadd.f32 %v5873_v21, %v5794_v26 }
 0x91a   : > { %v5973_v1 = vadd.f32 %v5972_v54, %v5874_v33 }
 0x91c   : > { %v6038_v43 = vadd.f32 %v6037_v58, %v5973_v1 }
 0x91d   : > { %v5798_v0 = vpop.f32.mrf.mxu2 }
 0x91e   : > { %v5799_v55 = vadd.f32 %v5798_v0, %v5710_v11  ;;  %6056 = vmax.xlane.f32.xlu1 %v6038_v43  ;;  %v5976_v63 = vpop.f32.mrf.mxu0 }
 0x920   : > { %v5880_v49 = vadd.f32 %v5879_v12, %v5799_v55 }
 0x922   : > { %v5977_v23 = vadd.f32 %v5976_v63, %v5880_v49 }
 0x924   : > { %v6042_v16 = vadd.f32 %v6041_v18, %v5977_v23 }
 0x926   : > { %6058 = vmax.xlane.f32.xlu2 %v6042_v16 }
 0x961   : > { %v6045_v61 = vpop.xlane.xlu1 %6044 }
 0x962   : > { %v6060_v53 = vsub.f32 %v10902_v51, %v6045_v61 }
 0x964   : > { %v6068_v32 = vmul.f32 1.442695, %v6060_v53 }
 0x966   : > { %6438 = vpow2.f32 %v6068_v32 }
 0x969   : > { %v6047_v24 = vpop.xlane.xlu2 %6046 }
 0x96a   : > { %v6061_v52 = vsub.f32 %v10906_v42, %v6047_v24 }
 0x96c   : > { %v6439_v62 = vpop.eup %6438  ;;  %v6070_v39 = vmul.f32 1.442695, %v6061_v52 }
 0x96d   : > { %6084 = vadd.xlane.f32.xlu0 %v6439_v62 }
 0x96e   : > { %6440 = vpow2.f32 %v6070_v39 }
 0x971   : > { %v6049_v48 = vpop.xlane.xlu0 %6048 }
 0x972   : > { %v6062_v10 = vsub.f32 %v10910_v31, %v6049_v48 }
 0x974   : > { %v6441_v22 = vpop.eup %6440  ;;  %v6072_v3 = vmul.f32 1.442695, %v6062_v10 }
 0x975   : > { %6086 = vadd.xlane.f32.xlu1 %v6441_v22 }
 0x976   : > { %6442 = vpow2.f32 %v6072_v3 }
 0x979   : > { %v6051_v41 = vpop.xlane.xlu1 %6050 }
 0x97a   : > { %v6063_v13 = vsub.f32 %v6026_v44, %v6051_v41 }
 0x97c   : > { %v6443_v34 = vpop.eup %6442  ;;  %v6074_v51 = vmul.f32 1.442695, %v6063_v13 }
 0x97d   : > { %6088 = vadd.xlane.f32.xlu2 %v6443_v34 }
 0x97e   : > { %6444 = vpow2.f32 %v6074_v51 }
 0x981   : > { %v6053_v35 = vpop.xlane.xlu2 %6052 }
 0x982   : > { %v6064_v4 = vsub.f32 %v6030_v2, %v6053_v35 }
 0x984   : > { %v6445_v42 = vpop.eup %6444  ;;  %v6076_v6 = vmul.f32 1.442695, %v6064_v4 }
 0x985   : > { %6090 = vadd.xlane.f32.xlu0 %v6445_v42 }
 0x986   : > { %6446 = vpow2.f32 %v6076_v6 }
 0x989   : > { %v6055_v7 = vpop.xlane.xlu0 %6054 }
 0x98a   : > { %v6065_v15 = vsub.f32 %v6034_v36, %v6055_v7 }
 0x98c   : > { %v6447_v29 = vpop.eup %6446  ;;  %v6078_v31 = vmul.f32 1.442695, %v6065_v15 }
 0x98d   : > { %6092 = vadd.xlane.f32.xlu1 %v6447_v29 }
 0x98e   : > { %6448 = vpow2.f32 %v6078_v31 }
 0x991   : > { %v6057_v19 = vpop.xlane.xlu1 %6056 }
 0x992   : > { %v6066_v17 = vsub.f32 %v6038_v43, %v6057_v19 }
 0x994   : > { %v6449_v57 = vpop.eup %6448  ;;  %v6080_v44 = vmul.f32 1.442695, %v6066_v17 }
 0x995   : > { %6094 = vadd.xlane.f32.xlu2 %v6449_v57 }
 0x996   : > { %6450 = vpow2.f32 %v6080_v44 }
 0x999   : > { %v6059_v45 = vpop.xlane.xlu2 %6058 }
 0x99a   : > { %v6067_v9 = vsub.f32 %v6042_v16, %v6059_v45 }
 0x99c   : > { %v6451_v20 = vpop.eup %6450  ;;  %v6082_v30 = vmul.f32 1.442695, %v6067_v9 }
 0x99d   : > { %6096 = vadd.xlane.f32.xlu0 %v6451_v20 }
 0x99e   : > { %6452 = vpow2.f32 %v6082_v30 }
 0x9a4   : > { %v6453_v56 = vpop.eup %6452 }
 0x9a5   : > { %6098 = vadd.xlane.f32.xlu1 %v6453_v56 }
 0x9e0   : > { %v6085_v8 = vpop.xlane.xlu0 %6084 }
 0x9e1   : > { %6454 = vlog2.f32 %v6085_v8 }
 0x9e7   : > { %v6455_v5 = vpop.eup %6454 }
 0x9e8   : > { %v6101_v25 = vmul.f32 0.6931472, %v6455_v5  ;;  %v6087_v50 = vpop.xlane.xlu1 %6086 }
 0x9e9   : > { %6456 = vlog2.f32 %v6087_v50 }
 0x9ea   : > { %v6116_v2 = vsub.f32 %v6060_v53, %v6101_v25 }
 0x9ec   : > { %6124 = vst [vmem:[%s11390_s24] sm:$0xff] %v6116_v2 }
 0x9ef   : > { %v6457_v60 = vpop.eup %6456 }
 0x9f0   : > { %v6103_v37 = vmul.f32 0.6931472, %v6457_v60  ;;  %v6089_v14 = vpop.xlane.xlu2 %6088 }
 0x9f1   : > { %6458 = vlog2.f32 %v6089_v14 }
 0x9f2   : > { %v6117_v40 = vsub.f32 %v6061_v52, %v6103_v37 }
 0x9f4   : > { %6125 = vst [vmem:[%s11391_s0 + $0x8] sm:$0xff] %v6117_v40 }
 0x9f7   : > { %v6459_v47 = vpop.eup %6458 }
 0x9f8   : > { %v6105_v28 = vmul.f32 0.6931472, %v6459_v47  ;;  %v6091_v46 = vpop.xlane.xlu0 %6090 }
 0x9f9   : > { %6460 = vlog2.f32 %v6091_v46 }
 0x9fa   : > { %v6118_v27 = vsub.f32 %v6062_v10, %v6105_v28 }
 0x9fc   : > { %6126 = vst [vmem:[%s11391_s0 + $0x10] sm:$0xff] %v6118_v27 }
 0x9ff   : > { %v6461_v36 = vpop.eup %6460 }
 0xa00   : > { %v6107_v21 = vmul.f32 0.6931472, %v6461_v36  ;;  %v6093_v59 = vpop.xlane.xlu1 %6092 }
 0xa01   : > { %6462 = vlog2.f32 %v6093_v59 }
 0xa02   : > { %v6119_v26 = vsub.f32 %v6063_v13, %v6107_v21 }
 0xa04   : > { %6127 = vst [vmem:[%s11391_s0 + $0x18] sm:$0xff] %v6119_v26 }
 0xa07   : > { %v6463_v54 = vpop.eup %6462 }
 0xa08   : > { %v6109_v38 = vmul.f32 0.6931472, %v6463_v54  ;;  %v6095_v33 = vpop.xlane.xlu2 %6094 }
 0xa09   : > { %6464 = vlog2.f32 %v6095_v33 }
 0xa0a   : > { %v6120_v58 = vsub.f32 %v6064_v4, %v6109_v38 }
 0xa0c   : > { %6128 = vst [vmem:[%s11391_s0 + $0x20] sm:$0xff] %v6120_v58 }
 0xa0f   : > { %v6465_v1 = vpop.eup %6464 }
 0xa10   : > { %v6111_v11 = vmul.f32 0.6931472, %v6465_v1  ;;  %v6097_v43 = vpop.xlane.xlu0 %6096 }
 0xa11   : > { %6466 = vlog2.f32 %v6097_v43 }
 0xa12   : > { %v6121_v0 = vsub.f32 %v6065_v15, %v6111_v11 }
 0xa14   : > { %6129 = vst [vmem:[%s11391_s0 + $0x28] sm:$0xff] %v6121_v0 }
 0xa17   : > { %v6467_v55 = vpop.eup %6466 }
 0xa18   : > { %v6113_v12 = vmul.f32 0.6931472, %v6467_v55  ;;  %v6099_v49 = vpop.xlane.xlu1 %6098 }
 0xa19   : > { %6468 = vlog2.f32 %v6099_v49 }
 0xa1a   : > { %v6122_v63 = vsub.f32 %v6066_v17, %v6113_v12 }
 0xa1c   : > { %6130 = vst [vmem:[%s11391_s0 + $0x30] sm:$0xff] %v6122_v63 }
 0xa1f   : > { %v6469_v23 = vpop.eup %6468 }
 0xa20   : > { %v6115_v18 = vmul.f32 0.6931472, %v6469_v23 }
 0xa22   : > { %v6123_v16 = vsub.f32 %v6067_v9, %v6115_v18 }
 0xa24   : > { %6131 = vst [vmem:[%s11391_s0 + $0x38] sm:$0xff] %v6123_v16 }
 0xa25 PF: > { %s11392_s21 = sld [smem:[#allocation3_spill]] }
 0xa2b   : > { %s27_s24 = sadd.s32 1, %s11392_s21  }
 0xa2c   : > { %p24_p7 = scmp.ge.s32.totalorder %s27_s24, 5  }
 0xa2e   :  { %26 = sbr.rel (!%p24_p7) target bundleno = 7 (0x7), region = 146 }

</bundles_post_ra>
